<compile_context>
chip_gen: v7x
topology: tpu7x:2x2x1
jax: 0.10.0
libtpu: 0.0.40
codegen_flags: <defaults>
</compile_context>

<pallas_src>
import functools
import math

import jax
import jax.numpy as jnp
from jax.experimental import pallas as pl
from jax.experimental.pallas import tpu as pltpu

EPS = 1e-5
COMPUTE_DTYPE = jnp.bfloat16
MAX_SINGLE_K = 2048          # above this, use the K-tiled accumulator path


def _round_up(n, t):
    return (n + t - 1) // t * t


def _pick_vmem_limit():
    """Generation-aware scoped-VMEM budget."""
    try:
        cap = getattr(pltpu.get_tpu_info(), "vmem_capacity_bytes", None)
    except Exception:
        cap = None
    if cap is None:
        return 32 * 1024 * 1024
    if cap >= 100 * 1024 * 1024:       # v5e / v6e: 128 MiB physical VMEM
        return 64 * 1024 * 1024
    return 28 * 1024 * 1024            # v7x: 64 MiB physical, stay conservative


VMEM_LIMIT = _pick_vmem_limit()


def _pick_tm(Mp):
    # Prefer >=2 parallel M blocks (two v7x TensorCores / pipelining slack).
    if Mp % 256 == 0 and Mp >= 512:
        return 256
    return 128


def _pick_tn(Np):
    return 256 if Np % 256 == 0 else 128


def _k_steps_for(Kp):
    """Smallest lane-aligned K split keeping each chunk <= MAX_SINGLE_K."""
    if Kp <= MAX_SINGLE_K:
        return 1
    for s in range(2, 65):
        if Kp % s == 0 and (Kp // s) % 128 == 0 and Kp // s <= MAX_SINGLE_K:
            return s
    return 1   # fallback: single big block (still correct)


def _ksplit_pad(K):
    """Pad K so that a valid lane-aligned split into <=MAX_SINGLE_K chunks exists."""
    Kp = _round_up(K, 128)
    nk = max(1, -(-Kp // MAX_SINGLE_K))
    tk = _round_up(-(-Kp // nk), 128)
    return nk * tk


# ----------------------------------------------------------------------------
# Pallas kernels
# ----------------------------------------------------------------------------
def _mm_bias_act_kernel(x_ref, w_ref, b_ref, o_ref, *, relu):
    """One output tile per grid step: y = act(x @ w + b)."""
    y = jnp.dot(x_ref[...], w_ref[...], preferred_element_type=jnp.float32)
    y = y + b_ref[...]
    if relu:
        y = jnp.maximum(y, 0.0)
    o_ref[...] = y.astype(o_ref.dtype)


def _mm_bias_act_ktiled_kernel(x_ref, w_ref, b_ref, o_ref, acc_ref, *, relu):
    """K-tiled fused matmul: accumulate over the innermost (arbitrary) K axis."""
    @pl.when(pl.program_id(2) == 0)
    def _():
        acc_ref[...] = jnp.zeros_like(acc_ref)

    acc_ref[...] += jnp.dot(x_ref[...], w_ref[...],
                            preferred_element_type=jnp.float32)

    @pl.when(pl.program_id(2) == pl.num_programs(2) - 1)
    def _():
        y = acc_ref[...] + b_ref[...]
        if relu:
            y = jnp.maximum(y, 0.0)
        o_ref[...] = y.astype(o_ref.dtype)


def _aspp_fused_kernel(x1_ref, w1_ref, s1_ref, wo1_ref,
                       c3_ref, w3_ref, s3_ref, wo3_ref, so_ref,
                       o_ref, acc_ref):
    """Fused ASPP: branch ConvBNReLU + channel-concat + 1x1 conv_out ConvBNReLU.

    Grid (i, j, g) with g (the 3x3-dilated branch index, 0..2) innermost and
    'arbitrary'.  At g == 0 the 1x1 branch (its own K = Cin) seeds the f32
    accumulator; each step adds relu(cols_g @ W_g + s_g) @ Wo_g; the last step
    applies conv_out's shift + ReLU and stores.
    """
    g = pl.program_id(2)

    @pl.when(g == 0)
    def _():
        f1 = jnp.dot(x1_ref[...], w1_ref[...], preferred_element_type=jnp.float32)
        f1 = jnp.maximum(f1 + s1_ref[...], 0.0)
        acc_ref[...] = jnp.dot(f1.astype(COMPUTE_DTYPE), wo1_ref[...],
                               preferred_element_type=jnp.float32)

    f = jnp.dot(c3_ref[...], w3_ref[...], preferred_element_type=jnp.float32)
    f = jnp.maximum(f + s3_ref[...], 0.0)
    acc_ref[...] += jnp.dot(f.astype(COMPUTE_DTYPE), wo3_ref[...],
                            preferred_element_type=jnp.float32)

    @pl.when(g == pl.num_programs(2) - 1)
    def _():
        y = jnp.maximum(acc_ref[...] + so_ref[...], 0.0)
        o_ref[...] = y.astype(o_ref.dtype)


def _dec_tail_kernel(c_ref, wc_ref, sc_ref, wo_ref, o_ref):
    """Fused decoder tail: h = relu(cols @ Wc + sc); logits = h @ Wout."""
    h = jnp.dot(c_ref[...], wc_ref[...], preferred_element_type=jnp.float32)
    h = jnp.maximum(h + sc_ref[...], 0.0)
    y = jnp.dot(h.astype(COMPUTE_DTYPE), wo_ref[...],
                preferred_element_type=jnp.float32)
    o_ref[...] = y.astype(o_ref.dtype)


# ----------------------------------------------------------------------------
# pallas_call wrappers
# ----------------------------------------------------------------------------
def _pad_m(x2d, Mp):
    M = x2d.shape[0]
    if Mp == M:
        return x2d
    return jnp.pad(x2d, ((0, Mp - M), (0, 0)))


def fused_conv_mm(x, w, b, *, relu, out_dtype):
    """y[:M] = act(x @ w + b).  w/b arrive pre-padded (K,N multiples of 128) + bf16."""
    M, K = x.shape
    Kw, Np = w.shape
    assert K == Kw, (K, Kw)
    Mp = _round_up(M, 128)
    tm, tn = _pick_tm(Mp), _pick_tn(Np)
    xp = _pad_m(x.astype(COMPUTE_DTYPE), Mp)
    k_steps = _k_steps_for(K)

    if k_steps == 1:
        kernel = functools.partial(_mm_bias_act_kernel, relu=relu)
        out = pl.pallas_call(
            kernel,
            out_shape=jax.ShapeDtypeStruct((Mp, Np), out_dtype),
            grid_spec=pltpu.PrefetchScalarGridSpec(
                num_scalar_prefetch=0,
                grid=(Mp // tm, Np // tn),
                in_specs=[
                    pl.BlockSpec((tm, K), lambda i, j: (i, 0)),
                    pl.BlockSpec((K, tn), lambda i, j: (0, j)),
                    pl.BlockSpec((1, tn), lambda i, j: (0, j)),
                ],
                out_specs=pl.BlockSpec((tm, tn), lambda i, j: (i, j)),
            ),
            compiler_params=pltpu.CompilerParams(
                dimension_semantics=("parallel", "parallel"),
                vmem_limit_bytes=VMEM_LIMIT),
        )(xp, w, b)
    else:
        tk = K // k_steps
        kernel = functools.partial(_mm_bias_act_ktiled_kernel, relu=relu)
        out = pl.pallas_call(
            kernel,
            out_shape=jax.ShapeDtypeStruct((Mp, Np), out_dtype),
            grid_spec=pltpu.PrefetchScalarGridSpec(
                num_scalar_prefetch=0,
                grid=(Mp // tm, Np // tn, k_steps),
                in_specs=[
                    pl.BlockSpec((tm, tk), lambda i, j, k: (i, k)),
                    pl.BlockSpec((tk, tn), lambda i, j, k: (k, j)),
                    pl.BlockSpec((1, tn), lambda i, j, k: (0, j)),
                ],
                out_specs=pl.BlockSpec((tm, tn), lambda i, j, k: (i, j)),
                scratch_shapes=[pltpu.VMEM((tm, tn), jnp.float32)],
            ),
            compiler_params=pltpu.CompilerParams(
                dimension_semantics=("parallel", "parallel", "arbitrary"),
                vmem_limit_bytes=VMEM_LIMIT),
        )(xp, w, b)
    return out[:M]


def aspp_fused(x1, cols3, p):
    """Fully fused ASPP.  x1: [M, Cinp] bf16, cols3: [3, M, K3p] bf16 -> [M, 256] bf16."""
    M, Cinp = x1.shape
    K3p = cols3.shape[2]
    Np = p['wo3'].shape[2]          # 256
    Mp = _round_up(M, 128)
    tm = _pick_tm(Mp)
    tn = Np                         # full intermediate width is needed per step

    x1p = _pad_m(x1, Mp)
    c3p = jnp.pad(cols3, ((0, 0), (0, Mp - M), (0, 0))) if Mp > M else cols3

    out = pl.pallas_call(
        _aspp_fused_kernel,
        out_shape=jax.ShapeDtypeStruct((Mp, Np), COMPUTE_DTYPE),
        grid_spec=pltpu.PrefetchScalarGridSpec(
            num_scalar_prefetch=0,
            grid=(Mp // tm, Np // tn, 3),
            in_specs=[
                pl.BlockSpec((tm, Cinp), lambda i, j, g: (i, 0)),
                pl.BlockSpec((Cinp, 256), lambda i, j, g: (0, 0)),
                pl.BlockSpec((1, 256), lambda i, j, g: (0, 0)),
                pl.BlockSpec((256, tn), lambda i, j, g: (0, j)),
                pl.BlockSpec((None, tm, K3p), lambda i, j, g: (g, i, 0)),
                pl.BlockSpec((None, K3p, 256), lambda i, j, g: (g, 0, 0)),
                pl.BlockSpec((None, 1, 256), lambda i, j, g: (g, 0, 0)),
                pl.BlockSpec((None, 256, tn), lambda i, j, g: (g, 0, j)),
                pl.BlockSpec((1, tn), lambda i, j, g: (0, j)),
            ],
            out_specs=pl.BlockSpec((tm, tn), lambda i, j, g: (i, j)),
            scratch_shapes=[pltpu.VMEM((tm, tn), jnp.float32)],
        ),
        compiler_params=pltpu.CompilerParams(
            dimension_semantics=("parallel", "parallel", "arbitrary"),
            vmem_limit_bytes=VMEM_LIMIT),
    )(x1p, p['w1'], p['s1'], p['wo1'], c3p, p['w3'], p['s3'], p['wo3'], p['so'])
    return out[:M]


def dec_tail_mm(cols, wc, sc, wo):
    """Fused dec_cat[1] (3x3 ConvBNReLU) + final 1x1 classifier (no bias/act)."""
    M, K = cols.shape
    Kw, Nc = wc.shape
    assert K == Kw
    Nout = wo.shape[1]
    Mp = _round_up(M, 128)
    tm = _pick_tm(Mp)
    xp = _pad_m(cols.astype(COMPUTE_DTYPE), Mp)

    out = pl.pallas_call(
        _dec_tail_kernel,
        out_shape=jax.ShapeDtypeStruct((Mp, Nout), jnp.float32),
        grid_spec=pltpu.PrefetchScalarGridSpec(
            num_scalar_prefetch=0,
            grid=(Mp // tm,),
            in_specs=[
                pl.BlockSpec((tm, K), lambda i: (i, 0)),
                pl.BlockSpec((K, Nc), lambda i: (0, 0)),
                pl.BlockSpec((1, Nc), lambda i: (0, 0)),
                pl.BlockSpec((Nc, Nout), lambda i: (0, 0)),
            ],
            out_specs=pl.BlockSpec((tm, Nout), lambda i: (i, 0)),
        ),
        compiler_params=pltpu.CompilerParams(
            dimension_semantics=("parallel",),
            vmem_limit_bytes=VMEM_LIMIT),
    )(xp, wc, sc, wo)
    return out[:M]


# ----------------------------------------------------------------------------
# Glue: im2col, bilinear upsample (align_corners=True), parameter init/prep
# ----------------------------------------------------------------------------
def im2col_3x3(x_nhwc, dilation, k_out):
    """3x3 conv, padding==dilation (same spatial size) -> [N*H*W, k_out].

    k_out >= 9*C; any extra lane-alignment columns are zero-filled inside the
    same concatenate (no separate pad copy).
    """
    N, H, W, C = x_nhwc.shape
    d = dilation
    xp = jnp.pad(x_nhwc, ((0, 0), (d, d), (d, d), (0, 0)))
    patches = []
    for ky in range(3):
        for kx in range(3):
            patches.append(xp[:, ky * d:ky * d + H, kx * d:kx * d + W, :])
    k_pad = k_out - 9 * C
    if k_pad > 0:
        patches.append(jnp.zeros((N, H, W, k_pad), x_nhwc.dtype))
    return jnp.concatenate(patches, axis=-1).reshape(N * H * W, k_out)


def upsample_bilinear_align_corners(x_nhwc, Ho, Wo):
    """F.interpolate(..., mode='bilinear', align_corners=True) on NHWC."""
    N, Hi, Wi, C = x_nhwc.shape

    def coords(out_size, in_size):
        if out_size == 1 or in_size == 1:
            z = jnp.zeros((out_size,), jnp.float32)
            zi = jnp.zeros((out_size,), jnp.int32)
            return z, zi, zi
        pos = jnp.arange(out_size, dtype=jnp.float32) * ((in_size - 1) / (out_size - 1))
        lo = jnp.clip(jnp.floor(pos).astype(jnp.int32), 0, in_size - 2)
        return pos - lo.astype(jnp.float32), lo, lo + 1

    fy, y0, y1 = coords(Ho, Hi)
    fx, x0, x1 = coords(Wo, Wi)
    fx_ = fx[None, None, :, None]
    fy_ = fy[None, :, None, None]
    r0 = x_nhwc[:, y0]
    r1 = x_nhwc[:, y1]
    top = r0[:, :, x0] * (1.0 - fx_) + r0[:, :, x1] * fx_
    bot = r1[:, :, x0] * (1.0 - fx_) + r1[:, :, x1] * fx_
    return top * (1.0 - fy_) + bot * fy_


def _init_convbn(key, cin, cout, ks, with_bn=True):
    kw, kg, kb, km, kv = jax.random.split(key, 5)
    fan_in = cin * ks * ks
    std = math.sqrt(2.0 / (fan_in * (1.0 + 1.0 ** 2)))  # kaiming_normal_(a=1)
    p = dict(w=std * jax.random.normal(kw, (cout, cin, ks, ks), jnp.float32),
             b=jnp.zeros((cout,), jnp.float32))
    if with_bn:
        p.update(
            gamma=1.0 + 0.05 * jax.random.normal(kg, (cout,), jnp.float32),
            beta=0.05 * jax.random.normal(kb, (cout,), jnp.float32),
            mean=0.05 * jax.random.normal(km, (cout,), jnp.float32),
            var=1.0 + 0.1 * jnp.abs(jax.random.normal(kv, (cout,), jnp.float32)),
        )
    return p


def init_params(key, in_channels, num_classes):
    ks = jax.random.split(key, 10)
    return dict(
        aspp1=_init_convbn(ks[0], in_channels, 256, 1),
        aspp2=_init_convbn(ks[1], in_channels, 256, 3),
        aspp3=_init_convbn(ks[2], in_channels, 256, 3),
        aspp4=_init_convbn(ks[3], in_channels, 256, 3),
        aspp_out=_init_convbn(ks[4], 256 * 4, 256, 1),
        dec_low=_init_convbn(ks[5], 256, 48, 1),
        dec_cat0=_init_convbn(ks[6], 304, 256, 3),
        dec_cat1=_init_convbn(ks[7], 256, 256, 3),
        dec_out=_init_convbn(ks[8], 256, num_classes, 1, with_bn=False),
    )


def _fold_conv_bn(p, ks):
    """Fold BN (inference) + conv bias into (W_folded [K,N] f32, shift [N] f32)."""
    cout, cin = p['w'].shape[0], p['w'].shape[1]
    if 'gamma' in p:
        s = p['gamma'] / jnp.sqrt(p['var'] + EPS)
        shift = p['beta'] - p['mean'] * s + p['b'] * s
    else:
        s = jnp.ones((cout,), jnp.float32)
        shift = p.get('b', jnp.zeros((cout,), jnp.float32))
    if ks == 1:
        wm = p['w'].reshape(cout, cin).T                      # [cin, cout]
    else:
        wm = jnp.transpose(p['w'], (2, 3, 1, 0)).reshape(ks * ks * cin, cout)
    return wm * s[None, :], shift.astype(jnp.float32)


def _pad_kn(w, Kp, Np):
    K, N = w.shape
    return jnp.pad(w, ((0, Kp - K), (0, Np - N)))


def prepare_params(params, in_channels):
    """Fold BN, reshape/transpose, lane-pad K/N and cast to bf16 once, outside jit."""
    Cin = in_channels
    Cinp = _round_up(Cin, 128)
    K3p = _round_up(9 * Cin, 128)

    wA1, sA1 = _fold_conv_bn(params['aspp1'], 1)              # [Cin, 256]
    wA2, sA2 = _fold_conv_bn(params['aspp2'], 3)              # [9Cin, 256]
    wA3, sA3 = _fold_conv_bn(params['aspp3'], 3)
    wA4, sA4 = _fold_conv_bn(params['aspp4'], 3)
    wo, so = _fold_conv_bn(params['aspp_out'], 1)             # [1024, 256]

    aspp = dict(
        w1=_pad_kn(wA1, Cinp, 256).astype(COMPUTE_DTYPE),
        s1=sA1[None, :],
        wo1=wo[0:256].astype(COMPUTE_DTYPE),                  # rows for feat1
        w3=jnp.stack([_pad_kn(wA2, K3p, 256),
                      _pad_kn(wA3, K3p, 256),
                      _pad_kn(wA4, K3p, 256)], 0).astype(COMPUTE_DTYPE),
        s3=jnp.stack([sA2, sA3, sA4], 0)[:, None, :],
        wo3=wo[256:].reshape(3, 256, 256).astype(COMPUTE_DTYPE),  # feat2..4 rows
        so=so[None, :],
    )

    wl, sl = _fold_conv_bn(params['dec_low'], 1)              # [256, 48]
    Nl = _round_up(48, 128)
    dec_low = dict(w=_pad_kn(wl, 256, Nl).astype(COMPUTE_DTYPE),
                   b=jnp.pad(sl, (0, Nl - 48))[None, :])

    wc0, sc0 = _fold_conv_bn(params['dec_cat0'], 3)           # [2736, 256]
    K0p = _ksplit_pad(9 * 304)
    dec_cat0 = dict(w=_pad_kn(wc0, K0p, 256).astype(COMPUTE_DTYPE),
                    b=sc0[None, :])

    wc1, sc1 = _fold_conv_bn(params['dec_cat1'], 3)           # [2304, 256]
    wout, _ = _fold_conv_bn(params['dec_out'], 1)             # [256, ncls], bias=0
    Nout = _round_up(wout.shape[1], 128)
    dec_tail = dict(wc=wc1.astype(COMPUTE_DTYPE),
                    sc=sc1[None, :],
                    wo=_pad_kn(wout, 256, Nout).astype(COMPUTE_DTYPE))

    return dict(aspp=aspp, dec_low=dec_low, dec_cat0=dec_cat0, dec_tail=dec_tail)


# ----------------------------------------------------------------------------
# Pallas-backed forward
# ----------------------------------------------------------------------------
@functools.partial(jax.jit, static_argnames=("num_classes",))
def deeplab_forward(prep, x_nchw, low_nchw, *, num_classes):
    x = jnp.transpose(x_nchw, (0, 2, 3, 1)).astype(COMPUTE_DTYPE)     # NHWC
    low = jnp.transpose(low_nchw, (0, 2, 3, 1)).astype(COMPUTE_DTYPE)

    N, H, W, Cin = x.shape
    M = N * H * W
    aspp_p = prep['aspp']
    Cinp = aspp_p['w1'].shape[0]
    K3p = aspp_p['w3'].shape[1]

    # --- ASPP: branches + concat + conv_out all in ONE fused pallas_call ----
    x1 = x.reshape(M, Cin)
    if Cinp > Cin:
        x1 = jnp.pad(x1, ((0, 0), (0, Cinp - Cin)))
    c2 = im2col_3x3(x, 6, K3p)
    c3 = im2col_3x3(x, 12, K3p)
    c4 = im2col_3x3(x, 18, K3p)
    cols3 = jnp.stack([c2, c3, c4], axis=0)                           # [3, M, K3p]
    feat_aspp = aspp_fused(x1, cols3, aspp_p)                          # [M, 256] bf16
    feat_aspp = feat_aspp.reshape(N, H, W, 256)

    # --- Decoder -------------------------------------------------------------
    B, Hl, Wl, Cl = low.shape
    Ml = B * Hl * Wl
    dl = prep['dec_low']
    feat_low = fused_conv_mm(low.reshape(Ml, Cl), dl['w'], dl['b'],
                             relu=True, out_dtype=COMPUTE_DTYPE)[:, :48]
    feat_low = feat_low.reshape(B, Hl, Wl, 48)

    feat_up = upsample_bilinear_align_corners(feat_aspp, Hl, Wl).astype(COMPUTE_DTYPE)
    feat_cat = jnp.concatenate([feat_low, feat_up], axis=-1)           # 304 ch, bf16

    dc0 = prep['dec_cat0']
    cols0 = im2col_3x3(feat_cat, 1, dc0['w'].shape[0])                 # [Ml, 2816]
    h = fused_conv_mm(cols0, dc0['w'], dc0['b'],
                      relu=True, out_dtype=COMPUTE_DTYPE)              # K-tiled path
    h = h.reshape(B, Hl, Wl, 256)

    # dec_cat[1] + final 1x1 classifier fused (h never written to HBM).
    dt = prep['dec_tail']
    cols1 = im2col_3x3(h, 1, dt['wc'].shape[0])                        # [Ml, 2304]
    logits = dec_tail_mm(cols1, dt['wc'], dt['sc'], dt['wo'])          # [Ml, 128] f32
    logits = logits[:, :num_classes].reshape(B, Hl, Wl, num_classes)
    return jnp.transpose(logits, (0, 3, 1, 2))                          # NCHW


# ----------------------------------------------------------------------------
# Pure-JAX f32 reference (lax convs) for verification
# ----------------------------------------------------------------------------
def _ref_cbr(x, p, ks, dilation=1):
    pad = 0 if ks == 1 else dilation
    y = jax.lax.conv_general_dilated(
        x, p['w'], (1, 1), [(pad, pad), (pad, pad)],
        rhs_dilation=(dilation, dilation),
        dimension_numbers=('NCHW', 'OIHW', 'NCHW'),
        precision=jax.lax.Precision.HIGHEST)
    y = y + p['b'][None, :, None, None]
    s = (p['gamma'] / jnp.sqrt(p['var'] + EPS))[None, :, None, None]
    y = (y - p['mean'][None, :, None, None]) * s + p['beta'][None, :, None, None]
    return jnp.maximum(y, 0.0)


def ref_forward(params, x, low):
    f1 = _ref_cbr(x, params['aspp1'], 1)
    f2 = _ref_cbr(x, params['aspp2'], 3, 6)
    f3 = _ref_cbr(x, params['aspp3'], 3, 12)
    f4 = _ref_cbr(x, params['aspp4'], 3, 18)
    feat = jnp.concatenate([f1, f2, f3, f4], axis=1)
    fa = _ref_cbr(feat, params['aspp_out'], 1)
    fl = _ref_cbr(low, params['dec_low'], 1)
    Hl, Wl = low.shape[2:]
    fa_up = jnp.transpose(
        upsample_bilinear_align_corners(jnp.transpose(fa, (0, 2, 3, 1)), Hl, Wl),
        (0, 3, 1, 2))
    cat = jnp.concatenate([fl, fa_up], axis=1)
    h = _ref_cbr(cat, params['dec_cat0'], 3, 1)
    h = _ref_cbr(h, params['dec_cat1'], 3, 1)
    w = params['dec_out']['w'].reshape(params['dec_out']['w'].shape[0], -1)
    return jnp.einsum('oc,nchw->nohw', w, h, precision=jax.lax.Precision.HIGHEST)


# ----------------------------------------------------------------------------
if __name__ == "__main__":
    key = jax.random.PRNGKey(0)
    in_channels, num_classes = 64, 11
    B, H, W = 2, 8, 8          # high-level feature map (x)
    Hl, Wl = 16, 16            # low-level feature map (low), must have 256 ch

    params = init_params(key, in_channels, num_classes)
    prep = prepare_params(params, in_channels)     # fold/pad/cast once, outside jit

    kx, klow = jax.random.split(jax.random.fold_in(key, 123))
    x = jax.random.normal(kx, (B, in_channels, H, W), jnp.float32)
    low = jax.random.normal(klow, (B, 256, Hl, Wl), jnp.float32)

    logits = deeplab_forward(prep, x, low, num_classes=num_classes)
    logits = jax.block_until_ready(logits)
    assert logits.shape == (B, num_classes, Hl, Wl), logits.shape

    ref = ref_forward(params, x, low)
    err = float(jnp.max(jnp.abs(logits - ref)))
    denom = float(jnp.max(jnp.abs(ref))) + 1e-6
    # bf16 MXU inputs (f32 accumulation) vs f32 reference -> relaxed tolerance.
    assert err / denom < 5e-2, (err, denom)

    print("KERNEL_OK")
</pallas_src>

<mosaic_0001>
module attributes {stable_mosaic.version = 11 : i64} {
  func.func @_mm_bias_act_kernel(%arg0: i32, %arg1: i32, %arg2: memref<256x256xbf16, #tpu.memory_space<vmem>>, %arg3: memref<256x128xbf16, #tpu.memory_space<vmem>>, %arg4: memref<1x128xf32, #tpu.memory_space<vmem>>, %arg5: memref<256x128xbf16, #tpu.memory_space<vmem>>) attributes {dimension_semantics = [#tpu.dimension_semantics<parallel>, #tpu.dimension_semantics<parallel>], iteration_bounds = array<i64: 2, 1>, scalar_prefetch = 0 : i64, scratch_operands = 0 : i64, tpu.core_type = #tpu.core_type<tc>, window_params = [{transform_indices = @transform_0, window_bounds = array<i64: 256, 256>}, {transform_indices = @transform_1, window_bounds = array<i64: 256, 128>}, {transform_indices = @transform_2, window_bounds = array<i64: 1, 128>}, {transform_indices = @transform_3, window_bounds = array<i64: 256, 128>}]} {
    %c0 = arith.constant 0 : index
    %c0_0 = arith.constant 0 : index
    %0 = vector.load %arg2[%c0, %c0_0] : memref<256x256xbf16, #tpu.memory_space<vmem>>, vector<256x256xbf16>
    %c0_1 = arith.constant 0 : index
    %c0_2 = arith.constant 0 : index
    %1 = vector.load %arg3[%c0_1, %c0_2] : memref<256x128xbf16, #tpu.memory_space<vmem>>, vector<256x128xbf16>
    %cst = arith.constant dense<0.000000e+00> : vector<256x128xf32>
    %2 = tpu.matmul %0, %1, %cst {dimension_numbers = #tpu.dot_dimension_numbers<[1], [0], [0], [1], [0, 0, 1, 1], [], []>} : vector<256x256xbf16>, vector<256x128xbf16>, vector<256x128xf32> -> vector<256x128xf32>
    %c0_3 = arith.constant 0 : index
    %c0_4 = arith.constant 0 : index
    %3 = vector.load %arg4[%c0_3, %c0_4] : memref<1x128xf32, #tpu.memory_space<vmem>>, vector<1x128xf32>
    %4 = vector.broadcast %3 : vector<1x128xf32> to vector<256x128xf32>
    %5 = arith.addf %2, %4 : vector<256x128xf32>
    %cst_5 = arith.constant 0.000000e+00 : f32
    %6 = vector.broadcast %cst_5 : f32 to vector<256x128xf32>
    %7 = arith.maximumf %5, %6 : vector<256x128xf32>
    %8 = arith.truncf %7 : vector<256x128xf32> to vector<256x128xbf16>
    %c0_6 = arith.constant 0 : index
    %c0_7 = arith.constant 0 : index
    %9 = vector.load %arg5[%c0_6, %c0_7] : memref<256x128xbf16, #tpu.memory_space<vmem>>, vector<256x128xbf16>
    tpu.vector_store %arg5[%c0_6, %c0_7], %8 {strides = array<i32>} : memref<256x128xbf16, #tpu.memory_space<vmem>>, vector<256x128xbf16>,
    return
  }
  func.func @transform_0(%arg0: i32, %arg1: i32) -> (i32, i32) {
    %c0_i32 = arith.constant 0 : i32
    %c0_i32_0 = arith.constant 0 : i32
    return %arg0, %c0_i32 : i32, i32
  }
  func.func @transform_1(%arg0: i32, %arg1: i32) -> (i32, i32) {
    %c0_i32 = arith.constant 0 : i32
    %c0_i32_0 = arith.constant 0 : i32
    return %c0_i32, %arg1 : i32, i32
  }
  func.func @transform_2(%arg0: i32, %arg1: i32) -> (i32, i32) {
    %c0_i32 = arith.constant 0 : i32
    %c0_i32_0 = arith.constant 0 : i32
    return %c0_i32, %arg1 : i32, i32
  }
  func.func @transform_3(%arg0: i32, %arg1: i32) -> (i32, i32) {
    %c0_i32 = arith.constant 0 : i32
    return %arg0, %arg1 : i32, i32
  }
}

module attributes {stable_mosaic.version = 11 : i64} {
  func.func @_aspp_fused_kernel(%arg0: i32, %arg1: i32, %arg2: i32, %arg3: memref<128x128xbf16, #tpu.memory_space<vmem>>, %arg4: memref<128x256xbf16, #tpu.memory_space<vmem>>, %arg5: memref<1x256xf32, #tpu.memory_space<vmem>>, %arg6: memref<256x256xbf16, #tpu.memory_space<vmem>>, %arg7: memref<1x128x640xbf16, #tpu.memory_space<vmem>>, %arg8: memref<1x640x256xbf16, #tpu.memory_space<vmem>>, %arg9: memref<1x1x256xf32, #tpu.memory_space<vmem>>, %arg10: memref<1x256x256xbf16, #tpu.memory_space<vmem>>, %arg11: memref<1x256xf32, #tpu.memory_space<vmem>>, %arg12: memref<128x256xbf16, #tpu.memory_space<vmem>>, %arg13: memref<128x256xf32, #tpu.memory_space<vmem>>) attributes {dimension_semantics = [#tpu.dimension_semantics<parallel>, #tpu.dimension_semantics<parallel>, #tpu.dimension_semantics<arbitrary>], iteration_bounds = array<i64: 1, 1, 3>, scalar_prefetch = 0 : i64, scratch_operands = 1 : i64, tpu.core_type = #tpu.core_type<tc>, window_params = [{transform_indices = @transform_0, window_bounds = array<i64: 128, 128>}, {pipeline_mode = #tpu.pipeline_mode<synchronous>, transform_indices = @transform_1, window_bounds = array<i64: 128, 256>}, {pipeline_mode = #tpu.pipeline_mode<synchronous>, transform_indices = @transform_2, window_bounds = array<i64: 1, 256>}, {transform_indices = @transform_3, window_bounds = array<i64: 256, 256>}, {transform_indices = @transform_4, window_bounds = array<i64: 1, 128, 640>}, {transform_indices = @transform_5, window_bounds = array<i64: 1, 640, 256>}, {transform_indices = @transform_6, window_bounds = array<i64: 1, 1, 256>}, {transform_indices = @transform_7, window_bounds = array<i64: 1, 256, 256>}, {transform_indices = @transform_8, window_bounds = array<i64: 1, 256>}, {transform_indices = @transform_9, window_bounds = array<i64: 128, 256>}]} {
    %c0_i32 = arith.constant 0 : i32
    %0 = arith.cmpi eq, %arg2, %c0_i32 : i32
    %1 = arith.extui %0 : i1 to i32
    %c0_i32_0 = arith.constant 0 : i32
    %2 = arith.cmpi ne, %1, %c0_i32_0 : i32
    scf.if %2 {
      %c0_19 = arith.constant 0 : index
      %c0_20 = arith.constant 0 : index
      %24 = vector.load %arg3[%c0_19, %c0_20] : memref<128x128xbf16, #tpu.memory_space<vmem>>, vector<128x128xbf16>
      %c0_21 = arith.constant 0 : index
      %c0_22 = arith.constant 0 : index
      %25 = vector.load %arg4[%c0_21, %c0_22] : memref<128x256xbf16, #tpu.memory_space<vmem>>, vector<128x256xbf16>
      %cst_23 = arith.constant dense<0.000000e+00> : vector<128x256xf32>
      %26 = tpu.matmul %24, %25, %cst_23 {dimension_numbers = #tpu.dot_dimension_numbers<[1], [0], [0], [1], [0, 0, 1, 1], [], []>} : vector<128x128xbf16>, vector<128x256xbf16>, vector<128x256xf32> -> vector<128x256xf32>
      %c0_24 = arith.constant 0 : index
      %c0_25 = arith.constant 0 : index
      %27 = vector.load %arg5[%c0_24, %c0_25] : memref<1x256xf32, #tpu.memory_space<vmem>>, vector<1x256xf32>
      %28 = vector.broadcast %27 : vector<1x256xf32> to vector<128x256xf32>
      %29 = arith.addf %26, %28 : vector<128x256xf32>
      %cst_26 = arith.constant 0.000000e+00 : f32
      %30 = vector.broadcast %cst_26 : f32 to vector<128x256xf32>
      %31 = arith.maximumf %29, %30 : vector<128x256xf32>
      %32 = arith.truncf %31 : vector<128x256xf32> to vector<128x256xbf16>
      %c0_27 = arith.constant 0 : index
      %c0_28 = arith.constant 0 : index
      %33 = vector.load %arg6[%c0_27, %c0_28] : memref<256x256xbf16, #tpu.memory_space<vmem>>, vector<256x256xbf16>
      %cst_29 = arith.constant dense<0.000000e+00> : vector<128x256xf32>
      %34 = tpu.matmul %32, %33, %cst_29 {dimension_numbers = #tpu.dot_dimension_numbers<[1], [0], [0], [1], [0, 0, 1, 1], [], []>} : vector<128x256xbf16>, vector<256x256xbf16>, vector<128x256xf32> -> vector<128x256xf32>
      %c0_30 = arith.constant 0 : index
      %c0_31 = arith.constant 0 : index
      %35 = vector.load %arg13[%c0_30, %c0_31] : memref<128x256xf32, #tpu.memory_space<vmem>>, vector<128x256xf32>
      tpu.vector_store %arg13[%c0_30, %c0_31], %34 {strides = array<i32>} : memref<128x256xf32, #tpu.memory_space<vmem>>, vector<128x256xf32>,
    } else {
    }
    %c0 = arith.constant 0 : index
    %c0_1 = arith.constant 0 : index
    %c0_2 = arith.constant 0 : index
    %3 = vector.load %arg7[%c0, %c0_1, %c0_2] : memref<1x128x640xbf16, #tpu.memory_space<vmem>>, vector<1x128x640xbf16>
    %4 = vector.shape_cast %3 : vector<1x128x640xbf16> to vector<128x640xbf16>
    %c0_3 = arith.constant 0 : index
    %c0_4 = arith.constant 0 : index
    %c0_5 = arith.constant 0 : index
    %5 = vector.load %arg8[%c0_3, %c0_4, %c0_5] : memref<1x640x256xbf16, #tpu.memory_space<vmem>>, vector<1x640x256xbf16>
    %6 = vector.shape_cast %5 : vector<1x640x256xbf16> to vector<640x256xbf16>
    %cst = arith.constant dense<0.000000e+00> : vector<128x256xf32>
    %7 = tpu.matmul %4, %6, %cst {dimension_numbers = #tpu.dot_dimension_numbers<[1], [0], [0], [1], [0, 0, 1, 1], [], []>} : vector<128x640xbf16>, vector<640x256xbf16>, vector<128x256xf32> -> vector<128x256xf32>
    %c0_6 = arith.constant 0 : index
    %c0_7 = arith.constant 0 : index
    %c0_8 = arith.constant 0 : index
    %8 = vector.load %arg9[%c0_6, %c0_7, %c0_8] : memref<1x1x256xf32, #tpu.memory_space<vmem>>, vector<1x1x256xf32>
    %9 = vector.shape_cast %8 : vector<1x1x256xf32> to vector<1x256xf32>
    %10 = vector.broadcast %9 : vector<1x256xf32> to vector<128x256xf32>
    %11 = arith.addf %7, %10 : vector<128x256xf32>
    %cst_9 = arith.constant 0.000000e+00 : f32
    %12 = vector.broadcast %cst_9 : f32 to vector<128x256xf32>
    %13 = arith.maximumf %11, %12 : vector<128x256xf32>
    %c0_10 = arith.constant 0 : index
    %c0_11 = arith.constant 0 : index
    %14 = vector.load %arg13[%c0_10, %c0_11] : memref<128x256xf32, #tpu.memory_space<vmem>>, vector<128x256xf32>
    %15 = arith.truncf %13 : vector<128x256xf32> to vector<128x256xbf16>
    %c0_12 = arith.constant 0 : index
    %c0_13 = arith.constant 0 : index
    %c0_14 = arith.constant 0 : index
    %16 = vector.load %arg10[%c0_12, %c0_13, %c0_14] : memref<1x256x256xbf16, #tpu.memory_space<vmem>>, vector<1x256x256xbf16>
    %17 = vector.shape_cast %16 : vector<1x256x256xbf16> to vector<256x256xbf16>
    %cst_15 = arith.constant dense<0.000000e+00> : vector<128x256xf32>
    %18 = tpu.matmul %15, %17, %cst_15 {dimension_numbers = #tpu.dot_dimension_numbers<[1], [0], [0], [1], [0, 0, 1, 1], [], []>} : vector<128x256xbf16>, vector<256x256xbf16>, vector<128x256xf32> -> vector<128x256xf32>
    %19 = arith.addf %14, %18 : vector<128x256xf32>
    %c0_16 = arith.constant 0 : index
    %c0_17 = arith.constant 0 : index
    %20 = vector.load %arg13[%c0_16, %c0_17] : memref<128x256xf32, #tpu.memory_space<vmem>>, vector<128x256xf32>
    tpu.vector_store %arg13[%c0_16, %c0_17], %19 {strides = array<i32>} : memref<128x256xf32, #tpu.memory_space<vmem>>, vector<128x256xf32>,
    %c2_i32 = arith.constant 2 : i32
    %21 = arith.cmpi eq, %arg2, %c2_i32 : i32
    %22 = arith.extui %21 : i1 to i32
    %c0_i32_18 = arith.constant 0 : i32
    %23 = arith.cmpi ne, %22, %c0_i32_18 : i32
    scf.if %23 {
      %c0_19 = arith.constant 0 : index
      %c0_20 = arith.constant 0 : index
      %24 = vector.load %arg13[%c0_19, %c0_20] : memref<128x256xf32, #tpu.memory_space<vmem>>, vector<128x256xf32>
      %c0_21 = arith.constant 0 : index
      %c0_22 = arith.constant 0 : index
      %25 = vector.load %arg11[%c0_21, %c0_22] : memref<1x256xf32, #tpu.memory_space<vmem>>, vector<1x256xf32>
      %26 = vector.broadcast %25 : vector<1x256xf32> to vector<128x256xf32>
      %27 = arith.addf %24, %26 : vector<128x256xf32>
      %cst_23 = arith.constant 0.000000e+00 : f32
      %28 = vector.broadcast %cst_23 : f32 to vector<128x256xf32>
      %29 = arith.maximumf %27, %28 : vector<128x256xf32>
      %30 = arith.truncf %29 : vector<128x256xf32> to vector<128x256xbf16>
      %c0_24 = arith.constant 0 : index
      %c0_25 = arith.constant 0 : index
      %31 = vector.load %arg12[%c0_24, %c0_25] : memref<128x256xbf16, #tpu.memory_space<vmem>>, vector<128x256xbf16>
      tpu.vector_store %arg12[%c0_24, %c0_25], %30 {strides = array<i32>} : memref<128x256xbf16, #tpu.memory_space<vmem>>, vector<128x256xbf16>,
    } else {
    }
    return
  }
  func.func @transform_0(%arg0: i32, %arg1: i32, %arg2: i32) -> (i32, i32) {
    %c0_i32 = arith.constant 0 : i32
    %c0_i32_0 = arith.constant 0 : i32
    return %arg0, %c0_i32 : i32, i32
  }
  func.func @transform_1(%arg0: i32, %arg1: i32, %arg2: i32) -> (i32, i32) {
    %c0_i32 = arith.constant 0 : i32
    %c0_i32_0 = arith.constant 0 : i32
    %c0_i32_1 = arith.constant 0 : i32
    return %c0_i32, %c0_i32_0 : i32, i32
  }
  func.func @transform_2(%arg0: i32, %arg1: i32, %arg2: i32) -> (i32, i32) {
    %c0_i32 = arith.constant 0 : i32
    %c0_i32_0 = arith.constant 0 : i32
    %c0_i32_1 = arith.constant 0 : i32
    return %c0_i32, %c0_i32_0 : i32, i32
  }
  func.func @transform_3(%arg0: i32, %arg1: i32, %arg2: i32) -> (i32, i32) {
    %c0_i32 = arith.constant 0 : i32
    %c0_i32_0 = arith.constant 0 : i32
    return %c0_i32, %arg1 : i32, i32
  }
  func.func @transform_4(%arg0: i32, %arg1: i32, %arg2: i32) -> (i32, i32, i32) {
    %c0_i32 = arith.constant 0 : i32
    %c0_i32_0 = arith.constant 0 : i32
    return %arg2, %arg0, %c0_i32 : i32, i32, i32
  }
  func.func @transform_5(%arg0: i32, %arg1: i32, %arg2: i32) -> (i32, i32, i32) {
    %c0_i32 = arith.constant 0 : i32
    %c0_i32_0 = arith.constant 0 : i32
    %c0_i32_1 = arith.constant 0 : i32
    return %arg2, %c0_i32, %c0_i32_0 : i32, i32, i32
  }
  func.func @transform_6(%arg0: i32, %arg1: i32, %arg2: i32) -> (i32, i32, i32) {
    %c0_i32 = arith.constant 0 : i32
    %c0_i32_0 = arith.constant 0 : i32
    %c0_i32_1 = arith.constant 0 : i32
    return %arg2, %c0_i32, %c0_i32_0 : i32, i32, i32
  }
  func.func @transform_7(%arg0: i32, %arg1: i32, %arg2: i32) -> (i32, i32, i32) {
    %c0_i32 = arith.constant 0 : i32
    %c0_i32_0 = arith.constant 0 : i32
    return %arg2, %c0_i32, %arg1 : i32, i32, i32
  }
  func.func @transform_8(%arg0: i32, %arg1: i32, %arg2: i32) -> (i32, i32) {
    %c0_i32 = arith.constant 0 : i32
    %c0_i32_0 = arith.constant 0 : i32
    return %c0_i32, %arg1 : i32, i32
  }
  func.func @transform_9(%arg0: i32, %arg1: i32, %arg2: i32) -> (i32, i32) {
    %c0_i32 = arith.constant 0 : i32
    return %arg0, %arg1 : i32, i32
  }
}

module attributes {stable_mosaic.version = 11 : i64} {
  func.func @_mm_bias_act_ktiled_kernel(%arg0: i32, %arg1: i32, %arg2: i32, %arg3: memref<256x1408xbf16, #tpu.memory_space<vmem>>, %arg4: memref<1408x256xbf16, #tpu.memory_space<vmem>>, %arg5: memref<1x256xf32, #tpu.memory_space<vmem>>, %arg6: memref<256x256xbf16, #tpu.memory_space<vmem>>, %arg7: memref<256x256xf32, #tpu.memory_space<vmem>>) attributes {dimension_semantics = [#tpu.dimension_semantics<parallel>, #tpu.dimension_semantics<parallel>, #tpu.dimension_semantics<arbitrary>], iteration_bounds = array<i64: 2, 1, 2>, scalar_prefetch = 0 : i64, scratch_operands = 1 : i64, tpu.core_type = #tpu.core_type<tc>, window_params = [{transform_indices = @transform_0, window_bounds = array<i64: 256, 1408>}, {transform_indices = @transform_1, window_bounds = array<i64: 1408, 256>}, {transform_indices = @transform_2, window_bounds = array<i64: 1, 256>}, {transform_indices = @transform_3, window_bounds = array<i64: 256, 256>}]} {
    %c0_i32 = arith.constant 0 : i32
    %0 = arith.cmpi eq, %arg2, %c0_i32 : i32
    %1 = arith.extui %0 : i1 to i32
    %c0_i32_0 = arith.constant 0 : i32
    %2 = arith.cmpi ne, %1, %c0_i32_0 : i32
    scf.if %2 {
      %cst_9 = arith.constant 0.000000e+00 : f32
      %12 = vector.broadcast %cst_9 : f32 to vector<256x256xf32>
      %c0_10 = arith.constant 0 : index
      %c0_11 = arith.constant 0 : index
      %13 = vector.load %arg7[%c0_10, %c0_11] : memref<256x256xf32, #tpu.memory_space<vmem>>, vector<256x256xf32>
      tpu.vector_store %arg7[%c0_10, %c0_11], %12 {strides = array<i32>} : memref<256x256xf32, #tpu.memory_space<vmem>>, vector<256x256xf32>,
    } else {
    }
    %c0 = arith.constant 0 : index
    %c0_1 = arith.constant 0 : index
    %3 = vector.load %arg7[%c0, %c0_1] : memref<256x256xf32, #tpu.memory_space<vmem>>, vector<256x256xf32>
    %c0_2 = arith.constant 0 : index
    %c0_3 = arith.constant 0 : index
    %4 = vector.load %arg3[%c0_2, %c0_3] : memref<256x1408xbf16, #tpu.memory_space<vmem>>, vector<256x1408xbf16>
    %c0_4 = arith.constant 0 : index
    %c0_5 = arith.constant 0 : index
    %5 = vector.load %arg4[%c0_4, %c0_5] : memref<1408x256xbf16, #tpu.memory_space<vmem>>, vector<1408x256xbf16>
    %cst = arith.constant dense<0.000000e+00> : vector<256x256xf32>
    %6 = tpu.matmul %4, %5, %cst {dimension_numbers = #tpu.dot_dimension_numbers<[1], [0], [0], [1], [0, 0, 1, 1], [], []>} : vector<256x1408xbf16>, vector<1408x256xbf16>, vector<256x256xf32> -> vector<256x256xf32>
    %7 = arith.addf %3, %6 : vector<256x256xf32>
    %c0_6 = arith.constant 0 : index
    %c0_7 = arith.constant 0 : index
    %8 = vector.load %arg7[%c0_6, %c0_7] : memref<256x256xf32, #tpu.memory_space<vmem>>, vector<256x256xf32>
    tpu.vector_store %arg7[%c0_6, %c0_7], %7 {strides = array<i32>} : memref<256x256xf32, #tpu.memory_space<vmem>>, vector<256x256xf32>,
    %c1_i32 = arith.constant 1 : i32
    %9 = arith.cmpi eq, %arg2, %c1_i32 : i32
    %10 = arith.extui %9 : i1 to i32
    %c0_i32_8 = arith.constant 0 : i32
    %11 = arith.cmpi ne, %10, %c0_i32_8 : i32
    scf.if %11 {
      %c0_9 = arith.constant 0 : index
      %c0_10 = arith.constant 0 : index
      %12 = vector.load %arg7[%c0_9, %c0_10] : memref<256x256xf32, #tpu.memory_space<vmem>>, vector<256x256xf32>
      %c0_11 = arith.constant 0 : index
      %c0_12 = arith.constant 0 : index
      %13 = vector.load %arg5[%c0_11, %c0_12] : memref<1x256xf32, #tpu.memory_space<vmem>>, vector<1x256xf32>
      %14 = vector.broadcast %13 : vector<1x256xf32> to vector<256x256xf32>
      %15 = arith.addf %12, %14 : vector<256x256xf32>
      %cst_13 = arith.constant 0.000000e+00 : f32
      %16 = vector.broadcast %cst_13 : f32 to vector<256x256xf32>
      %17 = arith.maximumf %15, %16 : vector<256x256xf32>
      %18 = arith.truncf %17 : vector<256x256xf32> to vector<256x256xbf16>
      %c0_14 = arith.constant 0 : index
      %c0_15 = arith.constant 0 : index
      %19 = vector.load %arg6[%c0_14, %c0_15] : memref<256x256xbf16, #tpu.memory_space<vmem>>, vector<256x256xbf16>
      tpu.vector_store %arg6[%c0_14, %c0_15], %18 {strides = array<i32>} : memref<256x256xbf16, #tpu.memory_space<vmem>>, vector<256x256xbf16>,
    } else {
    }
    return
  }
  func.func @transform_0(%arg0: i32, %arg1: i32, %arg2: i32) -> (i32, i32) {
    %c0_i32 = arith.constant 0 : i32
    return %arg0, %arg2 : i32, i32
  }
  func.func @transform_1(%arg0: i32, %arg1: i32, %arg2: i32) -> (i32, i32) {
    %c0_i32 = arith.constant 0 : i32
    return %arg2, %arg1 : i32, i32
  }
  func.func @transform_2(%arg0: i32, %arg1: i32, %arg2: i32) -> (i32, i32) {
    %c0_i32 = arith.constant 0 : i32
    %c0_i32_0 = arith.constant 0 : i32
    return %c0_i32, %arg1 : i32, i32
  }
  func.func @transform_3(%arg0: i32, %arg1: i32, %arg2: i32) -> (i32, i32) {
    %c0_i32 = arith.constant 0 : i32
    return %arg0, %arg1 : i32, i32
  }
}

module attributes {stable_mosaic.version = 11 : i64} {
  func.func @_dec_tail_kernel(%arg0: i32, %arg1: memref<256x2304xbf16, #tpu.memory_space<vmem>>, %arg2: memref<2304x256xbf16, #tpu.memory_space<vmem>>, %arg3: memref<1x256xf32, #tpu.memory_space<vmem>>, %arg4: memref<256x128xbf16, #tpu.memory_space<vmem>>, %arg5: memref<256x128xf32, #tpu.memory_space<vmem>>) attributes {dimension_semantics = [#tpu.dimension_semantics<parallel>], iteration_bounds = array<i64: 2>, scalar_prefetch = 0 : i64, scratch_operands = 0 : i64, tpu.core_type = #tpu.core_type<tc>, window_params = [{transform_indices = @transform_0, window_bounds = array<i64: 256, 2304>}, {pipeline_mode = #tpu.pipeline_mode<synchronous>, transform_indices = @transform_1, window_bounds = array<i64: 2304, 256>}, {pipeline_mode = #tpu.pipeline_mode<synchronous>, transform_indices = @transform_2, window_bounds = array<i64: 1, 256>}, {pipeline_mode = #tpu.pipeline_mode<synchronous>, transform_indices = @transform_3, window_bounds = array<i64: 256, 128>}, {transform_indices = @transform_4, window_bounds = array<i64: 256, 128>}]} {
    %c0 = arith.constant 0 : index
    %c0_0 = arith.constant 0 : index
    %0 = vector.load %arg1[%c0, %c0_0] : memref<256x2304xbf16, #tpu.memory_space<vmem>>, vector<256x2304xbf16>
    %c0_1 = arith.constant 0 : index
    %c0_2 = arith.constant 0 : index
    %1 = vector.load %arg2[%c0_1, %c0_2] : memref<2304x256xbf16, #tpu.memory_space<vmem>>, vector<2304x256xbf16>
    %cst = arith.constant dense<0.000000e+00> : vector<256x256xf32>
    %2 = tpu.matmul %0, %1, %cst {dimension_numbers = #tpu.dot_dimension_numbers<[1], [0], [0], [1], [0, 0, 1, 1], [], []>} : vector<256x2304xbf16>, vector<2304x256xbf16>, vector<256x256xf32> -> vector<256x256xf32>
    %c0_3 = arith.constant 0 : index
    %c0_4 = arith.constant 0 : index
    %3 = vector.load %arg3[%c0_3, %c0_4] : memref<1x256xf32, #tpu.memory_space<vmem>>, vector<1x256xf32>
    %4 = vector.broadcast %3 : vector<1x256xf32> to vector<256x256xf32>
    %5 = arith.addf %2, %4 : vector<256x256xf32>
    %cst_5 = arith.constant 0.000000e+00 : f32
    %6 = vector.broadcast %cst_5 : f32 to vector<256x256xf32>
    %7 = arith.maximumf %5, %6 : vector<256x256xf32>
    %8 = arith.truncf %7 : vector<256x256xf32> to vector<256x256xbf16>
    %c0_6 = arith.constant 0 : index
    %c0_7 = arith.constant 0 : index
    %9 = vector.load %arg4[%c0_6, %c0_7] : memref<256x128xbf16, #tpu.memory_space<vmem>>, vector<256x128xbf16>
    %cst_8 = arith.constant dense<0.000000e+00> : vector<256x128xf32>
    %10 = tpu.matmul %8, %9, %cst_8 {dimension_numbers = #tpu.dot_dimension_numbers<[1], [0], [0], [1], [0, 0, 1, 1], [], []>} : vector<256x256xbf16>, vector<256x128xbf16>, vector<256x128xf32> -> vector<256x128xf32>
    %c0_9 = arith.constant 0 : index
    %c0_10 = arith.constant 0 : index
    %11 = vector.load %arg5[%c0_9, %c0_10] : memref<256x128xf32, #tpu.memory_space<vmem>>, vector<256x128xf32>
    tpu.vector_store %arg5[%c0_9, %c0_10], %10 {strides = array<i32>} : memref<256x128xf32, #tpu.memory_space<vmem>>, vector<256x128xf32>,
    return
  }
  func.func @transform_0(%arg0: i32) -> (i32, i32) {
    %c0_i32 = arith.constant 0 : i32
    %c0_i32_0 = arith.constant 0 : i32
    return %arg0, %c0_i32 : i32, i32
  }
  func.func @transform_1(%arg0: i32) -> (i32, i32) {
    %c0_i32 = arith.constant 0 : i32
    %c0_i32_0 = arith.constant 0 : i32
    %c0_i32_1 = arith.constant 0 : i32
    return %c0_i32, %c0_i32_0 : i32, i32
  }
  func.func @transform_2(%arg0: i32) -> (i32, i32) {
    %c0_i32 = arith.constant 0 : i32
    %c0_i32_0 = arith.constant 0 : i32
    %c0_i32_1 = arith.constant 0 : i32
    return %c0_i32, %c0_i32_0 : i32, i32
  }
  func.func @transform_3(%arg0: i32) -> (i32, i32) {
    %c0_i32 = arith.constant 0 : i32
    %c0_i32_0 = arith.constant 0 : i32
    %c0_i32_1 = arith.constant 0 : i32
    return %c0_i32, %c0_i32_0 : i32, i32
  }
  func.func @transform_4(%arg0: i32) -> (i32, i32) {
    %c0_i32 = arith.constant 0 : i32
    %c0_i32_0 = arith.constant 0 : i32
    return %arg0, %c0_i32 : i32, i32
  }
}

</mosaic_0001>

<bundles_post_ra>
// kernel: deeplab_forward.5
= control target key start
LH: loop header
LB: loop body
LE: loop exit
PB: predicated region body
PF: predicated region fallthrough
CT: control target
= control target key end

     0   :  { %8 = vsyncpa [#allocation3], 0  ;;  %s1800_s0 = inlined_call_operand.vmem [shape: bf16[512,256], index: 0, kind: input, shape index: {}]   ;;  %s1801_s1 = inlined_call_operand.hbm [shape: bf16[256,128], index: 1, kind: input, shape index: {}]   ;;  %s1802_s2 = inlined_call_operand.hbm [shape: f32[1,128], index: 2, kind: input, shape index: {}]   ;;  %s1803_s3 = inlined_call_operand.vmem [shape: bf16[512,128], index: 3, kind: output, shape index: {}]  }
   0x1   :  { %9 = vsyncpa [#allocation5], 0  ;;  %s1597_s12 = smov 0   ;;  %s1599_s13 = smov 0  }
   0x2   :  { %s1601_s14 = smov 0  }
   0x3 LB: > { %s1021_s15 = sadd.s32 4294967295, %s1571_s14   ;;  %s27_s16 = sadd.s32 1, %s1567_s13  ;;  %s1571_s14 = sphi %s1601_s14, %s15_s14   ;;  %s1567_s13 = sphi %s1599_s13, %s1813_s13   ;;  %s1563_s12 = sphi %s1597_s12, %s1812_s12  }
   0x4   : > { %p29_p0 = scmp.ge.s32.totalorder %s27_s16, 2  ;;  %p1023_p1 = scmp.ge.s32.totalorder %s1571_s14, 1 }
   0x5   : > { %p138_p2 = scmp.lt.s32.totalorder %s1571_s14, 3  ;;  %p1622_p4 = scmp.eq.s32.totalorder %s1021_s15, 0 }
   0x6   : > { %s1815_s16 = smov (%p29_p0, %s27_s16), 0  ;;  %s1573_s19 = smov [#allocation2]  }
   0x7   : > { %p1618_p3 = pnand %p1023_p1, %p138_p2  ;;  %s152_s20 = sshll.u32 %s1573_s19, 4  ;;  %s153_s20 = int_to_ptr.vmem [resolvable:$true] %s152_s20 }
   0x8   : > { %s1808_s18 = scalar_select %p1622_p4, 1, 0 }
   0x9   : > { %s1807_s17 = scalar_select %p1618_p3, 1, 0 }
   0xa   : > { %p1382_p5 = pneg %p1618_p3  ;;  %s1574_s22 = smov [#allocation4]  }
   0xb   : > { %s168_s23 = sshll.u32 %s1574_s22, 4  ;;  %s1485_s26 = scalar_lea.hbm %s1801_s1, 2048  ;;  %s1634_s23 = int_to_ptr.vmem [resolvable:$true] %s168_s23 }
   0xc   : > { %p1630_p6 = pnand %p1622_p4, %p1382_p5  ;;  %p1486_p7 = scmp.ne.s32.totalorder %s1801_s1, %s1485_s26 }
   0xd   : > { %p1492_p11 = scmp.lt.u32.totalorder %s1485_s26, %s1801_s1 }
   0xe   : > { %p1487_p8 = pneg %p1630_p6 }
  0x10   : > { %p1488_p9 = pnand %p1487_p8, %p1486_p7 }
  0x12   : > { %p1489_p10 = pneg %p1488_p9 }
  0x14   : > { %p1494_p12 = pnand %p1492_p11, %p1489_p10 }
  0x16   : > { %1497 = shalt.err (!%p1494_p12)
}
  0x17   : > { %s1498_s4 = scalar_lea.vmem %s153_s20, 2048  ;;  %p1506_p2 = scmp.lt.s32.totalorder %s153_s20, %s153_s20 }
  0x18   : > { %p1499_p13 = scmp.ne.s32.totalorder %s153_s20, %s1498_s4  ;;  %p1507_p5 = scmp.lt.s32.totalorder %s1498_s4, %s1498_s4 }
  0x1a   : > { %p1501_p0 = pnand %p1499_p13, %p1487_p8  ;;  %p1508_p4 = por %p1507_p5, %p1506_p2 }
  0x1c   : > { %p1502_p1 = pneg %p1501_p0 }
  0x1e   : > { %p1509_p3 = pnand %p1508_p4, %p1502_p1 }
  0x20   : > { %1512 = shalt.err (!%p1509_p3)
}
  0x21   : > { %s1575_s5 = smov 64   ;;  %s1576_s6 = smov 4  }
  0x22   : > { %1385 = dma.hbm_to_vmem [thread:$0]  (!%p1630_p6), %s1801_s1, 2048, %s153_s20, [#allocation3], %s1575_s5, %s1575_s5, %s1576_s6  }
  0x23   : > { %s1513_s11 = scalar_lea.hbm %s1802_s2, 16 }
  0x24   : > { %p1514_p7 = scmp.ne.s32.totalorder %s1802_s2, %s1513_s11  ;;  %p1520_p9 = scmp.lt.u32.totalorder %s1513_s11, %s1802_s2 }
  0x26   : > { %p1516_p3 = pnand %p1514_p7, %p1487_p8 }
  0x28   : > { %p1517_p4 = pneg %p1516_p3 }
  0x2a   : > { %p1522_p10 = pnand %p1520_p9, %p1517_p4 }
  0x2c   : > { %1525 = shalt.err (!%p1522_p10)
}
  0x2d   : > { %s1526_s20 = scalar_lea.vmem %s1634_s23, 16  ;;  %s1533_s25 = scalar_lea.vmem %s1634_s23, 32 }
  0x2e   : > { %p1527_p11 = scmp.ne.s32.totalorder %s1634_s23, %s1526_s20  ;;  %p1534_p0 = scmp.lt.s32.totalorder %s1634_s23, %s1634_s23 }
  0x2f   : > { %p1535_p1 = scmp.lt.s32.totalorder %s1533_s25, %s1526_s20 }
  0x30   : > { %p1529_p12 = pnand %p1527_p11, %p1487_p8 }
  0x31   : > { %p1536_p2 = por %p1535_p1, %p1534_p0 }
  0x32   : > { %p1530_p13 = pneg %p1529_p12 }
  0x34   : > { %p1537_p5 = pnand %p1536_p2, %p1530_p13 }
  0x36   : > { %1540 = shalt.err (!%p1537_p5)
}
  0x37   : > { %1388 = dma.hbm_to_vmem [thread:$0]  (!%p1630_p6), %s1802_s2, 16, %s1634_s23, [#allocation5]  }
  0x38   : > { %p1810_p7 = scmp.ne.s32.totalorder %s1807_s17, 0 }
  0x39   : > { %p1811_p8 = scmp.ne.s32.totalorder (!%p1810_p7), %s1808_s18, 0 }
  0x3a   : > { %191 = sbr.rel (%p1810_p7) target bundleno = 382 (0x17e), region = 32 }
  0x41   : > { %1554 = dma.done.wait (%p1811_p8), [#allocation3], 2048  }
  0x42   : > { %1556 = vsyncadd (%p1811_p8), [#allocation3], 4294965248 }
  0x43   : > { %1558 = dma.done.wait (%p1811_p8), [#allocation5], 16  }
  0x44   : > { %1560 = vsyncadd (%p1811_p8), [#allocation5], 4294967280  ;;  %v1421_v0 = vld [vmem:[#allocation2 + $0x40] sm:$0xff]   ;;  %s1030_s21 = sshll.u32 %s1563_s12, 5  ;;  %v1423_v2 = vld [vmem:[#allocation2 + $0x48] sm:$0xff]  }
  0x45   : > { %v1422_v1 = vld [vmem:[#allocation2] sm:$0xff]   ;;  %1246 = vmatprep.subr.bf16.mxu0 %v1421_v0  ;;  %1358 = vmatprep.subr.bf16.mxu1 %v1421_v0  ;;  %v1424_v3 = vld [vmem:[#allocation2 + $0x8] sm:$0xff]   ;;  %p224_p6 = scmp.lt.s32.totalorder %s1030_s21, 63  ;;  %v1425_v4 = vld [vmem:[#allocation2 + $0x50] sm:$0xff]  }
  0x46   : > { %1247 = vmatpush3.bf16.msra.mxu0 %v1422_v1  ;;  %1366 = vmatpush3.bf16.msra.mxu1 %v1422_v1  ;;  %v1426_v5 = vld [vmem:[#allocation2 + $0x10] sm:$0xff]   ;;  %v1427_v6 = vld [vmem:[#allocation2 + $0x58] sm:$0xff]   ;;  %v1429_v8 = vld [vmem:[#allocation2 + $0x60] sm:$0xff]  }
  0x47   : > { %1248 = vmatprep.subr.bf16.mxu0 %v1423_v2  ;;  %1359 = vmatprep.subr.bf16.mxu1 %v1423_v2  ;;  %s1817_s21 = smov (!%p224_p6, %s1030_s21), 63  ;;  %v1428_v7 = vld [vmem:[#allocation2 + $0x18] sm:$0xff]   ;;  %v1430_v9 = vld [vmem:[#allocation2 + $0x20] sm:$0xff]   ;;  %v1431_v10 = vld [vmem:[#allocation2 + $0x68] sm:$0xff]  }
  0x48   : > { %s1118_s12 = sshll.u32 %s1817_s21, 3  ;;  %v1432_v13 = vld [vmem:[#allocation2 + $0x28] sm:$0xff]   ;;  %v1433_v14 = vld [vmem:[#allocation2 + $0x70] sm:$0xff]   ;;  %v1435_v16 = vld [vmem:[#allocation2 + $0x78] sm:$0xff]   ;;  %s1034_s28 = sshll.u32 %s1817_s21, 2 }
  0x49   : > { %s1701_s23 = scalar_lea.vmem %s1800_s0, %s1118_s12  ;;  %v1434_v15 = vld [vmem:[#allocation2 + $0x30] sm:$0xff]   ;;  %v1436_v17 = vld [vmem:[#allocation2 + $0x38] sm:$0xff]   ;;  %v1735_v50 = vld [vmem:[#allocation4] ss:$0 sm:$0xff]  ;;  %s1745_s4 = scalar_lea.vmem %s1803_s3, %s1034_s28 }
  0x4a   : > { %1249 = vmatpush3.bf16.msra.mxu0 %v1424_v3  ;;  %1367 = vmatpush3.bf16.msra.mxu1 %v1424_v3  ;;  %v1439_v11 = vld [vmem:[%s1701_s23 + $0x4] ss:$8 sps:$4 sm:$0xff]   ;;  %v1437_v18 = vld [vmem:[%s1701_s23] ss:$8 sps:$4 sm:$0xff]   ;;  %v1443_v20 = vld [vmem:[%s1701_s23 + $0x14] ss:$8 sps:$4 sm:$0xff]  }
  0x4b   : > { %1250 = vmatprep.subr.bf16.mxu0 %v1425_v4  ;;  %1360 = vmatprep.subr.bf16.mxu1 %v1425_v4  ;;  %v1442_v12 = vld [vmem:[%s1701_s23 + $0x84] ss:$8 sps:$4 sm:$0xff]   ;;  %v1440_v19 = vld [vmem:[%s1701_s23 + $0x80] ss:$8 sps:$4 sm:$0xff]   ;;  %v1445_v21 = vld [vmem:[%s1701_s23 + $0x94] ss:$8 sps:$4 sm:$0xff]  }
  0x4c   : > { %599 = vmatprep.mubr.bf16.mxu0 %v1439_v11  ;;  %663 = vmatprep.mubr.bf16.mxu1 %v1442_v12  ;;  %v1447_v22 = vld [vmem:[%s1701_s23 + $0x10] ss:$8 sps:$4 sm:$0xff]   ;;  %v1449_v24 = vld [vmem:[%s1701_s23 + $0x24] ss:$8 sps:$4 sm:$0xff]   ;;  %v1453_v26 = vld [vmem:[%s1701_s23 + $0x20] ss:$8 sps:$4 sm:$0xff]  }
  0x4d   : > { %v1448_v23 = vld [vmem:[%s1701_s23 + $0x90] ss:$8 sps:$4 sm:$0xff]   ;;  %v1451_v25 = vld [vmem:[%s1701_s23 + $0xa4] ss:$8 sps:$4 sm:$0xff]   ;;  %v1454_v27 = vld [vmem:[%s1701_s23 + $0xa0] ss:$8 sps:$4 sm:$0xff]  }
  0x4e   : > { %1251 = vmatpush3.bf16.msra.mxu0 %v1426_v5  ;;  %1368 = vmatpush3.bf16.msra.mxu1 %v1426_v5  ;;  %v1455_v28 = vld [vmem:[%s1701_s23 + $0x34] ss:$8 sps:$4 sm:$0xff]   ;;  %v1459_v30 = vld [vmem:[%s1701_s23 + $0x30] ss:$8 sps:$4 sm:$0xff]   ;;  %v1461_v32 = vld [vmem:[%s1701_s23 + $0x44] ss:$8 sps:$4 sm:$0xff]  }
  0x4f   : > { %1252 = vmatprep.subr.bf16.mxu0 %v1427_v6  ;;  %1361 = vmatprep.subr.bf16.mxu1 %v1427_v6  ;;  %v1457_v29 = vld [vmem:[%s1701_s23 + $0xb4] ss:$8 sps:$4 sm:$0xff]   ;;  %v1460_v31 = vld [vmem:[%s1701_s23 + $0xb0] ss:$8 sps:$4 sm:$0xff]   ;;  %v1463_v33 = vld [vmem:[%s1701_s23 + $0xc4] ss:$8 sps:$4 sm:$0xff]  }
  0x50   : > { %v1465_v34 = vld [vmem:[%s1701_s23 + $0x40] ss:$8 sps:$4 sm:$0xff]   ;;  %v1467_v36 = vld [vmem:[%s1701_s23 + $0x54] ss:$8 sps:$4 sm:$0xff]   ;;  %v1471_v38 = vld [vmem:[%s1701_s23 + $0x50] ss:$8 sps:$4 sm:$0xff]  }
  0x51   : > { %v1466_v35 = vld [vmem:[%s1701_s23 + $0xc0] ss:$8 sps:$4 sm:$0xff]   ;;  %v1469_v37 = vld [vmem:[%s1701_s23 + $0xd4] ss:$8 sps:$4 sm:$0xff]   ;;  %v1472_v39 = vld [vmem:[%s1701_s23 + $0xd0] ss:$8 sps:$4 sm:$0xff]  }
  0x52   : > { %1253 = vmatpush3.bf16.msra.mxu0 %v1428_v7  ;;  %1369 = vmatpush3.bf16.msra.mxu1 %v1428_v7  ;;  %v1473_v40 = vld [vmem:[%s1701_s23 + $0x64] ss:$8 sps:$4 sm:$0xff]   ;;  %v1477_v42 = vld [vmem:[%s1701_s23 + $0x60] ss:$8 sps:$4 sm:$0xff]   ;;  %v1479_v44 = vld [vmem:[%s1701_s23 + $0x74] ss:$8 sps:$4 sm:$0xff]  }
  0x53   : > { %1254 = vmatprep.subr.bf16.mxu0 %v1429_v8  ;;  %1362 = vmatprep.subr.bf16.mxu1 %v1429_v8  ;;  %v1475_v41 = vld [vmem:[%s1701_s23 + $0xe4] ss:$8 sps:$4 sm:$0xff]   ;;  %v1478_v43 = vld [vmem:[%s1701_s23 + $0xe0] ss:$8 sps:$4 sm:$0xff]   ;;  %v1481_v45 = vld [vmem:[%s1701_s23 + $0xf4] ss:$8 sps:$4 sm:$0xff]  }
  0x54   : > { %v1483_v46 = vld [vmem:[%s1701_s23 + $0x70] ss:$8 sps:$4 sm:$0xff]  }
  0x55   : > { %v1484_v47 = vld [vmem:[%s1701_s23 + $0xf0] ss:$8 sps:$4 sm:$0xff]  }
  0x56   : > { %1255 = vmatpush3.bf16.msra.mxu0 %v1430_v9  ;;  %1370 = vmatpush3.bf16.msra.mxu1 %v1430_v9 }
  0x57   : > { %1256 = vmatprep.subr.bf16.mxu0 %v1431_v10  ;;  %1363 = vmatprep.subr.bf16.mxu1 %v1431_v10 }
  0x5a   : > { %1257 = vmatpush3.bf16.msra.mxu0 %v1432_v13  ;;  %1371 = vmatpush3.bf16.msra.mxu1 %v1432_v13 }
  0x5b   : > { %1258 = vmatprep.subr.bf16.mxu0 %v1433_v14  ;;  %1364 = vmatprep.subr.bf16.mxu1 %v1433_v14 }
  0x5e   : > { %1259 = vmatpush3.bf16.msra.mxu0 %v1434_v15  ;;  %1372 = vmatpush3.bf16.msra.mxu1 %v1434_v15 }
  0x5f   : > { %1260 = vmatprep.subr.bf16.mxu0 %v1435_v16  ;;  %1365 = vmatprep.subr.bf16.mxu1 %v1435_v16 }
  0x62   : > { %1261 = vmatpush3.bf16.msra.mxu0 %v1436_v17  ;;  %1373 = vmatpush3.bf16.msra.mxu1 %v1436_v17 }
  0x65   : > { %600 = vmatmul.mubr.bf16.vlgmr.msra.gmra.mrb[0].mxu0 %v1437_v18  ;;  %664 = vmatmul.mubr.bf16.vlgmr.msra.gmra.mrb[0].mxu1 %v1440_v19 }
  0x66   : > { %607 = vmatprep.mubr.bf16.mxu0 %v1443_v20  ;;  %671 = vmatprep.mubr.bf16.mxu1 %v1445_v21 }
  0x6d   : > { %608 = vmatmul.mubr.bf16.gmra.mrb[4].mxu0 %v1447_v22  ;;  %672 = vmatmul.mubr.bf16.gmra.mrb[4].mxu1 %v1448_v23 }
  0x6e   : > { %615 = vmatprep.mubr.bf16.mxu0 %v1449_v24  ;;  %679 = vmatprep.mubr.bf16.mxu1 %v1451_v25 }
  0x75   : > { %616 = vmatmul.mubr.bf16.gmra.mrb[8].mxu0 %v1453_v26  ;;  %680 = vmatmul.mubr.bf16.gmra.mrb[8].mxu1 %v1454_v27 }
  0x76   : > { %623 = vmatprep.mubr.bf16.mxu0 %v1455_v28  ;;  %687 = vmatprep.mubr.bf16.mxu1 %v1457_v29 }
  0x7d   : > { %624 = vmatmul.mubr.bf16.gmra.mrb[12].mxu0 %v1459_v30  ;;  %688 = vmatmul.mubr.bf16.gmra.mrb[12].mxu1 %v1460_v31 }
  0x7e   : > { %631 = vmatprep.mubr.bf16.mxu0 %v1461_v32  ;;  %695 = vmatprep.mubr.bf16.mxu1 %v1463_v33 }
  0x85   : > { %632 = vmatmul.mubr.bf16.gmra.mrb[16].mxu0 %v1465_v34  ;;  %696 = vmatmul.mubr.bf16.gmra.mrb[16].mxu1 %v1466_v35 }
  0x86   : > { %639 = vmatprep.mubr.bf16.mxu0 %v1467_v36  ;;  %703 = vmatprep.mubr.bf16.mxu1 %v1469_v37 }
  0x8d   : > { %640 = vmatmul.mubr.bf16.gmra.mrb[20].mxu0 %v1471_v38  ;;  %704 = vmatmul.mubr.bf16.gmra.mrb[20].mxu1 %v1472_v39 }
  0x8e   : > { %647 = vmatprep.mubr.bf16.mxu0 %v1473_v40  ;;  %711 = vmatprep.mubr.bf16.mxu1 %v1475_v41 }
  0x95   : > { %648 = vmatmul.mubr.bf16.gmra.mrb[24].mxu0 %v1477_v42  ;;  %712 = vmatmul.mubr.bf16.gmra.mrb[24].mxu1 %v1478_v43 }
  0x96   : > { %655 = vmatprep.mubr.bf16.mxu0 %v1479_v44  ;;  %719 = vmatprep.mubr.bf16.mxu1 %v1481_v45 }
  0x9d   : > { %656 = vmatmul.mubr.bf16.gmra.mrb[28].mxu0 %v1483_v46  ;;  %720 = vmatmul.mubr.bf16.gmra.mrb[28].mxu1 %v1484_v47 }
 0x138   : > { %v1262_v48 = vpop.f32.mrb[0].mxu0  ;;  %v1310_v49 = vpop.f32.mrb[0].mxu1 }
 0x139   : > { %v1263_v51 = vpop.f32.mrb[1].mxu0  ;;  %v1311_v52 = vpop.f32.mrb[1].mxu1 }
 0x13a   : > { %v1264_v53 = vadd.f32 %v1263_v51, %v1262_v48  ;;  %v1312_v54 = vadd.f32 %v1311_v52, %v1310_v49  ;;  %v1265_v55 = vpop.f32.mrb[2].mxu0  ;;  %v1313_v56 = vpop.f32.mrb[2].mxu1 }
 0x13b   : > { %v1266_v57 = vpop.f32.mrb[3].mxu0  ;;  %v1314_v58 = vpop.f32.mrb[3].mxu1 }
 0x13c   : > { %v602_v59 = vadd.f32 %v1264_v53, %v1735_v50  ;;  %v666_v60 = vadd.f32 %v1312_v54, %v1735_v50  ;;  %v1267_v61 = vadd.f32 %v1266_v57, %v1265_v55  ;;  %v1315_v62 = vadd.f32 %v1314_v58, %v1313_v56 }
 0x13e   : > { %v605_v63 = vadd.f32 %v1267_v61, %v1735_v50  ;;  %v669_v0 = vadd.f32 %v1315_v62, %v1735_v50  ;;  %v728_v1 = vmax.f32 %v602_v59, 0.0  ;;  %v744_v2 = vmax.f32 %v666_v60, 0.0 }
 0x140   : > { %v729_v3 = vmax.f32 %v605_v63, 0.0  ;;  %v745_v4 = vmax.f32 %v669_v0, 0.0  ;;  %v1268_v5 = vpop.f32.mrb[4].mxu0  ;;  %v1316_v6 = vpop.f32.mrb[4].mxu1 }
 0x141   : > { %v1269_v7 = vpop.f32.mrb[5].mxu0  ;;  %v1317_v8 = vpop.f32.mrb[5].mxu1 }
 0x142   : > { %v1154_v9 = vpack.c.bf16 %v729_v3, %v728_v1  ;;  %v1194_v10 = vpack.c.bf16 %v745_v4, %v744_v2  ;;  %v1270_v11 = vadd.f32 %v1269_v7, %v1268_v5  ;;  %v1318_v12 = vadd.f32 %v1317_v8, %v1316_v6  ;;  %v1271_v13 = vpop.f32.mrb[6].mxu0  ;;  %v1319_v14 = vpop.f32.mrb[6].mxu1 }
 0x143   : > { %v1272_v15 = vpop.f32.mrb[7].mxu0  ;;  %v1320_v16 = vpop.f32.mrb[7].mxu1 }
 0x144   : > { %1155 = vst [vmem:[%s1745_s4] sm:$0xff] %v1154_v9   ;;  %1238 = vst [vmem:[%s1745_s4 + $0x40] sm:$0xff] %v1194_v10   ;;  %v610_v17 = vadd.f32 %v1270_v11, %v1735_v50  ;;  %v674_v18 = vadd.f32 %v1318_v12, %v1735_v50  ;;  %v1273_v19 = vadd.f32 %v1272_v15, %v1271_v13 }
 0x145   : > { %v1321_v20 = vadd.f32 %v1320_v16, %v1319_v14 }
 0x146   : > { %v613_v21 = vadd.f32 %v1273_v19, %v1735_v50  ;;  %v730_v23 = vmax.f32 %v610_v17, 0.0  ;;  %v746_v24 = vmax.f32 %v674_v18, 0.0 }
 0x147   : > { %v677_v22 = vadd.f32 %v1321_v20, %v1735_v50 }
 0x148   : > { %v731_v25 = vmax.f32 %v613_v21, 0.0  ;;  %v1274_v27 = vpop.f32.mrb[8].mxu0  ;;  %v1322_v28 = vpop.f32.mrb[8].mxu1 }
 0x149   : > { %v747_v26 = vmax.f32 %v677_v22, 0.0  ;;  %v1275_v29 = vpop.f32.mrb[9].mxu0  ;;  %v1323_v30 = vpop.f32.mrb[9].mxu1 }
 0x14a   : > { %v1159_v31 = vpack.c.bf16 %v731_v25, %v730_v23  ;;  %v1276_v33 = vadd.f32 %v1275_v29, %v1274_v27  ;;  %v1324_v34 = vadd.f32 %v1323_v30, %v1322_v28  ;;  %v1277_v35 = vpop.f32.mrb[10].mxu0  ;;  %v1325_v36 = vpop.f32.mrb[10].mxu1 }
 0x14b   : > { %v1199_v32 = vpack.c.bf16 %v747_v26, %v746_v24  ;;  %v1278_v37 = vpop.f32.mrb[11].mxu0  ;;  %v1326_v38 = vpop.f32.mrb[11].mxu1 }
 0x14c   : > { %1231 = vst [vmem:[%s1745_s4 + $0x8] sm:$0xff] %v1159_v31   ;;  %v618_v39 = vadd.f32 %v1276_v33, %v1735_v50  ;;  %v682_v40 = vadd.f32 %v1324_v34, %v1735_v50  ;;  %v1279_v41 = vadd.f32 %v1278_v37, %v1277_v35  ;;  %v1327_v42 = vadd.f32 %v1326_v38, %v1325_v36 }
 0x14d   : > { %1239 = vst [vmem:[%s1745_s4 + $0x48] sm:$0xff] %v1199_v32  }
 0x14e   : > { %v621_v43 = vadd.f32 %v1279_v41, %v1735_v50  ;;  %v685_v44 = vadd.f32 %v1327_v42, %v1735_v50  ;;  %v732_v45 = vmax.f32 %v618_v39, 0.0  ;;  %v748_v46 = vmax.f32 %v682_v40, 0.0 }
 0x150   : > { %v733_v47 = vmax.f32 %v621_v43, 0.0  ;;  %v749_v48 = vmax.f32 %v685_v44, 0.0  ;;  %v1280_v49 = vpop.f32.mrb[12].mxu0  ;;  %v1328_v51 = vpop.f32.mrb[12].mxu1 }
 0x151   : > { %v1281_v52 = vpop.f32.mrb[13].mxu0  ;;  %v1329_v53 = vpop.f32.mrb[13].mxu1 }
 0x152   : > { %v1164_v54 = vpack.c.bf16 %v733_v47, %v732_v45  ;;  %v1204_v55 = vpack.c.bf16 %v749_v48, %v748_v46  ;;  %v1282_v56 = vadd.f32 %v1281_v52, %v1280_v49  ;;  %v1330_v57 = vadd.f32 %v1329_v53, %v1328_v51  ;;  %v1283_v58 = vpop.f32.mrb[14].mxu0  ;;  %v1331_v59 = vpop.f32.mrb[14].mxu1 }
 0x153   : > { %v1284_v60 = vpop.f32.mrb[15].mxu0  ;;  %v1332_v61 = vpop.f32.mrb[15].mxu1 }
 0x154   : > { %1232 = vst [vmem:[%s1745_s4 + $0x10] sm:$0xff] %v1164_v54   ;;  %1240 = vst [vmem:[%s1745_s4 + $0x50] sm:$0xff] %v1204_v55   ;;  %v626_v62 = vadd.f32 %v1282_v56, %v1735_v50  ;;  %v690_v63 = vadd.f32 %v1330_v57, %v1735_v50  ;;  %v1285_v0 = vadd.f32 %v1284_v60, %v1283_v58 }
 0x155   : > { %v1333_v1 = vadd.f32 %v1332_v61, %v1331_v59 }
 0x156   : > { %v629_v2 = vadd.f32 %v1285_v0, %v1735_v50  ;;  %v734_v4 = vmax.f32 %v626_v62, 0.0  ;;  %v750_v5 = vmax.f32 %v690_v63, 0.0 }
 0x157   : > { %v693_v3 = vadd.f32 %v1333_v1, %v1735_v50 }
 0x158   : > { %v735_v6 = vmax.f32 %v629_v2, 0.0  ;;  %v1286_v8 = vpop.f32.mrb[16].mxu0  ;;  %v1334_v9 = vpop.f32.mrb[16].mxu1 }
 0x159   : > { %v751_v7 = vmax.f32 %v693_v3, 0.0  ;;  %v1287_v10 = vpop.f32.mrb[17].mxu0  ;;  %v1335_v11 = vpop.f32.mrb[17].mxu1 }
 0x15a   : > { %v1169_v12 = vpack.c.bf16 %v735_v6, %v734_v4  ;;  %v1288_v14 = vadd.f32 %v1287_v10, %v1286_v8  ;;  %v1336_v15 = vadd.f32 %v1335_v11, %v1334_v9  ;;  %v1289_v16 = vpop.f32.mrb[18].mxu0  ;;  %v1337_v17 = vpop.f32.mrb[18].mxu1 }
 0x15b   : > { %v1209_v13 = vpack.c.bf16 %v751_v7, %v750_v5  ;;  %v1290_v18 = vpop.f32.mrb[19].mxu0  ;;  %v1338_v19 = vpop.f32.mrb[19].mxu1 }
 0x15c   : > { %1233 = vst [vmem:[%s1745_s4 + $0x18] sm:$0xff] %v1169_v12   ;;  %v634_v20 = vadd.f32 %v1288_v14, %v1735_v50  ;;  %v698_v21 = vadd.f32 %v1336_v15, %v1735_v50  ;;  %v1291_v22 = vadd.f32 %v1290_v18, %v1289_v16  ;;  %v1339_v23 = vadd.f32 %v1338_v19, %v1337_v17 }
 0x15d   : > { %1241 = vst [vmem:[%s1745_s4 + $0x58] sm:$0xff] %v1209_v13  }
 0x15e   : > { %v637_v24 = vadd.f32 %v1291_v22, %v1735_v50  ;;  %v701_v25 = vadd.f32 %v1339_v23, %v1735_v50  ;;  %v736_v26 = vmax.f32 %v634_v20, 0.0  ;;  %v752_v27 = vmax.f32 %v698_v21, 0.0 }
 0x160   : > { %v737_v28 = vmax.f32 %v637_v24, 0.0  ;;  %v753_v29 = vmax.f32 %v701_v25, 0.0  ;;  %v1292_v30 = vpop.f32.mrb[20].mxu0  ;;  %v1340_v31 = vpop.f32.mrb[20].mxu1 }
 0x161   : > { %v1293_v32 = vpop.f32.mrb[21].mxu0  ;;  %v1341_v33 = vpop.f32.mrb[21].mxu1 }
 0x162   : > { %v1174_v34 = vpack.c.bf16 %v737_v28, %v736_v26  ;;  %v1214_v35 = vpack.c.bf16 %v753_v29, %v752_v27  ;;  %v1294_v36 = vadd.f32 %v1293_v32, %v1292_v30  ;;  %v1342_v37 = vadd.f32 %v1341_v33, %v1340_v31  ;;  %v1295_v38 = vpop.f32.mrb[22].mxu0  ;;  %v1343_v39 = vpop.f32.mrb[22].mxu1 }
 0x163   : > { %v1296_v40 = vpop.f32.mrb[23].mxu0  ;;  %v1344_v41 = vpop.f32.mrb[23].mxu1 }
 0x164   : > { %1234 = vst [vmem:[%s1745_s4 + $0x20] sm:$0xff] %v1174_v34   ;;  %1242 = vst [vmem:[%s1745_s4 + $0x60] sm:$0xff] %v1214_v35   ;;  %v642_v42 = vadd.f32 %v1294_v36, %v1735_v50  ;;  %v706_v43 = vadd.f32 %v1342_v37, %v1735_v50  ;;  %v1297_v44 = vadd.f32 %v1296_v40, %v1295_v38 }
 0x165   : > { %v1345_v45 = vadd.f32 %v1344_v41, %v1343_v39 }
 0x166   : > { %v645_v46 = vadd.f32 %v1297_v44, %v1735_v50  ;;  %v738_v48 = vmax.f32 %v642_v42, 0.0  ;;  %v754_v49 = vmax.f32 %v706_v43, 0.0 }
 0x167   : > { %v709_v47 = vadd.f32 %v1345_v45, %v1735_v50 }
 0x168   : > { %v739_v51 = vmax.f32 %v645_v46, 0.0  ;;  %v1298_v53 = vpop.f32.mrb[24].mxu0  ;;  %v1346_v54 = vpop.f32.mrb[24].mxu1 }
 0x169   : > { %v755_v52 = vmax.f32 %v709_v47, 0.0  ;;  %v1299_v55 = vpop.f32.mrb[25].mxu0  ;;  %v1347_v56 = vpop.f32.mrb[25].mxu1 }
 0x16a   : > { %v1179_v57 = vpack.c.bf16 %v739_v51, %v738_v48  ;;  %v1300_v59 = vadd.f32 %v1299_v55, %v1298_v53  ;;  %v1348_v60 = vadd.f32 %v1347_v56, %v1346_v54  ;;  %v1301_v61 = vpop.f32.mrb[26].mxu0  ;;  %v1349_v62 = vpop.f32.mrb[26].mxu1 }
 0x16b   : > { %v1219_v58 = vpack.c.bf16 %v755_v52, %v754_v49  ;;  %v1302_v63 = vpop.f32.mrb[27].mxu0  ;;  %v1350_v0 = vpop.f32.mrb[27].mxu1 }
 0x16c   : > { %1235 = vst [vmem:[%s1745_s4 + $0x28] sm:$0xff] %v1179_v57   ;;  %v650_v1 = vadd.f32 %v1300_v59, %v1735_v50  ;;  %v714_v2 = vadd.f32 %v1348_v60, %v1735_v50  ;;  %v1303_v3 = vadd.f32 %v1302_v63, %v1301_v61  ;;  %v1351_v4 = vadd.f32 %v1350_v0, %v1349_v62 }
 0x16d   : > { %1243 = vst [vmem:[%s1745_s4 + $0x68] sm:$0xff] %v1219_v58  }
 0x16e   : > { %v653_v5 = vadd.f32 %v1303_v3, %v1735_v50  ;;  %v717_v6 = vadd.f32 %v1351_v4, %v1735_v50  ;;  %v740_v7 = vmax.f32 %v650_v1, 0.0  ;;  %v756_v8 = vmax.f32 %v714_v2, 0.0 }
 0x170   : > { %v741_v9 = vmax.f32 %v653_v5, 0.0  ;;  %v757_v10 = vmax.f32 %v717_v6, 0.0  ;;  %v1304_v11 = vpop.f32.mrb[28].mxu0  ;;  %v1352_v12 = vpop.f32.mrb[28].mxu1 }
 0x171   : > { %v1305_v13 = vpop.f32.mrb[29].mxu0  ;;  %v1353_v14 = vpop.f32.mrb[29].mxu1 }
 0x172   : > { %v1184_v15 = vpack.c.bf16 %v741_v9, %v740_v7  ;;  %v1224_v16 = vpack.c.bf16 %v757_v10, %v756_v8  ;;  %v1306_v17 = vadd.f32 %v1305_v13, %v1304_v11  ;;  %v1354_v18 = vadd.f32 %v1353_v14, %v1352_v12  ;;  %v1307_v19 = vpop.f32.mrb[30].mxu0  ;;  %v1355_v20 = vpop.f32.mrb[30].mxu1 }
 0x173   : > { %v1308_v21 = vpop.f32.mrb[31].mxu0  ;;  %v1356_v22 = vpop.f32.mrb[31].mxu1 }
 0x174   : > { %1236 = vst [vmem:[%s1745_s4 + $0x30] sm:$0xff] %v1184_v15   ;;  %1244 = vst [vmem:[%s1745_s4 + $0x70] sm:$0xff] %v1224_v16   ;;  %v658_v23 = vadd.f32 %v1306_v17, %v1735_v50  ;;  %v722_v24 = vadd.f32 %v1354_v18, %v1735_v50  ;;  %v1309_v25 = vadd.f32 %v1308_v21, %v1307_v19 }
 0x175   : > { %v1357_v26 = vadd.f32 %v1356_v22, %v1355_v20 }
 0x176   : > { %v661_v27 = vadd.f32 %v1309_v25, %v1735_v50  ;;  %v742_v29 = vmax.f32 %v658_v23, 0.0  ;;  %v758_v30 = vmax.f32 %v722_v24, 0.0 }
 0x177   : > { %v725_v28 = vadd.f32 %v1357_v26, %v1735_v50 }
 0x178   : > { %v743_v31 = vmax.f32 %v661_v27, 0.0 }
 0x179   : > { %v759_v32 = vmax.f32 %v725_v28, 0.0 }
 0x17a   : > { %v1189_v33 = vpack.c.bf16 %v743_v31, %v742_v29 }
 0x17b   : > { %v1229_v34 = vpack.c.bf16 %v759_v32, %v758_v30 }
 0x17c   : > { %1237 = vst [vmem:[%s1745_s4 + $0x38] sm:$0xff] %v1189_v33  }
 0x17d   : > { %1245 = vst [vmem:[%s1745_s4 + $0x78] sm:$0xff] %v1229_v34  }
 0x17e PF: > { %s15_s14 = sadd.s32 1, %s1571_s14   ;;  %s1812_s12 = smov %s1567_s13 }
 0x17f   : > { %p12_p3 = scmp.ge.s32.totalorder %s15_s14, 4   ;;  %s1813_s13 = smov %s1815_s16 }
 0x181   :  { %14 = sbr.rel (!%p12_p3) target bundleno = 3 (0x3), region = 73 }
 0x188   :  { %948 = vsyncpa [#allocation3], 1 }
 0x189   :  { %950 = vsyncpa [#allocation3 + $0x1], 1 }
 0x18a   :  { %951 = vsyncpa [#allocation5], 1 }

// kernel: deeplab_forward.4
= control target key start
LH: loop header
LB: loop body
LE: loop exit
PB: predicated region body
PF: predicated region fallthrough
CT: control target
= control target key end

     0   :  { %s3928_s30 = smov 0   ;;  %s3930_s10 = smov 0   ;;  %s4553_s0 = inlined_call_operand.vmem [shape: bf16[128,128], index: 0, kind: input, shape index: {}]   ;;  %s4554_s1 = inlined_call_operand.vmem [shape: bf16[128,256], index: 1, kind: input, shape index: {}]   ;;  %s4555_s2 = inlined_call_operand.vmem [shape: f32[1,256], index: 2, kind: input, shape index: {}]   ;;  %s4556_s3 = inlined_call_operand.vmem [shape: bf16[256,256], index: 3, kind: input, shape index: {}]   ;;  %s4557_s4 = inlined_call_operand.vmem [shape: bf16[3,128,640], index: 4, kind: input, shape index: {}]   ;;  %s4558_s5 = inlined_call_operand.vmem [shape: bf16[3,640,256], index: 5, kind: input, shape index: {}]   ;;  %s4559_s6 = inlined_call_operand.vmem [shape: f32[3,1,256], index: 6, kind: input, shape index: {}]   ;;  %s4560_s7 = inlined_call_operand.vmem [shape: bf16[3,256,256], index: 7, kind: input, shape index: {}]   ;;  %s4561_s8 = inlined_call_operand.vmem [shape: f32[1,256], index: 8, kind: input, shape index: {}]   ;;  %s4562_s9 = inlined_call_operand.vmem [shape: bf16[128,256], index: 9, kind: output, shape index: {}]  }
   0x1   :  { %s3932_s11 = smov 0  }
   0x2 LB: > { %s31_s12 = sadd.s32 1, %s3870_s10  ;;  %p3139_p0 = scmp.ge.s32.totalorder %s3874_s11, 1  ;;  %s3874_s11 = sphi %s3932_s11, %s19_s11   ;;  %s3870_s10 = sphi %s3930_s10, %s4564_s10   ;;  %s3866_s30 = sphi %s3928_s30, %s4563_s30  }
   0x3   : > { %p32_p1 = scmp.ge.s32.totalorder %s31_s12, 3  ;;  %p384_p2 = scmp.lt.s32.totalorder %s3874_s11, 4 }
   0x5   : > { %s4566_s12 = smov (%p32_p1, %s31_s12), 0  ;;  %p385_p3 = pnand %p3139_p0, %p384_p2 }
   0x6   : > { %p475_p4 = scmp.lt.s32.totalorder (!%p385_p3), %s3866_s30, 2  ;;  %p3145_p5 = scmp.ne.s32.totalorder (!%p385_p3), %s3866_s30, 0 }
   0x7   : > { %388 = sbr.rel (%p385_p3) target bundleno = 1181 (0x49d), region = 56 }
   0xe   : > { %s476_s13 = scalar_select %p475_p4, %s3866_s30, 2 }
   0xf   : > { %525 = sbr.rel (%p3145_p5) target bundleno = 542 (0x21e), region = 60  ;;  %v3548_v0 = vld [vmem:[%s4554_s1 + $0x4] ss:$8 sps:$4 sm:$0xff] (!%p3145_p5)   ;;  %v3550_v1 = vld [vmem:[%s4554_s1] ss:$8 sps:$4 sm:$0xff] (!%p3145_p5)   ;;  %v3876_v2 = vmov (!%p3145_p5), 0   ;;  %v560_v57 = vlaneseq (!%p3145_p5) }
  0x10   : > { %s3520_s14 = smul.u32 320, %s476_s13  ;;  %s3142_s15 = sshll.u32 %s476_s13, 1  ;;  %730 = vmatprep.mubr.bf16.mxu0 (!%p3145_p5), %v3876_v2  ;;  %698 = vmatprep.subr.bf16.mxu0 (!%p3145_p5), %v3548_v0  ;;  %v3551_v3 = vld [vmem:[%s4554_s1 + $0x14] ss:$8 sps:$4 sm:$0xff] (!%p3145_p5)   ;;  %v3553_v4 = vld [vmem:[%s4554_s1 + $0x10] ss:$8 sps:$4 sm:$0xff] (!%p3145_p5)  }
  0x11   : > { %s3521_s16 = smul.u32 640, %s476_s13  ;;  %s3953_s19 = scalar_lea.vmem %s4559_s6, %s3142_s15  ;;  %699 = vmatpush1.bf16.msra.mxu0 (!%p3145_p5), %v3550_v1  ;;  %v3554_v5 = vld [vmem:[%s4554_s1 + $0x24] ss:$8 sps:$4 sm:$0xff] (!%p3145_p5)   ;;  %v3556_v6 = vld [vmem:[%s4554_s1 + $0x20] ss:$8 sps:$4 sm:$0xff] (!%p3145_p5)   ;;  %v3574_v34 = vld [vmem:[%s4553_s0 + $0x10] sm:$0xff] (!%p3145_p5)  }
  0x12   : > { %s3958_s22 = scalar_lea.vmem %s4557_s4, %s3520_s14  ;;  %s3375_s23 = sshll.u32 %s476_s13, 8  ;;  %700 = vmatprep.subr.bf16.mxu0 (!%p3145_p5), %v3551_v3  ;;  %v3557_v7 = vld [vmem:[%s4554_s1 + $0x34] ss:$8 sps:$4 sm:$0xff] (!%p3145_p5)   ;;  %v3559_v8 = vld [vmem:[%s4554_s1 + $0x30] ss:$8 sps:$4 sm:$0xff] (!%p3145_p5)   ;;  %v3572_v24 = vld [vmem:[%s4553_s0] sm:$0xff] (!%p3145_p5)  }
  0x13   : > { %s3963_s26 = scalar_lea.vmem %s4558_s5, %s3521_s16  ;;  %s3968_s29 = scalar_lea.vmem %s4560_s7, %s3375_s23  ;;  %v3560_v9 = vld [vmem:[%s4554_s1 + $0x44] ss:$8 sps:$4 sm:$0xff] (!%p3145_p5)   ;;  %v3562_v10 = vld [vmem:[%s4554_s1 + $0x40] ss:$8 sps:$4 sm:$0xff] (!%p3145_p5)   ;;  %v3563_v11 = vld [vmem:[%s4554_s1 + $0x54] ss:$8 sps:$4 sm:$0xff] (!%p3145_p5)  }
  0x14   : > { %v3565_v12 = vld [vmem:[%s4554_s1 + $0x50] ss:$8 sps:$4 sm:$0xff] (!%p3145_p5)   ;;  %v3566_v13 = vld [vmem:[%s4554_s1 + $0x64] ss:$8 sps:$4 sm:$0xff] (!%p3145_p5)   ;;  %v3580_v15 = vld [vmem:[%s4556_s3] ss:$8 sps:$4 sm:$0xff] (!%p3145_p5)  }
  0x15   : > { %701 = vmatpush1.bf16.msra.mxu0 (!%p3145_p5), %v3553_v4  ;;  %v3582_v14 = vld [vmem:[%s4556_s3 + $0x4] ss:$8 sps:$4 sm:$0xff] (!%p3145_p5)   ;;  %v3585_v16 = vld [vmem:[%s4556_s3 + $0x14] ss:$8 sps:$4 sm:$0xff] (!%p3145_p5)   ;;  %v3568_v17 = vld [vmem:[%s4554_s1 + $0x60] ss:$8 sps:$4 sm:$0xff] (!%p3145_p5)  }
  0x16   : > { %702 = vmatprep.subr.bf16.mxu0 %v3554_v5  ;;  %3392 = vmatprep.subr.bf16.mxu1 %v3582_v14  ;;  %v3569_v18 = vld [vmem:[%s4554_s1 + $0x74] ss:$8 sps:$4 sm:$0xff]   ;;  %v3583_v19 = vld [vmem:[%s4556_s3 + $0x10] ss:$8 sps:$4 sm:$0xff]   ;;  %v3588_v20 = vld [vmem:[%s4556_s3 + $0x24] ss:$8 sps:$4 sm:$0xff]  }
  0x17   : > { %3408 = vmatpush1.bf16.msra.mxu1 %v3580_v15  ;;  %v3571_v21 = vld [vmem:[%s4554_s1 + $0x70] ss:$8 sps:$4 sm:$0xff]   ;;  %v3586_v22 = vld [vmem:[%s4556_s3 + $0x20] ss:$8 sps:$4 sm:$0xff]   ;;  %v3591_v23 = vld [vmem:[%s4556_s3 + $0x34] ss:$8 sps:$4 sm:$0xff]  }
  0x18   : > { %3393 = vmatprep.subr.bf16.mxu1 %v3585_v16  ;;  %v3589_v25 = vld [vmem:[%s4556_s3 + $0x30] ss:$8 sps:$4 sm:$0xff]   ;;  %v3594_v26 = vld [vmem:[%s4556_s3 + $0x44] ss:$8 sps:$4 sm:$0xff]   ;;  %v3592_v27 = vld [vmem:[%s4556_s3 + $0x40] ss:$8 sps:$4 sm:$0xff]  }
  0x19   : > { %703 = vmatpush1.bf16.msra.mxu0 %v3556_v6  ;;  %v3573_v28 = vld [vmem:[%s4553_s0 + $0x8] sm:$0xff]   ;;  %v3597_v29 = vld [vmem:[%s4556_s3 + $0x54] ss:$8 sps:$4 sm:$0xff]   ;;  %v3595_v30 = vld [vmem:[%s4556_s3 + $0x50] ss:$8 sps:$4 sm:$0xff]   ;;  %v561_v58 = vshrl.u32 %v560_v57, 7 }
  0x1a   : > { %704 = vmatprep.subr.bf16.mxu0 %v3557_v7  ;;  %v3600_v31 = vld [vmem:[%s4556_s3 + $0x64] ss:$8 sps:$4 sm:$0xff]   ;;  %v3598_v32 = vld [vmem:[%s4556_s3 + $0x60] ss:$8 sps:$4 sm:$0xff]   ;;  %v3603_v33 = vld [vmem:[%s4556_s3 + $0x74] ss:$8 sps:$4 sm:$0xff]  }
  0x1b   : > { %3409 = vmatpush1.bf16.msra.mxu1 %v3583_v19  ;;  %v3601_v35 = vld [vmem:[%s4556_s3 + $0x70] ss:$8 sps:$4 sm:$0xff]   ;;  %v3606_v36 = vld [vmem:[%s4556_s3 + $0x84] ss:$8 sps:$4 sm:$0xff]   ;;  %v3604_v37 = vld [vmem:[%s4556_s3 + $0x80] ss:$8 sps:$4 sm:$0xff]  }
  0x1c   : > { %3394 = vmatprep.subr.bf16.mxu1 %v3588_v20  ;;  %v3609_v38 = vld [vmem:[%s4556_s3 + $0x94] ss:$8 sps:$4 sm:$0xff]   ;;  %v3607_v40 = vld [vmem:[%s4556_s3 + $0x90] ss:$8 sps:$4 sm:$0xff]   ;;  %v3612_v41 = vld [vmem:[%s4556_s3 + $0xa4] ss:$8 sps:$4 sm:$0xff]  }
  0x1d   : > { %705 = vmatpush1.bf16.msra.mxu0 %v3559_v8  ;;  %v3575_v39 = vld [vmem:[%s4553_s0 + $0x18] sm:$0xff]   ;;  %v3610_v42 = vld [vmem:[%s4556_s3 + $0xa0] ss:$8 sps:$4 sm:$0xff]   ;;  %v3618_v46 = vld [vmem:[%s4556_s3 + $0xc4] ss:$8 sps:$4 sm:$0xff]   ;;  %v562_v59 = vsub.s32 0, %v561_v58 }
  0x1e   : > { %706 = vmatprep.subr.bf16.mxu0 %v3560_v9  ;;  %v3615_v43 = vld [vmem:[%s4556_s3 + $0xb4] ss:$8 sps:$4 sm:$0xff]   ;;  %v3576_v44 = vld [vmem:[%s4553_s0 + $0x20] sm:$0xff]   ;;  %v3613_v45 = vld [vmem:[%s4556_s3 + $0xb0] ss:$8 sps:$4 sm:$0xff]   ;;  %v566_v61 = vsub.s32 1, %v561_v58 }
  0x1f   : > { %3410 = vmatpush1.bf16.msra.mxu1 %v3586_v22  ;;  %v3616_v47 = vld [vmem:[%s4556_s3 + $0xc0] ss:$8 sps:$4 sm:$0xff]   ;;  %v3621_v48 = vld [vmem:[%s4556_s3 + $0xd4] ss:$8 sps:$4 sm:$0xff]   ;;  %v3619_v50 = vld [vmem:[%s4556_s3 + $0xd0] ss:$8 sps:$4 sm:$0xff]  }
  0x20   : > { %3395 = vmatprep.subr.bf16.mxu1 %v3591_v23  ;;  %v3577_v49 = vld [vmem:[%s4553_s0 + $0x28] sm:$0xff]   ;;  %v3578_v51 = vld [vmem:[%s4553_s0 + $0x30] sm:$0xff]   ;;  %v3579_v52 = vld [vmem:[%s4553_s0 + $0x38] sm:$0xff]  }
  0x21   : > { %707 = vmatpush1.bf16.msra.mxu0 %v3562_v10  ;;  %v3624_v53 = vld [vmem:[%s4556_s3 + $0xe4] ss:$8 sps:$4 sm:$0xff]   ;;  %v3622_v54 = vld [vmem:[%s4556_s3 + $0xe0] ss:$8 sps:$4 sm:$0xff]   ;;  %v3627_v55 = vld [vmem:[%s4556_s3 + $0xf4] ss:$8 sps:$4 sm:$0xff]  }
  0x22   : > { %708 = vmatprep.subr.bf16.mxu0 %v3563_v11  ;;  %v3625_v56 = vld [vmem:[%s4556_s3 + $0xf0] ss:$8 sps:$4 sm:$0xff]   ;;  %v558_v60 = vld [vmem:[%s4555_s2] sm:$0x3] }
  0x23   : > { %3411 = vmatpush1.bf16.msra.mxu1 %v3589_v25  ;;  %v4150_v62 = vrot.slane %v558_v60, %v562_v59  ;;  %v4152_v63 = vrot.slane %v558_v60, %v566_v61 }
  0x24   : > { %3396 = vmatprep.subr.bf16.mxu1 %v3594_v26 }
  0x25   : > { %709 = vmatpush1.bf16.msra.mxu0 %v3565_v12 }
  0x26   : > { %710 = vmatprep.subr.bf16.mxu0 %v3566_v13 }
  0x27   : > { %3412 = vmatpush1.bf16.msra.mxu1 %v3592_v27 }
  0x28   : > { %3397 = vmatprep.subr.bf16.mxu1 %v3597_v29 }
  0x29   : > { %711 = vmatpush1.bf16.msra.mxu0 %v3568_v17 }
  0x2a   : > { %712 = vmatprep.subr.bf16.mxu0 %v3569_v18 }
  0x2b   : > { %3413 = vmatpush1.bf16.msra.mxu1 %v3595_v30 }
  0x2c   : > { %3398 = vmatprep.subr.bf16.mxu1 %v3600_v31 }
  0x2d   : > { %713 = vmatpush1.bf16.msra.mxu0 %v3571_v21 }
  0x2e   : > { %1051 = vmatprep.subr.bf16.mxu0 %v3582_v14 }
  0x2f   : > { %3414 = vmatpush1.bf16.msra.mxu1 %v3598_v32 }
  0x30   : > { %731 = vmatmul.mubr.bf16.vlgmr.msra.gmra.mrb[0].mxu0 %v3572_v24  ;;  %3399 = vmatprep.subr.bf16.mxu1 %v3603_v33 }
  0x31   : > { %740 = vmatprep.mubr.bf16.mxu0 %v3876_v2  ;;  %1052 = vmatpush1.bf16.msra.mxu0 %v3580_v15 }
  0x32   : > { %1053 = vmatprep.subr.bf16.mxu0 %v3585_v16 }
  0x33   : > { %3415 = vmatpush1.bf16.msra.mxu1 %v3601_v35 }
  0x34   : > { %3400 = vmatprep.subr.bf16.mxu1 %v3606_v36 }
  0x35   : > { %1054 = vmatpush1.bf16.msra.mxu0 %v3583_v19 }
  0x36   : > { %1055 = vmatprep.subr.bf16.mxu0 %v3588_v20 }
  0x37   : > { %3416 = vmatpush1.bf16.msra.mxu1 %v3604_v37 }
  0x38   : > { %741 = vmatmul.mubr.bf16.gmra.mrb[4].mxu0 %v3573_v28  ;;  %3401 = vmatprep.subr.bf16.mxu1 %v3609_v38 }
  0x39   : > { %750 = vmatprep.mubr.bf16.mxu0 %v3876_v2  ;;  %1056 = vmatpush1.bf16.msra.mxu0 %v3586_v22 }
  0x3a   : > { %1057 = vmatprep.subr.bf16.mxu0 %v3591_v23 }
  0x3b   : > { %3417 = vmatpush1.bf16.msra.mxu1 %v3607_v40 }
  0x3c   : > { %3402 = vmatprep.subr.bf16.mxu1 %v3612_v41 }
  0x3d   : > { %1058 = vmatpush1.bf16.msra.mxu0 %v3589_v25 }
  0x3e   : > { %1059 = vmatprep.subr.bf16.mxu0 %v3594_v26 }
  0x3f   : > { %3418 = vmatpush1.bf16.msra.mxu1 %v3610_v42 }
  0x40   : > { %751 = vmatmul.mubr.bf16.gmra.mrb[8].mxu0 %v3574_v34  ;;  %3403 = vmatprep.subr.bf16.mxu1 %v3615_v43 }
  0x41   : > { %760 = vmatprep.mubr.bf16.mxu0 %v3876_v2  ;;  %1060 = vmatpush1.bf16.msra.mxu0 %v3592_v27 }
  0x42   : > { %1061 = vmatprep.subr.bf16.mxu0 %v3597_v29 }
  0x43   : > { %3419 = vmatpush1.bf16.msra.mxu1 %v3613_v45 }
  0x44   : > { %3404 = vmatprep.subr.bf16.mxu1 %v3618_v46 }
  0x45   : > { %1062 = vmatpush1.bf16.msra.mxu0 %v3595_v30 }
  0x46   : > { %1063 = vmatprep.subr.bf16.mxu0 %v3600_v31 }
  0x47   : > { %3420 = vmatpush1.bf16.msra.mxu1 %v3616_v47 }
  0x48   : > { %761 = vmatmul.mubr.bf16.gmra.mrb[12].mxu0 %v3575_v39  ;;  %3405 = vmatprep.subr.bf16.mxu1 %v3621_v48 }
  0x49   : > { %770 = vmatprep.mubr.bf16.mxu0 %v3876_v2  ;;  %1064 = vmatpush1.bf16.msra.mxu0 %v3598_v32 }
  0x4a   : > { %1065 = vmatprep.subr.bf16.mxu0 %v3603_v33 }
  0x4b   : > { %3421 = vmatpush1.bf16.msra.mxu1 %v3619_v50 }
  0x4c   : > { %3406 = vmatprep.subr.bf16.mxu1 %v3624_v53 }
  0x4d   : > { %1066 = vmatpush1.bf16.msra.mxu0 %v3601_v35 }
  0x4e   : > { %1067 = vmatprep.subr.bf16.mxu0 %v3606_v36 }
  0x4f   : > { %3422 = vmatpush1.bf16.msra.mxu1 %v3622_v54 }
  0x50   : > { %771 = vmatmul.mubr.bf16.gmra.mrb[16].mxu0 %v3576_v44  ;;  %3407 = vmatprep.subr.bf16.mxu1 %v3627_v55 }
  0x51   : > { %780 = vmatprep.mubr.bf16.mxu0 %v3876_v2  ;;  %1068 = vmatpush1.bf16.msra.mxu0 %v3604_v37 }
  0x52   : > { %1069 = vmatprep.subr.bf16.mxu0 %v3609_v38 }
  0x53   : > { %3423 = vmatpush1.bf16.msra.mxu1 %v3625_v56 }
  0x55   : > { %1070 = vmatpush1.bf16.msra.mxu0 %v3607_v40 }
  0x56   : > { %1071 = vmatprep.subr.bf16.mxu0 %v3612_v41 }
  0x58   : > { %781 = vmatmul.mubr.bf16.gmra.mrb[20].mxu0 %v3577_v49 }
  0x59   : > { %790 = vmatprep.mubr.bf16.mxu0 %v3876_v2  ;;  %1072 = vmatpush1.bf16.msra.mxu0 %v3610_v42 }
  0x5a   : > { %1073 = vmatprep.subr.bf16.mxu0 %v3615_v43 }
  0x5d   : > { %1074 = vmatpush1.bf16.msra.mxu0 %v3613_v45 }
  0x5e   : > { %1075 = vmatprep.subr.bf16.mxu0 %v3618_v46 }
  0x60   : > { %791 = vmatmul.mubr.bf16.gmra.mrb[24].mxu0 %v3578_v51 }
  0x61   : > { %800 = vmatprep.mubr.bf16.mxu0 %v3876_v2  ;;  %1076 = vmatpush1.bf16.msra.mxu0 %v3616_v47 }
  0x62   : > { %1077 = vmatprep.subr.bf16.mxu0 %v3621_v48 }
  0x65   : > { %1078 = vmatpush1.bf16.msra.mxu0 %v3619_v50 }
  0x66   : > { %1079 = vmatprep.subr.bf16.mxu0 %v3624_v53 }
  0x68   : > { %801 = vmatmul.mubr.bf16.gmra.mrb[28].mxu0 %v3579_v52 }
  0x69   : > { %1080 = vmatpush1.bf16.msra.mxu0 %v3622_v54 }
  0x6a   : > { %1081 = vmatprep.subr.bf16.mxu0 %v3627_v55 }
  0x6d   : > { %1082 = vmatpush1.bf16.msra.mxu0 %v3625_v56 }
 0x103   : > { %v732_v0 = vpop.f32.mrb[0].mxu0 }
 0x104   : > { %v733_v1 = vadd.f32 %v732_v0, %v4150_v62  ;;  %v734_v2 = vpop.f32.mrb[1].mxu0 }
 0x105   : > { %v735_v3 = vadd.f32 %v734_v2, %v4152_v63  ;;  %v736_v4 = vpop.f32.mrb[2].mxu0 }
 0x106   : > { %v737_v5 = vadd.f32 %v736_v4, %v4150_v62  ;;  %v738_v6 = vpop.f32.mrb[3].mxu0  ;;  %v811_v8 = vmax.f32 %v733_v1, 0.0 }
 0x107   : > { %v739_v7 = vadd.f32 %v738_v6, %v4152_v63  ;;  %v812_v10 = vmax.f32 %v735_v3, 0.0 }
 0x108   : > { %v813_v9 = vmax.f32 %v737_v5, 0.0 }
 0x109   : > { %v814_v11 = vmax.f32 %v739_v7, 0.0 }
 0x10a   : > { %v843_v12 = vpack.c.bf16 %v813_v9, %v811_v8 }
 0x10b   : > { %v844_v13 = vpack.c.bf16 %v814_v11, %v812_v10  ;;  %v742_v14 = vpop.f32.mrb[4].mxu0 }
 0x10c   : > { %v743_v15 = vadd.f32 %v742_v14, %v4150_v62  ;;  %v744_v16 = vpop.f32.mrb[5].mxu0 }
 0x10d   : > { %v745_v17 = vadd.f32 %v744_v16, %v4152_v63  ;;  %v746_v18 = vpop.f32.mrb[6].mxu0  ;;  %1083 = vmatprep.mubr.bf16.mxu0 %v844_v13 }
 0x10e   : > { %v747_v19 = vadd.f32 %v746_v18, %v4150_v62  ;;  %v748_v20 = vpop.f32.mrb[7].mxu0  ;;  %1084 = vmatmul.mubr.bf16.vlgmr.msra.gmra.mrb[32].mxu0 %v843_v12  ;;  %v815_v22 = vmax.f32 %v743_v15, 0.0 }
 0x10f   : > { %v749_v21 = vadd.f32 %v748_v20, %v4152_v63  ;;  %v816_v24 = vmax.f32 %v745_v17, 0.0 }
 0x110   : > { %v817_v23 = vmax.f32 %v747_v19, 0.0 }
 0x111   : > { %v818_v25 = vmax.f32 %v749_v21, 0.0 }
 0x112   : > { %v845_v26 = vpack.c.bf16 %v817_v23, %v815_v22 }
 0x113   : > { %v846_v27 = vpack.c.bf16 %v818_v25, %v816_v24  ;;  %v752_v28 = vpop.f32.mrb[8].mxu0 }
 0x114   : > { %v753_v29 = vadd.f32 %v752_v28, %v4150_v62  ;;  %v754_v30 = vpop.f32.mrb[9].mxu0 }
 0x115   : > { %v755_v31 = vadd.f32 %v754_v30, %v4152_v63  ;;  %v756_v32 = vpop.f32.mrb[10].mxu0  ;;  %1093 = vmatprep.mubr.bf16.mxu0 %v846_v27 }
 0x116   : > { %v757_v33 = vadd.f32 %v756_v32, %v4150_v62  ;;  %v758_v34 = vpop.f32.mrb[11].mxu0  ;;  %1094 = vmatmul.mubr.bf16.gmra.mrb[36].mxu0 %v845_v26  ;;  %v819_v36 = vmax.f32 %v753_v29, 0.0 }
 0x117   : > { %v759_v35 = vadd.f32 %v758_v34, %v4152_v63  ;;  %v820_v38 = vmax.f32 %v755_v31, 0.0 }
 0x118   : > { %v821_v37 = vmax.f32 %v757_v33, 0.0 }
 0x119   : > { %v822_v39 = vmax.f32 %v759_v35, 0.0 }
 0x11a   : > { %v847_v40 = vpack.c.bf16 %v821_v37, %v819_v36 }
 0x11b   : > { %v762_v41 = vpop.f32.mrb[12].mxu0  ;;  %v848_v42 = vpack.c.bf16 %v822_v39, %v820_v38 }
 0x11c   : > { %v763_v43 = vadd.f32 %v762_v41, %v4150_v62  ;;  %v764_v44 = vpop.f32.mrb[13].mxu0 }
 0x11d   : > { %v765_v45 = vadd.f32 %v764_v44, %v4152_v63  ;;  %v766_v46 = vpop.f32.mrb[14].mxu0  ;;  %1103 = vmatprep.mubr.bf16.mxu1 %v848_v42 }
 0x11e   : > { %v767_v47 = vadd.f32 %v766_v46, %v4150_v62  ;;  %v768_v48 = vpop.f32.mrb[15].mxu0  ;;  %1104 = vmatmul.mubr.bf16.vlgmr.msra.gmra.mrb[0].mxu1 %v847_v40  ;;  %v823_v50 = vmax.f32 %v763_v43, 0.0 }
 0x11f   : > { %v769_v49 = vadd.f32 %v768_v48, %v4152_v63  ;;  %v824_v52 = vmax.f32 %v765_v45, 0.0 }
 0x120   : > { %v825_v51 = vmax.f32 %v767_v47, 0.0 }
 0x121   : > { %v826_v53 = vmax.f32 %v769_v49, 0.0 }
 0x122   : > { %v849_v54 = vpack.c.bf16 %v825_v51, %v823_v50 }
 0x123   : > { %v850_v55 = vpack.c.bf16 %v826_v53, %v824_v52  ;;  %v772_v56 = vpop.f32.mrb[16].mxu0 }
 0x124   : > { %v773_v57 = vadd.f32 %v772_v56, %v4150_v62  ;;  %v774_v58 = vpop.f32.mrb[17].mxu0 }
 0x125   : > { %v775_v59 = vadd.f32 %v774_v58, %v4152_v63  ;;  %v776_v60 = vpop.f32.mrb[18].mxu0  ;;  %1113 = vmatprep.mubr.bf16.mxu1 %v850_v55 }
 0x126   : > { %v777_v61 = vadd.f32 %v776_v60, %v4150_v62  ;;  %v778_v0 = vpop.f32.mrb[19].mxu0  ;;  %1114 = vmatmul.mubr.bf16.gmra.mrb[4].mxu1 %v849_v54  ;;  %v827_v2 = vmax.f32 %v773_v57, 0.0 }
 0x127   : > { %v779_v1 = vadd.f32 %v778_v0, %v4152_v63  ;;  %v828_v4 = vmax.f32 %v775_v59, 0.0 }
 0x128   : > { %v829_v3 = vmax.f32 %v777_v61, 0.0 }
 0x129   : > { %v830_v5 = vmax.f32 %v779_v1, 0.0 }
 0x12a   : > { %v851_v6 = vpack.c.bf16 %v829_v3, %v827_v2 }
 0x12b   : > { %v852_v7 = vpack.c.bf16 %v830_v5, %v828_v4  ;;  %v782_v8 = vpop.f32.mrb[20].mxu0 }
 0x12c   : > { %v783_v9 = vadd.f32 %v782_v8, %v4150_v62  ;;  %v784_v10 = vpop.f32.mrb[21].mxu0 }
 0x12d   : > { %v785_v11 = vadd.f32 %v784_v10, %v4152_v63  ;;  %v786_v12 = vpop.f32.mrb[22].mxu0  ;;  %1123 = vmatprep.mubr.bf16.mxu1 %v852_v7 }
 0x12e   : > { %v787_v13 = vadd.f32 %v786_v12, %v4150_v62  ;;  %v788_v14 = vpop.f32.mrb[23].mxu0  ;;  %1124 = vmatmul.mubr.bf16.gmra.mrb[8].mxu1 %v851_v6  ;;  %v831_v16 = vmax.f32 %v783_v9, 0.0 }
 0x12f   : > { %v789_v15 = vadd.f32 %v788_v14, %v4152_v63  ;;  %v832_v18 = vmax.f32 %v785_v11, 0.0 }
 0x130   : > { %v833_v17 = vmax.f32 %v787_v13, 0.0 }
 0x131   : > { %v834_v19 = vmax.f32 %v789_v15, 0.0 }
 0x132   : > { %v853_v20 = vpack.c.bf16 %v833_v17, %v831_v16 }
 0x133   : > { %v854_v21 = vpack.c.bf16 %v834_v19, %v832_v18  ;;  %v792_v22 = vpop.f32.mrb[24].mxu0 }
 0x134   : > { %v793_v23 = vadd.f32 %v792_v22, %v4150_v62  ;;  %v794_v24 = vpop.f32.mrb[25].mxu0 }
 0x135   : > { %v795_v25 = vadd.f32 %v794_v24, %v4152_v63  ;;  %v796_v26 = vpop.f32.mrb[26].mxu0  ;;  %1133 = vmatprep.mubr.bf16.mxu1 %v854_v21 }
 0x136   : > { %v797_v27 = vadd.f32 %v796_v26, %v4150_v62  ;;  %v798_v28 = vpop.f32.mrb[27].mxu0  ;;  %1134 = vmatmul.mubr.bf16.gmra.mrb[12].mxu1 %v853_v20  ;;  %v835_v30 = vmax.f32 %v793_v23, 0.0 }
 0x137   : > { %v799_v29 = vadd.f32 %v798_v28, %v4152_v63  ;;  %v836_v32 = vmax.f32 %v795_v25, 0.0 }
 0x138   : > { %v837_v31 = vmax.f32 %v797_v27, 0.0 }
 0x139   : > { %v838_v33 = vmax.f32 %v799_v29, 0.0 }
 0x13a   : > { %v855_v34 = vpack.c.bf16 %v837_v31, %v835_v30 }
 0x13b   : > { %v856_v35 = vpack.c.bf16 %v838_v33, %v836_v32  ;;  %v802_v36 = vpop.f32.mrb[28].mxu0 }
 0x13c   : > { %v803_v37 = vadd.f32 %v802_v36, %v4150_v62  ;;  %v804_v38 = vpop.f32.mrb[29].mxu0 }
 0x13d   : > { %v805_v39 = vadd.f32 %v804_v38, %v4152_v63  ;;  %v806_v40 = vpop.f32.mrb[30].mxu0  ;;  %1143 = vmatprep.mubr.bf16.mxu1 %v856_v35 }
 0x13e   : > { %v807_v41 = vadd.f32 %v806_v40, %v4150_v62  ;;  %v808_v42 = vpop.f32.mrb[31].mxu0  ;;  %1144 = vmatmul.mubr.bf16.gmra.mrb[16].mxu1 %v855_v34  ;;  %v839_v44 = vmax.f32 %v803_v37, 0.0 }
 0x13f   : > { %v809_v43 = vadd.f32 %v808_v42, %v4152_v63  ;;  %v840_v46 = vmax.f32 %v805_v39, 0.0 }
 0x140   : > { %v841_v45 = vmax.f32 %v807_v41, 0.0 }
 0x141   : > { %v842_v47 = vmax.f32 %v809_v43, 0.0 }
 0x142   : > { %v857_v48 = vpack.c.bf16 %v841_v45, %v839_v44 }
 0x143   : > { %v858_v49 = vpack.c.bf16 %v842_v47, %v840_v46 }
 0x145   : > { %1153 = vmatprep.mubr.bf16.mxu1 %v858_v49 }
 0x146   : > { %1154 = vmatmul.mubr.bf16.gmra.mrb[20].mxu1 %v857_v48 }
 0x1e1   : > { %v1085_v50 = vpop.f32.mrb[32].mxu0 }
 0x1e2   : > { %1164 = vst [vmem:[#allocation2] sm:$0xff] %v1085_v50  ;;  %v1087_v51 = vpop.f32.mrb[33].mxu0 }
 0x1e3   : > { %1165 = vst [vmem:[#allocation2 + $0x8] sm:$0xff] %v1087_v51  ;;  %v1089_v52 = vpop.f32.mrb[34].mxu0 }
 0x1e4   : > { %1166 = vst [vmem:[#allocation2 + $0x10] sm:$0xff] %v1089_v52  ;;  %v1091_v53 = vpop.f32.mrb[35].mxu0 }
 0x1e5   : > { %1167 = vst [vmem:[#allocation2 + $0x18] sm:$0xff] %v1091_v53 }
 0x1e9   : > { %v1095_v62 = vpop.f32.mrb[36].mxu0 }
 0x1ea   : > { %1168 = vst [vmem:[#allocation2 + $0x20] sm:$0xff] %v1095_v62  ;;  %v1097_v54 = vpop.f32.mrb[37].mxu0 }
 0x1eb   : > { %1169 = vst [vmem:[#allocation2 + $0x28] sm:$0xff] %v1097_v54  ;;  %v1099_v63 = vpop.f32.mrb[38].mxu0 }
 0x1ec   : > { %1170 = vst [vmem:[#allocation2 + $0x30] sm:$0xff] %v1099_v63  ;;  %v1101_v55 = vpop.f32.mrb[39].mxu0 }
 0x1ed   : > { %1171 = vst [vmem:[#allocation2 + $0x38] sm:$0xff] %v1101_v55 }
 0x1f1   : > { %v1105_v56 = vpop.f32.mrb[0].mxu1 }
 0x1f2   : > { %1172 = vst [vmem:[#allocation2 + $0x40] sm:$0xff] %v1105_v56  ;;  %v1107_v57 = vpop.f32.mrb[1].mxu1 }
 0x1f3   : > { %1173 = vst [vmem:[#allocation2 + $0x48] sm:$0xff] %v1107_v57  ;;  %v1109_v58 = vpop.f32.mrb[2].mxu1 }
 0x1f4   : > { %1174 = vst [vmem:[#allocation2 + $0x50] sm:$0xff] %v1109_v58  ;;  %v1111_v59 = vpop.f32.mrb[3].mxu1 }
 0x1f5   : > { %1175 = vst [vmem:[#allocation2 + $0x58] sm:$0xff] %v1111_v59 }
 0x1f9   : > { %v1115_v60 = vpop.f32.mrb[4].mxu1 }
 0x1fa   : > { %1176 = vst [vmem:[#allocation2 + $0x60] sm:$0xff] %v1115_v60  ;;  %v1117_v61 = vpop.f32.mrb[5].mxu1 }
 0x1fb   : > { %1177 = vst [vmem:[#allocation2 + $0x68] sm:$0xff] %v1117_v61  ;;  %v1119_v0 = vpop.f32.mrb[6].mxu1 }
 0x1fc   : > { %1178 = vst [vmem:[#allocation2 + $0x70] sm:$0xff] %v1119_v0  ;;  %v1121_v1 = vpop.f32.mrb[7].mxu1 }
 0x1fd   : > { %1179 = vst [vmem:[#allocation2 + $0x78] sm:$0xff] %v1121_v1 }
 0x201   : > { %v1125_v2 = vpop.f32.mrb[8].mxu1 }
 0x202   : > { %1180 = vst [vmem:[#allocation2 + $0x80] sm:$0xff] %v1125_v2  ;;  %v1127_v3 = vpop.f32.mrb[9].mxu1 }
 0x203   : > { %1181 = vst [vmem:[#allocation2 + $0x88] sm:$0xff] %v1127_v3  ;;  %v1129_v4 = vpop.f32.mrb[10].mxu1 }
 0x204   : > { %1182 = vst [vmem:[#allocation2 + $0x90] sm:$0xff] %v1129_v4  ;;  %v1131_v5 = vpop.f32.mrb[11].mxu1 }
 0x205   : > { %1183 = vst [vmem:[#allocation2 + $0x98] sm:$0xff] %v1131_v5 }
 0x209   : > { %v1135_v6 = vpop.f32.mrb[12].mxu1 }
 0x20a   : > { %1184 = vst [vmem:[#allocation2 + $0xa0] sm:$0xff] %v1135_v6  ;;  %v1137_v7 = vpop.f32.mrb[13].mxu1 }
 0x20b   : > { %1185 = vst [vmem:[#allocation2 + $0xa8] sm:$0xff] %v1137_v7  ;;  %v1139_v8 = vpop.f32.mrb[14].mxu1 }
 0x20c   : > { %1186 = vst [vmem:[#allocation2 + $0xb0] sm:$0xff] %v1139_v8  ;;  %v1141_v9 = vpop.f32.mrb[15].mxu1 }
 0x20d   : > { %1187 = vst [vmem:[#allocation2 + $0xb8] sm:$0xff] %v1141_v9 }
 0x211   : > { %v1145_v10 = vpop.f32.mrb[16].mxu1 }
 0x212   : > { %1188 = vst [vmem:[#allocation2 + $0xc0] sm:$0xff] %v1145_v10  ;;  %v1147_v11 = vpop.f32.mrb[17].mxu1 }
 0x213   : > { %1189 = vst [vmem:[#allocation2 + $0xc8] sm:$0xff] %v1147_v11  ;;  %v1149_v12 = vpop.f32.mrb[18].mxu1 }
 0x214   : > { %1190 = vst [vmem:[#allocation2 + $0xd0] sm:$0xff] %v1149_v12  ;;  %v1151_v13 = vpop.f32.mrb[19].mxu1 }
 0x215   : > { %1191 = vst [vmem:[#allocation2 + $0xd8] sm:$0xff] %v1151_v13 }
 0x219   : > { %v1155_v14 = vpop.f32.mrb[20].mxu1 }
 0x21a   : > { %1192 = vst [vmem:[#allocation2 + $0xe0] sm:$0xff] %v1155_v14  ;;  %v1157_v15 = vpop.f32.mrb[21].mxu1 }
 0x21b   : > { %1193 = vst [vmem:[#allocation2 + $0xe8] sm:$0xff] %v1157_v15  ;;  %v1159_v16 = vpop.f32.mrb[22].mxu1 }
 0x21c   : > { %1194 = vst [vmem:[#allocation2 + $0xf0] sm:$0xff] %v1159_v16  ;;  %v1161_v17 = vpop.f32.mrb[23].mxu1 }
 0x21d   : > { %1195 = vst [vmem:[#allocation2 + $0xf8] sm:$0xff] %v1161_v17 }
 0x21e PF: > { %v3628_v18 = vld [vmem:[%s3963_s26 + $0x104] ss:$8 sps:$4 sm:$0xff]   ;;  %v3630_v19 = vld [vmem:[%s3963_s26 + $0x100] ss:$8 sps:$4 sm:$0xff]   ;;  %v3631_v20 = vld [vmem:[%s3963_s26 + $0x114] ss:$8 sps:$4 sm:$0xff]  }
 0x21f   : > { %2057 = vmatprep.subr.bf16.mxu0 %v3628_v18  ;;  %v3633_v21 = vld [vmem:[%s3963_s26 + $0x110] ss:$8 sps:$4 sm:$0xff]   ;;  %v3634_v22 = vld [vmem:[%s3963_s26 + $0x124] ss:$8 sps:$4 sm:$0xff]   ;;  %v3636_v23 = vld [vmem:[%s3963_s26 + $0x120] ss:$8 sps:$4 sm:$0xff]  }
 0x220   : > { %2058 = vmatpush1.bf16.msra.mxu0 %v3630_v19  ;;  %v3637_v24 = vld [vmem:[%s3963_s26 + $0x134] ss:$8 sps:$4 sm:$0xff]   ;;  %v3639_v25 = vld [vmem:[%s3963_s26 + $0x130] ss:$8 sps:$4 sm:$0xff]   ;;  %v3640_v26 = vld [vmem:[%s3963_s26 + $0x144] ss:$8 sps:$4 sm:$0xff]  }
 0x221   : > { %2059 = vmatprep.subr.bf16.mxu0 %v3631_v20  ;;  %v3642_v27 = vld [vmem:[%s3963_s26 + $0x140] ss:$8 sps:$4 sm:$0xff]   ;;  %v3643_v28 = vld [vmem:[%s3963_s26 + $0x154] ss:$8 sps:$4 sm:$0xff]   ;;  %v3645_v29 = vld [vmem:[%s3963_s26 + $0x150] ss:$8 sps:$4 sm:$0xff]  }
 0x222   : > { %v3646_v30 = vld [vmem:[%s3963_s26 + $0x164] ss:$8 sps:$4 sm:$0xff]   ;;  %v3648_v32 = vld [vmem:[%s3963_s26 + $0x160] ss:$8 sps:$4 sm:$0xff]   ;;  %v3649_v34 = vld [vmem:[%s3963_s26 + $0x174] ss:$8 sps:$4 sm:$0xff]  }
 0x223   : > { %v3673_v31 = vld [vmem:[%s3963_s26 + $0x4] ss:$8 sps:$4 sm:$0xff]   ;;  %v3677_v33 = vld [vmem:[%s3963_s26] ss:$8 sps:$4 sm:$0xff]   ;;  %v3682_v36 = vld [vmem:[%s3963_s26 + $0x14] ss:$8 sps:$4 sm:$0xff]  }
 0x224   : > { %2060 = vmatpush1.bf16.msra.mxu0 %v3633_v21  ;;  %1944 = vmatprep.subr.bf16.mxu1 %v3673_v31  ;;  %v3681_v35 = vld [vmem:[%s3958_s22 + $0xc] ss:$20 sps:$4 sm:$0xff]   ;;  %v3651_v37 = vld [vmem:[%s3963_s26 + $0x170] ss:$8 sps:$4 sm:$0xff]   ;;  %v3693_v42 = vld [vmem:[%s3963_s26 + $0x34] ss:$8 sps:$4 sm:$0xff]  }
 0x225   : > { %2061 = vmatprep.subr.bf16.mxu0 %v3634_v22  ;;  %1945 = vmatpush1.bf16.msra.mxu1 %v3677_v33  ;;  %v3687_v38 = vld [vmem:[%s3963_s26 + $0x10] ss:$8 sps:$4 sm:$0xff]   ;;  %v3652_v39 = vld [vmem:[%s3963_s26 + $0x184] ss:$8 sps:$4 sm:$0xff]   ;;  %v3690_v41 = vld [vmem:[%s3963_s26 + $0x20] ss:$8 sps:$4 sm:$0xff]  }
 0x226   : > { %2089 = vmatprep.mubr.bf16.mxu0 %v3681_v35  ;;  %1946 = vmatprep.subr.bf16.mxu1 %v3682_v36  ;;  %v3688_v40 = vld [vmem:[%s3963_s26 + $0x24] ss:$8 sps:$4 sm:$0xff]   ;;  %v3654_v43 = vld [vmem:[%s3963_s26 + $0x180] ss:$8 sps:$4 sm:$0xff]   ;;  %v3655_v44 = vld [vmem:[%s3963_s26 + $0x194] ss:$8 sps:$4 sm:$0xff]  }
 0x227   : > { %v3699_v45 = vld [vmem:[%s3963_s26 + $0x30] ss:$8 sps:$4 sm:$0xff]   ;;  %v3700_v46 = vld [vmem:[%s3963_s26 + $0x44] ss:$8 sps:$4 sm:$0xff]   ;;  %v3702_v49 = vld [vmem:[%s3963_s26 + $0x40] ss:$8 sps:$4 sm:$0xff]  }
 0x228   : > { %2062 = vmatpush1.bf16.msra.mxu0 %v3636_v23  ;;  %v3657_v47 = vld [vmem:[%s3963_s26 + $0x190] ss:$8 sps:$4 sm:$0xff]   ;;  %v3658_v48 = vld [vmem:[%s3963_s26 + $0x1a4] ss:$8 sps:$4 sm:$0xff]   ;;  %v3705_v50 = vld [vmem:[%s3963_s26 + $0x54] ss:$8 sps:$4 sm:$0xff]  }
 0x229   : > { %2063 = vmatprep.subr.bf16.mxu0 %v3637_v24  ;;  %1947 = vmatpush1.bf16.msra.mxu1 %v3687_v38  ;;  %v3660_v51 = vld [vmem:[%s3963_s26 + $0x1a0] ss:$8 sps:$4 sm:$0xff]   ;;  %v3661_v52 = vld [vmem:[%s3963_s26 + $0x1b4] ss:$8 sps:$4 sm:$0xff]   ;;  %v3711_v53 = vld [vmem:[%s3963_s26 + $0x50] ss:$8 sps:$4 sm:$0xff]  }
 0x22a   : > { %1948 = vmatprep.subr.bf16.mxu1 %v3688_v40  ;;  %v3712_v62 = vld [vmem:[%s3963_s26 + $0x64] ss:$8 sps:$4 sm:$0xff]   ;;  %v3663_v54 = vld [vmem:[%s3963_s26 + $0x1b0] ss:$8 sps:$4 sm:$0xff]   ;;  %v3714_v55 = vld [vmem:[%s3963_s26 + $0x60] ss:$8 sps:$4 sm:$0xff]  }
 0x22b   : > { %v3664_v63 = vld [vmem:[%s3963_s26 + $0x1c4] ss:$8 sps:$4 sm:$0xff]   ;;  %v3717_v56 = vld [vmem:[%s3963_s26 + $0x74] ss:$8 sps:$4 sm:$0xff]   ;;  %v3666_v57 = vld [vmem:[%s3963_s26 + $0x1c0] ss:$8 sps:$4 sm:$0xff]  }
 0x22c   : > { %2064 = vmatpush1.bf16.msra.mxu0 %v3639_v25  ;;  %v3667_v58 = vld [vmem:[%s3963_s26 + $0x1d4] ss:$8 sps:$4 sm:$0xff]   ;;  %v3723_v59 = vld [vmem:[%s3963_s26 + $0x70] ss:$8 sps:$4 sm:$0xff]   ;;  %v3724_v60 = vld [vmem:[%s3963_s26 + $0x84] ss:$8 sps:$4 sm:$0xff]  }
 0x22d   : > { %2065 = vmatprep.subr.bf16.mxu0 %v3640_v26  ;;  %1949 = vmatpush1.bf16.msra.mxu1 %v3690_v41  ;;  %v3669_v61 = vld [vmem:[%s3963_s26 + $0x1d0] ss:$8 sps:$4 sm:$0xff]   ;;  %v3670_v0 = vld [vmem:[%s3963_s26 + $0x1e4] ss:$8 sps:$4 sm:$0xff]   ;;  %v3726_v1 = vld [vmem:[%s3963_s26 + $0x80] ss:$8 sps:$4 sm:$0xff]  }
 0x22e   : > { %1950 = vmatprep.subr.bf16.mxu1 %v3693_v42  ;;  %v3729_v2 = vld [vmem:[%s3963_s26 + $0x94] ss:$8 sps:$4 sm:$0xff]   ;;  %v3672_v3 = vld [vmem:[%s3963_s26 + $0x1e0] ss:$8 sps:$4 sm:$0xff]   ;;  %v3735_v5 = vld [vmem:[%s3963_s26 + $0x90] ss:$8 sps:$4 sm:$0xff]  }
 0x22f   : > { %v3675_v4 = vld [vmem:[%s3963_s26 + $0x1f4] ss:$8 sps:$4 sm:$0xff]   ;;  %v3736_v6 = vld [vmem:[%s3963_s26 + $0xa4] ss:$8 sps:$4 sm:$0xff]   ;;  %v3678_v7 = vld [vmem:[%s3963_s26 + $0x1f0] ss:$8 sps:$4 sm:$0xff]  }
 0x230   : > { %2066 = vmatpush1.bf16.msra.mxu0 %v3642_v27  ;;  %v3686_v8 = vld [vmem:[%s3963_s26 + $0x204] ss:$8 sps:$4 sm:$0xff]   ;;  %v3679_v9 = vld [vmem:[%s3958_s22 + $0x8] ss:$20 sps:$4 sm:$0xff]   ;;  %v3747_v15 = vld [vmem:[%s3963_s26 + $0xb0] ss:$8 sps:$4 sm:$0xff]  }
 0x231   : > { %2067 = vmatprep.subr.bf16.mxu0 %v3643_v28  ;;  %1951 = vmatpush1.bf16.msra.mxu1 %v3699_v45  ;;  %v3738_v10 = vld [vmem:[%s3963_s26 + $0xa0] ss:$8 sps:$4 sm:$0xff]   ;;  %v3741_v11 = vld [vmem:[%s3963_s26 + $0xb4] ss:$8 sps:$4 sm:$0xff]   ;;  %v3748_v16 = vld [vmem:[%s3963_s26 + $0xc4] ss:$8 sps:$4 sm:$0xff]  }
 0x232   : > { %1952 = vmatprep.subr.bf16.mxu1 %v3700_v46  ;;  %v3684_v12 = vld [vmem:[%s3963_s26 + $0x200] ss:$8 sps:$4 sm:$0xff]   ;;  %v3698_v14 = vld [vmem:[%s3963_s26 + $0x214] ss:$8 sps:$4 sm:$0xff]   ;;  %v3774_v17 = vld [vmem:[%s3958_s22 + $0x4] ss:$20 sps:$4 sm:$0xff]  }
 0x233   : > { %v3691_v13 = vld [vmem:[%s3958_s22 + $0x34] ss:$20 sps:$4 sm:$0xff]   ;;  %v3696_v18 = vld [vmem:[%s3963_s26 + $0x210] ss:$8 sps:$4 sm:$0xff]   ;;  %v3710_v19 = vld [vmem:[%s3963_s26 + $0x224] ss:$8 sps:$4 sm:$0xff]   ;;  %1976 = vmatprep.mubr.bf16.mxu1 %v3774_v17 }
 0x234   : > { %2068 = vmatpush1.bf16.msra.mxu0 %v3645_v29  ;;  %v3695_v20 = vld [vmem:[%s3958_s22 + $0x30] ss:$20 sps:$4 sm:$0xff]   ;;  %v3750_v21 = vld [vmem:[%s3963_s26 + $0xc0] ss:$8 sps:$4 sm:$0xff]   ;;  %v3753_v23 = vld [vmem:[%s3963_s26 + $0xd4] ss:$8 sps:$4 sm:$0xff]  }
 0x235   : > { %2069 = vmatprep.subr.bf16.mxu0 %v3646_v30  ;;  %1953 = vmatpush1.bf16.msra.mxu1 %v3702_v49  ;;  %v3703_v22 = vld [vmem:[%s3958_s22 + $0x5c] ss:$20 sps:$4 sm:$0xff]   ;;  %v3708_v24 = vld [vmem:[%s3963_s26 + $0x220] ss:$8 sps:$4 sm:$0xff]   ;;  %v3760_v27 = vld [vmem:[%s3963_s26 + $0xe4] ss:$8 sps:$4 sm:$0xff]  }
 0x236   : > { %1954 = vmatprep.subr.bf16.mxu1 %v3705_v50  ;;  %v3722_v25 = vld [vmem:[%s3963_s26 + $0x234] ss:$8 sps:$4 sm:$0xff]   ;;  %v3759_v26 = vld [vmem:[%s3963_s26 + $0xd0] ss:$8 sps:$4 sm:$0xff]   ;;  %v3734_v30 = vld [vmem:[%s3963_s26 + $0x244] ss:$8 sps:$4 sm:$0xff]  }
 0x237   : > { %v3720_v28 = vld [vmem:[%s3963_s26 + $0x230] ss:$8 sps:$4 sm:$0xff]   ;;  %v3762_v31 = vld [vmem:[%s3963_s26 + $0xe0] ss:$8 sps:$4 sm:$0xff]   ;;  %v3765_v33 = vld [vmem:[%s3963_s26 + $0xf4] ss:$8 sps:$4 sm:$0xff]  }
 0x238   : > { %2070 = vmatpush1.bf16.msra.mxu0 %v3648_v32  ;;  %v3707_v29 = vld [vmem:[%s3958_s22 + $0x58] ss:$20 sps:$4 sm:$0xff]   ;;  %v3746_v35 = vld [vmem:[%s3963_s26 + $0x254] ss:$8 sps:$4 sm:$0xff]   ;;  %v3804_v42 = vld [vmem:[%s3968_s29] ss:$8 sps:$4 sm:$0xff]  }
 0x239   : > { %2071 = vmatprep.subr.bf16.mxu0 %v3649_v34  ;;  %1955 = vmatpush1.bf16.msra.mxu1 %v3711_v53  ;;  %v3715_v32 = vld [vmem:[%s3958_s22 + $0x84] ss:$20 sps:$4 sm:$0xff]   ;;  %v3732_v34 = vld [vmem:[%s3963_s26 + $0x240] ss:$8 sps:$4 sm:$0xff]   ;;  %p3354_p6 = scmp.ne.s32.totalorder %s3866_s30, 2 }
 0x23a   : > { %1956 = vmatprep.subr.bf16.mxu1 %v3712_v62  ;;  %v3771_v36 = vld [vmem:[%s3963_s26 + $0xf0] ss:$8 sps:$4 sm:$0xff]   ;;  %v3758_v38 = vld [vmem:[%s3963_s26 + $0x264] ss:$8 sps:$4 sm:$0xff]   ;;  %v3756_v46 = vld [vmem:[%s3963_s26 + $0x260] ss:$8 sps:$4 sm:$0xff]  }
 0x23b   : > { %v3806_v40 = vld [vmem:[%s3968_s29 + $0x4] ss:$8 sps:$4 sm:$0xff]   ;;  %v3768_v50 = vld [vmem:[%s3963_s26 + $0x270] ss:$8 sps:$4 sm:$0xff]   ;;  %v3810_v53 = vld [vmem:[%s3968_s29 + $0x20] ss:$8 sps:$4 sm:$0xff]  }
 0x23c   : > { %2072 = vmatpush1.bf16.msra.mxu0 %v3651_v37  ;;  %v3744_v37 = vld [vmem:[%s3963_s26 + $0x250] ss:$8 sps:$4 sm:$0xff]   ;;  %v3776_v41 = vld [vmem:[%s3958_s22 + $0x2c] ss:$20 sps:$4 sm:$0xff]   ;;  %v3731_v62 = vld [vmem:[%s3958_s22 + $0xa8] ss:$20 sps:$4 sm:$0xff]  }
 0x23d   : > { %2073 = vmatprep.subr.bf16.mxu0 %v3652_v39  ;;  %1957 = vmatpush1.bf16.msra.mxu1 %v3714_v55  ;;  %v3772_v39 = vld [vmem:[%s3958_s22] ss:$20 sps:$4 sm:$0xff]   ;;  %v3812_v49 = vld [vmem:[%s3968_s29 + $0x24] ss:$8 sps:$4 sm:$0xff]   ;;  %v3813_v55 = vld [vmem:[%s3968_s29 + $0x30] ss:$8 sps:$4 sm:$0xff]  }
 0x23e   : > { %1958 = vmatprep.subr.bf16.mxu1 %v3717_v56  ;;  %v3727_v45 = vld [vmem:[%s3958_s22 + $0xac] ss:$20 sps:$4 sm:$0xff]  }
 0x23f   : > { %v3818_v56 = vld [vmem:[%s3968_s29 + $0x44] ss:$8 sps:$4 sm:$0xff]  }
 0x240   : > { %2074 = vmatpush1.bf16.msra.mxu0 %v3654_v43  ;;  %v3719_v43 = vld [vmem:[%s3958_s22 + $0x80] ss:$20 sps:$4 sm:$0xff]   ;;  %v3836_v17 = vld [vmem:[%s3968_s29 + $0xa4] ss:$8 sps:$4 sm:$0xff]  }
 0x241   : > { %2075 = vmatprep.subr.bf16.mxu0 %v3655_v44  ;;  %1959 = vmatpush1.bf16.msra.mxu1 %v3723_v59  ;;  %v3809_v44 = vld [vmem:[%s3968_s29 + $0x14] ss:$8 sps:$4 sm:$0xff]   ;;  %v3816_v59 = vld [vmem:[%s3968_s29 + $0x40] ss:$8 sps:$4 sm:$0xff]  }
 0x242   : > { %1960 = vmatprep.subr.bf16.mxu1 %v3724_v60  ;;  %v3743_v60 = vld [vmem:[%s3958_s22 + $0xd0] ss:$20 sps:$4 sm:$0xff]  }
 0x244   : > { %2076 = vmatpush1.bf16.msra.mxu0 %v3657_v47  ;;  %v3770_v47 = vld [vmem:[%s3963_s26 + $0x274] ss:$8 sps:$4 sm:$0xff]  }
 0x245   : > { %2077 = vmatprep.subr.bf16.mxu0 %v3658_v48  ;;  %1961 = vmatpush1.bf16.msra.mxu1 %v3726_v1  ;;  %v3807_v48 = vld [vmem:[%s3968_s29 + $0x10] ss:$8 sps:$4 sm:$0xff]  }
 0x246   : > { %1962 = vmatprep.subr.bf16.mxu1 %v3729_v2  ;;  %v3819_v1 = vld [vmem:[%s3968_s29 + $0x50] ss:$8 sps:$4 sm:$0xff]   ;;  %v3824_v2 = vld [vmem:[%s3968_s29 + $0x64] ss:$8 sps:$4 sm:$0xff]  }
 0x248   : > { %2078 = vmatpush1.bf16.msra.mxu0 %v3660_v51  ;;  %v3778_v51 = vld [vmem:[%s3958_s22 + $0x28] ss:$20 sps:$4 sm:$0xff]  }
 0x249   : > { %2079 = vmatprep.subr.bf16.mxu0 %v3661_v52  ;;  %1963 = vmatpush1.bf16.msra.mxu1 %v3735_v5  ;;  %v3780_v52 = vld [vmem:[%s3958_s22 + $0x54] ss:$20 sps:$4 sm:$0xff]  }
 0x24a   : > { %1964 = vmatprep.subr.bf16.mxu1 %v3736_v6  ;;  %v3822_v5 = vld [vmem:[%s3968_s29 + $0x60] ss:$8 sps:$4 sm:$0xff]   ;;  %v3755_v6 = vld [vmem:[%s3958_s22 + $0xf8] ss:$20 sps:$4 sm:$0xff]  }
 0x24c   : > { %2080 = vmatpush1.bf16.msra.mxu0 %v3663_v54  ;;  %v3815_v54 = vld [vmem:[%s3968_s29 + $0x34] ss:$8 sps:$4 sm:$0xff]  }
 0x24d   : > { %2081 = vmatprep.subr.bf16.mxu0 %v3664_v63  ;;  %1965 = vmatpush1.bf16.msra.mxu1 %v3738_v10  ;;  %v3739_v63 = vld [vmem:[%s3958_s22 + $0xd4] ss:$20 sps:$4 sm:$0xff]   ;;  %v3830_v10 = vld [vmem:[%s3968_s29 + $0x84] ss:$8 sps:$4 sm:$0xff]  }
 0x24e   : > { %1966 = vmatprep.subr.bf16.mxu1 %v3741_v11  ;;  %v3790_v11 = vld [vmem:[%s3958_s22 + $0xa0] ss:$20 sps:$4 sm:$0xff]  }
 0x250   : > { %2082 = vmatpush1.bf16.msra.mxu0 %v3666_v57  ;;  %v3782_v57 = vld [vmem:[%s3958_s22 + $0x50] ss:$20 sps:$4 sm:$0xff]  }
 0x251   : > { %2083 = vmatprep.subr.bf16.mxu0 %v3667_v58  ;;  %1967 = vmatpush1.bf16.msra.mxu1 %v3747_v15  ;;  %v3784_v58 = vld [vmem:[%s3958_s22 + $0x7c] ss:$20 sps:$4 sm:$0xff]  }
 0x252   : > { %1968 = vmatprep.subr.bf16.mxu1 %v3748_v16  ;;  %v3833_v15 = vld [vmem:[%s3968_s29 + $0x94] ss:$8 sps:$4 sm:$0xff]   ;;  %v3831_v16 = vld [vmem:[%s3968_s29 + $0x90] ss:$8 sps:$4 sm:$0xff]  }
 0x254   : > { %2084 = vmatpush1.bf16.msra.mxu0 %v3669_v61  ;;  %v3821_v61 = vld [vmem:[%s3968_s29 + $0x54] ss:$8 sps:$4 sm:$0xff]  }
 0x255   : > { %2085 = vmatprep.subr.bf16.mxu0 %v3670_v0  ;;  %1969 = vmatpush1.bf16.msra.mxu1 %v3750_v21  ;;  %v3751_v0 = vld [vmem:[%s3958_s22 + $0xfc] ss:$20 sps:$4 sm:$0xff]   ;;  %v3834_v21 = vld [vmem:[%s3968_s29 + $0xa0] ss:$8 sps:$4 sm:$0xff]  }
 0x256   : > { %1970 = vmatprep.subr.bf16.mxu1 %v3753_v23  ;;  %v3839_v23 = vld [vmem:[%s3968_s29 + $0xb4] ss:$8 sps:$4 sm:$0xff]  }
 0x258   : > { %2086 = vmatpush1.bf16.msra.mxu0 %v3672_v3  ;;  %v3786_v3 = vld [vmem:[%s3958_s22 + $0x78] ss:$20 sps:$4 sm:$0xff]  }
 0x259   : > { %2087 = vmatprep.subr.bf16.mxu0 %v3675_v4  ;;  %1971 = vmatpush1.bf16.msra.mxu1 %v3759_v26  ;;  %v3788_v4 = vld [vmem:[%s3958_s22 + $0xa4] ss:$20 sps:$4 sm:$0xff]  }
 0x25a   : > { %1972 = vmatprep.subr.bf16.mxu1 %v3760_v27  ;;  %v3798_v26 = vld [vmem:[%s3958_s22 + $0xf0] ss:$20 sps:$4 sm:$0xff]  }
 0x25b   : > { %v3800_v27 = vld [vmem:[%s3958_s22 + $0x11c] ss:$20 sps:$4 sm:$0xff]  }
 0x25c   : > { %2088 = vmatpush1.bf16.msra.mxu0 %v3678_v7  ;;  %v3827_v7 = vld [vmem:[%s3968_s29 + $0x74] ss:$8 sps:$4 sm:$0xff]  }
 0x25d   : > { %2170 = vmatprep.subr.bf16.mxu0 %v3686_v8  ;;  %1973 = vmatpush1.bf16.msra.mxu1 %v3762_v31  ;;  %v3763_v8 = vld [vmem:[%s3958_s22 + $0x124] ss:$20 sps:$4 sm:$0xff]   ;;  %v3783_v31 = vld [vmem:[%s3958_s22 + $0x60] ss:$20 sps:$4 sm:$0xff]  }
 0x25e   : > { %1974 = vmatprep.subr.bf16.mxu1 %v3765_v33  ;;  %v3791_v33 = vld [vmem:[%s3958_s22 + $0xb0] ss:$20 sps:$4 sm:$0xff]  }
 0x25f   : > { %2090 = vmatmul.mubr.bf16.vlgmr.msra.gmra.mrb[0].mxu0 %v3679_v9  ;;  %v3825_v9 = vld [vmem:[%s3968_s29 + $0x70] ss:$8 sps:$4 sm:$0xff]  }
 0x260   : > { %2171 = vmatpush1.bf16.msra.mxu0 %v3684_v12  ;;  %2099 = vmatprep.mubr.bf16.mxu0 %v3691_v13  ;;  %v3792_v12 = vld [vmem:[%s3958_s22 + $0xcc] ss:$20 sps:$4 sm:$0xff]  }
 0x261   : > { %2172 = vmatprep.subr.bf16.mxu0 %v3698_v14  ;;  %1975 = vmatpush1.bf16.msra.mxu1 %v3771_v36  ;;  %v3828_v13 = vld [vmem:[%s3968_s29 + $0x80] ss:$8 sps:$4 sm:$0xff]   ;;  %v3843_v36 = vld [vmem:[%s3968_s29 + $0xd0] ss:$8 sps:$4 sm:$0xff]  }
 0x262   : > { %2555 = vmatprep.subr.bf16.mxu1 %v3806_v40  ;;  %v3767_v14 = vld [vmem:[%s3958_s22 + $0x120] ss:$20 sps:$4 sm:$0xff]  }
 0x263   : > { %v3846_v40 = vld [vmem:[%s3968_s29 + $0xe0] ss:$8 sps:$4 sm:$0xff]  }
 0x264   : > { %2173 = vmatpush1.bf16.msra.mxu0 %v3696_v18  ;;  %1977 = vmatmul.mubr.bf16.vlgmr.msra.gmra.mrb[0].mxu1 %v3772_v39  ;;  %v3877_v18 = vmov 0   ;;  %v3848_v39 = vld [vmem:[%s3968_s29 + $0xe4] ss:$8 sps:$4 sm:$0xff]  }
 0x265   : > { %2174 = vmatprep.subr.bf16.mxu0 %v3710_v19  ;;  %1986 = vmatprep.mubr.bf16.mxu1 %v3776_v41  ;;  %v3794_v19 = vld [vmem:[%s3958_s22 + $0xc8] ss:$20 sps:$4 sm:$0xff]  }
 0x266   : > { %2556 = vmatpush1.bf16.msra.mxu1 %v3804_v42  ;;  %v3851_v41 = vld [vmem:[%s3968_s29 + $0xf4] ss:$8 sps:$4 sm:$0xff]   ;;  %v3849_v42 = vld [vmem:[%s3968_s29 + $0xf0] ss:$8 sps:$4 sm:$0xff]  }
 0x267   : > { %2100 = vmatmul.mubr.bf16.gmra.mrb[4].mxu0 %v3695_v20  ;;  %2557 = vmatprep.subr.bf16.mxu1 %v3809_v44  ;;  %v3796_v20 = vld [vmem:[%s3958_s22 + $0xf4] ss:$20 sps:$4 sm:$0xff]  }
 0x268   : > { %2109 = vmatprep.mubr.bf16.mxu0 %v3703_v22  ;;  %2175 = vmatpush1.bf16.msra.mxu0 %v3708_v24  ;;  %v3775_v22 = vld [vmem:[%s3958_s22 + $0x10] ss:$20 sps:$4 sm:$0xff]  }
 0x269   : > { %2176 = vmatprep.subr.bf16.mxu0 %v3722_v25  ;;  %v3837_v24 = vld [vmem:[%s3968_s29 + $0xb0] ss:$8 sps:$4 sm:$0xff]   ;;  %v3842_v25 = vld [vmem:[%s3968_s29 + $0xc4] ss:$8 sps:$4 sm:$0xff]  }
 0x26a   : > { %2558 = vmatpush1.bf16.msra.mxu1 %v3807_v48 }
 0x26b   : > { %2559 = vmatprep.subr.bf16.mxu1 %v3812_v49 }
 0x26c   : > { %2177 = vmatpush1.bf16.msra.mxu0 %v3720_v28  ;;  %1987 = vmatmul.mubr.bf16.gmra.mrb[4].mxu1 %v3778_v51  ;;  %v3840_v28 = vld [vmem:[%s3968_s29 + $0xc0] ss:$8 sps:$4 sm:$0xff]  }
 0x26d   : > { %2178 = vmatprep.subr.bf16.mxu0 %v3734_v30  ;;  %1996 = vmatprep.mubr.bf16.mxu1 %v3780_v52  ;;  %v3802_v30 = vld [vmem:[%s3958_s22 + $0x118] ss:$20 sps:$4 sm:$0xff]  }
 0x26e   : > { %2560 = vmatpush1.bf16.msra.mxu1 %v3810_v53 }
 0x26f   : > { %2110 = vmatmul.mubr.bf16.gmra.mrb[8].mxu0 %v3707_v29  ;;  %2561 = vmatprep.subr.bf16.mxu1 %v3815_v54  ;;  %v3779_v29 = vld [vmem:[%s3958_s22 + $0x38] ss:$20 sps:$4 sm:$0xff]   ;;  %v1326_v54 = vlaneseq }
 0x270   : > { %2119 = vmatprep.mubr.bf16.mxu0 %v3715_v32  ;;  %2179 = vmatpush1.bf16.msra.mxu0 %v3732_v34  ;;  %v3787_v32 = vld [vmem:[%s3958_s22 + $0x88] ss:$20 sps:$4 sm:$0xff]   ;;  %v3795_v34 = vld [vmem:[%s3958_s22 + $0xd8] ss:$20 sps:$4 sm:$0xff]  }
 0x271   : > { %2180 = vmatprep.subr.bf16.mxu0 %v3746_v35  ;;  %v3799_v35 = vld [vmem:[%s3958_s22 + $0x100] ss:$20 sps:$4 sm:$0xff]  }
 0x272   : > { %2562 = vmatpush1.bf16.msra.mxu1 %v3813_v55 }
 0x273   : > { %2563 = vmatprep.subr.bf16.mxu1 %v3818_v56 }
 0x274   : > { %2181 = vmatpush1.bf16.msra.mxu0 %v3744_v37  ;;  %1997 = vmatmul.mubr.bf16.gmra.mrb[8].mxu1 %v3782_v57  ;;  %v3845_v37 = vld [vmem:[%s3968_s29 + $0xd4] ss:$8 sps:$4 sm:$0xff]  }
 0x275   : > { %2182 = vmatprep.subr.bf16.mxu0 %v3758_v38  ;;  %2006 = vmatprep.mubr.bf16.mxu1 %v3784_v58  ;;  %v3803_v38 = vld [vmem:[%s3958_s22 + $0x128] ss:$20 sps:$4 sm:$0xff]   ;;  %v4352_v58 = vshrl.u32 %v1326_v54, 7 }
 0x276   : > { %2564 = vmatpush1.bf16.msra.mxu1 %v3816_v59 }
 0x277   : > { %2120 = vmatmul.mubr.bf16.gmra.mrb[12].mxu0 %v3719_v43  ;;  %2565 = vmatprep.subr.bf16.mxu1 %v3821_v61  ;;  %v1328_v59 = vsub.s32 0, %v4352_v58  ;;  %v1324_v61 = vld [vmem:[%s3953_s19] sm:$0x3] }
 0x278   : > { %2129 = vmatprep.mubr.bf16.mxu0 %v3727_v45  ;;  %2183 = vmatpush1.bf16.msra.mxu0 %v3756_v46 }
 0x279   : > { %2184 = vmatprep.subr.bf16.mxu0 %v3770_v47 }
 0x27a   : > { %2566 = vmatpush1.bf16.msra.mxu1 %v3819_v1 }
 0x27b   : > { %2567 = vmatprep.subr.bf16.mxu1 %v3824_v2 }
 0x27c   : > { %2185 = vmatpush1.bf16.msra.mxu0 %v3768_v50  ;;  %2007 = vmatmul.mubr.bf16.gmra.mrb[12].mxu1 %v3786_v3 }
 0x27d   : > { %2016 = vmatprep.mubr.bf16.mxu1 %v3788_v4  ;;  %v4367_v4 = vrot.slane %v1324_v61, %v1328_v59 }
 0x27e   : > { %2568 = vmatpush1.bf16.msra.mxu1 %v3822_v5 }
 0x27f   : > { %2130 = vmatmul.mubr.bf16.gmra.mrb[16].mxu0 %v3731_v62  ;;  %2569 = vmatprep.subr.bf16.mxu1 %v3827_v7 }
 0x280   : > { %2139 = vmatprep.mubr.bf16.mxu0 %v3739_v63 }
 0x282   : > { %2570 = vmatpush1.bf16.msra.mxu1 %v3825_v9 }
 0x283   : > { %2571 = vmatprep.subr.bf16.mxu1 %v3830_v10 }
 0x284   : > { %2017 = vmatmul.mubr.bf16.gmra.mrb[16].mxu1 %v3790_v11 }
 0x285   : > { %2026 = vmatprep.mubr.bf16.mxu1 %v3792_v12 }
 0x286   : > { %2572 = vmatpush1.bf16.msra.mxu1 %v3828_v13 }
 0x287   : > { %2140 = vmatmul.mubr.bf16.gmra.mrb[20].mxu0 %v3743_v60  ;;  %2573 = vmatprep.subr.bf16.mxu1 %v3833_v15 }
 0x288   : > { %2149 = vmatprep.mubr.bf16.mxu0 %v3751_v0  ;;  %v1332_v0 = vsub.s32 1, %v4352_v58 }
 0x28a   : > { %2574 = vmatpush1.bf16.msra.mxu1 %v3831_v16  ;;  %v4371_v5 = vrot.slane %v1324_v61, %v1332_v0 }
 0x28b   : > { %2575 = vmatprep.subr.bf16.mxu1 %v3836_v17 }
 0x28c   : > { %2027 = vmatmul.mubr.bf16.gmra.mrb[20].mxu1 %v3794_v19 }
 0x28d   : > { %2036 = vmatprep.mubr.bf16.mxu1 %v3796_v20 }
 0x28e   : > { %2576 = vmatpush1.bf16.msra.mxu1 %v3834_v21 }
 0x28f   : > { %2150 = vmatmul.mubr.bf16.gmra.mrb[24].mxu0 %v3755_v6  ;;  %2577 = vmatprep.subr.bf16.mxu1 %v3839_v23 }
 0x290   : > { %2159 = vmatprep.mubr.bf16.mxu0 %v3763_v8 }
 0x292   : > { %2578 = vmatpush1.bf16.msra.mxu1 %v3837_v24 }
 0x293   : > { %2579 = vmatprep.subr.bf16.mxu1 %v3842_v25 }
 0x294   : > { %2037 = vmatmul.mubr.bf16.gmra.mrb[24].mxu1 %v3798_v26 }
 0x295   : > { %2046 = vmatprep.mubr.bf16.mxu1 %v3800_v27 }
 0x296   : > { %2580 = vmatpush1.bf16.msra.mxu1 %v3840_v28 }
 0x297   : > { %2160 = vmatmul.mubr.bf16.gmra.mrb[28].mxu0 %v3767_v14  ;;  %2581 = vmatprep.subr.bf16.mxu1 %v3845_v37 }
 0x298   : > { %2202 = vmatprep.mubr.bf16.mxu0 %v3877_v18 }
 0x29a   : > { %2582 = vmatpush1.bf16.msra.mxu1 %v3843_v36 }
 0x29b   : > { %2583 = vmatprep.subr.bf16.mxu1 %v3848_v39 }
 0x29c   : > { %2047 = vmatmul.mubr.bf16.gmra.mrb[28].mxu1 %v3802_v30 }
 0x29e   : > { %2584 = vmatpush1.bf16.msra.mxu1 %v3846_v40 }
 0x29f   : > { %2203 = vmatmul.mubr.bf16.vlgmr.msra.gmra.mrb[0].mxu0 %v3775_v22  ;;  %2585 = vmatprep.subr.bf16.mxu1 %v3851_v41 }
 0x2a0   : > { %2212 = vmatprep.mubr.bf16.mxu0 %v3877_v18 }
 0x2a2   : > { %2586 = vmatpush1.bf16.msra.mxu1 %v3849_v42 }
 0x2a7   : > { %2213 = vmatmul.mubr.bf16.gmra.mrb[4].mxu0 %v3779_v29 }
 0x2a8   : > { %2222 = vmatprep.mubr.bf16.mxu0 %v3877_v18 }
 0x2af   : > { %2223 = vmatmul.mubr.bf16.gmra.mrb[8].mxu0 %v3783_v31 }
 0x2b0   : > { %2232 = vmatprep.mubr.bf16.mxu0 %v3877_v18 }
 0x2b7   : > { %2233 = vmatmul.mubr.bf16.gmra.mrb[12].mxu0 %v3787_v32 }
 0x2b8   : > { %2242 = vmatprep.mubr.bf16.mxu0 %v3877_v18 }
 0x2bf   : > { %2243 = vmatmul.mubr.bf16.gmra.mrb[16].mxu0 %v3791_v33 }
 0x2c0   : > { %2252 = vmatprep.mubr.bf16.mxu0 %v3877_v18 }
 0x2c7   : > { %2253 = vmatmul.mubr.bf16.gmra.mrb[20].mxu0 %v3795_v34 }
 0x2c8   : > { %2262 = vmatprep.mubr.bf16.mxu0 %v3877_v18 }
 0x2cf   : > { %2263 = vmatmul.mubr.bf16.gmra.mrb[24].mxu0 %v3799_v35 }
 0x2d0   : > { %2272 = vmatprep.mubr.bf16.mxu0 %v3877_v18 }
 0x2d7   : > { %2273 = vmatmul.mubr.bf16.gmra.mrb[28].mxu0 %v3803_v38 }
 0x337   : > { %v1978_v43 = vpop.f32.mrb[0].mxu1 }
 0x338   : > { %v1980_v44 = vpop.f32.mrb[1].mxu1  ;;  %v1979_v6 = vadd.f32 %v1978_v43, %v4367_v4 }
 0x339   : > { %v1982_v45 = vpop.f32.mrb[2].mxu1  ;;  %v1981_v8 = vadd.f32 %v1980_v44, %v4371_v5 }
 0x33a   : > { %v1984_v46 = vpop.f32.mrb[3].mxu1  ;;  %v1983_v13 = vadd.f32 %v1982_v45, %v4367_v4 }
 0x33b   : > { %v1985_v16 = vadd.f32 %v1984_v46, %v4371_v5 }
 0x33f   : > { %v1988_v47 = vpop.f32.mrb[4].mxu1 }
 0x340   : > { %v1990_v48 = vpop.f32.mrb[5].mxu1  ;;  %v1989_v24 = vadd.f32 %v1988_v47, %v4367_v4 }
 0x341   : > { %v1992_v49 = vpop.f32.mrb[6].mxu1  ;;  %v1991_v28 = vadd.f32 %v1990_v48, %v4371_v5 }
 0x342   : > { %v1994_v50 = vpop.f32.mrb[7].mxu1  ;;  %v1993_v35 = vadd.f32 %v1992_v49, %v4367_v4 }
 0x343   : > { %v1995_v38 = vadd.f32 %v1994_v50, %v4371_v5 }
 0x347   : > { %v1998_v51 = vpop.f32.mrb[8].mxu1 }
 0x348   : > { %v4338_v52 = vpop.f32.mrb[9].mxu1  ;;  %v1999_v46 = vadd.f32 %v1998_v51, %v4367_v4 }
 0x349   : > { %v4340_v53 = vpop.f32.mrb[10].mxu1  ;;  %v2001_v49 = vadd.f32 %v4338_v52, %v4371_v5 }
 0x34a   : > { %v4342_v62 = vpop.f32.mrb[11].mxu1 }
 0x34f   : > { %v4344_v63 = vpop.f32.mrb[12].mxu1 }
 0x350   : > { %v4346_v55 = vpop.f32.mrb[13].mxu1 }
 0x351   : > { %v4348_v56 = vpop.f32.mrb[14].mxu1 }
 0x352   : > { %v4350_v57 = vpop.f32.mrb[15].mxu1 }
 0x357   : > { %v4355_v60 = vpop.f32.mrb[16].mxu1 }
 0x358   : > { %v4359_v1 = vpop.f32.mrb[17].mxu1 }
 0x359   : > { %v4361_v2 = vpop.f32.mrb[18].mxu1 }
 0x35a   : > { %v4363_v3 = vpop.f32.mrb[19].mxu1 }
 0x35f   : > { %v4374_v7 = vpop.f32.mrb[20].mxu1 }
 0x360   : > { %v4377_v9 = vpop.f32.mrb[21].mxu1 }
 0x361   : > { %v4379_v10 = vpop.f32.mrb[22].mxu1 }
 0x362   : > { %v4381_v12 = vpop.f32.mrb[23].mxu1 }
 0x367   : > { %v4386_v25 = vpop.f32.mrb[24].mxu1 }
 0x368   : > { %v4389_v29 = vpop.f32.mrb[25].mxu1 }
 0x369   : > { %v4391_v31 = vpop.f32.mrb[26].mxu1 }
 0x36a   : > { %v4393_v34 = vpop.f32.mrb[27].mxu1 }
 0x36f   : > { %v4398_v47 = vpop.f32.mrb[28].mxu1 }
 0x370   : > { %v4402_v61 = vpop.f32.mrb[29].mxu1 }
 0x372   : > { %v2204_v11 = vpop.f32.mrb[0].mxu0 }
 0x373   : > { %v3425_v14 = vadd.f32 %v2204_v11, %v1979_v6  ;;  %v2206_v15 = vpop.f32.mrb[1].mxu0  ;;  %v4404_v6 = vpop.f32.mrb[30].mxu1 }
 0x374   : > { %v3427_v17 = vadd.f32 %v2206_v15, %v1981_v8  ;;  %v2208_v18 = vpop.f32.mrb[2].mxu0 }
 0x375   : > { %v3429_v19 = vadd.f32 %v2208_v18, %v1983_v13  ;;  %v2210_v20 = vpop.f32.mrb[3].mxu0  ;;  %v2283_v22 = vmax.f32 %v3425_v14, 0.0  ;;  %v4406_v13 = vpop.f32.mrb[31].mxu1  ;;  %v2003_v14 = vadd.f32 %v4340_v53, %v4367_v4  ;;  %v2011_v53 = vadd.f32 %v4346_v55, %v4371_v5 }
 0x376   : > { %v3431_v21 = vadd.f32 %v2210_v20, %v1985_v16  ;;  %v2284_v26 = vmax.f32 %v3427_v17, 0.0  ;;  %v2005_v16 = vadd.f32 %v4342_v62, %v4371_v5 }
 0x377   : > { %v2285_v23 = vmax.f32 %v3429_v19, 0.0 }
 0x378   : > { %v2286_v27 = vmax.f32 %v3431_v21, 0.0 }
 0x379   : > { %v2347_v30 = vpack.c.bf16 %v2285_v23, %v2283_v22  ;;  %v2009_v23 = vadd.f32 %v4344_v63, %v4367_v4 }
 0x37a   : > { %v2348_v32 = vpack.c.bf16 %v2286_v27, %v2284_v26  ;;  %v2214_v33 = vpop.f32.mrb[4].mxu0 }
 0x37b   : > { %v3433_v36 = vadd.f32 %v2214_v33, %v1989_v24  ;;  %v2216_v37 = vpop.f32.mrb[5].mxu0 }
 0x37c   : > { %v3435_v39 = vadd.f32 %v2216_v37, %v1991_v28  ;;  %v2218_v40 = vpop.f32.mrb[6].mxu0  ;;  %2587 = vmatprep.mubr.bf16.mxu1 %v2348_v32 }
 0x37d   : > { %v3437_v41 = vadd.f32 %v2218_v40, %v1993_v35  ;;  %v2220_v42 = vpop.f32.mrb[7].mxu0  ;;  %2588 = vmatmul.mubr.bf16.vlgmr.msra.gmra.mrb[32].mxu1 %v2347_v30  ;;  %v2287_v44 = vmax.f32 %v3433_v36, 0.0  ;;  %v2013_v30 = vadd.f32 %v4348_v56, %v4367_v4  ;;  %v2015_v35 = vadd.f32 %v4350_v57, %v4371_v5 }
 0x37e   : > { %v3439_v43 = vadd.f32 %v2220_v42, %v1995_v38  ;;  %v2288_v48 = vmax.f32 %v3435_v39, 0.0  ;;  %v2021_v56 = vadd.f32 %v4359_v1, %v4371_v5 }
 0x37f   : > { %v2289_v45 = vmax.f32 %v3437_v41, 0.0  ;;  %v2019_v41 = vadd.f32 %v4355_v60, %v4367_v4 }
 0x380   : > { %v2290_v54 = vmax.f32 %v3439_v43, 0.0 }
 0x381   : > { %v2349_v50 = vpack.c.bf16 %v2289_v45, %v2287_v44 }
 0x382   : > { %v2350_v8 = vpack.c.bf16 %v2290_v54, %v2288_v48  ;;  %v2224_v11 = vpop.f32.mrb[8].mxu0 }
 0x383   : > { %v3441_v51 = vadd.f32 %v2224_v11, %v1999_v46  ;;  %v2226_v15 = vpop.f32.mrb[9].mxu0  ;;  %v2023_v46 = vadd.f32 %v4361_v2, %v4367_v4  ;;  %v2031_v2 = vadd.f32 %v4377_v9, %v4371_v5 }
 0x384   : > { %v3443_v17 = vadd.f32 %v2226_v15, %v2001_v49  ;;  %v2228_v18 = vpop.f32.mrb[10].mxu0  ;;  %2597 = vmatprep.mubr.bf16.mxu1 %v2350_v8  ;;  %v2025_v49 = vadd.f32 %v4363_v3, %v4371_v5  ;;  %v2029_v15 = vadd.f32 %v4374_v7, %v4367_v4 }
 0x385   : > { %v3445_v52 = vadd.f32 %v2228_v18, %v2003_v14  ;;  %v2230_v19 = vpop.f32.mrb[11].mxu0  ;;  %2598 = vmatmul.mubr.bf16.gmra.mrb[36].mxu1 %v2349_v50  ;;  %v2291_v21 = vmax.f32 %v3441_v51, 0.0 }
 0x386   : > { %v3447_v20 = vadd.f32 %v2230_v19, %v2005_v16  ;;  %v2292_v24 = vmax.f32 %v3443_v17, 0.0  ;;  %v2033_v19 = vadd.f32 %v4379_v10, %v4367_v4  ;;  %v2041_v10 = vadd.f32 %v4389_v29, %v4371_v5 }
 0x387   : > { %v2293_v22 = vmax.f32 %v3445_v52, 0.0 }
 0x388   : > { %v2294_v26 = vmax.f32 %v3447_v20, 0.0 }
 0x389   : > { %v2351_v27 = vpack.c.bf16 %v2293_v22, %v2291_v21  ;;  %v2035_v22 = vadd.f32 %v4381_v12, %v4371_v5 }
 0x38a   : > { %v2352_v28 = vpack.c.bf16 %v2294_v26, %v2292_v24  ;;  %v2234_v62 = vpop.f32.mrb[12].mxu0 }
 0x38b   : > { %v3449_v32 = vadd.f32 %v2234_v62, %v2009_v23  ;;  %v2236_v33 = vpop.f32.mrb[13].mxu0 }
 0x38c   : > { %v3451_v36 = vadd.f32 %v2236_v33, %v2011_v53  ;;  %v2238_v37 = vpop.f32.mrb[14].mxu0  ;;  %2607 = vmatprep.mubr.bf16.mxu1 %v2352_v28  ;;  %v2039_v28 = vadd.f32 %v4386_v25, %v4367_v4 }
 0x38d   : > { %v3453_v63 = vadd.f32 %v2238_v37, %v2013_v30  ;;  %v2240_v38 = vpop.f32.mrb[15].mxu0  ;;  %2608 = vmatmul.mubr.bf16.gmra.mrb[40].mxu1 %v2351_v27  ;;  %v2295_v40 = vmax.f32 %v3449_v32, 0.0 }
 0x38e   : > { %v3455_v39 = vadd.f32 %v2240_v38, %v2015_v35  ;;  %v2296_v42 = vmax.f32 %v3451_v36, 0.0  ;;  %v2043_v35 = vadd.f32 %v4391_v31, %v4367_v4  ;;  %v2051_v31 = vadd.f32 %v4402_v61, %v4371_v5 }
 0x38f   : > { %v2297_v55 = vmax.f32 %v3453_v63, 0.0  ;;  %v2045_v63 = vadd.f32 %v4393_v34, %v4371_v5 }
 0x390   : > { %v2298_v43 = vmax.f32 %v3455_v39, 0.0 }
 0x391   : > { %v2353_v44 = vpack.c.bf16 %v2297_v55, %v2295_v40 }
 0x392   : > { %v2354_v45 = vpack.c.bf16 %v2298_v43, %v2296_v42  ;;  %v2244_v57 = vpop.f32.mrb[16].mxu0  ;;  %v2049_v42 = vadd.f32 %v4398_v47, %v4367_v4 }
 0x393   : > { %v3457_v48 = vadd.f32 %v2244_v57, %v2019_v41  ;;  %v2246_v54 = vpop.f32.mrb[17].mxu0  ;;  %v2053_v57 = vadd.f32 %v4404_v6, %v4367_v4  ;;  %v2315_v4 = vld [vmem:[#allocation2] sm:$0xff]  ;;  %v2316_v6 = vld [vmem:[#allocation2 + $0x8] sm:$0xff] }
 0x394   : > { %v3459_v50 = vadd.f32 %v2246_v54, %v2021_v56  ;;  %v2248_v8 = vpop.f32.mrb[18].mxu0  ;;  %2617 = vmatprep.mubr.bf16.mxu1 %v2354_v45  ;;  %v2055_v54 = vadd.f32 %v4406_v13, %v4371_v5 }
 0x395   : > { %v3461_v60 = vadd.f32 %v2248_v8, %v2023_v46  ;;  %v2250_v11 = vpop.f32.mrb[19].mxu0  ;;  %2618 = vmatmul.mubr.bf16.gmra.mrb[44].mxu1 %v2353_v44  ;;  %v2299_v51 = vmax.f32 %v3457_v48, 0.0 }
 0x396   : > { %v3463_v14 = vadd.f32 %v2250_v11, %v2025_v49  ;;  %v2300_v16 = vmax.f32 %v3459_v50, 0.0 }
 0x397   : > { %v2301_v1 = vmax.f32 %v3461_v60, 0.0 }
 0x398   : > { %v2302_v17 = vmax.f32 %v3463_v14, 0.0 }
 0x399   : > { %v2355_v18 = vpack.c.bf16 %v2301_v1, %v2299_v51 }
 0x39a   : > { %v2356_v52 = vpack.c.bf16 %v2302_v17, %v2300_v16  ;;  %v2254_v3 = vpop.f32.mrb[20].mxu0  ;;  %v2317_v17 = vld [vmem:[#allocation2 + $0x10] sm:$0xff] }
 0x39b   : > { %v3465_v20 = vadd.f32 %v2254_v3, %v2029_v15  ;;  %v2256_v21 = vpop.f32.mrb[21].mxu0 }
 0x39c   : > { %v3467_v23 = vadd.f32 %v2256_v21, %v2031_v2  ;;  %v2258_v24 = vpop.f32.mrb[22].mxu0  ;;  %2627 = vmatprep.mubr.bf16.mxu1 %v2356_v52  ;;  %v2318_v2 = vld [vmem:[#allocation2 + $0x18] sm:$0xff]  ;;  %v2319_v21 = vld [vmem:[#allocation2 + $0x20] sm:$0xff] }
 0x39d   : > { %v3469_v7 = vadd.f32 %v2258_v24, %v2033_v19  ;;  %v2260_v26 = vpop.f32.mrb[23].mxu0  ;;  %2628 = vmatmul.mubr.bf16.gmra.mrb[48].mxu1 %v2355_v18  ;;  %v2303_v27 = vmax.f32 %v3465_v20, 0.0  ;;  %v2321_v24 = vld [vmem:[#allocation2 + $0x30] sm:$0xff] }
 0x39e   : > { %v3471_v53 = vadd.f32 %v2260_v26, %v2035_v22  ;;  %v2304_v62 = vmax.f32 %v3467_v23, 0.0  ;;  %v2320_v22 = vld [vmem:[#allocation2 + $0x28] sm:$0xff] }
 0x39f   : > { %v2305_v9 = vmax.f32 %v3469_v7, 0.0 }
 0x3a0   : > { %v2306_v30 = vmax.f32 %v3471_v53, 0.0  ;;  %v2322_v53 = vld [vmem:[#allocation2 + $0x38] sm:$0xff] }
 0x3a1   : > { %v2357_v32 = vpack.c.bf16 %v2305_v9, %v2303_v27 }
 0x3a2   : > { %v2358_v33 = vpack.c.bf16 %v2306_v30, %v2304_v62  ;;  %v2264_v12 = vpop.f32.mrb[24].mxu0 }
 0x3a3   : > { %v3473_v36 = vadd.f32 %v2264_v12, %v2039_v28  ;;  %v2266_v37 = vpop.f32.mrb[25].mxu0  ;;  %v2325_v12 = vld [vmem:[#allocation2 + $0x50] sm:$0xff] }
 0x3a4   : > { %v3475_v38 = vadd.f32 %v2266_v37, %v2041_v10  ;;  %v2268_v39 = vpop.f32.mrb[26].mxu0  ;;  %2637 = vmatprep.mubr.bf16.mxu1 %v2358_v33  ;;  %v2323_v10 = vld [vmem:[#allocation2 + $0x40] sm:$0xff]  ;;  %v2326_v37 = vld [vmem:[#allocation2 + $0x58] sm:$0xff] }
 0x3a5   : > { %v3477_v25 = vadd.f32 %v2268_v39, %v2043_v35  ;;  %v2270_v40 = vpop.f32.mrb[27].mxu0  ;;  %2638 = vmatmul.mubr.bf16.gmra.mrb[52].mxu1 %v2357_v32  ;;  %v2307_v41 = vmax.f32 %v3473_v36, 0.0  ;;  %v2324_v32 = vld [vmem:[#allocation2 + $0x48] sm:$0xff] }
 0x3a6   : > { %v3479_v55 = vadd.f32 %v2270_v40, %v2045_v63  ;;  %v2308_v43 = vmax.f32 %v3475_v38, 0.0 }
 0x3a7   : > { %v2309_v29 = vmax.f32 %v3477_v25, 0.0 }
 0x3a8   : > { %v2310_v56 = vmax.f32 %v3479_v55, 0.0  ;;  %v2327_v55 = vld [vmem:[#allocation2 + $0x60] sm:$0xff] }
 0x3a9   : > { %v2359_v44 = vpack.c.bf16 %v2309_v29, %v2307_v41  ;;  %v2328_v41 = vld [vmem:[#allocation2 + $0x68] sm:$0xff] }
 0x3aa   : > { %v2360_v45 = vpack.c.bf16 %v2310_v56, %v2308_v43  ;;  %v2274_v34 = vpop.f32.mrb[28].mxu0 }
 0x3ab   : > { %v3481_v46 = vadd.f32 %v2274_v34, %v2049_v42  ;;  %v2276_v48 = vpop.f32.mrb[29].mxu0  ;;  %v2329_v42 = vld [vmem:[#allocation2 + $0x70] sm:$0xff] }
 0x3ac   : > { %v3483_v49 = vadd.f32 %v2276_v48, %v2051_v31  ;;  %v2278_v50 = vpop.f32.mrb[30].mxu0  ;;  %2647 = vmatprep.mubr.bf16.mxu1 %v2360_v45  ;;  %v2330_v31 = vld [vmem:[#allocation2 + $0x78] sm:$0xff]  ;;  %v2331_v48 = vld [vmem:[#allocation2 + $0x80] sm:$0xff] }
 0x3ad   : > { %v3485_v47 = vadd.f32 %v2278_v50, %v2053_v57  ;;  %v2280_v8 = vpop.f32.mrb[31].mxu0  ;;  %2648 = vmatmul.mubr.bf16.gmra.mrb[56].mxu1 %v2359_v44  ;;  %v2311_v11 = vmax.f32 %v3481_v46, 0.0  ;;  %v2333_v50 = vld [vmem:[#allocation2 + $0x90] sm:$0xff] }
 0x3ae   : > { %v3487_v60 = vadd.f32 %v2280_v8, %v2055_v54  ;;  %v2312_v14 = vmax.f32 %v3483_v49, 0.0  ;;  %v2332_v54 = vld [vmem:[#allocation2 + $0x88] sm:$0xff] }
 0x3af   : > { %v2313_v61 = vmax.f32 %v3485_v47, 0.0 }
 0x3b0   : > { %v2314_v51 = vmax.f32 %v3487_v60, 0.0  ;;  %v2334_v60 = vld [vmem:[#allocation2 + $0x98] sm:$0xff] }
 0x3b1   : > { %v2361_v1 = vpack.c.bf16 %v2313_v61, %v2311_v11 }
 0x3b2   : > { %v2362_v15 = vpack.c.bf16 %v2314_v51, %v2312_v14 }
 0x3b4   : > { %2657 = vmatprep.mubr.bf16.mxu1 %v2362_v15  ;;  %v2335_v15 = vld [vmem:[#allocation2 + $0xa0] sm:$0xff] }
 0x3b5   : > { %2658 = vmatmul.mubr.bf16.gmra.mrb[60].mxu1 %v2361_v1 }
 0x450   : > { %v2589_v16 = vpop.f32.mrb[32].mxu1 }
 0x451   : > { %v2668_v5 = vadd.f32 %v2589_v16, %v2315_v4  ;;  %v2591_v13 = vpop.f32.mrb[33].mxu1  ;;  %v2336_v4 = vld [vmem:[#allocation2 + $0xa8] sm:$0xff]  ;;  %v2337_v16 = vld [vmem:[#allocation2 + $0xb0] sm:$0xff] }
 0x452   : > { %v2669_v18 = vadd.f32 %v2591_v13, %v2316_v6  ;;  %v2593_v52 = vpop.f32.mrb[34].mxu1  ;;  %v2338_v13 = vld [vmem:[#allocation2 + $0xb8] sm:$0xff] }
 0x453   : > { %2700 = vst [vmem:[#allocation2] sm:$0xff] %v2668_v5  ;;  %v2670_v3 = vadd.f32 %v2593_v52, %v2317_v17  ;;  %v2595_v19 = vpop.f32.mrb[35].mxu1 }
 0x454   : > { %2701 = vst [vmem:[#allocation2 + $0x8] sm:$0xff] %v2669_v18  ;;  %v2671_v20 = vadd.f32 %v2595_v19, %v2318_v2 }
 0x455   : > { %2702 = vst [vmem:[#allocation2 + $0x10] sm:$0xff] %v2670_v3 }
 0x456   : > { %2703 = vst [vmem:[#allocation2 + $0x18] sm:$0xff] %v2671_v20  ;;  %v2339_v20 = vld [vmem:[#allocation2 + $0xc0] sm:$0xff] }
 0x458   : > { %v2599_v23 = vpop.f32.mrb[36].mxu1 }
 0x459   : > { %v2672_v7 = vadd.f32 %v2599_v23, %v2319_v21  ;;  %v2601_v26 = vpop.f32.mrb[37].mxu1  ;;  %v2340_v21 = vld [vmem:[#allocation2 + $0xc8] sm:$0xff]  ;;  %v2341_v23 = vld [vmem:[#allocation2 + $0xd0] sm:$0xff] }
 0x45a   : > { %v2673_v27 = vadd.f32 %v2601_v26, %v2320_v22  ;;  %v2603_v9 = vpop.f32.mrb[38].mxu1  ;;  %v2342_v26 = vld [vmem:[#allocation2 + $0xd8] sm:$0xff] }
 0x45b   : > { %2704 = vst [vmem:[#allocation2 + $0x20] sm:$0xff] %v2672_v7  ;;  %v2674_v28 = vadd.f32 %v2603_v9, %v2321_v24  ;;  %v2605_v62 = vpop.f32.mrb[39].mxu1 }
 0x45c   : > { %2705 = vst [vmem:[#allocation2 + $0x28] sm:$0xff] %v2673_v27  ;;  %v2675_v30 = vadd.f32 %v2605_v62, %v2322_v53 }
 0x45d   : > { %2706 = vst [vmem:[#allocation2 + $0x30] sm:$0xff] %v2674_v28 }
 0x45e   : > { %2707 = vst [vmem:[#allocation2 + $0x38] sm:$0xff] %v2675_v30  ;;  %v2343_v30 = vld [vmem:[#allocation2 + $0xe0] sm:$0xff] }
 0x460   : > { %v2609_v33 = vpop.f32.mrb[40].mxu1 }
 0x461   : > { %v2676_v35 = vadd.f32 %v2609_v33, %v2323_v10  ;;  %v2611_v36 = vpop.f32.mrb[41].mxu1  ;;  %v2344_v10 = vld [vmem:[#allocation2 + $0xe8] sm:$0xff]  ;;  %v2345_v33 = vld [vmem:[#allocation2 + $0xf0] sm:$0xff] }
 0x462   : > { %v2677_v63 = vadd.f32 %v2611_v36, %v2324_v32  ;;  %v2613_v38 = vpop.f32.mrb[42].mxu1  ;;  %v2346_v36 = vld [vmem:[#allocation2 + $0xf8] sm:$0xff] }
 0x463   : > { %2708 = vst [vmem:[#allocation2 + $0x40] sm:$0xff] %v2676_v35  ;;  %v2678_v39 = vadd.f32 %v2613_v38, %v2325_v12  ;;  %v2615_v25 = vpop.f32.mrb[43].mxu1 }
 0x464   : > { %2709 = vst [vmem:[#allocation2 + $0x48] sm:$0xff] %v2677_v63  ;;  %v2679_v40 = vadd.f32 %v2615_v25, %v2326_v37 }
 0x465   : > { %2710 = vst [vmem:[#allocation2 + $0x50] sm:$0xff] %v2678_v39 }
 0x466   : > { %2711 = vst [vmem:[#allocation2 + $0x58] sm:$0xff] %v2679_v40  ;;  %v2736_v40 = vld [vmem:[#allocation2] sm:$0xff] (!%p3354_p6) }
 0x468   : > { %v2619_v29 = vpop.f32.mrb[44].mxu1 }
 0x469   : > { %v2680_v43 = vadd.f32 %v2619_v29, %v2327_v55  ;;  %v2621_v56 = vpop.f32.mrb[45].mxu1  ;;  %v2737_v55 = vld [vmem:[#allocation2 + $0x8] sm:$0xff] (!%p3354_p6) }
 0x46a   : > { %v2681_v44 = vadd.f32 %v2621_v56, %v2328_v41  ;;  %v2623_v45 = vpop.f32.mrb[46].mxu1  ;;  %v2768_v41 = vld [vmem:[%s4561_s8] sm:$0x3] (!%p3354_p6)  ;;  %v2739_v56 = vld [vmem:[#allocation2 + $0x18] sm:$0xff] (!%p3354_p6) }
 0x46b   : > { %2712 = vst [vmem:[#allocation2 + $0x60] sm:$0xff] %v2680_v43  ;;  %v2682_v34 = vadd.f32 %v2623_v45, %v2329_v42  ;;  %v2625_v57 = vpop.f32.mrb[47].mxu1  ;;  %v4458_v29 = vrot.slane (!%p3354_p6), %v2768_v41, %v1328_v59  ;;  %v4462_v42 = vrot.slane (!%p3354_p6), %v2768_v41, %v1332_v0  ;;  %v2738_v43 = vld [vmem:[#allocation2 + $0x10] sm:$0xff] (!%p3354_p6) }
 0x46c   : > { %2713 = vst [vmem:[#allocation2 + $0x68] sm:$0xff] %v2681_v44  ;;  %v2683_v46 = vadd.f32 %v2625_v57, %v2330_v31  ;;  %v2740_v31 = vld [vmem:[#allocation2 + $0x20] sm:$0xff] (!%p3354_p6)  ;;  %v2741_v44 = vld [vmem:[#allocation2 + $0x28] sm:$0xff] (!%p3354_p6)  ;;  %v2742_v45 = vld [vmem:[#allocation2 + $0x30] sm:$0xff] (!%p3354_p6) }
 0x46d   : > { %2714 = vst [vmem:[#allocation2 + $0x70] sm:$0xff] %v2682_v34  ;;  %v2743_v34 = vld [vmem:[#allocation2 + $0x38] sm:$0xff] (!%p3354_p6)  ;;  %v2780_v57 = vadd.f32 (!%p3354_p6), %v4458_v29, %v2736_v40  ;;  %v2784_v59 = vadd.f32 (!%p3354_p6), %v4458_v29, %v2740_v31  ;;  %v2785_v58 = vadd.f32 (!%p3354_p6), %v4462_v42, %v2741_v44  ;;  %v2786_v0 = vadd.f32 (!%p3354_p6), %v4458_v29, %v2742_v45 }
 0x46e   : > { %2715 = vst [vmem:[#allocation2 + $0x78] sm:$0xff] %v2683_v46  ;;  %v2781_v46 = vadd.f32 (!%p3354_p6), %v4462_v42, %v2737_v55 }
 0x470   : > { %v2629_v49 = vpop.f32.mrb[48].mxu1 }
 0x471   : > { %v2684_v47 = vadd.f32 %v2629_v49, %v2331_v48  ;;  %v2631_v8 = vpop.f32.mrb[49].mxu1  ;;  %v2782_v48 = vadd.f32 (!%p3354_p6), %v4458_v29, %v2738_v43  ;;  %v2787_v49 = vadd.f32 (!%p3354_p6), %v4462_v42, %v2743_v34 }
 0x472   : > { %v2685_v11 = vadd.f32 %v2631_v8, %v2332_v54  ;;  %v2633_v61 = vpop.f32.mrb[50].mxu1  ;;  %v2783_v54 = vadd.f32 (!%p3354_p6), %v4462_v42, %v2739_v56  ;;  %v2812_v8 = vmax.f32 (!%p3354_p6), %v2780_v57, 0.0 }
 0x473   : > { %2716 = vst [vmem:[#allocation2 + $0x80] sm:$0xff] %v2684_v47  ;;  %v2686_v14 = vadd.f32 %v2633_v61, %v2333_v50  ;;  %v2635_v51 = vpop.f32.mrb[51].mxu1  ;;  %v2744_v50 = vld [vmem:[#allocation2 + $0x40] sm:$0xff] (!%p3354_p6)  ;;  %v2745_v47 = vld [vmem:[#allocation2 + $0x48] sm:$0xff] (!%p3354_p6) }
 0x474   : > { %2717 = vst [vmem:[#allocation2 + $0x88] sm:$0xff] %v2685_v11  ;;  %v2687_v1 = vadd.f32 %v2635_v51, %v2334_v60  ;;  %v2813_v60 = vmax.f32 (!%p3354_p6), %v2781_v46, 0.0  ;;  %v2814_v11 = vmax.f32 (!%p3354_p6), %v2782_v48, 0.0  ;;  %v2815_v61 = vmax.f32 (!%p3354_p6), %v2783_v54, 0.0  ;;  %v2747_v51 = vld [vmem:[#allocation2 + $0x58] sm:$0xff] (!%p3354_p6) }
 0x475   : > { %2718 = vst [vmem:[#allocation2 + $0x90] sm:$0xff] %v2686_v14  ;;  %v2746_v14 = vld [vmem:[#allocation2 + $0x50] sm:$0xff] (!%p3354_p6) }
 0x476   : > { %2719 = vst [vmem:[#allocation2 + $0x98] sm:$0xff] %v2687_v1  ;;  %v2816_v1 = vmax.f32 (!%p3354_p6), %v2784_v59, 0.0 }
 0x478   : > { %v2639_v6 = vpop.f32.mrb[52].mxu1 }
 0x479   : > { %v2688_v17 = vadd.f32 %v2639_v6, %v2335_v15  ;;  %v2641_v5 = vpop.f32.mrb[53].mxu1  ;;  %v2817_v15 = vmax.f32 (!%p3354_p6), %v2785_v58, 0.0  ;;  %v2819_v6 = vmax.f32 (!%p3354_p6), %v2787_v49, 0.0 }
 0x47a   : > { %v2689_v2 = vadd.f32 %v2641_v5, %v2336_v4  ;;  %v2643_v18 = vpop.f32.mrb[54].mxu1  ;;  %v2818_v4 = vmax.f32 (!%p3354_p6), %v2786_v0, 0.0  ;;  %v3376_v5 = vpack.c.bf16 (!%p3354_p6), %v2813_v60, %v2812_v8 }
 0x47b   : > { %2720 = vst [vmem:[#allocation2 + $0xa0] sm:$0xff] %v2688_v17  ;;  %v2690_v52 = vadd.f32 %v2643_v18, %v2337_v16  ;;  %v2645_v3 = vpop.f32.mrb[55].mxu1  ;;  %v2748_v16 = vld [vmem:[#allocation2 + $0x60] sm:$0xff] (!%p3354_p6)  ;;  %v2749_v17 = vld [vmem:[#allocation2 + $0x68] sm:$0xff] (!%p3354_p6)  ;;  %v2789_v18 = vadd.f32 (!%p3354_p6), %v4462_v42, %v2745_v47 }
 0x47c   : > { %2721 = vst [vmem:[#allocation2 + $0xa8] sm:$0xff] %v2689_v2  ;;  %v2691_v19 = vadd.f32 %v2645_v3, %v2338_v13  ;;  %v3377_v13 = vpack.c.bf16 (!%p3354_p6), %v2815_v61, %v2814_v11  ;;  %v2788_v2 = vadd.f32 (!%p3354_p6), %v4458_v29, %v2744_v50  ;;  %v2751_v3 = vld [vmem:[#allocation2 + $0x78] sm:$0xff] (!%p3354_p6)  ;;  %2940 = vst [vmem:[%s4562_s9] sm:$0xff] (!%p3354_p6), %v3376_v5 }
 0x47d   : > { %2722 = vst [vmem:[#allocation2 + $0xb0] sm:$0xff] %v2690_v52  ;;  %v2750_v52 = vld [vmem:[#allocation2 + $0x70] sm:$0xff] (!%p3354_p6) }
 0x47e   : > { %2723 = vst [vmem:[#allocation2 + $0xb8] sm:$0xff] %v2691_v19  ;;  %v3378_v19 = vpack.c.bf16 (!%p3354_p6), %v2817_v15, %v2816_v1  ;;  %2941 = vst [vmem:[%s4562_s9 + $0x8] sm:$0xff] (!%p3354_p6), %v3377_v13 }
 0x480   : > { %v2649_v22 = vpop.f32.mrb[56].mxu1  ;;  %2942 = vst [vmem:[%s4562_s9 + $0x10] sm:$0xff] (!%p3354_p6), %v3378_v19 }
 0x481   : > { %v2692_v24 = vadd.f32 %v2649_v22, %v2339_v20  ;;  %v2651_v7 = vpop.f32.mrb[57].mxu1  ;;  %v3379_v20 = vpack.c.bf16 (!%p3354_p6), %v2819_v6, %v2818_v4  ;;  %v2791_v22 = vadd.f32 (!%p3354_p6), %v4462_v42, %v2747_v51 }
 0x482   : > { %v2693_v53 = vadd.f32 %v2651_v7, %v2340_v21  ;;  %v2653_v27 = vpop.f32.mrb[58].mxu1  ;;  %v2790_v21 = vadd.f32 (!%p3354_p6), %v4458_v29, %v2746_v14  ;;  %v2821_v7 = vmax.f32 (!%p3354_p6), %v2789_v18, 0.0 }
 0x483   : > { %2724 = vst [vmem:[#allocation2 + $0xc0] sm:$0xff] %v2692_v24  ;;  %v2694_v9 = vadd.f32 %v2653_v27, %v2341_v23  ;;  %v2655_v28 = vpop.f32.mrb[59].mxu1  ;;  %v2752_v23 = vld [vmem:[#allocation2 + $0x80] sm:$0xff] (!%p3354_p6)  ;;  %v2820_v24 = vmax.f32 (!%p3354_p6), %v2788_v2, 0.0  ;;  %v2753_v27 = vld [vmem:[#allocation2 + $0x88] sm:$0xff] (!%p3354_p6)  ;;  %2943 = vst [vmem:[%s4562_s9 + $0x18] sm:$0xff] (!%p3354_p6), %v3379_v20 }
 0x484   : > { %2725 = vst [vmem:[#allocation2 + $0xc8] sm:$0xff] %v2693_v53  ;;  %v2695_v62 = vadd.f32 %v2655_v28, %v2342_v26  ;;  %v2792_v26 = vadd.f32 (!%p3354_p6), %v4458_v29, %v2748_v16  ;;  %v2793_v53 = vadd.f32 (!%p3354_p6), %v4462_v42, %v2749_v17  ;;  %v2823_v28 = vmax.f32 (!%p3354_p6), %v2791_v22, 0.0  ;;  %v2758_v55 = vld [vmem:[#allocation2 + $0xb0] sm:$0xff] (!%p3354_p6) }
 0x485   : > { %2726 = vst [vmem:[#allocation2 + $0xd0] sm:$0xff] %v2694_v9  ;;  %v2822_v9 = vmax.f32 (!%p3354_p6), %v2790_v21, 0.0  ;;  %v2797_v40 = vadd.f32 (!%p3354_p6), %v4462_v42, %v2753_v27  ;;  %v2759_v41 = vld [vmem:[#allocation2 + $0xb8] sm:$0xff] (!%p3354_p6)  ;;  %v2802_v0 = vadd.f32 (!%p3354_p6), %v4458_v29, %v2758_v55 }
 0x486   : > { %2727 = vst [vmem:[#allocation2 + $0xd8] sm:$0xff] %v2695_v62  ;;  %v2794_v62 = vadd.f32 (!%p3354_p6), %v4458_v29, %v2750_v52  ;;  %v2803_v49 = vadd.f32 (!%p3354_p6), %v4462_v42, %v2759_v41 }
 0x487   : > { %v2829_v57 = vmax.f32 (!%p3354_p6), %v2797_v40, 0.0  ;;  %v2834_v15 = vmax.f32 (!%p3354_p6), %v2802_v0, 0.0 }
 0x488   : > { %v2659_v32 = vpop.f32.mrb[60].mxu1  ;;  %2735 = sbr.rel (%p3354_p6) target bundleno = 1181 (0x49d), region = 64  ;;  %v2835_v4 = vmax.f32 (!%p3354_p6), %v2803_v49, 0.0 }
 0x489   : > { %v2696_v12 = vadd.f32 %v2659_v32, %v2343_v30  ;;  %v2661_v35 = vpop.f32.mrb[61].mxu1  ;;  %v2795_v30 = vadd.f32 (!%p3354_p6), %v4462_v42, %v2751_v3  ;;  %v2755_v32 = vld [vmem:[#allocation2 + $0x98] sm:$0xff] (!%p3354_p6) }
 0x48a   : > { %v2697_v37 = vadd.f32 %v2661_v35, %v2344_v10  ;;  %v2663_v63 = vpop.f32.mrb[62].mxu1  ;;  %v2754_v10 = vld [vmem:[#allocation2 + $0x90] sm:$0xff] (!%p3354_p6)  ;;  %v2825_v35 = vmax.f32 (!%p3354_p6), %v2793_v53, 0.0  ;;  %v2799_v44 = vadd.f32 (!%p3354_p6), %v4462_v42, %v2755_v32  ;;  %v2760_v45 = vld [vmem:[#allocation2 + $0xc0] sm:$0xff] (!%p3354_p6)  ;;  %v3387_v52 = vpack.c.bf16 (!%p3354_p6), %v2835_v4, %v2834_v15 }
 0x48b   : > { %2728 = vst [vmem:[#allocation2 + $0xe0] sm:$0xff] %v2696_v12  ;;  %v2698_v38 = vadd.f32 %v2663_v63, %v2345_v33  ;;  %v2665_v39 = vpop.f32.mrb[63].mxu1  ;;  %v3380_v33 = vpack.c.bf16 (!%p3354_p6), %v2821_v7, %v2820_v24  ;;  %v2824_v12 = vmax.f32 (!%p3354_p6), %v2792_v26, 0.0  ;;  %v2757_v63 = vld [vmem:[#allocation2 + $0xa8] sm:$0xff] (!%p3354_p6)  ;;  %v2798_v31 = vadd.f32 (!%p3354_p6), %v4458_v29, %v2754_v10 }
 0x48c   : > { %2729 = vst [vmem:[#allocation2 + $0xe8] sm:$0xff] %v2697_v37  ;;  %v2699_v25 = vadd.f32 %v2665_v39, %v2346_v36  ;;  %v2796_v36 = vadd.f32 (!%p3354_p6), %v4458_v29, %v2752_v23  ;;  %v2756_v37 = vld [vmem:[#allocation2 + $0xa0] sm:$0xff] (!%p3354_p6)  ;;  %v2826_v39 = vmax.f32 (!%p3354_p6), %v2794_v62, 0.0  ;;  %v2801_v48 = vadd.f32 (!%p3354_p6), %v4462_v42, %v2757_v63  ;;  %v2761_v54 = vld [vmem:[#allocation2 + $0xc8] sm:$0xff] (!%p3354_p6)  ;;  %v2762_v50 = vld [vmem:[#allocation2 + $0xd0] sm:$0xff] (!%p3354_p6) }
 0x48d   : > { %2730 = vst [vmem:[#allocation2 + $0xf0] sm:$0xff] %v2698_v38  ;;  %v3381_v38 = vpack.c.bf16 (!%p3354_p6), %v2823_v28, %v2822_v9  ;;  %2944 = vst [vmem:[%s4562_s9 + $0x20] sm:$0xff] (!%p3354_p6), %v3380_v33  ;;  %v3382_v43 = vpack.c.bf16 (!%p3354_p6), %v2825_v35, %v2824_v12  ;;  %v2800_v46 = vadd.f32 (!%p3354_p6), %v4458_v29, %v2756_v37  ;;  %v2830_v59 = vmax.f32 (!%p3354_p6), %v2798_v31, 0.0  ;;  %v2763_v47 = vld [vmem:[#allocation2 + $0xd8] sm:$0xff] (!%p3354_p6) }
 0x48e   : > { %2731 = vst [vmem:[#allocation2 + $0xf8] sm:$0xff] %v2699_v25  ;;  %v2827_v25 = vmax.f32 (!%p3354_p6), %v2795_v30, 0.0  ;;  %v2828_v56 = vmax.f32 (!%p3354_p6), %v2796_v36, 0.0  ;;  %v2831_v58 = vmax.f32 (!%p3354_p6), %v2799_v44, 0.0  ;;  %v2833_v11 = vmax.f32 (!%p3354_p6), %v2801_v48, 0.0  ;;  %2951 = vst [vmem:[%s4562_s9 + $0x58] sm:$0xff] (!%p3354_p6), %v3387_v52 }
 0x48f   : > { %2945 = vst [vmem:[%s4562_s9 + $0x28] sm:$0xff] %v3381_v38  ;;  %2946 = vst [vmem:[%s4562_s9 + $0x30] sm:$0xff] %v3382_v43  ;;  %v2832_v60 = vmax.f32 %v2800_v46, 0.0  ;;  %v2804_v61 = vadd.f32 %v4458_v29, %v2760_v45  ;;  %v2805_v6 = vadd.f32 %v4462_v42, %v2761_v54  ;;  %v2806_v2 = vadd.f32 %v4458_v29, %v2762_v50 }
 0x490   : > { %v3383_v34 = vpack.c.bf16 %v2827_v25, %v2826_v39  ;;  %v3384_v8 = vpack.c.bf16 %v2829_v57, %v2828_v56  ;;  %v3385_v1 = vpack.c.bf16 %v2831_v58, %v2830_v59  ;;  %v2807_v18 = vadd.f32 %v4462_v42, %v2763_v47 }
 0x491   : > { %v3386_v5 = vpack.c.bf16 %v2833_v11, %v2832_v60  ;;  %v2836_v13 = vmax.f32 %v2804_v61, 0.0  ;;  %v2837_v3 = vmax.f32 %v2805_v6, 0.0  ;;  %v2838_v21 = vmax.f32 %v2806_v2, 0.0 }
 0x492   : > { %2947 = vst [vmem:[%s4562_s9 + $0x38] sm:$0xff] %v3383_v34  ;;  %v2764_v14 = vld [vmem:[#allocation2 + $0xe0] sm:$0xff]  ;;  %2948 = vst [vmem:[%s4562_s9 + $0x40] sm:$0xff] %v3384_v8  ;;  %v2839_v22 = vmax.f32 %v2807_v18, 0.0 }
 0x493   : > { %v2765_v51 = vld [vmem:[#allocation2 + $0xe8] sm:$0xff]  ;;  %2949 = vst [vmem:[%s4562_s9 + $0x48] sm:$0xff] %v3385_v1  ;;  %v2808_v19 = vadd.f32 %v4458_v29, %v2764_v14  ;;  %2950 = vst [vmem:[%s4562_s9 + $0x50] sm:$0xff] %v3386_v5  ;;  %v3388_v7 = vpack.c.bf16 %v2837_v3, %v2836_v13 }
 0x494   : > { %v2766_v16 = vld [vmem:[#allocation2 + $0xf0] sm:$0xff]  ;;  %v2809_v20 = vadd.f32 %v4462_v42, %v2765_v51  ;;  %v3389_v27 = vpack.c.bf16 %v2839_v22, %v2838_v21 }
 0x495   : > { %v2767_v17 = vld [vmem:[#allocation2 + $0xf8] sm:$0xff]  ;;  %v2810_v23 = vadd.f32 %v4458_v29, %v2766_v16  ;;  %v2840_v26 = vmax.f32 %v2808_v19, 0.0  ;;  %2952 = vst [vmem:[%s4562_s9 + $0x60] sm:$0xff] %v3388_v7 }
 0x496   : > { %v2811_v24 = vadd.f32 %v4462_v42, %v2767_v17  ;;  %v2841_v53 = vmax.f32 %v2809_v20, 0.0  ;;  %2953 = vst [vmem:[%s4562_s9 + $0x68] sm:$0xff] %v3389_v27 }
 0x497   : > { %v2842_v9 = vmax.f32 %v2810_v23, 0.0 }
 0x498   : > { %v2843_v28 = vmax.f32 %v2811_v24, 0.0  ;;  %v3390_v62 = vpack.c.bf16 %v2841_v53, %v2840_v26 }
 0x49a   : > { %v3391_v29 = vpack.c.bf16 %v2843_v28, %v2842_v9  ;;  %2954 = vst [vmem:[%s4562_s9 + $0x70] sm:$0xff] %v3390_v62 }
 0x49c   : > { %2955 = vst [vmem:[%s4562_s9 + $0x78] sm:$0xff] %v3391_v29 }
 0x49d PF: > { %s19_s11 = sadd.s32 1, %s3874_s11   ;;  %s4563_s30 = smov %s3870_s10 }
 0x49e   : > { %p16_p7 = scmp.ge.s32.totalorder %s19_s11, 5   ;;  %s4564_s10 = smov %s4566_s12 }
 0x4a0   :  { %18 = sbr.rel (!%p16_p7) target bundleno = 2 (0x2), region = 112 }

// kernel: deeplab_forward.6
= control target key start
LH: loop header
LB: loop body
LE: loop exit
PB: predicated region body
PF: predicated region fallthrough
CT: control target
= control target key end

     0   :  { %s6289_s12 = smov 0   ;;  %s6291_s13 = smov 0   ;;  %s7312_s0 = inlined_call_operand.vmem [shape: bf16[512,2816], index: 0, kind: input, shape index: {}]   ;;  %s7313_s1 = inlined_call_operand.vmem [shape: bf16[2816,256], index: 1, kind: input, shape index: {}]   ;;  %s7314_s2 = inlined_call_operand.vmem [shape: f32[1,256], index: 2, kind: input, shape index: {}]   ;;  %s7315_s3 = inlined_call_operand.vmem [shape: bf16[512,256], index: 3, kind: output, shape index: {}]  }
   0x1   :  { %s6293_s14 = smov 0   ;;  %s6295_s15 = smov 0  }
   0x2   :  { %s6297_s16 = smov 0   ;;  %s6299_s17 = smov 0  }
   0x3   :  { %s6301_s18 = smov 0  }
   0x4 LB: > { %s25_s19 = sadd.s32 1, %s6257_s16  ;;  %s32_s20 = sadd.s32 1, %s6261_s17  ;;  %s6265_s18 = sphi %s6301_s18, %s13_s18   ;;  %s6261_s17 = sphi %s6299_s17, %s7321_s17   ;;  %s6257_s16 = sphi %s6297_s16, %s7320_s16   ;;  %s6253_s15 = sphi %s6295_s15, %s7319_s15   ;;  %s6249_s14 = sphi %s6293_s14, %s7318_s14   ;;  %s6245_s13 = sphi %s6291_s13, %s7317_s13   ;;  %s6241_s12 = sphi %s6289_s12, %s7316_s12  }
   0x5   : > { %p26_p0 = scmp.ge.s32.totalorder %s25_s19, 2  ;;  %p48_p1 = scmp.ne.s32.totalorder %s6245_s13, %s6241_s12 }
   0x6   : > { %p49_p2 = scmp.eq.s32.totalorder %s6265_s18, 0  ;;  %s41_s24 = sadd.s32 1, %s6245_s13 }
   0x7   : > { %s7323_s19 = smov (%p26_p0, %s25_s19), 0  ;;  %s7325_s20 = smov (!%p26_p0, %s32_s20), %s6261_s17 }
   0x8   : > { %p50_p3 = por %p49_p2, %p48_p1  ;;  %p34_p4 = scmp.ge.s32.totalorder %s7325_s20, 2 }
   0x9   : > { %s37_s21 = ssub.s32 %s6257_s16, %s7323_s19  ;;  %p4814_p6 = scmp.ge.s32.totalorder %s6265_s18, 4 }
   0xa   : > { %s7327_s20 = smov (%p34_p4, %s7325_s20), 0 }
   0xb   : > { %s36_s22 = ssub.s32 %s6261_s17, %s7327_s20  ;;  %164 = sbr.rel (%p4814_p6) target bundleno = 128 (0x80), region = 20 }
   0xc   : > { %s38_s23 = sor.u32 %s37_s21, %s36_s22 }
   0xd   : > { %p39_p5 = scmp.eq.s32.totalorder %s38_s23, 0 }
   0xf   : > { %s6340_s25 = scalar_select %p39_p5, %s6245_s13, %s41_s24  }
  0x12   : > { %167 = sbr.rel (!%p50_p3) target bundleno = 128 (0x80), region = 24  ;;  %s169_s26 = sand.u32 (%p50_p3), 1, %s6245_s13  }
  0x13   : > { %s173_s27 = smul.u32 (%p50_p3), 11, %s6257_s16 }
  0x14   : > { %s5630_s28 = smul.u32 (%p50_p3), 1408, %s169_s26 }
  0x15   : > { %s5631_s29 = smul.u32 (%p50_p3), 704, %s6261_s17 }
  0x16   : > { %s6354_s8 = scalar_lea.vmem (%p50_p3), [#allocation3], %s5630_s28 }
  0x17   : > { %s175_s30 = sadd.s32 (%p50_p3), %s5631_s29, %s173_s27 }
  0x18   : > { %s4817_s4 = sshll.u32 (%p50_p3), %s175_s30, 2 }
  0x19   : > { %s6349_s7 = scalar_lea.vmem %s7312_s0, %s4817_s4 }
  0x1a   : > { %v192_v0 = vld [vmem:[%s6349_s7] sm:$0xff]  ;;  %v194_v1 = vld [vmem:[%s6349_s7 + $0x8] sm:$0xff]  ;;  %v196_v2 = vld [vmem:[%s6349_s7 + $0x10] sm:$0xff] }
  0x1b   : > { %193 = vst [vmem:[%s6354_s8] sm:$0xff] %v192_v0  ;;  %195 = vst [vmem:[%s6354_s8 + $0x8] sm:$0xff] %v194_v1  ;;  %v198_v3 = vld [vmem:[%s6349_s7 + $0x18] sm:$0xff]  ;;  %v200_v4 = vld [vmem:[%s6349_s7 + $0x20] sm:$0xff] }
  0x1c   : > { %197 = vst [vmem:[%s6354_s8 + $0x10] sm:$0xff] %v196_v2  ;;  %v202_v5 = vld [vmem:[%s6349_s7 + $0x58] sm:$0xff]  ;;  %199 = vst [vmem:[%s6354_s8 + $0x18] sm:$0xff] %v198_v3  ;;  %v204_v6 = vld [vmem:[%s6349_s7 + $0x60] sm:$0xff] }
  0x1d   : > { %201 = vst [vmem:[%s6354_s8 + $0x20] sm:$0xff] %v200_v4  ;;  %203 = vst [vmem:[%s6354_s8 + $0x2c] sm:$0xff] %v202_v5  ;;  %v206_v7 = vld [vmem:[%s6349_s7 + $0x68] sm:$0xff]  ;;  %v208_v8 = vld [vmem:[%s6349_s7 + $0x70] sm:$0xff] }
  0x1e   : > { %205 = vst [vmem:[%s6354_s8 + $0x34] sm:$0xff] %v204_v6  ;;  %207 = vst [vmem:[%s6354_s8 + $0x3c] sm:$0xff] %v206_v7  ;;  %v210_v9 = vld [vmem:[%s6349_s7 + $0x78] sm:$0xff]  ;;  %v212_v10 = vld [vmem:[%s6349_s7 + $0xb0] sm:$0xff] }
  0x1f   : > { %209 = vst [vmem:[%s6354_s8 + $0x44] sm:$0xff] %v208_v8  ;;  %v214_v11 = vld [vmem:[%s6349_s7 + $0xb8] sm:$0xff]  ;;  %211 = vst [vmem:[%s6354_s8 + $0x4c] sm:$0xff] %v210_v9  ;;  %v216_v12 = vld [vmem:[%s6349_s7 + $0xc0] sm:$0xff] }
  0x20   : > { %213 = vst [vmem:[%s6354_s8 + $0x58] sm:$0xff] %v212_v10  ;;  %215 = vst [vmem:[%s6354_s8 + $0x60] sm:$0xff] %v214_v11  ;;  %v218_v13 = vld [vmem:[%s6349_s7 + $0xc8] sm:$0xff]  ;;  %v220_v14 = vld [vmem:[%s6349_s7 + $0xd0] sm:$0xff] }
  0x21   : > { %217 = vst [vmem:[%s6354_s8 + $0x68] sm:$0xff] %v216_v12  ;;  %219 = vst [vmem:[%s6354_s8 + $0x70] sm:$0xff] %v218_v13  ;;  %v222_v15 = vld [vmem:[%s6349_s7 + $0x108] sm:$0xff]  ;;  %v224_v16 = vld [vmem:[%s6349_s7 + $0x110] sm:$0xff] }
  0x22   : > { %221 = vst [vmem:[%s6354_s8 + $0x78] sm:$0xff] %v220_v14  ;;  %v226_v17 = vld [vmem:[%s6349_s7 + $0x118] sm:$0xff]  ;;  %223 = vst [vmem:[%s6354_s8 + $0x84] sm:$0xff] %v222_v15  ;;  %v228_v18 = vld [vmem:[%s6349_s7 + $0x120] sm:$0xff] }
  0x23   : > { %225 = vst [vmem:[%s6354_s8 + $0x8c] sm:$0xff] %v224_v16  ;;  %227 = vst [vmem:[%s6354_s8 + $0x94] sm:$0xff] %v226_v17  ;;  %v230_v19 = vld [vmem:[%s6349_s7 + $0x128] sm:$0xff]  ;;  %v232_v20 = vld [vmem:[%s6349_s7 + $0x160] sm:$0xff] }
  0x24   : > { %229 = vst [vmem:[%s6354_s8 + $0x9c] sm:$0xff] %v228_v18  ;;  %231 = vst [vmem:[%s6354_s8 + $0xa4] sm:$0xff] %v230_v19  ;;  %v234_v21 = vld [vmem:[%s6349_s7 + $0x168] sm:$0xff]  ;;  %v236_v22 = vld [vmem:[%s6349_s7 + $0x170] sm:$0xff] }
  0x25   : > { %233 = vst [vmem:[%s6354_s8 + $0xb0] sm:$0xff] %v232_v20  ;;  %v238_v23 = vld [vmem:[%s6349_s7 + $0x178] sm:$0xff]  ;;  %235 = vst [vmem:[%s6354_s8 + $0xb8] sm:$0xff] %v234_v21  ;;  %v240_v24 = vld [vmem:[%s6349_s7 + $0x180] sm:$0xff] }
  0x26   : > { %237 = vst [vmem:[%s6354_s8 + $0xc0] sm:$0xff] %v236_v22  ;;  %239 = vst [vmem:[%s6354_s8 + $0xc8] sm:$0xff] %v238_v23  ;;  %v242_v25 = vld [vmem:[%s6349_s7 + $0x1b8] sm:$0xff]  ;;  %v244_v26 = vld [vmem:[%s6349_s7 + $0x1c0] sm:$0xff] }
  0x27   : > { %241 = vst [vmem:[%s6354_s8 + $0xd0] sm:$0xff] %v240_v24  ;;  %243 = vst [vmem:[%s6354_s8 + $0xdc] sm:$0xff] %v242_v25  ;;  %v246_v27 = vld [vmem:[%s6349_s7 + $0x1c8] sm:$0xff]  ;;  %v248_v28 = vld [vmem:[%s6349_s7 + $0x1d0] sm:$0xff] }
  0x28   : > { %245 = vst [vmem:[%s6354_s8 + $0xe4] sm:$0xff] %v244_v26  ;;  %v250_v29 = vld [vmem:[%s6349_s7 + $0x1d8] sm:$0xff]  ;;  %247 = vst [vmem:[%s6354_s8 + $0xec] sm:$0xff] %v246_v27  ;;  %v252_v30 = vld [vmem:[%s6349_s7 + $0x210] sm:$0xff] }
  0x29   : > { %249 = vst [vmem:[%s6354_s8 + $0xf4] sm:$0xff] %v248_v28  ;;  %251 = vst [vmem:[%s6354_s8 + $0xfc] sm:$0xff] %v250_v29  ;;  %v254_v31 = vld [vmem:[%s6349_s7 + $0x218] sm:$0xff]  ;;  %v256_v32 = vld [vmem:[%s6349_s7 + $0x220] sm:$0xff] }
  0x2a   : > { %253 = vst [vmem:[%s6354_s8 + $0x108] sm:$0xff] %v252_v30  ;;  %255 = vst [vmem:[%s6354_s8 + $0x110] sm:$0xff] %v254_v31  ;;  %v258_v33 = vld [vmem:[%s6349_s7 + $0x228] sm:$0xff]  ;;  %v260_v34 = vld [vmem:[%s6349_s7 + $0x230] sm:$0xff] }
  0x2b   : > { %257 = vst [vmem:[%s6354_s8 + $0x118] sm:$0xff] %v256_v32  ;;  %v262_v35 = vld [vmem:[%s6349_s7 + $0x268] sm:$0xff]  ;;  %259 = vst [vmem:[%s6354_s8 + $0x120] sm:$0xff] %v258_v33  ;;  %v264_v36 = vld [vmem:[%s6349_s7 + $0x270] sm:$0xff] }
  0x2c   : > { %261 = vst [vmem:[%s6354_s8 + $0x128] sm:$0xff] %v260_v34  ;;  %263 = vst [vmem:[%s6354_s8 + $0x134] sm:$0xff] %v262_v35  ;;  %v266_v37 = vld [vmem:[%s6349_s7 + $0x278] sm:$0xff]  ;;  %v268_v38 = vld [vmem:[%s6349_s7 + $0x280] sm:$0xff] }
  0x2d   : > { %265 = vst [vmem:[%s6354_s8 + $0x13c] sm:$0xff] %v264_v36  ;;  %267 = vst [vmem:[%s6354_s8 + $0x144] sm:$0xff] %v266_v37  ;;  %v270_v39 = vld [vmem:[%s6349_s7 + $0x288] sm:$0xff]  ;;  %v272_v40 = vld [vmem:[%s6349_s7 + $0x2c0] sm:$0xff] }
  0x2e   : > { %269 = vst [vmem:[%s6354_s8 + $0x14c] sm:$0xff] %v268_v38  ;;  %v274_v41 = vld [vmem:[%s6349_s7 + $0x2c8] sm:$0xff]  ;;  %271 = vst [vmem:[%s6354_s8 + $0x154] sm:$0xff] %v270_v39  ;;  %v276_v42 = vld [vmem:[%s6349_s7 + $0x2d0] sm:$0xff] }
  0x2f   : > { %273 = vst [vmem:[%s6354_s8 + $0x160] sm:$0xff] %v272_v40  ;;  %275 = vst [vmem:[%s6354_s8 + $0x168] sm:$0xff] %v274_v41  ;;  %v278_v43 = vld [vmem:[%s6349_s7 + $0x2d8] sm:$0xff]  ;;  %v280_v44 = vld [vmem:[%s6349_s7 + $0x2e0] sm:$0xff] }
  0x30   : > { %277 = vst [vmem:[%s6354_s8 + $0x170] sm:$0xff] %v276_v42  ;;  %279 = vst [vmem:[%s6354_s8 + $0x178] sm:$0xff] %v278_v43  ;;  %v282_v45 = vld [vmem:[%s6349_s7 + $0x318] sm:$0xff]  ;;  %v284_v46 = vld [vmem:[%s6349_s7 + $0x320] sm:$0xff] }
  0x31   : > { %281 = vst [vmem:[%s6354_s8 + $0x180] sm:$0xff] %v280_v44  ;;  %v286_v47 = vld [vmem:[%s6349_s7 + $0x328] sm:$0xff]  ;;  %283 = vst [vmem:[%s6354_s8 + $0x18c] sm:$0xff] %v282_v45  ;;  %v288_v48 = vld [vmem:[%s6349_s7 + $0x330] sm:$0xff] }
  0x32   : > { %285 = vst [vmem:[%s6354_s8 + $0x194] sm:$0xff] %v284_v46  ;;  %287 = vst [vmem:[%s6354_s8 + $0x19c] sm:$0xff] %v286_v47  ;;  %v290_v49 = vld [vmem:[%s6349_s7 + $0x338] sm:$0xff]  ;;  %v292_v50 = vld [vmem:[%s6349_s7 + $0x370] sm:$0xff] }
  0x33   : > { %289 = vst [vmem:[%s6354_s8 + $0x1a4] sm:$0xff] %v288_v48  ;;  %291 = vst [vmem:[%s6354_s8 + $0x1ac] sm:$0xff] %v290_v49  ;;  %v294_v51 = vld [vmem:[%s6349_s7 + $0x378] sm:$0xff]  ;;  %v296_v52 = vld [vmem:[%s6349_s7 + $0x380] sm:$0xff] }
  0x34   : > { %293 = vst [vmem:[%s6354_s8 + $0x1b8] sm:$0xff] %v292_v50  ;;  %v298_v53 = vld [vmem:[%s6349_s7 + $0x388] sm:$0xff]  ;;  %295 = vst [vmem:[%s6354_s8 + $0x1c0] sm:$0xff] %v294_v51  ;;  %v300_v54 = vld [vmem:[%s6349_s7 + $0x390] sm:$0xff] }
  0x35   : > { %297 = vst [vmem:[%s6354_s8 + $0x1c8] sm:$0xff] %v296_v52  ;;  %299 = vst [vmem:[%s6354_s8 + $0x1d0] sm:$0xff] %v298_v53  ;;  %v302_v55 = vld [vmem:[%s6349_s7 + $0x3c8] sm:$0xff]  ;;  %v304_v56 = vld [vmem:[%s6349_s7 + $0x3d0] sm:$0xff] }
  0x36   : > { %301 = vst [vmem:[%s6354_s8 + $0x1d8] sm:$0xff] %v300_v54  ;;  %303 = vst [vmem:[%s6354_s8 + $0x1e4] sm:$0xff] %v302_v55  ;;  %v306_v57 = vld [vmem:[%s6349_s7 + $0x3d8] sm:$0xff]  ;;  %v308_v58 = vld [vmem:[%s6349_s7 + $0x3e0] sm:$0xff] }
  0x37   : > { %305 = vst [vmem:[%s6354_s8 + $0x1ec] sm:$0xff] %v304_v56  ;;  %v310_v59 = vld [vmem:[%s6349_s7 + $0x3e8] sm:$0xff]  ;;  %307 = vst [vmem:[%s6354_s8 + $0x1f4] sm:$0xff] %v306_v57  ;;  %v312_v60 = vld [vmem:[%s6349_s7 + $0x420] sm:$0xff] }
  0x38   : > { %309 = vst [vmem:[%s6354_s8 + $0x1fc] sm:$0xff] %v308_v58  ;;  %311 = vst [vmem:[%s6354_s8 + $0x204] sm:$0xff] %v310_v59  ;;  %v314_v61 = vld [vmem:[%s6349_s7 + $0x428] sm:$0xff]  ;;  %v316_v62 = vld [vmem:[%s6349_s7 + $0x430] sm:$0xff] }
  0x39   : > { %313 = vst [vmem:[%s6354_s8 + $0x210] sm:$0xff] %v312_v60  ;;  %315 = vst [vmem:[%s6354_s8 + $0x218] sm:$0xff] %v314_v61  ;;  %v318_v63 = vld [vmem:[%s6349_s7 + $0x438] sm:$0xff]  ;;  %v320_v0 = vld [vmem:[%s6349_s7 + $0x440] sm:$0xff] }
  0x3a   : > { %317 = vst [vmem:[%s6354_s8 + $0x220] sm:$0xff] %v316_v62  ;;  %v322_v1 = vld [vmem:[%s6349_s7 + $0x478] sm:$0xff]  ;;  %319 = vst [vmem:[%s6354_s8 + $0x228] sm:$0xff] %v318_v63  ;;  %v324_v2 = vld [vmem:[%s6349_s7 + $0x480] sm:$0xff] }
  0x3b   : > { %321 = vst [vmem:[%s6354_s8 + $0x230] sm:$0xff] %v320_v0  ;;  %323 = vst [vmem:[%s6354_s8 + $0x23c] sm:$0xff] %v322_v1  ;;  %v326_v3 = vld [vmem:[%s6349_s7 + $0x488] sm:$0xff]  ;;  %v328_v4 = vld [vmem:[%s6349_s7 + $0x490] sm:$0xff] }
  0x3c   : > { %325 = vst [vmem:[%s6354_s8 + $0x244] sm:$0xff] %v324_v2  ;;  %327 = vst [vmem:[%s6354_s8 + $0x24c] sm:$0xff] %v326_v3  ;;  %v330_v5 = vld [vmem:[%s6349_s7 + $0x498] sm:$0xff]  ;;  %v332_v6 = vld [vmem:[%s6349_s7 + $0x4d0] sm:$0xff] }
  0x3d   : > { %329 = vst [vmem:[%s6354_s8 + $0x254] sm:$0xff] %v328_v4  ;;  %v334_v7 = vld [vmem:[%s6349_s7 + $0x4d8] sm:$0xff]  ;;  %331 = vst [vmem:[%s6354_s8 + $0x25c] sm:$0xff] %v330_v5  ;;  %v336_v8 = vld [vmem:[%s6349_s7 + $0x4e0] sm:$0xff] }
  0x3e   : > { %333 = vst [vmem:[%s6354_s8 + $0x268] sm:$0xff] %v332_v6  ;;  %335 = vst [vmem:[%s6354_s8 + $0x270] sm:$0xff] %v334_v7  ;;  %v338_v9 = vld [vmem:[%s6349_s7 + $0x4e8] sm:$0xff]  ;;  %v340_v10 = vld [vmem:[%s6349_s7 + $0x4f0] sm:$0xff] }
  0x3f   : > { %337 = vst [vmem:[%s6354_s8 + $0x278] sm:$0xff] %v336_v8  ;;  %339 = vst [vmem:[%s6354_s8 + $0x280] sm:$0xff] %v338_v9  ;;  %v342_v11 = vld [vmem:[%s6349_s7 + $0x528] sm:$0xff]  ;;  %v344_v12 = vld [vmem:[%s6349_s7 + $0x530] sm:$0xff] }
  0x40   : > { %341 = vst [vmem:[%s6354_s8 + $0x288] sm:$0xff] %v340_v10  ;;  %v346_v13 = vld [vmem:[%s6349_s7 + $0x538] sm:$0xff]  ;;  %343 = vst [vmem:[%s6354_s8 + $0x294] sm:$0xff] %v342_v11  ;;  %v348_v14 = vld [vmem:[%s6349_s7 + $0x540] sm:$0xff] }
  0x41   : > { %345 = vst [vmem:[%s6354_s8 + $0x29c] sm:$0xff] %v344_v12  ;;  %347 = vst [vmem:[%s6354_s8 + $0x2a4] sm:$0xff] %v346_v13  ;;  %v350_v15 = vld [vmem:[%s6349_s7 + $0x548] sm:$0xff]  ;;  %v352_v16 = vld [vmem:[%s6349_s7 + $0x580] sm:$0xff] }
  0x42   : > { %349 = vst [vmem:[%s6354_s8 + $0x2ac] sm:$0xff] %v348_v14  ;;  %351 = vst [vmem:[%s6354_s8 + $0x2b4] sm:$0xff] %v350_v15  ;;  %v354_v17 = vld [vmem:[%s6349_s7 + $0x588] sm:$0xff]  ;;  %v356_v18 = vld [vmem:[%s6349_s7 + $0x590] sm:$0xff] }
  0x43   : > { %353 = vst [vmem:[%s6354_s8 + $0x2c0] sm:$0xff] %v352_v16  ;;  %v358_v19 = vld [vmem:[%s6349_s7 + $0x598] sm:$0xff]  ;;  %355 = vst [vmem:[%s6354_s8 + $0x2c8] sm:$0xff] %v354_v17  ;;  %v360_v20 = vld [vmem:[%s6349_s7 + $0x5a0] sm:$0xff] }
  0x44   : > { %357 = vst [vmem:[%s6354_s8 + $0x2d0] sm:$0xff] %v356_v18  ;;  %359 = vst [vmem:[%s6354_s8 + $0x2d8] sm:$0xff] %v358_v19  ;;  %v362_v21 = vld [vmem:[%s6349_s7 + $0x5d8] sm:$0xff]  ;;  %v364_v22 = vld [vmem:[%s6349_s7 + $0x5e0] sm:$0xff] }
  0x45   : > { %361 = vst [vmem:[%s6354_s8 + $0x2e0] sm:$0xff] %v360_v20  ;;  %363 = vst [vmem:[%s6354_s8 + $0x2ec] sm:$0xff] %v362_v21  ;;  %v366_v23 = vld [vmem:[%s6349_s7 + $0x5e8] sm:$0xff]  ;;  %v368_v24 = vld [vmem:[%s6349_s7 + $0x5f0] sm:$0xff] }
  0x46   : > { %365 = vst [vmem:[%s6354_s8 + $0x2f4] sm:$0xff] %v364_v22  ;;  %v370_v25 = vld [vmem:[%s6349_s7 + $0x5f8] sm:$0xff]  ;;  %367 = vst [vmem:[%s6354_s8 + $0x2fc] sm:$0xff] %v366_v23  ;;  %v372_v26 = vld [vmem:[%s6349_s7 + $0x630] sm:$0xff] }
  0x47   : > { %369 = vst [vmem:[%s6354_s8 + $0x304] sm:$0xff] %v368_v24  ;;  %371 = vst [vmem:[%s6354_s8 + $0x30c] sm:$0xff] %v370_v25  ;;  %v374_v27 = vld [vmem:[%s6349_s7 + $0x638] sm:$0xff]  ;;  %v376_v28 = vld [vmem:[%s6349_s7 + $0x640] sm:$0xff] }
  0x48   : > { %373 = vst [vmem:[%s6354_s8 + $0x318] sm:$0xff] %v372_v26  ;;  %375 = vst [vmem:[%s6354_s8 + $0x320] sm:$0xff] %v374_v27  ;;  %v378_v29 = vld [vmem:[%s6349_s7 + $0x648] sm:$0xff]  ;;  %v380_v30 = vld [vmem:[%s6349_s7 + $0x650] sm:$0xff] }
  0x49   : > { %377 = vst [vmem:[%s6354_s8 + $0x328] sm:$0xff] %v376_v28  ;;  %v382_v31 = vld [vmem:[%s6349_s7 + $0x688] sm:$0xff]  ;;  %379 = vst [vmem:[%s6354_s8 + $0x330] sm:$0xff] %v378_v29  ;;  %v384_v32 = vld [vmem:[%s6349_s7 + $0x690] sm:$0xff] }
  0x4a   : > { %381 = vst [vmem:[%s6354_s8 + $0x338] sm:$0xff] %v380_v30  ;;  %383 = vst [vmem:[%s6354_s8 + $0x344] sm:$0xff] %v382_v31  ;;  %v386_v33 = vld [vmem:[%s6349_s7 + $0x698] sm:$0xff]  ;;  %v388_v34 = vld [vmem:[%s6349_s7 + $0x6a0] sm:$0xff] }
  0x4b   : > { %385 = vst [vmem:[%s6354_s8 + $0x34c] sm:$0xff] %v384_v32  ;;  %387 = vst [vmem:[%s6354_s8 + $0x354] sm:$0xff] %v386_v33  ;;  %v390_v35 = vld [vmem:[%s6349_s7 + $0x6a8] sm:$0xff]  ;;  %v392_v36 = vld [vmem:[%s6349_s7 + $0x6e0] sm:$0xff] }
  0x4c   : > { %389 = vst [vmem:[%s6354_s8 + $0x35c] sm:$0xff] %v388_v34  ;;  %v394_v37 = vld [vmem:[%s6349_s7 + $0x6e8] sm:$0xff]  ;;  %391 = vst [vmem:[%s6354_s8 + $0x364] sm:$0xff] %v390_v35  ;;  %v396_v38 = vld [vmem:[%s6349_s7 + $0x6f0] sm:$0xff] }
  0x4d   : > { %393 = vst [vmem:[%s6354_s8 + $0x370] sm:$0xff] %v392_v36  ;;  %395 = vst [vmem:[%s6354_s8 + $0x378] sm:$0xff] %v394_v37  ;;  %v398_v39 = vld [vmem:[%s6349_s7 + $0x6f8] sm:$0xff]  ;;  %v400_v40 = vld [vmem:[%s6349_s7 + $0x700] sm:$0xff] }
  0x4e   : > { %397 = vst [vmem:[%s6354_s8 + $0x380] sm:$0xff] %v396_v38  ;;  %399 = vst [vmem:[%s6354_s8 + $0x388] sm:$0xff] %v398_v39  ;;  %v402_v41 = vld [vmem:[%s6349_s7 + $0x738] sm:$0xff]  ;;  %v404_v42 = vld [vmem:[%s6349_s7 + $0x740] sm:$0xff] }
  0x4f   : > { %401 = vst [vmem:[%s6354_s8 + $0x390] sm:$0xff] %v400_v40  ;;  %v406_v43 = vld [vmem:[%s6349_s7 + $0x748] sm:$0xff]  ;;  %403 = vst [vmem:[%s6354_s8 + $0x39c] sm:$0xff] %v402_v41  ;;  %v408_v44 = vld [vmem:[%s6349_s7 + $0x750] sm:$0xff] }
  0x50   : > { %405 = vst [vmem:[%s6354_s8 + $0x3a4] sm:$0xff] %v404_v42  ;;  %407 = vst [vmem:[%s6354_s8 + $0x3ac] sm:$0xff] %v406_v43  ;;  %v410_v45 = vld [vmem:[%s6349_s7 + $0x758] sm:$0xff]  ;;  %v412_v46 = vld [vmem:[%s6349_s7 + $0x790] sm:$0xff] }
  0x51   : > { %409 = vst [vmem:[%s6354_s8 + $0x3b4] sm:$0xff] %v408_v44  ;;  %411 = vst [vmem:[%s6354_s8 + $0x3bc] sm:$0xff] %v410_v45  ;;  %v414_v47 = vld [vmem:[%s6349_s7 + $0x798] sm:$0xff]  ;;  %v416_v48 = vld [vmem:[%s6349_s7 + $0x7a0] sm:$0xff] }
  0x52   : > { %413 = vst [vmem:[%s6354_s8 + $0x3c8] sm:$0xff] %v412_v46  ;;  %v418_v49 = vld [vmem:[%s6349_s7 + $0x7a8] sm:$0xff]  ;;  %415 = vst [vmem:[%s6354_s8 + $0x3d0] sm:$0xff] %v414_v47  ;;  %v420_v50 = vld [vmem:[%s6349_s7 + $0x7b0] sm:$0xff] }
  0x53   : > { %417 = vst [vmem:[%s6354_s8 + $0x3d8] sm:$0xff] %v416_v48  ;;  %419 = vst [vmem:[%s6354_s8 + $0x3e0] sm:$0xff] %v418_v49  ;;  %v422_v51 = vld [vmem:[%s6349_s7 + $0x7e8] sm:$0xff]  ;;  %v424_v52 = vld [vmem:[%s6349_s7 + $0x7f0] sm:$0xff] }
  0x54   : > { %421 = vst [vmem:[%s6354_s8 + $0x3e8] sm:$0xff] %v420_v50  ;;  %423 = vst [vmem:[%s6354_s8 + $0x3f4] sm:$0xff] %v422_v51  ;;  %v426_v53 = vld [vmem:[%s6349_s7 + $0x7f8] sm:$0xff]  ;;  %v428_v54 = vld [vmem:[%s6349_s7 + $0x800] sm:$0xff] }
  0x55   : > { %425 = vst [vmem:[%s6354_s8 + $0x3fc] sm:$0xff] %v424_v52  ;;  %v430_v55 = vld [vmem:[%s6349_s7 + $0x808] sm:$0xff]  ;;  %427 = vst [vmem:[%s6354_s8 + $0x404] sm:$0xff] %v426_v53  ;;  %v432_v56 = vld [vmem:[%s6349_s7 + $0x840] sm:$0xff] }
  0x56   : > { %429 = vst [vmem:[%s6354_s8 + $0x40c] sm:$0xff] %v428_v54  ;;  %431 = vst [vmem:[%s6354_s8 + $0x414] sm:$0xff] %v430_v55  ;;  %v434_v57 = vld [vmem:[%s6349_s7 + $0x848] sm:$0xff]  ;;  %v436_v58 = vld [vmem:[%s6349_s7 + $0x850] sm:$0xff] }
  0x57   : > { %433 = vst [vmem:[%s6354_s8 + $0x420] sm:$0xff] %v432_v56  ;;  %435 = vst [vmem:[%s6354_s8 + $0x428] sm:$0xff] %v434_v57  ;;  %v438_v59 = vld [vmem:[%s6349_s7 + $0x858] sm:$0xff]  ;;  %v440_v60 = vld [vmem:[%s6349_s7 + $0x860] sm:$0xff] }
  0x58   : > { %437 = vst [vmem:[%s6354_s8 + $0x430] sm:$0xff] %v436_v58  ;;  %v442_v61 = vld [vmem:[%s6349_s7 + $0x898] sm:$0xff]  ;;  %439 = vst [vmem:[%s6354_s8 + $0x438] sm:$0xff] %v438_v59  ;;  %v444_v62 = vld [vmem:[%s6349_s7 + $0x8a0] sm:$0xff] }
  0x59   : > { %441 = vst [vmem:[%s6354_s8 + $0x440] sm:$0xff] %v440_v60  ;;  %443 = vst [vmem:[%s6354_s8 + $0x44c] sm:$0xff] %v442_v61  ;;  %v446_v63 = vld [vmem:[%s6349_s7 + $0x8a8] sm:$0xff]  ;;  %v448_v0 = vld [vmem:[%s6349_s7 + $0x8b0] sm:$0xff] }
  0x5a   : > { %445 = vst [vmem:[%s6354_s8 + $0x454] sm:$0xff] %v444_v62  ;;  %447 = vst [vmem:[%s6354_s8 + $0x45c] sm:$0xff] %v446_v63  ;;  %v450_v1 = vld [vmem:[%s6349_s7 + $0x8b8] sm:$0xff]  ;;  %v452_v2 = vld [vmem:[%s6349_s7 + $0x8f0] sm:$0xff] }
  0x5b   : > { %449 = vst [vmem:[%s6354_s8 + $0x464] sm:$0xff] %v448_v0  ;;  %v454_v3 = vld [vmem:[%s6349_s7 + $0x8f8] sm:$0xff]  ;;  %451 = vst [vmem:[%s6354_s8 + $0x46c] sm:$0xff] %v450_v1  ;;  %v456_v4 = vld [vmem:[%s6349_s7 + $0x900] sm:$0xff] }
  0x5c   : > { %453 = vst [vmem:[%s6354_s8 + $0x478] sm:$0xff] %v452_v2  ;;  %455 = vst [vmem:[%s6354_s8 + $0x480] sm:$0xff] %v454_v3  ;;  %v458_v5 = vld [vmem:[%s6349_s7 + $0x908] sm:$0xff]  ;;  %v460_v6 = vld [vmem:[%s6349_s7 + $0x910] sm:$0xff] }
  0x5d   : > { %457 = vst [vmem:[%s6354_s8 + $0x488] sm:$0xff] %v456_v4  ;;  %459 = vst [vmem:[%s6354_s8 + $0x490] sm:$0xff] %v458_v5  ;;  %v462_v7 = vld [vmem:[%s6349_s7 + $0x948] sm:$0xff]  ;;  %v464_v8 = vld [vmem:[%s6349_s7 + $0x950] sm:$0xff] }
  0x5e   : > { %461 = vst [vmem:[%s6354_s8 + $0x498] sm:$0xff] %v460_v6  ;;  %v466_v9 = vld [vmem:[%s6349_s7 + $0x958] sm:$0xff]  ;;  %463 = vst [vmem:[%s6354_s8 + $0x4a4] sm:$0xff] %v462_v7  ;;  %v468_v10 = vld [vmem:[%s6349_s7 + $0x960] sm:$0xff] }
  0x5f   : > { %465 = vst [vmem:[%s6354_s8 + $0x4ac] sm:$0xff] %v464_v8  ;;  %467 = vst [vmem:[%s6354_s8 + $0x4b4] sm:$0xff] %v466_v9  ;;  %v470_v11 = vld [vmem:[%s6349_s7 + $0x968] sm:$0xff]  ;;  %v472_v12 = vld [vmem:[%s6349_s7 + $0x9a0] sm:$0xff] }
  0x60   : > { %469 = vst [vmem:[%s6354_s8 + $0x4bc] sm:$0xff] %v468_v10  ;;  %471 = vst [vmem:[%s6354_s8 + $0x4c4] sm:$0xff] %v470_v11  ;;  %v474_v13 = vld [vmem:[%s6349_s7 + $0x9a8] sm:$0xff]  ;;  %v476_v14 = vld [vmem:[%s6349_s7 + $0x9b0] sm:$0xff] }
  0x61   : > { %473 = vst [vmem:[%s6354_s8 + $0x4d0] sm:$0xff] %v472_v12  ;;  %v478_v15 = vld [vmem:[%s6349_s7 + $0x9b8] sm:$0xff]  ;;  %475 = vst [vmem:[%s6354_s8 + $0x4d8] sm:$0xff] %v474_v13  ;;  %v480_v16 = vld [vmem:[%s6349_s7 + $0x9c0] sm:$0xff] }
  0x62   : > { %477 = vst [vmem:[%s6354_s8 + $0x4e0] sm:$0xff] %v476_v14  ;;  %479 = vst [vmem:[%s6354_s8 + $0x4e8] sm:$0xff] %v478_v15  ;;  %v482_v17 = vld [vmem:[%s6349_s7 + $0x9f8] sm:$0xff]  ;;  %v484_v18 = vld [vmem:[%s6349_s7 + $0xa00] sm:$0xff] }
  0x63   : > { %481 = vst [vmem:[%s6354_s8 + $0x4f0] sm:$0xff] %v480_v16  ;;  %483 = vst [vmem:[%s6354_s8 + $0x4fc] sm:$0xff] %v482_v17  ;;  %v486_v19 = vld [vmem:[%s6349_s7 + $0xa08] sm:$0xff]  ;;  %v488_v20 = vld [vmem:[%s6349_s7 + $0xa10] sm:$0xff] }
  0x64   : > { %485 = vst [vmem:[%s6354_s8 + $0x504] sm:$0xff] %v484_v18  ;;  %v490_v21 = vld [vmem:[%s6349_s7 + $0xa18] sm:$0xff]  ;;  %487 = vst [vmem:[%s6354_s8 + $0x50c] sm:$0xff] %v486_v19  ;;  %v492_v22 = vld [vmem:[%s6349_s7 + $0xa50] sm:$0xff] }
  0x65   : > { %489 = vst [vmem:[%s6354_s8 + $0x514] sm:$0xff] %v488_v20  ;;  %491 = vst [vmem:[%s6354_s8 + $0x51c] sm:$0xff] %v490_v21  ;;  %v494_v23 = vld [vmem:[%s6349_s7 + $0xa58] sm:$0xff]  ;;  %v496_v24 = vld [vmem:[%s6349_s7 + $0xa60] sm:$0xff] }
  0x66   : > { %493 = vst [vmem:[%s6354_s8 + $0x528] sm:$0xff] %v492_v22  ;;  %495 = vst [vmem:[%s6354_s8 + $0x530] sm:$0xff] %v494_v23  ;;  %v498_v25 = vld [vmem:[%s6349_s7 + $0xa68] sm:$0xff]  ;;  %v500_v26 = vld [vmem:[%s6349_s7 + $0xa70] sm:$0xff] }
  0x67   : > { %497 = vst [vmem:[%s6354_s8 + $0x538] sm:$0xff] %v496_v24  ;;  %v502_v27 = vld [vmem:[%s6349_s7 + $0xaa8] sm:$0xff]  ;;  %499 = vst [vmem:[%s6354_s8 + $0x540] sm:$0xff] %v498_v25  ;;  %v504_v28 = vld [vmem:[%s6349_s7 + $0xab0] sm:$0xff] }
  0x68   : > { %501 = vst [vmem:[%s6354_s8 + $0x548] sm:$0xff] %v500_v26  ;;  %503 = vst [vmem:[%s6354_s8 + $0x554] sm:$0xff] %v502_v27  ;;  %v506_v29 = vld [vmem:[%s6349_s7 + $0xab8] sm:$0xff]  ;;  %v508_v30 = vld [vmem:[%s6349_s7 + $0xac0] sm:$0xff] }
  0x69   : > { %505 = vst [vmem:[%s6354_s8 + $0x55c] sm:$0xff] %v504_v28  ;;  %507 = vst [vmem:[%s6354_s8 + $0x564] sm:$0xff] %v506_v29  ;;  %v510_v31 = vld [vmem:[%s6349_s7 + $0xac8] sm:$0xff]  ;;  %v4820_v33 = vld [vmem:[%s6349_s7 + $0x80] sm:$0xf] }
  0x6a   : > { %509 = vst [vmem:[%s6354_s8 + $0x56c] sm:$0xff] %v508_v30  ;;  %v4818_v32 = vld [vmem:[%s6349_s7 + $0x28] sm:$0xf]  ;;  %511 = vst [vmem:[%s6354_s8 + $0x574] sm:$0xff] %v510_v31  ;;  %v4822_v34 = vld [vmem:[%s6349_s7 + $0xd8] sm:$0xf] }
  0x6b   : > { %4819 = vst [vmem:[%s6354_s8 + $0x28] sm:$0xf] %v4818_v32  ;;  %4821 = vst [vmem:[%s6354_s8 + $0x54] sm:$0xf] %v4820_v33  ;;  %v4824_v35 = vld [vmem:[%s6349_s7 + $0x130] sm:$0xf] }
  0x6c   : > { %v4826_v36 = vld [vmem:[%s6349_s7 + $0x188] sm:$0xf]  ;;  %4823 = vst [vmem:[%s6354_s8 + $0x80] sm:$0xf] %v4822_v34  ;;  %4825 = vst [vmem:[%s6354_s8 + $0xac] sm:$0xf] %v4824_v35 }
  0x6d   : > { %4827 = vst [vmem:[%s6354_s8 + $0xd8] sm:$0xf] %v4826_v36  ;;  %v4828_v37 = vld [vmem:[%s6349_s7 + $0x1e0] sm:$0xf]  ;;  %v4830_v38 = vld [vmem:[%s6349_s7 + $0x238] sm:$0xf] }
  0x6e   : > { %v4832_v39 = vld [vmem:[%s6349_s7 + $0x290] sm:$0xf]  ;;  %4829 = vst [vmem:[%s6354_s8 + $0x104] sm:$0xf] %v4828_v37  ;;  %4831 = vst [vmem:[%s6354_s8 + $0x130] sm:$0xf] %v4830_v38 }
  0x6f   : > { %4833 = vst [vmem:[%s6354_s8 + $0x15c] sm:$0xf] %v4832_v39  ;;  %v4834_v40 = vld [vmem:[%s6349_s7 + $0x2e8] sm:$0xf]  ;;  %v4836_v41 = vld [vmem:[%s6349_s7 + $0x340] sm:$0xf] }
  0x70   : > { %v4838_v42 = vld [vmem:[%s6349_s7 + $0x398] sm:$0xf]  ;;  %4835 = vst [vmem:[%s6354_s8 + $0x188] sm:$0xf] %v4834_v40  ;;  %4837 = vst [vmem:[%s6354_s8 + $0x1b4] sm:$0xf] %v4836_v41 }
  0x71   : > { %4839 = vst [vmem:[%s6354_s8 + $0x1e0] sm:$0xf] %v4838_v42  ;;  %v4840_v43 = vld [vmem:[%s6349_s7 + $0x3f0] sm:$0xf]  ;;  %v4842_v44 = vld [vmem:[%s6349_s7 + $0x448] sm:$0xf] }
  0x72   : > { %v4844_v45 = vld [vmem:[%s6349_s7 + $0x4a0] sm:$0xf]  ;;  %4841 = vst [vmem:[%s6354_s8 + $0x20c] sm:$0xf] %v4840_v43  ;;  %4843 = vst [vmem:[%s6354_s8 + $0x238] sm:$0xf] %v4842_v44 }
  0x73   : > { %4845 = vst [vmem:[%s6354_s8 + $0x264] sm:$0xf] %v4844_v45  ;;  %v4846_v46 = vld [vmem:[%s6349_s7 + $0x4f8] sm:$0xf]  ;;  %v4848_v47 = vld [vmem:[%s6349_s7 + $0x550] sm:$0xf] }
  0x74   : > { %v4850_v48 = vld [vmem:[%s6349_s7 + $0x5a8] sm:$0xf]  ;;  %4847 = vst [vmem:[%s6354_s8 + $0x290] sm:$0xf] %v4846_v46  ;;  %4849 = vst [vmem:[%s6354_s8 + $0x2bc] sm:$0xf] %v4848_v47 }
  0x75   : > { %4851 = vst [vmem:[%s6354_s8 + $0x2e8] sm:$0xf] %v4850_v48  ;;  %v4852_v49 = vld [vmem:[%s6349_s7 + $0x600] sm:$0xf]  ;;  %v4854_v50 = vld [vmem:[%s6349_s7 + $0x658] sm:$0xf] }
  0x76   : > { %v4856_v51 = vld [vmem:[%s6349_s7 + $0x6b0] sm:$0xf]  ;;  %4853 = vst [vmem:[%s6354_s8 + $0x314] sm:$0xf] %v4852_v49  ;;  %4855 = vst [vmem:[%s6354_s8 + $0x340] sm:$0xf] %v4854_v50 }
  0x77   : > { %4857 = vst [vmem:[%s6354_s8 + $0x36c] sm:$0xf] %v4856_v51  ;;  %v4858_v52 = vld [vmem:[%s6349_s7 + $0x708] sm:$0xf]  ;;  %v4860_v53 = vld [vmem:[%s6349_s7 + $0x760] sm:$0xf] }
  0x78   : > { %v4862_v54 = vld [vmem:[%s6349_s7 + $0x7b8] sm:$0xf]  ;;  %4859 = vst [vmem:[%s6354_s8 + $0x398] sm:$0xf] %v4858_v52  ;;  %4861 = vst [vmem:[%s6354_s8 + $0x3c4] sm:$0xf] %v4860_v53 }
  0x79   : > { %4863 = vst [vmem:[%s6354_s8 + $0x3f0] sm:$0xf] %v4862_v54  ;;  %v4864_v55 = vld [vmem:[%s6349_s7 + $0x810] sm:$0xf]  ;;  %v4866_v56 = vld [vmem:[%s6349_s7 + $0x868] sm:$0xf] }
  0x7a   : > { %v4868_v57 = vld [vmem:[%s6349_s7 + $0x8c0] sm:$0xf]  ;;  %4865 = vst [vmem:[%s6354_s8 + $0x41c] sm:$0xf] %v4864_v55  ;;  %4867 = vst [vmem:[%s6354_s8 + $0x448] sm:$0xf] %v4866_v56 }
  0x7b   : > { %4869 = vst [vmem:[%s6354_s8 + $0x474] sm:$0xf] %v4868_v57  ;;  %v4870_v58 = vld [vmem:[%s6349_s7 + $0x918] sm:$0xf]  ;;  %v4872_v59 = vld [vmem:[%s6349_s7 + $0x970] sm:$0xf] }
  0x7c   : > { %v4874_v60 = vld [vmem:[%s6349_s7 + $0x9c8] sm:$0xf]  ;;  %4871 = vst [vmem:[%s6354_s8 + $0x4a0] sm:$0xf] %v4870_v58  ;;  %4873 = vst [vmem:[%s6354_s8 + $0x4cc] sm:$0xf] %v4872_v59 }
  0x7d   : > { %4875 = vst [vmem:[%s6354_s8 + $0x4f8] sm:$0xf] %v4874_v60  ;;  %v4876_v61 = vld [vmem:[%s6349_s7 + $0xa20] sm:$0xf]  ;;  %v4878_v62 = vld [vmem:[%s6349_s7 + $0xa78] sm:$0xf] }
  0x7e   : > { %v4880_v63 = vld [vmem:[%s6349_s7 + $0xad0] sm:$0xf]  ;;  %4877 = vst [vmem:[%s6354_s8 + $0x524] sm:$0xf] %v4876_v61  ;;  %4879 = vst [vmem:[%s6354_s8 + $0x550] sm:$0xf] %v4878_v62 }
  0x7f   : > { %4881 = vst [vmem:[%s6354_s8 + $0x57c] sm:$0xf] %v4880_v63 }
  0x80 PF: > { %p4882_p7 = scmp.ge.s32.totalorder %s6265_s18, 1  ;;  %p602_p8 = scmp.lt.s32.totalorder %s6265_s18, 5 }
  0x82   : > { %p603_p9 = pnand %p4882_p7, %p602_p8 }
  0x83   : > { %s609_s9 = sand.u32 (!%p603_p9), 1, %s6241_s12   ;;  %s653_s10 = smul.u32 (!%p603_p9), 176, %s6249_s14 }
  0x84   : > { %606 = sbr.rel (%p603_p9) target bundleno = 867 (0x363), region = 54  ;;  %s4885_s21 = sshll.u32 (!%p603_p9), %s6253_s15, 5 }
  0x85   : > { %s5632_s11 = smul.u32 (!%p603_p9), 1408, %s609_s9  ;;  %p655_p10 = scmp.lt.s32.totalorder (!%p603_p9), %s653_s10, 351 }
  0x86   : > { %p672_p11 = scmp.lt.s32.totalorder (!%p603_p9), %s4885_s21, 63  ;;  %p4888_p12 = scmp.ne.s32.totalorder (!%p603_p9), %s6249_s14, 0 }
  0x87   : > { %s6752_s12 = scalar_lea.vmem (!%p603_p9), [#allocation3], %s5632_s11 }
  0x8b   : > { %s7329_s10 = smov (!%p655_p10, %s653_s10), 351  ;;  %s7331_s21 = smov (!%p672_p11, %s4885_s21), 63 }
  0x8c   : > { %s5276_s22 = sshll.u32 %s7329_s10, 3  ;;  %s5277_s27 = sshll.u32 %s7331_s21, 3  ;;  %v6267_v0 = vmov (!%p4888_p12), 0.0  }
  0x8d   : > { %s6745_s26 = scalar_lea.vmem %s7313_s1, %s5276_s22  ;;  %s6750_s30 = scalar_lea.vmem %s7315_s3, %s5277_s27  ;;  %687 = vst [vmem:[#allocation2] sm:$0xff] (!%p4888_p12), %v6267_v0  ;;  %688 = vst [vmem:[#allocation2 + $0x8] sm:$0xff] (!%p4888_p12), %v6267_v0 }
  0x8e   : > { %686 = sbr.rel (%p4888_p12) target bundleno = 173 (0xad), region = 62  ;;  %689 = vst [vmem:[#allocation2 + $0x10] sm:$0xff] (!%p4888_p12), %v6267_v0  ;;  %690 = vst [vmem:[#allocation2 + $0x18] sm:$0xff] (!%p4888_p12), %v6267_v0 }
  0x8f   : > { %691 = vst [vmem:[#allocation2 + $0x20] sm:$0xff] (!%p4888_p12), %v6267_v0  ;;  %692 = vst [vmem:[#allocation2 + $0x28] sm:$0xff] (!%p4888_p12), %v6267_v0 }
  0x90   : > { %693 = vst [vmem:[#allocation2 + $0x30] sm:$0xff] (!%p4888_p12), %v6267_v0  ;;  %694 = vst [vmem:[#allocation2 + $0x38] sm:$0xff] (!%p4888_p12), %v6267_v0 }
  0x91   : > { %695 = vst [vmem:[#allocation2 + $0x40] sm:$0xff] (!%p4888_p12), %v6267_v0  ;;  %696 = vst [vmem:[#allocation2 + $0x48] sm:$0xff] (!%p4888_p12), %v6267_v0 }
  0x92   : > { %697 = vst [vmem:[#allocation2 + $0x50] sm:$0xff] (!%p4888_p12), %v6267_v0  ;;  %698 = vst [vmem:[#allocation2 + $0x58] sm:$0xff] (!%p4888_p12), %v6267_v0 }
  0x93   : > { %699 = vst [vmem:[#allocation2 + $0x60] sm:$0xff] (!%p4888_p12), %v6267_v0  ;;  %700 = vst [vmem:[#allocation2 + $0x68] sm:$0xff] (!%p4888_p12), %v6267_v0 }
  0x94   : > { %701 = vst [vmem:[#allocation2 + $0x70] sm:$0xff] (!%p4888_p12), %v6267_v0  ;;  %702 = vst [vmem:[#allocation2 + $0x78] sm:$0xff] (!%p4888_p12), %v6267_v0 }
  0x95   : > { %703 = vst [vmem:[#allocation2 + $0x80] sm:$0xff] %v6267_v0  ;;  %704 = vst [vmem:[#allocation2 + $0x88] sm:$0xff] %v6267_v0 }
  0x96   : > { %705 = vst [vmem:[#allocation2 + $0x90] sm:$0xff] %v6267_v0  ;;  %706 = vst [vmem:[#allocation2 + $0x98] sm:$0xff] %v6267_v0 }
  0x97   : > { %707 = vst [vmem:[#allocation2 + $0xa0] sm:$0xff] %v6267_v0  ;;  %708 = vst [vmem:[#allocation2 + $0xa8] sm:$0xff] %v6267_v0 }
  0x98   : > { %709 = vst [vmem:[#allocation2 + $0xb0] sm:$0xff] %v6267_v0  ;;  %710 = vst [vmem:[#allocation2 + $0xb8] sm:$0xff] %v6267_v0 }
  0x99   : > { %711 = vst [vmem:[#allocation2 + $0xc0] sm:$0xff] %v6267_v0  ;;  %712 = vst [vmem:[#allocation2 + $0xc8] sm:$0xff] %v6267_v0 }
  0x9a   : > { %713 = vst [vmem:[#allocation2 + $0xd0] sm:$0xff] %v6267_v0  ;;  %714 = vst [vmem:[#allocation2 + $0xd8] sm:$0xff] %v6267_v0 }
  0x9b   : > { %715 = vst [vmem:[#allocation2 + $0xe0] sm:$0xff] %v6267_v0  ;;  %716 = vst [vmem:[#allocation2 + $0xe8] sm:$0xff] %v6267_v0 }
  0x9c   : > { %717 = vst [vmem:[#allocation2 + $0xf0] sm:$0xff] %v6267_v0  ;;  %718 = vst [vmem:[#allocation2 + $0xf8] sm:$0xff] %v6267_v0 }
  0x9d   : > { %719 = vst [vmem:[#allocation2 + $0x100] sm:$0xff] %v6267_v0  ;;  %720 = vst [vmem:[#allocation2 + $0x108] sm:$0xff] %v6267_v0 }
  0x9e   : > { %721 = vst [vmem:[#allocation2 + $0x110] sm:$0xff] %v6267_v0  ;;  %722 = vst [vmem:[#allocation2 + $0x118] sm:$0xff] %v6267_v0 }
  0x9f   : > { %723 = vst [vmem:[#allocation2 + $0x120] sm:$0xff] %v6267_v0  ;;  %724 = vst [vmem:[#allocation2 + $0x128] sm:$0xff] %v6267_v0 }
  0xa0   : > { %725 = vst [vmem:[#allocation2 + $0x130] sm:$0xff] %v6267_v0  ;;  %726 = vst [vmem:[#allocation2 + $0x138] sm:$0xff] %v6267_v0 }
  0xa1   : > { %727 = vst [vmem:[#allocation2 + $0x140] sm:$0xff] %v6267_v0  ;;  %728 = vst [vmem:[#allocation2 + $0x148] sm:$0xff] %v6267_v0 }
  0xa2   : > { %729 = vst [vmem:[#allocation2 + $0x150] sm:$0xff] %v6267_v0  ;;  %730 = vst [vmem:[#allocation2 + $0x158] sm:$0xff] %v6267_v0 }
  0xa3   : > { %731 = vst [vmem:[#allocation2 + $0x160] sm:$0xff] %v6267_v0  ;;  %732 = vst [vmem:[#allocation2 + $0x168] sm:$0xff] %v6267_v0 }
  0xa4   : > { %733 = vst [vmem:[#allocation2 + $0x170] sm:$0xff] %v6267_v0  ;;  %734 = vst [vmem:[#allocation2 + $0x178] sm:$0xff] %v6267_v0 }
  0xa5   : > { %735 = vst [vmem:[#allocation2 + $0x180] sm:$0xff] %v6267_v0  ;;  %736 = vst [vmem:[#allocation2 + $0x188] sm:$0xff] %v6267_v0 }
  0xa6   : > { %737 = vst [vmem:[#allocation2 + $0x190] sm:$0xff] %v6267_v0  ;;  %738 = vst [vmem:[#allocation2 + $0x198] sm:$0xff] %v6267_v0 }
  0xa7   : > { %739 = vst [vmem:[#allocation2 + $0x1a0] sm:$0xff] %v6267_v0  ;;  %740 = vst [vmem:[#allocation2 + $0x1a8] sm:$0xff] %v6267_v0 }
  0xa8   : > { %741 = vst [vmem:[#allocation2 + $0x1b0] sm:$0xff] %v6267_v0  ;;  %742 = vst [vmem:[#allocation2 + $0x1b8] sm:$0xff] %v6267_v0 }
  0xa9   : > { %743 = vst [vmem:[#allocation2 + $0x1c0] sm:$0xff] %v6267_v0  ;;  %744 = vst [vmem:[#allocation2 + $0x1c8] sm:$0xff] %v6267_v0 }
  0xaa   : > { %745 = vst [vmem:[#allocation2 + $0x1d0] sm:$0xff] %v6267_v0  ;;  %746 = vst [vmem:[#allocation2 + $0x1d8] sm:$0xff] %v6267_v0 }
  0xab   : > { %747 = vst [vmem:[#allocation2 + $0x1e0] sm:$0xff] %v6267_v0  ;;  %748 = vst [vmem:[#allocation2 + $0x1e8] sm:$0xff] %v6267_v0 }
  0xac   : > { %749 = vst [vmem:[#allocation2 + $0x1f0] sm:$0xff] %v6267_v0  ;;  %750 = vst [vmem:[#allocation2 + $0x1f8] sm:$0xff] %v6267_v0 }
  0xad PF: > { %v5691_v1 = vld [vmem:[%s6745_s26 + $0x4] ss:$8 sps:$4 sm:$0xff]   ;;  %v5695_v3 = vld [vmem:[%s6745_s26] ss:$8 sps:$4 sm:$0xff]   ;;  %v5697_v5 = vld [vmem:[%s6745_s26 + $0x14] ss:$8 sps:$4 sm:$0xff]  }
  0xae   : > { %v5693_v2 = vld [vmem:[%s6745_s26 + $0x304] ss:$8 sps:$4 sm:$0xff]   ;;  %2959 = vmatprep.subr.bf16.mxu1 %v5691_v1  ;;  %v5696_v4 = vld [vmem:[%s6745_s26 + $0x300] ss:$8 sps:$4 sm:$0xff]   ;;  %v5699_v6 = vld [vmem:[%s6745_s26 + $0x314] ss:$8 sps:$4 sm:$0xff]  }
  0xaf   : > { %3538 = vmatprep.subr.bf16.mxu0 %v5693_v2  ;;  %2960 = vmatpush1.bf16.msra.mxu1 %v5695_v3  ;;  %v5701_v7 = vld [vmem:[%s6745_s26 + $0x10] ss:$8 sps:$4 sm:$0xff]   ;;  %v5703_v9 = vld [vmem:[%s6745_s26 + $0x24] ss:$8 sps:$4 sm:$0xff]   ;;  %v5707_v11 = vld [vmem:[%s6745_s26 + $0x20] ss:$8 sps:$4 sm:$0xff]  }
  0xb0   : > { %3539 = vmatpush1.bf16.msra.mxu0 %v5696_v4  ;;  %2961 = vmatprep.subr.bf16.mxu1 %v5697_v5  ;;  %v5702_v8 = vld [vmem:[%s6745_s26 + $0x310] ss:$8 sps:$4 sm:$0xff]   ;;  %v5705_v10 = vld [vmem:[%s6745_s26 + $0x324] ss:$8 sps:$4 sm:$0xff]   ;;  %v5708_v12 = vld [vmem:[%s6745_s26 + $0x320] ss:$8 sps:$4 sm:$0xff]  }
  0xb1   : > { %3540 = vmatprep.subr.bf16.mxu0 %v5699_v6  ;;  %v5709_v13 = vld [vmem:[%s6745_s26 + $0x34] ss:$8 sps:$4 sm:$0xff]   ;;  %v5713_v15 = vld [vmem:[%s6745_s26 + $0x30] ss:$8 sps:$4 sm:$0xff]   ;;  %v5715_v17 = vld [vmem:[%s6745_s26 + $0x44] ss:$8 sps:$4 sm:$0xff]  }
  0xb2   : > { %v5711_v14 = vld [vmem:[%s6745_s26 + $0x334] ss:$8 sps:$4 sm:$0xff]   ;;  %v5714_v16 = vld [vmem:[%s6745_s26 + $0x330] ss:$8 sps:$4 sm:$0xff]   ;;  %v5717_v18 = vld [vmem:[%s6745_s26 + $0x344] ss:$8 sps:$4 sm:$0xff]  }
  0xb3   : > { %2962 = vmatpush1.bf16.msra.mxu1 %v5701_v7  ;;  %v5719_v19 = vld [vmem:[%s6745_s26 + $0x40] ss:$8 sps:$4 sm:$0xff]   ;;  %v5721_v21 = vld [vmem:[%s6745_s26 + $0x54] ss:$8 sps:$4 sm:$0xff]   ;;  %v5725_v23 = vld [vmem:[%s6745_s26 + $0x50] ss:$8 sps:$4 sm:$0xff]  }
  0xb4   : > { %3541 = vmatpush1.bf16.msra.mxu0 %v5702_v8  ;;  %2963 = vmatprep.subr.bf16.mxu1 %v5703_v9  ;;  %v5720_v20 = vld [vmem:[%s6745_s26 + $0x340] ss:$8 sps:$4 sm:$0xff]   ;;  %v5723_v22 = vld [vmem:[%s6745_s26 + $0x354] ss:$8 sps:$4 sm:$0xff]   ;;  %v5726_v24 = vld [vmem:[%s6745_s26 + $0x350] ss:$8 sps:$4 sm:$0xff]  }
  0xb5   : > { %3542 = vmatprep.subr.bf16.mxu0 %v5705_v10  ;;  %v5727_v25 = vld [vmem:[%s6745_s26 + $0x64] ss:$8 sps:$4 sm:$0xff]   ;;  %v5731_v27 = vld [vmem:[%s6745_s26 + $0x60] ss:$8 sps:$4 sm:$0xff]   ;;  %v5733_v29 = vld [vmem:[%s6745_s26 + $0x74] ss:$8 sps:$4 sm:$0xff]  }
  0xb6   : > { %v5729_v26 = vld [vmem:[%s6745_s26 + $0x364] ss:$8 sps:$4 sm:$0xff]   ;;  %v5732_v28 = vld [vmem:[%s6745_s26 + $0x360] ss:$8 sps:$4 sm:$0xff]   ;;  %v5735_v30 = vld [vmem:[%s6745_s26 + $0x374] ss:$8 sps:$4 sm:$0xff]  }
  0xb7   : > { %2964 = vmatpush1.bf16.msra.mxu1 %v5707_v11  ;;  %v5737_v31 = vld [vmem:[%s6745_s26 + $0x70] ss:$8 sps:$4 sm:$0xff]   ;;  %v5739_v33 = vld [vmem:[%s6745_s26 + $0x84] ss:$8 sps:$4 sm:$0xff]   ;;  %v5743_v35 = vld [vmem:[%s6745_s26 + $0x80] ss:$8 sps:$4 sm:$0xff]  }
  0xb8   : > { %3543 = vmatpush1.bf16.msra.mxu0 %v5708_v12  ;;  %2965 = vmatprep.subr.bf16.mxu1 %v5709_v13  ;;  %v5738_v32 = vld [vmem:[%s6745_s26 + $0x370] ss:$8 sps:$4 sm:$0xff]   ;;  %v5741_v34 = vld [vmem:[%s6745_s26 + $0x384] ss:$8 sps:$4 sm:$0xff]   ;;  %v5744_v36 = vld [vmem:[%s6745_s26 + $0x380] ss:$8 sps:$4 sm:$0xff]  }
  0xb9   : > { %3544 = vmatprep.subr.bf16.mxu0 %v5711_v14  ;;  %v5745_v37 = vld [vmem:[%s6745_s26 + $0x94] ss:$8 sps:$4 sm:$0xff]   ;;  %v5749_v39 = vld [vmem:[%s6745_s26 + $0x90] ss:$8 sps:$4 sm:$0xff]   ;;  %v5751_v41 = vld [vmem:[%s6745_s26 + $0xa4] ss:$8 sps:$4 sm:$0xff]  }
  0xba   : > { %v5747_v38 = vld [vmem:[%s6745_s26 + $0x394] ss:$8 sps:$4 sm:$0xff]   ;;  %v5750_v40 = vld [vmem:[%s6745_s26 + $0x390] ss:$8 sps:$4 sm:$0xff]   ;;  %v5753_v42 = vld [vmem:[%s6745_s26 + $0x3a4] ss:$8 sps:$4 sm:$0xff]  }
  0xbb   : > { %2966 = vmatpush1.bf16.msra.mxu1 %v5713_v15  ;;  %v5755_v43 = vld [vmem:[%s6745_s26 + $0xa0] ss:$8 sps:$4 sm:$0xff]   ;;  %v5757_v45 = vld [vmem:[%s6745_s26 + $0xb4] ss:$8 sps:$4 sm:$0xff]   ;;  %v5761_v47 = vld [vmem:[%s6745_s26 + $0xb0] ss:$8 sps:$4 sm:$0xff]  }
  0xbc   : > { %3545 = vmatpush1.bf16.msra.mxu0 %v5714_v16  ;;  %2967 = vmatprep.subr.bf16.mxu1 %v5715_v17  ;;  %v5756_v44 = vld [vmem:[%s6745_s26 + $0x3a0] ss:$8 sps:$4 sm:$0xff]   ;;  %v5759_v46 = vld [vmem:[%s6745_s26 + $0x3b4] ss:$8 sps:$4 sm:$0xff]   ;;  %v5762_v48 = vld [vmem:[%s6745_s26 + $0x3b0] ss:$8 sps:$4 sm:$0xff]  }
  0xbd   : > { %3546 = vmatprep.subr.bf16.mxu0 %v5717_v18  ;;  %v5763_v49 = vld [vmem:[%s6745_s26 + $0xc4] ss:$8 sps:$4 sm:$0xff]   ;;  %v5792_v52 = vld [vmem:[%s6752_s12 + $0x1c] ss:$44 sps:$4 sm:$0xff]   ;;  %v5773_v57 = vld [vmem:[%s6745_s26 + $0xd0] ss:$8 sps:$4 sm:$0xff]  }
  0xbe   : > { %v5789_v50 = vld [vmem:[%s6752_s12 + $0x4] ss:$44 sps:$4 sm:$0xff]   ;;  %v5767_v53 = vld [vmem:[%s6745_s26 + $0xc0] ss:$8 sps:$4 sm:$0xff]   ;;  %3570 = vmatprep.mubr.bf16.mxu0 %v5792_v52  ;;  %v5769_v55 = vld [vmem:[%s6745_s26 + $0xd4] ss:$8 sps:$4 sm:$0xff]  }
  0xbf   : > { %2968 = vmatpush1.bf16.msra.mxu1 %v5719_v19  ;;  %v5765_v51 = vld [vmem:[%s6745_s26 + $0x3c4] ss:$8 sps:$4 sm:$0xff]   ;;  %2991 = vmatprep.mubr.bf16.mxu1 %v5789_v50  ;;  %v5768_v54 = vld [vmem:[%s6745_s26 + $0x3c0] ss:$8 sps:$4 sm:$0xff]   ;;  %v5771_v56 = vld [vmem:[%s6745_s26 + $0x3d4] ss:$8 sps:$4 sm:$0xff]  }
  0xc0   : > { %3547 = vmatpush1.bf16.msra.mxu0 %v5720_v20  ;;  %2969 = vmatprep.subr.bf16.mxu1 %v5721_v21  ;;  %v5774_v58 = vld [vmem:[%s6745_s26 + $0x3d0] ss:$8 sps:$4 sm:$0xff]   ;;  %v5775_v59 = vld [vmem:[%s6745_s26 + $0xe4] ss:$8 sps:$4 sm:$0xff]   ;;  %v5779_v61 = vld [vmem:[%s6745_s26 + $0xe0] ss:$8 sps:$4 sm:$0xff]  }
  0xc1   : > { %3548 = vmatprep.subr.bf16.mxu0 %v5723_v22  ;;  %v5777_v60 = vld [vmem:[%s6745_s26 + $0x3e4] ss:$8 sps:$4 sm:$0xff]   ;;  %v5780_v62 = vld [vmem:[%s6745_s26 + $0x3e0] ss:$8 sps:$4 sm:$0xff]   ;;  %v5781_v63 = vld [vmem:[%s6745_s26 + $0xf4] ss:$8 sps:$4 sm:$0xff]  }
  0xc2   : > { %v5783_v0 = vld [vmem:[%s6745_s26 + $0x3f4] ss:$8 sps:$4 sm:$0xff]   ;;  %v5785_v1 = vld [vmem:[%s6745_s26 + $0xf0] ss:$8 sps:$4 sm:$0xff]   ;;  %v5795_v3 = vld [vmem:[%s6745_s26 + $0x104] ss:$8 sps:$4 sm:$0xff]  }
  0xc3   : > { %2970 = vmatpush1.bf16.msra.mxu1 %v5725_v23  ;;  %v5786_v2 = vld [vmem:[%s6745_s26 + $0x3f0] ss:$8 sps:$4 sm:$0xff]   ;;  %v5787_v4 = vld [vmem:[%s6752_s12] ss:$44 sps:$4 sm:$0xff]   ;;  %v5799_v9 = vld [vmem:[%s6752_s12 + $0x5c] ss:$44 sps:$4 sm:$0xff]  }
  0xc4   : > { %3549 = vmatpush1.bf16.msra.mxu0 %v5726_v24  ;;  %2971 = vmatprep.subr.bf16.mxu1 %v5727_v25  ;;  %v5798_v5 = vld [vmem:[%s6745_s26 + $0x404] ss:$8 sps:$4 sm:$0xff]   ;;  %v5793_v7 = vld [vmem:[%s6745_s26 + $0x100] ss:$8 sps:$4 sm:$0xff]   ;;  %v5806_v11 = vld [vmem:[%s6745_s26 + $0x114] ss:$8 sps:$4 sm:$0xff]  }
  0xc5   : > { %3550 = vmatprep.subr.bf16.mxu0 %v5729_v26  ;;  %v5790_v6 = vld [vmem:[%s6752_s12 + $0x18] ss:$44 sps:$4 sm:$0xff]   ;;  %v5796_v8 = vld [vmem:[%s6745_s26 + $0x400] ss:$8 sps:$4 sm:$0xff]   ;;  %v5810_v12 = vld [vmem:[%s6745_s26 + $0x414] ss:$8 sps:$4 sm:$0xff]  }
  0xc6   : > { %v5801_v10 = vld [vmem:[%s6752_s12 + $0x74] ss:$44 sps:$4 sm:$0xff]   ;;  %v5804_v13 = vld [vmem:[%s6745_s26 + $0x110] ss:$8 sps:$4 sm:$0xff]   ;;  %v5818_v15 = vld [vmem:[%s6745_s26 + $0x124] ss:$8 sps:$4 sm:$0xff]  }
  0xc7   : > { %2972 = vmatpush1.bf16.msra.mxu1 %v5731_v27  ;;  %v5808_v14 = vld [vmem:[%s6745_s26 + $0x410] ss:$8 sps:$4 sm:$0xff]   ;;  %v5822_v16 = vld [vmem:[%s6745_s26 + $0x424] ss:$8 sps:$4 sm:$0xff]   ;;  %v5811_v19 = vld [vmem:[%s6752_s12 + $0xb4] ss:$44 sps:$4 sm:$0xff]  }
  0xc8   : > { %3551 = vmatpush1.bf16.msra.mxu0 %v5732_v28  ;;  %2973 = vmatprep.subr.bf16.mxu1 %v5733_v29  ;;  %v5803_v17 = vld [vmem:[%s6752_s12 + $0x58] ss:$44 sps:$4 sm:$0xff]   ;;  %v5807_v18 = vld [vmem:[%s6752_s12 + $0x70] ss:$44 sps:$4 sm:$0xff]   ;;  %v5816_v21 = vld [vmem:[%s6745_s26 + $0x120] ss:$8 sps:$4 sm:$0xff]  }
  0xc9   : > { %3552 = vmatprep.subr.bf16.mxu0 %v5735_v30  ;;  %v5813_v20 = vld [vmem:[%s6752_s12 + $0xcc] ss:$44 sps:$4 sm:$0xff]   ;;  %v5820_v22 = vld [vmem:[%s6745_s26 + $0x420] ss:$8 sps:$4 sm:$0xff]   ;;  %v5830_v23 = vld [vmem:[%s6745_s26 + $0x134] ss:$8 sps:$4 sm:$0xff]  }
  0xca   : > { %v5834_v24 = vld [vmem:[%s6745_s26 + $0x434] ss:$8 sps:$4 sm:$0xff]   ;;  %v5828_v25 = vld [vmem:[%s6745_s26 + $0x130] ss:$8 sps:$4 sm:$0xff]   ;;  %v5842_v30 = vld [vmem:[%s6745_s26 + $0x144] ss:$8 sps:$4 sm:$0xff]  }
  0xcb   : > { %2974 = vmatpush1.bf16.msra.mxu1 %v5737_v31  ;;  %v5815_v26 = vld [vmem:[%s6752_s12 + $0xb0] ss:$44 sps:$4 sm:$0xff]   ;;  %v5819_v27 = vld [vmem:[%s6752_s12 + $0xc8] ss:$44 sps:$4 sm:$0xff]   ;;  %v5823_v29 = vld [vmem:[%s6752_s12 + $0x10c] ss:$44 sps:$4 sm:$0xff]  }
  0xcc   : > { %3553 = vmatpush1.bf16.msra.mxu0 %v5738_v32  ;;  %2975 = vmatprep.subr.bf16.mxu1 %v5739_v33  ;;  %v5832_v28 = vld [vmem:[%s6745_s26 + $0x430] ss:$8 sps:$4 sm:$0xff]   ;;  %v5846_v31 = vld [vmem:[%s6745_s26 + $0x444] ss:$8 sps:$4 sm:$0xff]   ;;  %v5840_v33 = vld [vmem:[%s6745_s26 + $0x140] ss:$8 sps:$4 sm:$0xff]  }
  0xcd   : > { %3554 = vmatprep.subr.bf16.mxu0 %v5741_v34  ;;  %v5825_v32 = vld [vmem:[%s6752_s12 + $0x124] ss:$44 sps:$4 sm:$0xff]   ;;  %v5844_v34 = vld [vmem:[%s6745_s26 + $0x440] ss:$8 sps:$4 sm:$0xff]   ;;  %p5241_p13 = scmp.ne.s32.totalorder %s6249_s14, 1 }
  0xce   : > { %v5839_v50 = vld [vmem:[%s6752_s12 + $0x160] ss:$44 sps:$4 sm:$0xff]   ;;  %v5880_v52 = vld [vmem:[%s6745_s26 + $0x470] ss:$8 sps:$4 sm:$0xff]  }
  0xcf   : > { %2976 = vmatpush1.bf16.msra.mxu1 %v5743_v35  ;;  %v5854_v35 = vld [vmem:[%s6745_s26 + $0x154] ss:$8 sps:$4 sm:$0xff]  }
  0xd0   : > { %3555 = vmatpush1.bf16.msra.mxu0 %v5744_v36  ;;  %2977 = vmatprep.subr.bf16.mxu1 %v5745_v37  ;;  %v5858_v36 = vld [vmem:[%s6745_s26 + $0x454] ss:$8 sps:$4 sm:$0xff]   ;;  %v5852_v37 = vld [vmem:[%s6745_s26 + $0x150] ss:$8 sps:$4 sm:$0xff]  }
  0xd1   : > { %3556 = vmatprep.subr.bf16.mxu0 %v5747_v38  ;;  %v5856_v38 = vld [vmem:[%s6745_s26 + $0x450] ss:$8 sps:$4 sm:$0xff]  }
  0xd3   : > { %2978 = vmatpush1.bf16.msra.mxu1 %v5749_v39  ;;  %v5827_v39 = vld [vmem:[%s6752_s12 + $0x108] ss:$44 sps:$4 sm:$0xff]  }
  0xd4   : > { %3557 = vmatpush1.bf16.msra.mxu0 %v5750_v40  ;;  %2979 = vmatprep.subr.bf16.mxu1 %v5751_v41  ;;  %v5866_v40 = vld [vmem:[%s6745_s26 + $0x164] ss:$8 sps:$4 sm:$0xff]  }
  0xd5   : > { %3558 = vmatprep.subr.bf16.mxu0 %v5753_v42  ;;  %v5870_v41 = vld [vmem:[%s6745_s26 + $0x464] ss:$8 sps:$4 sm:$0xff]  }
  0xd6   : > { %v5831_v42 = vld [vmem:[%s6752_s12 + $0x120] ss:$44 sps:$4 sm:$0xff]  }
  0xd7   : > { %2980 = vmatpush1.bf16.msra.mxu1 %v5755_v43  ;;  %v5835_v43 = vld [vmem:[%s6752_s12 + $0x164] ss:$44 sps:$4 sm:$0xff]  }
  0xd8   : > { %3559 = vmatpush1.bf16.msra.mxu0 %v5756_v44  ;;  %2981 = vmatprep.subr.bf16.mxu1 %v5757_v45  ;;  %v5837_v44 = vld [vmem:[%s6752_s12 + $0x17c] ss:$44 sps:$4 sm:$0xff]  }
  0xd9   : > { %3560 = vmatprep.subr.bf16.mxu0 %v5759_v46  ;;  %v5864_v45 = vld [vmem:[%s6745_s26 + $0x160] ss:$8 sps:$4 sm:$0xff]  }
  0xda   : > { %v5868_v46 = vld [vmem:[%s6745_s26 + $0x460] ss:$8 sps:$4 sm:$0xff]  }
  0xdb   : > { %2982 = vmatpush1.bf16.msra.mxu1 %v5761_v47  ;;  %v5878_v47 = vld [vmem:[%s6745_s26 + $0x174] ss:$8 sps:$4 sm:$0xff]  }
  0xdc   : > { %3561 = vmatpush1.bf16.msra.mxu0 %v5762_v48  ;;  %2983 = vmatprep.subr.bf16.mxu1 %v5763_v49  ;;  %v5882_v48 = vld [vmem:[%s6745_s26 + $0x474] ss:$8 sps:$4 sm:$0xff]   ;;  %v5876_v49 = vld [vmem:[%s6745_s26 + $0x170] ss:$8 sps:$4 sm:$0xff]  }
  0xdd   : > { %3562 = vmatprep.subr.bf16.mxu0 %v5765_v51  ;;  %v5843_v51 = vld [vmem:[%s6752_s12 + $0x178] ss:$44 sps:$4 sm:$0xff]  }
  0xdf   : > { %2984 = vmatpush1.bf16.msra.mxu1 %v5767_v53  ;;  %v5847_v53 = vld [vmem:[%s6752_s12 + $0x1bc] ss:$44 sps:$4 sm:$0xff]  }
  0xe0   : > { %3563 = vmatpush1.bf16.msra.mxu0 %v5768_v54  ;;  %2985 = vmatprep.subr.bf16.mxu1 %v5769_v55  ;;  %v5890_v54 = vld [vmem:[%s6745_s26 + $0x184] ss:$8 sps:$4 sm:$0xff]  }
  0xe1   : > { %3564 = vmatprep.subr.bf16.mxu0 %v5771_v56  ;;  %v5894_v55 = vld [vmem:[%s6745_s26 + $0x484] ss:$8 sps:$4 sm:$0xff]   ;;  %v5849_v56 = vld [vmem:[%s6752_s12 + $0x1d4] ss:$44 sps:$4 sm:$0xff]  }
  0xe3   : > { %2986 = vmatpush1.bf16.msra.mxu1 %v5773_v57  ;;  %v5888_v57 = vld [vmem:[%s6745_s26 + $0x180] ss:$8 sps:$4 sm:$0xff]  }
  0xe4   : > { %3565 = vmatpush1.bf16.msra.mxu0 %v5774_v58  ;;  %2987 = vmatprep.subr.bf16.mxu1 %v5775_v59  ;;  %v5892_v58 = vld [vmem:[%s6745_s26 + $0x480] ss:$8 sps:$4 sm:$0xff]   ;;  %v5902_v59 = vld [vmem:[%s6745_s26 + $0x194] ss:$8 sps:$4 sm:$0xff]  }
  0xe5   : > { %3566 = vmatprep.subr.bf16.mxu0 %v5777_v60  ;;  %v5906_v60 = vld [vmem:[%s6745_s26 + $0x494] ss:$8 sps:$4 sm:$0xff]  }
  0xe7   : > { %2988 = vmatpush1.bf16.msra.mxu1 %v5779_v61  ;;  %v5900_v61 = vld [vmem:[%s6745_s26 + $0x190] ss:$8 sps:$4 sm:$0xff]  }
  0xe8   : > { %3567 = vmatpush1.bf16.msra.mxu0 %v5780_v62  ;;  %2989 = vmatprep.subr.bf16.mxu1 %v5781_v63  ;;  %v5904_v62 = vld [vmem:[%s6745_s26 + $0x490] ss:$8 sps:$4 sm:$0xff]  }
  0xe9   : > { %3568 = vmatprep.subr.bf16.mxu0 %v5783_v0  ;;  %v5851_v63 = vld [vmem:[%s6752_s12 + $0x1b8] ss:$44 sps:$4 sm:$0xff]  }
  0xea   : > { %v5914_v0 = vld [vmem:[%s6745_s26 + $0x1a4] ss:$8 sps:$4 sm:$0xff]  }
  0xeb   : > { %2990 = vmatpush1.bf16.msra.mxu1 %v5785_v1  ;;  %v5918_v1 = vld [vmem:[%s6745_s26 + $0x4a4] ss:$8 sps:$4 sm:$0xff]  }
  0xec   : > { %3569 = vmatpush1.bf16.msra.mxu0 %v5786_v2  ;;  %3152 = vmatprep.subr.bf16.mxu1 %v5795_v3  ;;  %v5855_v2 = vld [vmem:[%s6752_s12 + $0x1d0] ss:$44 sps:$4 sm:$0xff]   ;;  %v5859_v3 = vld [vmem:[%s6752_s12 + $0x214] ss:$44 sps:$4 sm:$0xff]  }
  0xed   : > { %3731 = vmatprep.subr.bf16.mxu0 %v5798_v5  ;;  %v5912_v5 = vld [vmem:[%s6745_s26 + $0x1a0] ss:$8 sps:$4 sm:$0xff]  }
  0xee   : > { %2992 = vmatmul.mubr.bf16.vlgmr.msra.gmra.mrb[0].mxu1 %v5787_v4  ;;  %v5861_v4 = vld [vmem:[%s6752_s12 + $0x22c] ss:$44 sps:$4 sm:$0xff]  }
  0xef   : > { %3571 = vmatmul.mubr.bf16.vlgmr.msra.gmra.mrb[0].mxu0 %v5790_v6  ;;  %3153 = vmatpush1.bf16.msra.mxu1 %v5793_v7  ;;  %v5916_v6 = vld [vmem:[%s6745_s26 + $0x4a0] ss:$8 sps:$4 sm:$0xff]   ;;  %v5926_v7 = vld [vmem:[%s6745_s26 + $0x1b4] ss:$8 sps:$4 sm:$0xff]  }
  0xf0   : > { %3732 = vmatpush1.bf16.msra.mxu0 %v5796_v8  ;;  %3001 = vmatprep.mubr.bf16.mxu1 %v5799_v9  ;;  %v5930_v8 = vld [vmem:[%s6745_s26 + $0x4b4] ss:$8 sps:$4 sm:$0xff]   ;;  %v5924_v9 = vld [vmem:[%s6745_s26 + $0x1b0] ss:$8 sps:$4 sm:$0xff]  }
  0xf1   : > { %3580 = vmatprep.mubr.bf16.mxu0 %v5801_v10  ;;  %3154 = vmatprep.subr.bf16.mxu1 %v5806_v11  ;;  %v5863_v10 = vld [vmem:[%s6752_s12 + $0x210] ss:$44 sps:$4 sm:$0xff]   ;;  %v5867_v11 = vld [vmem:[%s6752_s12 + $0x228] ss:$44 sps:$4 sm:$0xff]  }
  0xf2   : > { %3733 = vmatprep.subr.bf16.mxu0 %v5810_v12  ;;  %v5928_v12 = vld [vmem:[%s6745_s26 + $0x4b0] ss:$8 sps:$4 sm:$0xff]  }
  0xf3   : > { %3155 = vmatpush1.bf16.msra.mxu1 %v5804_v13  ;;  %v5871_v13 = vld [vmem:[%s6752_s12 + $0x26c] ss:$44 sps:$4 sm:$0xff]  }
  0xf4   : > { %3734 = vmatpush1.bf16.msra.mxu0 %v5808_v14  ;;  %3156 = vmatprep.subr.bf16.mxu1 %v5818_v15  ;;  %v5938_v14 = vld [vmem:[%s6745_s26 + $0x1c4] ss:$8 sps:$4 sm:$0xff]  }
  0xf5   : > { %3735 = vmatprep.subr.bf16.mxu0 %v5822_v16  ;;  %v5873_v15 = vld [vmem:[%s6752_s12 + $0x284] ss:$44 sps:$4 sm:$0xff]  }
  0xf6   : > { %3002 = vmatmul.mubr.bf16.gmra.mrb[4].mxu1 %v5803_v17  ;;  %v5942_v16 = vld [vmem:[%s6745_s26 + $0x4c4] ss:$8 sps:$4 sm:$0xff]   ;;  %v5936_v17 = vld [vmem:[%s6745_s26 + $0x1c0] ss:$8 sps:$4 sm:$0xff]  }
  0xf7   : > { %3581 = vmatmul.mubr.bf16.gmra.mrb[4].mxu0 %v5807_v18  ;;  %3011 = vmatprep.mubr.bf16.mxu1 %v5811_v19  ;;  %v5940_v18 = vld [vmem:[%s6745_s26 + $0x4c0] ss:$8 sps:$4 sm:$0xff]   ;;  %v5948_v19 = vld [vmem:[%s6745_s26 + $0x1d0] ss:$8 sps:$4 sm:$0xff]  }
  0xf8   : > { %3590 = vmatprep.mubr.bf16.mxu0 %v5813_v20  ;;  %3157 = vmatpush1.bf16.msra.mxu1 %v5816_v21  ;;  %v5950_v20 = vld [vmem:[%s6745_s26 + $0x1d4] ss:$8 sps:$4 sm:$0xff]   ;;  %v5952_v21 = vld [vmem:[%s6745_s26 + $0x4d0] ss:$8 sps:$4 sm:$0xff]  }
  0xf9   : > { %3736 = vmatpush1.bf16.msra.mxu0 %v5820_v22  ;;  %3158 = vmatprep.subr.bf16.mxu1 %v5830_v23  ;;  %v5954_v22 = vld [vmem:[%s6745_s26 + $0x4d4] ss:$8 sps:$4 sm:$0xff]  }
  0xfa   : > { %3737 = vmatprep.subr.bf16.mxu0 %v5834_v24  ;;  %v5875_v23 = vld [vmem:[%s6752_s12 + $0x268] ss:$44 sps:$4 sm:$0xff]   ;;  %v5879_v24 = vld [vmem:[%s6752_s12 + $0x280] ss:$44 sps:$4 sm:$0xff]  }
  0xfc   : > { %3159 = vmatpush1.bf16.msra.mxu1 %v5828_v25  ;;  %v5883_v25 = vld [vmem:[%s6752_s12 + $0x2c4] ss:$44 sps:$4 sm:$0xff]  }
  0xfd   : > { %3738 = vmatpush1.bf16.msra.mxu0 %v5832_v28  ;;  %3160 = vmatprep.subr.bf16.mxu1 %v5842_v30  ;;  %v5960_v28 = vld [vmem:[%s6745_s26 + $0x1e0] ss:$8 sps:$4 sm:$0xff]   ;;  %v5966_v30 = vld [vmem:[%s6745_s26 + $0x4e4] ss:$8 sps:$4 sm:$0xff]  }
  0xfe   : > { %3739 = vmatprep.subr.bf16.mxu0 %v5846_v31  ;;  %3012 = vmatmul.mubr.bf16.gmra.mrb[8].mxu1 %v5815_v26  ;;  %v5885_v26 = vld [vmem:[%s6752_s12 + $0x2dc] ss:$44 sps:$4 sm:$0xff]   ;;  %v5887_v31 = vld [vmem:[%s6752_s12 + $0x2c0] ss:$44 sps:$4 sm:$0xff]  }
  0xff   : > { %3591 = vmatmul.mubr.bf16.gmra.mrb[8].mxu0 %v5819_v27  ;;  %3021 = vmatprep.mubr.bf16.mxu1 %v5823_v29  ;;  %v5962_v27 = vld [vmem:[%s6745_s26 + $0x1e4] ss:$8 sps:$4 sm:$0xff]   ;;  %v5964_v29 = vld [vmem:[%s6745_s26 + $0x4e0] ss:$8 sps:$4 sm:$0xff]  }
 0x100   : > { %3600 = vmatprep.mubr.bf16.mxu0 %v5825_v32  ;;  %3161 = vmatpush1.bf16.msra.mxu1 %v5840_v33  ;;  %v5891_v32 = vld [vmem:[%s6752_s12 + $0x2d8] ss:$44 sps:$4 sm:$0xff]  }
 0x101   : > { %3740 = vmatpush1.bf16.msra.mxu0 %v5844_v34  ;;  %3162 = vmatprep.subr.bf16.mxu1 %v5854_v35  ;;  %v5972_v33 = vld [vmem:[%s6745_s26 + $0x1f0] ss:$8 sps:$4 sm:$0xff]   ;;  %v5895_v34 = vld [vmem:[%s6752_s12 + $0x31c] ss:$44 sps:$4 sm:$0xff]  }
 0x102   : > { %3741 = vmatprep.subr.bf16.mxu0 %v5858_v36  ;;  %v5974_v35 = vld [vmem:[%s6745_s26 + $0x1f4] ss:$8 sps:$4 sm:$0xff]   ;;  %v5976_v36 = vld [vmem:[%s6745_s26 + $0x4f0] ss:$8 sps:$4 sm:$0xff]  }
 0x104   : > { %3163 = vmatpush1.bf16.msra.mxu1 %v5852_v37  ;;  %v5978_v37 = vld [vmem:[%s6745_s26 + $0x4f4] ss:$8 sps:$4 sm:$0xff]  }
 0x105   : > { %3742 = vmatpush1.bf16.msra.mxu0 %v5856_v38  ;;  %3164 = vmatprep.subr.bf16.mxu1 %v5866_v40  ;;  %v5897_v38 = vld [vmem:[%s6752_s12 + $0x334] ss:$44 sps:$4 sm:$0xff]   ;;  %v5990_v40 = vld [vmem:[%s6745_s26 + $0x504] ss:$8 sps:$4 sm:$0xff]  }
 0x106   : > { %3743 = vmatprep.subr.bf16.mxu0 %v5870_v41  ;;  %3022 = vmatmul.mubr.bf16.gmra.mrb[12].mxu1 %v5827_v39  ;;  %v5987_v39 = vld [vmem:[%s6745_s26 + $0x204] ss:$8 sps:$4 sm:$0xff]  }
 0x107   : > { %3601 = vmatmul.mubr.bf16.gmra.mrb[12].mxu0 %v5831_v42  ;;  %3031 = vmatprep.mubr.bf16.mxu1 %v5835_v43  ;;  %v5899_v41 = vld [vmem:[%s6752_s12 + $0x318] ss:$44 sps:$4 sm:$0xff]   ;;  %v5903_v42 = vld [vmem:[%s6752_s12 + $0x330] ss:$44 sps:$4 sm:$0xff]   ;;  %v5907_v43 = vld [vmem:[%s6752_s12 + $0x374] ss:$44 sps:$4 sm:$0xff]  }
 0x108   : > { %3610 = vmatprep.mubr.bf16.mxu0 %v5837_v44  ;;  %3165 = vmatpush1.bf16.msra.mxu1 %v5864_v45  ;;  %v5909_v44 = vld [vmem:[%s6752_s12 + $0x38c] ss:$44 sps:$4 sm:$0xff]   ;;  %v5911_v45 = vld [vmem:[%s6752_s12 + $0x370] ss:$44 sps:$4 sm:$0xff]  }
 0x109   : > { %3744 = vmatpush1.bf16.msra.mxu0 %v5868_v46  ;;  %3166 = vmatprep.subr.bf16.mxu1 %v5878_v47  ;;  %v5915_v46 = vld [vmem:[%s6752_s12 + $0x388] ss:$44 sps:$4 sm:$0xff]   ;;  %v5919_v47 = vld [vmem:[%s6752_s12 + $0x3cc] ss:$44 sps:$4 sm:$0xff]  }
 0x10a   : > { %3745 = vmatprep.subr.bf16.mxu0 %v5882_v48  ;;  %v5921_v48 = vld [vmem:[%s6752_s12 + $0x3e4] ss:$44 sps:$4 sm:$0xff]  }
 0x10c   : > { %3167 = vmatpush1.bf16.msra.mxu1 %v5876_v49  ;;  %v5923_v49 = vld [vmem:[%s6752_s12 + $0x3c8] ss:$44 sps:$4 sm:$0xff]  }
 0x10d   : > { %3746 = vmatpush1.bf16.msra.mxu0 %v5880_v52  ;;  %3168 = vmatprep.subr.bf16.mxu1 %v5890_v54  ;;  %v5933_v52 = vld [vmem:[%s6752_s12 + $0x43c] ss:$44 sps:$4 sm:$0xff]   ;;  %v5939_v54 = vld [vmem:[%s6752_s12 + $0x438] ss:$44 sps:$4 sm:$0xff]  }
 0x10e   : > { %3747 = vmatprep.subr.bf16.mxu0 %v5894_v55  ;;  %3032 = vmatmul.mubr.bf16.gmra.mrb[16].mxu1 %v5839_v50  ;;  %v5927_v50 = vld [vmem:[%s6752_s12 + $0x3e0] ss:$44 sps:$4 sm:$0xff]   ;;  %v5943_v55 = vld [vmem:[%s6752_s12 + $0x47c] ss:$44 sps:$4 sm:$0xff]  }
 0x10f   : > { %3611 = vmatmul.mubr.bf16.gmra.mrb[16].mxu0 %v5843_v51  ;;  %3041 = vmatprep.mubr.bf16.mxu1 %v5847_v53  ;;  %v5931_v51 = vld [vmem:[%s6752_s12 + $0x424] ss:$44 sps:$4 sm:$0xff]   ;;  %v5935_v53 = vld [vmem:[%s6752_s12 + $0x420] ss:$44 sps:$4 sm:$0xff]  }
 0x110   : > { %3620 = vmatprep.mubr.bf16.mxu0 %v5849_v56  ;;  %3169 = vmatpush1.bf16.msra.mxu1 %v5888_v57  ;;  %v5945_v56 = vld [vmem:[%s6752_s12 + $0x494] ss:$44 sps:$4 sm:$0xff]   ;;  %v5947_v57 = vld [vmem:[%s6752_s12 + $0x478] ss:$44 sps:$4 sm:$0xff]  }
 0x111   : > { %3748 = vmatpush1.bf16.msra.mxu0 %v5892_v58  ;;  %3170 = vmatprep.subr.bf16.mxu1 %v5902_v59  ;;  %v5951_v58 = vld [vmem:[%s6752_s12 + $0x490] ss:$44 sps:$4 sm:$0xff]   ;;  %v5955_v59 = vld [vmem:[%s6752_s12 + $0x4d4] ss:$44 sps:$4 sm:$0xff]  }
 0x112   : > { %3749 = vmatprep.subr.bf16.mxu0 %v5906_v60  ;;  %v5957_v60 = vld [vmem:[%s6752_s12 + $0x4ec] ss:$44 sps:$4 sm:$0xff]  }
 0x114   : > { %3171 = vmatpush1.bf16.msra.mxu1 %v5900_v61  ;;  %v5959_v61 = vld [vmem:[%s6752_s12 + $0x4d0] ss:$44 sps:$4 sm:$0xff]  }
 0x115   : > { %3750 = vmatpush1.bf16.msra.mxu0 %v5904_v62  ;;  %3172 = vmatprep.subr.bf16.mxu1 %v5914_v0  ;;  %v5963_v62 = vld [vmem:[%s6752_s12 + $0x4e8] ss:$44 sps:$4 sm:$0xff]   ;;  %v5969_v0 = vld [vmem:[%s6752_s12 + $0x544] ss:$44 sps:$4 sm:$0xff]  }
 0x116   : > { %3751 = vmatprep.subr.bf16.mxu0 %v5918_v1  ;;  %3042 = vmatmul.mubr.bf16.gmra.mrb[20].mxu1 %v5851_v63  ;;  %v5967_v63 = vld [vmem:[%s6752_s12 + $0x52c] ss:$44 sps:$4 sm:$0xff]   ;;  %v5971_v1 = vld [vmem:[%s6752_s12 + $0x528] ss:$44 sps:$4 sm:$0xff]  }
 0x117   : > { %3621 = vmatmul.mubr.bf16.gmra.mrb[20].mxu0 %v5855_v2  ;;  %3051 = vmatprep.mubr.bf16.mxu1 %v5859_v3  ;;  %v5975_v2 = vld [vmem:[%s6752_s12 + $0x540] ss:$44 sps:$4 sm:$0xff]  }
 0x118   : > { %3630 = vmatprep.mubr.bf16.mxu0 %v5861_v4  ;;  %3173 = vmatpush1.bf16.msra.mxu1 %v5912_v5  ;;  %v5981_v3 = vld [vmem:[%s6752_s12 + $0xc] ss:$44 sps:$4 sm:$0xff]   ;;  %v5984_v4 = vld [vmem:[%s6752_s12 + $0x24] ss:$44 sps:$4 sm:$0xff]   ;;  %v5979_v5 = vld [vmem:[%s6752_s12 + $0x8] ss:$44 sps:$4 sm:$0xff]  }
 0x119   : > { %3752 = vmatpush1.bf16.msra.mxu0 %v5916_v6  ;;  %3174 = vmatprep.subr.bf16.mxu1 %v5926_v7  ;;  %v5982_v6 = vld [vmem:[%s6752_s12 + $0x20] ss:$44 sps:$4 sm:$0xff]  }
 0x11a   : > { %3753 = vmatprep.subr.bf16.mxu0 %v5930_v8  ;;  %v5985_v7 = vld [vmem:[%s6745_s26 + $0x200] ss:$8 sps:$4 sm:$0xff]  }
 0x11b   : > { %v5988_v8 = vld [vmem:[%s6745_s26 + $0x500] ss:$8 sps:$4 sm:$0xff]  }
 0x11c   : > { %3175 = vmatpush1.bf16.msra.mxu1 %v5924_v9  ;;  %v5991_v9 = vld [vmem:[%s6752_s12 + $0x64] ss:$44 sps:$4 sm:$0xff]  }
 0x11d   : > { %3754 = vmatpush1.bf16.msra.mxu0 %v5928_v12  ;;  %3176 = vmatprep.subr.bf16.mxu1 %v5938_v14  ;;  %v6011_v12 = vld [vmem:[%s6745_s26 + $0x514] ss:$8 sps:$4 sm:$0xff]   ;;  %v6007_v14 = vld [vmem:[%s6745_s26 + $0x224] ss:$8 sps:$4 sm:$0xff]  }
 0x11e   : > { %3755 = vmatprep.subr.bf16.mxu0 %v5942_v16  ;;  %3052 = vmatmul.mubr.bf16.gmra.mrb[24].mxu1 %v5863_v10  ;;  %v5993_v10 = vld [vmem:[%s6752_s12 + $0x7c] ss:$44 sps:$4 sm:$0xff]   ;;  %v6032_v16 = vld [vmem:[%s6745_s26 + $0x524] ss:$8 sps:$4 sm:$0xff]  }
 0x11f   : > { %3631 = vmatmul.mubr.bf16.gmra.mrb[24].mxu0 %v5867_v11  ;;  %3061 = vmatprep.mubr.bf16.mxu1 %v5871_v13  ;;  %v5998_v11 = vld [vmem:[%s6745_s26 + $0x214] ss:$8 sps:$4 sm:$0xff]   ;;  %v5996_v13 = vld [vmem:[%s6745_s26 + $0x210] ss:$8 sps:$4 sm:$0xff]  }
 0x120   : > { %3640 = vmatprep.mubr.bf16.mxu0 %v5873_v15  ;;  %3177 = vmatpush1.bf16.msra.mxu1 %v5936_v17  ;;  %v6009_v15 = vld [vmem:[%s6745_s26 + $0x510] ss:$8 sps:$4 sm:$0xff]   ;;  %v5995_v17 = vld [vmem:[%s6752_s12 + $0x60] ss:$44 sps:$4 sm:$0xff]  }
 0x121   : > { %3756 = vmatpush1.bf16.msra.mxu0 %v5940_v18  ;;  %3178 = vmatprep.subr.bf16.mxu1 %v5950_v20  ;;  %v5999_v18 = vld [vmem:[%s6752_s12 + $0x78] ss:$44 sps:$4 sm:$0xff]   ;;  %v6002_v20 = vld [vmem:[%s6752_s12 + $0xd4] ss:$44 sps:$4 sm:$0xff]  }
 0x122   : > { %3757 = vmatprep.subr.bf16.mxu0 %v5954_v22  ;;  %v6030_v22 = vld [vmem:[%s6745_s26 + $0x520] ss:$8 sps:$4 sm:$0xff]  }
 0x124   : > { %3179 = vmatpush1.bf16.msra.mxu1 %v5948_v19  ;;  %v6000_v19 = vld [vmem:[%s6752_s12 + $0xbc] ss:$44 sps:$4 sm:$0xff]  }
 0x125   : > { %3758 = vmatpush1.bf16.msra.mxu0 %v5952_v21  ;;  %3180 = vmatprep.subr.bf16.mxu1 %v5962_v27  ;;  %v6005_v21 = vld [vmem:[%s6745_s26 + $0x220] ss:$8 sps:$4 sm:$0xff]   ;;  %v6004_v27 = vld [vmem:[%s6752_s12 + $0xb8] ss:$44 sps:$4 sm:$0xff]  }
 0x126   : > { %3062 = vmatmul.mubr.bf16.gmra.mrb[28].mxu1 %v5875_v23  ;;  %3759 = vmatprep.subr.bf16.mxu0 %v5966_v30  ;;  %v6019_v23 = vld [vmem:[%s6745_s26 + $0x234] ss:$8 sps:$4 sm:$0xff]  }
 0x127   : > { %3641 = vmatmul.mubr.bf16.gmra.mrb[28].mxu0 %v5879_v24  ;;  %3071 = vmatprep.mubr.bf16.mxu1 %v5883_v25  ;;  %v6053_v24 = vld [vmem:[%s6745_s26 + $0x534] ss:$8 sps:$4 sm:$0xff]   ;;  %v6017_v25 = vld [vmem:[%s6745_s26 + $0x230] ss:$8 sps:$4 sm:$0xff]  }
 0x128   : > { %3650 = vmatprep.mubr.bf16.mxu0 %v5885_v26  ;;  %3181 = vmatpush1.bf16.msra.mxu1 %v5960_v28  ;;  %v6028_v26 = vld [vmem:[%s6745_s26 + $0x244] ss:$8 sps:$4 sm:$0xff]   ;;  %v6008_v28 = vld [vmem:[%s6752_s12 + $0xd0] ss:$44 sps:$4 sm:$0xff]   ;;  %v6012_v30 = vld [vmem:[%s6752_s12 + $0x114] ss:$44 sps:$4 sm:$0xff]  }
 0x129   : > { %3760 = vmatpush1.bf16.msra.mxu0 %v5964_v29  ;;  %3182 = vmatprep.subr.bf16.mxu1 %v5974_v35  ;;  %v6051_v29 = vld [vmem:[%s6745_s26 + $0x530] ss:$8 sps:$4 sm:$0xff]   ;;  %v6072_v35 = vld [vmem:[%s6745_s26 + $0x540] ss:$8 sps:$4 sm:$0xff]  }
 0x12a   : > { %3761 = vmatprep.subr.bf16.mxu0 %v5978_v37  ;;  %v6038_v37 = vld [vmem:[%s6745_s26 + $0x250] ss:$8 sps:$4 sm:$0xff]  }
 0x12c   : > { %3183 = vmatpush1.bf16.msra.mxu1 %v5972_v33  ;;  %v6026_v33 = vld [vmem:[%s6745_s26 + $0x240] ss:$8 sps:$4 sm:$0xff]  }
 0x12d   : > { %3762 = vmatpush1.bf16.msra.mxu0 %v5976_v36  ;;  %3345 = vmatprep.subr.bf16.mxu1 %v5987_v39  ;;  %v6095_v36 = vld [vmem:[%s6745_s26 + $0x554] ss:$8 sps:$4 sm:$0xff]   ;;  %v6049_v39 = vld [vmem:[%s6745_s26 + $0x264] ss:$8 sps:$4 sm:$0xff]  }
 0x12e   : > { %3072 = vmatmul.mubr.bf16.gmra.mrb[32].mxu1 %v5887_v31  ;;  %3924 = vmatprep.subr.bf16.mxu0 %v5990_v40  ;;  %v6014_v31 = vld [vmem:[%s6752_s12 + $0x12c] ss:$44 sps:$4 sm:$0xff]  }
 0x12f   : > { %3651 = vmatmul.mubr.bf16.gmra.mrb[32].mxu0 %v5891_v32  ;;  %3081 = vmatprep.mubr.bf16.mxu1 %v5895_v34  ;;  %v6074_v32 = vld [vmem:[%s6745_s26 + $0x544] ss:$8 sps:$4 sm:$0xff]   ;;  %v6040_v34 = vld [vmem:[%s6745_s26 + $0x254] ss:$8 sps:$4 sm:$0xff]  }
 0x130   : > { %3660 = vmatprep.mubr.bf16.mxu0 %v5897_v38  ;;  %v6093_v38 = vld [vmem:[%s6745_s26 + $0x550] ss:$8 sps:$4 sm:$0xff]   ;;  %v6116_v40 = vld [vmem:[%s6745_s26 + $0x564] ss:$8 sps:$4 sm:$0xff]  }
 0x136   : > { %3082 = vmatmul.mubr.bf16.gmra.mrb[36].mxu1 %v5899_v41  ;;  %v6016_v41 = vld [vmem:[%s6752_s12 + $0x110] ss:$44 sps:$4 sm:$0xff]  }
 0x137   : > { %3661 = vmatmul.mubr.bf16.gmra.mrb[36].mxu0 %v5903_v42  ;;  %3091 = vmatprep.mubr.bf16.mxu1 %v5907_v43  ;;  %v6020_v42 = vld [vmem:[%s6752_s12 + $0x128] ss:$44 sps:$4 sm:$0xff]   ;;  %v6021_v43 = vld [vmem:[%s6752_s12 + $0x16c] ss:$44 sps:$4 sm:$0xff]  }
 0x138   : > { %3670 = vmatprep.mubr.bf16.mxu0 %v5909_v44  ;;  %v6023_v44 = vld [vmem:[%s6752_s12 + $0x184] ss:$44 sps:$4 sm:$0xff]  }
 0x13e   : > { %3092 = vmatmul.mubr.bf16.gmra.mrb[40].mxu1 %v5911_v45  ;;  %v6047_v45 = vld [vmem:[%s6745_s26 + $0x260] ss:$8 sps:$4 sm:$0xff]  }
 0x13f   : > { %3671 = vmatmul.mubr.bf16.gmra.mrb[40].mxu0 %v5915_v46  ;;  %3101 = vmatprep.mubr.bf16.mxu1 %v5919_v47  ;;  %v6114_v46 = vld [vmem:[%s6745_s26 + $0x560] ss:$8 sps:$4 sm:$0xff]   ;;  %v6061_v47 = vld [vmem:[%s6745_s26 + $0x274] ss:$8 sps:$4 sm:$0xff]  }
 0x140   : > { %3680 = vmatprep.mubr.bf16.mxu0 %v5921_v48  ;;  %v6137_v48 = vld [vmem:[%s6745_s26 + $0x574] ss:$8 sps:$4 sm:$0xff]  }
 0x146   : > { %3102 = vmatmul.mubr.bf16.gmra.mrb[44].mxu1 %v5923_v49  ;;  %v6059_v49 = vld [vmem:[%s6745_s26 + $0x270] ss:$8 sps:$4 sm:$0xff]  }
 0x147   : > { %3681 = vmatmul.mubr.bf16.gmra.mrb[44].mxu0 %v5927_v50  ;;  %3111 = vmatprep.mubr.bf16.mxu1 %v5931_v51  ;;  %v6070_v50 = vld [vmem:[%s6745_s26 + $0x284] ss:$8 sps:$4 sm:$0xff]   ;;  %v6135_v51 = vld [vmem:[%s6745_s26 + $0x570] ss:$8 sps:$4 sm:$0xff]  }
 0x148   : > { %3690 = vmatprep.mubr.bf16.mxu0 %v5933_v52  ;;  %v6025_v52 = vld [vmem:[%s6752_s12 + $0x168] ss:$44 sps:$4 sm:$0xff]  }
 0x14e   : > { %3112 = vmatmul.mubr.bf16.gmra.mrb[48].mxu1 %v5935_v53  ;;  %v6029_v53 = vld [vmem:[%s6752_s12 + $0x180] ss:$44 sps:$4 sm:$0xff]  }
 0x14f   : > { %3691 = vmatmul.mubr.bf16.gmra.mrb[48].mxu0 %v5939_v54  ;;  %3121 = vmatprep.mubr.bf16.mxu1 %v5943_v55  ;;  %v6033_v54 = vld [vmem:[%s6752_s12 + $0x1c4] ss:$44 sps:$4 sm:$0xff]   ;;  %v6035_v55 = vld [vmem:[%s6752_s12 + $0x1dc] ss:$44 sps:$4 sm:$0xff]  }
 0x150   : > { %3700 = vmatprep.mubr.bf16.mxu0 %v5945_v56  ;;  %v6068_v56 = vld [vmem:[%s6745_s26 + $0x280] ss:$8 sps:$4 sm:$0xff]  }
 0x156   : > { %3122 = vmatmul.mubr.bf16.gmra.mrb[52].mxu1 %v5947_v57  ;;  %v6082_v57 = vld [vmem:[%s6745_s26 + $0x294] ss:$8 sps:$4 sm:$0xff]  }
 0x157   : > { %3701 = vmatmul.mubr.bf16.gmra.mrb[52].mxu0 %v5951_v58  ;;  %3131 = vmatprep.mubr.bf16.mxu1 %v5955_v59  ;;  %v6080_v58 = vld [vmem:[%s6745_s26 + $0x290] ss:$8 sps:$4 sm:$0xff]   ;;  %v6091_v59 = vld [vmem:[%s6745_s26 + $0x2a4] ss:$8 sps:$4 sm:$0xff]  }
 0x158   : > { %3710 = vmatprep.mubr.bf16.mxu0 %v5957_v60  ;;  %v6037_v60 = vld [vmem:[%s6752_s12 + $0x1c0] ss:$44 sps:$4 sm:$0xff]  }
 0x15e   : > { %3132 = vmatmul.mubr.bf16.gmra.mrb[56].mxu1 %v5959_v61  ;;  %v6041_v61 = vld [vmem:[%s6752_s12 + $0x1d8] ss:$44 sps:$4 sm:$0xff]  }
 0x15f   : > { %3711 = vmatmul.mubr.bf16.gmra.mrb[56].mxu0 %v5963_v62  ;;  %3141 = vmatprep.mubr.bf16.mxu1 %v5967_v63  ;;  %v6042_v62 = vld [vmem:[%s6752_s12 + $0x21c] ss:$44 sps:$4 sm:$0xff]   ;;  %v6044_v63 = vld [vmem:[%s6752_s12 + $0x234] ss:$44 sps:$4 sm:$0xff]  }
 0x160   : > { %3720 = vmatprep.mubr.bf16.mxu0 %v5969_v0  ;;  %v6089_v0 = vld [vmem:[%s6745_s26 + $0x2a0] ss:$8 sps:$4 sm:$0xff]  }
 0x166   : > { %3142 = vmatmul.mubr.bf16.gmra.mrb[60].mxu1 %v5971_v1  ;;  %v6103_v1 = vld [vmem:[%s6745_s26 + $0x2b4] ss:$8 sps:$4 sm:$0xff]  }
 0x167   : > { %3721 = vmatmul.mubr.bf16.gmra.mrb[60].mxu0 %v5975_v2  ;;  %3184 = vmatprep.mubr.bf16.mxu1 %v5981_v3  ;;  %v6101_v2 = vld [vmem:[%s6745_s26 + $0x2b0] ss:$8 sps:$4 sm:$0xff]   ;;  %v6112_v3 = vld [vmem:[%s6745_s26 + $0x2c4] ss:$8 sps:$4 sm:$0xff]  }
 0x168   : > { %3763 = vmatprep.mubr.bf16.mxu0 %v5984_v4  ;;  %v6046_v4 = vld [vmem:[%s6752_s12 + $0x218] ss:$44 sps:$4 sm:$0xff]  }
 0x16e   : > { %3185 = vmatmul.mubr.bf16.vlgmr.msra.gmra.mrb[0].mxu1 %v5979_v5  ;;  %v6050_v5 = vld [vmem:[%s6752_s12 + $0x230] ss:$44 sps:$4 sm:$0xff]  }
 0x16f   : > { %3764 = vmatmul.mubr.bf16.vlgmr.msra.gmra.mrb[0].mxu0 %v5982_v6  ;;  %3346 = vmatpush1.bf16.msra.mxu1 %v5985_v7  ;;  %v6054_v6 = vld [vmem:[%s6752_s12 + $0x274] ss:$44 sps:$4 sm:$0xff]   ;;  %v6056_v7 = vld [vmem:[%s6752_s12 + $0x28c] ss:$44 sps:$4 sm:$0xff]  }
 0x170   : > { %3925 = vmatpush1.bf16.msra.mxu0 %v5988_v8  ;;  %3194 = vmatprep.mubr.bf16.mxu1 %v5991_v9  ;;  %v6110_v8 = vld [vmem:[%s6745_s26 + $0x2c0] ss:$8 sps:$4 sm:$0xff]   ;;  %v6124_v9 = vld [vmem:[%s6745_s26 + $0x2d4] ss:$8 sps:$4 sm:$0xff]  }
 0x171   : > { %3773 = vmatprep.mubr.bf16.mxu0 %v5993_v10  ;;  %3347 = vmatprep.subr.bf16.mxu1 %v5998_v11  ;;  %v6122_v10 = vld [vmem:[%s6745_s26 + $0x2d0] ss:$8 sps:$4 sm:$0xff]   ;;  %v6133_v11 = vld [vmem:[%s6745_s26 + $0x2e4] ss:$8 sps:$4 sm:$0xff]  }
 0x172   : > { %3926 = vmatprep.subr.bf16.mxu0 %v6011_v12  ;;  %v6058_v12 = vld [vmem:[%s6752_s12 + $0x270] ss:$44 sps:$4 sm:$0xff]  }
 0x173   : > { %3348 = vmatpush1.bf16.msra.mxu1 %v5996_v13  ;;  %v6062_v13 = vld [vmem:[%s6752_s12 + $0x288] ss:$44 sps:$4 sm:$0xff]  }
 0x174   : > { %3927 = vmatpush1.bf16.msra.mxu0 %v6009_v15  ;;  %3349 = vmatprep.subr.bf16.mxu1 %v6007_v14  ;;  %v6063_v14 = vld [vmem:[%s6752_s12 + $0x2cc] ss:$44 sps:$4 sm:$0xff]   ;;  %v6065_v15 = vld [vmem:[%s6752_s12 + $0x2e4] ss:$44 sps:$4 sm:$0xff]  }
 0x175   : > { %3928 = vmatprep.subr.bf16.mxu0 %v6032_v16  ;;  %v6131_v16 = vld [vmem:[%s6745_s26 + $0x2e0] ss:$8 sps:$4 sm:$0xff]  }
 0x176   : > { %3195 = vmatmul.mubr.bf16.gmra.mrb[4].mxu1 %v5995_v17  ;;  %v6145_v17 = vld [vmem:[%s6745_s26 + $0x2f4] ss:$8 sps:$4 sm:$0xff]  }
 0x177   : > { %3774 = vmatmul.mubr.bf16.gmra.mrb[4].mxu0 %v5999_v18  ;;  %3204 = vmatprep.mubr.bf16.mxu1 %v6000_v19  ;;  %v6143_v18 = vld [vmem:[%s6745_s26 + $0x2f0] ss:$8 sps:$4 sm:$0xff]   ;;  %v6067_v19 = vld [vmem:[%s6752_s12 + $0x2c8] ss:$44 sps:$4 sm:$0xff]  }
 0x178   : > { %3783 = vmatprep.mubr.bf16.mxu0 %v6002_v20  ;;  %3350 = vmatpush1.bf16.msra.mxu1 %v6005_v21  ;;  %v6071_v20 = vld [vmem:[%s6752_s12 + $0x2e0] ss:$44 sps:$4 sm:$0xff]   ;;  %v6075_v21 = vld [vmem:[%s6752_s12 + $0x324] ss:$44 sps:$4 sm:$0xff]  }
 0x179   : > { %3929 = vmatpush1.bf16.msra.mxu0 %v6030_v22  ;;  %3351 = vmatprep.subr.bf16.mxu1 %v6019_v23  ;;  %v6077_v22 = vld [vmem:[%s6752_s12 + $0x33c] ss:$44 sps:$4 sm:$0xff]   ;;  %v6079_v23 = vld [vmem:[%s6752_s12 + $0x320] ss:$44 sps:$4 sm:$0xff]  }
 0x17a   : > { %3930 = vmatprep.subr.bf16.mxu0 %v6053_v24  ;;  %v6083_v24 = vld [vmem:[%s6752_s12 + $0x338] ss:$44 sps:$4 sm:$0xff]  }
 0x17c   : > { %3352 = vmatpush1.bf16.msra.mxu1 %v6017_v25  ;;  %v6084_v25 = vld [vmem:[%s6752_s12 + $0x37c] ss:$44 sps:$4 sm:$0xff]  }
 0x17d   : > { %3931 = vmatpush1.bf16.msra.mxu0 %v6051_v29  ;;  %3353 = vmatprep.subr.bf16.mxu1 %v6028_v26  ;;  %v6086_v26 = vld [vmem:[%s6752_s12 + $0x394] ss:$44 sps:$4 sm:$0xff]  }
 0x17e   : > { %3932 = vmatprep.subr.bf16.mxu0 %v6074_v32  ;;  %3205 = vmatmul.mubr.bf16.gmra.mrb[8].mxu1 %v6004_v27  ;;  %v6088_v27 = vld [vmem:[%s6752_s12 + $0x378] ss:$44 sps:$4 sm:$0xff]   ;;  %v6096_v29 = vld [vmem:[%s6752_s12 + $0x3d4] ss:$44 sps:$4 sm:$0xff]  }
 0x17f   : > { %3784 = vmatmul.mubr.bf16.gmra.mrb[8].mxu0 %v6008_v28  ;;  %3214 = vmatprep.mubr.bf16.mxu1 %v6012_v30  ;;  %v6092_v28 = vld [vmem:[%s6752_s12 + $0x390] ss:$44 sps:$4 sm:$0xff]   ;;  %v6098_v30 = vld [vmem:[%s6752_s12 + $0x3ec] ss:$44 sps:$4 sm:$0xff]   ;;  %v6104_v32 = vld [vmem:[%s6752_s12 + $0x3e8] ss:$44 sps:$4 sm:$0xff]  }
 0x180   : > { %3793 = vmatprep.mubr.bf16.mxu0 %v6014_v31  ;;  %3354 = vmatpush1.bf16.msra.mxu1 %v6026_v33  ;;  %v6100_v31 = vld [vmem:[%s6752_s12 + $0x3d0] ss:$44 sps:$4 sm:$0xff]   ;;  %v6105_v33 = vld [vmem:[%s6752_s12 + $0x42c] ss:$44 sps:$4 sm:$0xff]  }
 0x181   : > { %3933 = vmatpush1.bf16.msra.mxu0 %v6072_v35  ;;  %3355 = vmatprep.subr.bf16.mxu1 %v6040_v34  ;;  %v6107_v34 = vld [vmem:[%s6752_s12 + $0x444] ss:$44 sps:$4 sm:$0xff]   ;;  %v6109_v35 = vld [vmem:[%s6752_s12 + $0x428] ss:$44 sps:$4 sm:$0xff]  }
 0x182   : > { %3934 = vmatprep.subr.bf16.mxu0 %v6095_v36  ;;  %v6113_v36 = vld [vmem:[%s6752_s12 + $0x440] ss:$44 sps:$4 sm:$0xff]  }
 0x184   : > { %3356 = vmatpush1.bf16.msra.mxu1 %v6038_v37  ;;  %v6117_v37 = vld [vmem:[%s6752_s12 + $0x484] ss:$44 sps:$4 sm:$0xff]  }
 0x185   : > { %3935 = vmatpush1.bf16.msra.mxu0 %v6093_v38  ;;  %3357 = vmatprep.subr.bf16.mxu1 %v6049_v39  ;;  %v6119_v38 = vld [vmem:[%s6752_s12 + $0x49c] ss:$44 sps:$4 sm:$0xff]   ;;  %v6121_v39 = vld [vmem:[%s6752_s12 + $0x480] ss:$44 sps:$4 sm:$0xff]  }
 0x186   : > { %3936 = vmatprep.subr.bf16.mxu0 %v6116_v40  ;;  %3215 = vmatmul.mubr.bf16.gmra.mrb[12].mxu1 %v6016_v41  ;;  %v6125_v40 = vld [vmem:[%s6752_s12 + $0x498] ss:$44 sps:$4 sm:$0xff]   ;;  %v6126_v41 = vld [vmem:[%s6752_s12 + $0x4dc] ss:$44 sps:$4 sm:$0xff]  }
 0x187   : > { %3794 = vmatmul.mubr.bf16.gmra.mrb[12].mxu0 %v6020_v42  ;;  %3224 = vmatprep.mubr.bf16.mxu1 %v6021_v43  ;;  %v6128_v42 = vld [vmem:[%s6752_s12 + $0x4f4] ss:$44 sps:$4 sm:$0xff]   ;;  %v6130_v43 = vld [vmem:[%s6752_s12 + $0x4d8] ss:$44 sps:$4 sm:$0xff]  }
 0x188   : > { %3803 = vmatprep.mubr.bf16.mxu0 %v6023_v44  ;;  %3358 = vmatpush1.bf16.msra.mxu1 %v6047_v45  ;;  %v6134_v44 = vld [vmem:[%s6752_s12 + $0x4f0] ss:$44 sps:$4 sm:$0xff]   ;;  %v6138_v45 = vld [vmem:[%s6752_s12 + $0x534] ss:$44 sps:$4 sm:$0xff]  }
 0x189   : > { %3937 = vmatpush1.bf16.msra.mxu0 %v6114_v46  ;;  %3359 = vmatprep.subr.bf16.mxu1 %v6061_v47  ;;  %v6140_v46 = vld [vmem:[%s6752_s12 + $0x54c] ss:$44 sps:$4 sm:$0xff]   ;;  %v6142_v47 = vld [vmem:[%s6752_s12 + $0x530] ss:$44 sps:$4 sm:$0xff]  }
 0x18a   : > { %3938 = vmatprep.subr.bf16.mxu0 %v6137_v48  ;;  %v6146_v48 = vld [vmem:[%s6752_s12 + $0x548] ss:$44 sps:$4 sm:$0xff]  }
 0x18c   : > { %3360 = vmatpush1.bf16.msra.mxu1 %v6059_v49  ;;  %v6149_v49 = vld [vmem:[%s6752_s12 + $0x14] ss:$44 sps:$4 sm:$0xff]  }
 0x18d   : > { %3939 = vmatpush1.bf16.msra.mxu0 %v6135_v51  ;;  %3361 = vmatprep.subr.bf16.mxu1 %v6070_v50  ;;  %v6268_v50 = vmov 0   ;;  %v6147_v51 = vld [vmem:[%s6752_s12 + $0x10] ss:$44 sps:$4 sm:$0xff]  }
 0x18e   : > { %3225 = vmatmul.mubr.bf16.gmra.mrb[16].mxu1 %v6025_v52  ;;  %v6150_v52 = vld [vmem:[%s6752_s12 + $0x28] ss:$44 sps:$4 sm:$0xff]  }
 0x18f   : > { %3804 = vmatmul.mubr.bf16.gmra.mrb[16].mxu0 %v6029_v53  ;;  %3234 = vmatprep.mubr.bf16.mxu1 %v6033_v54  ;;  %v6151_v53 = vld [vmem:[%s6752_s12 + $0x6c] ss:$44 sps:$4 sm:$0xff]   ;;  %v6153_v54 = vld [vmem:[%s6752_s12 + $0x68] ss:$44 sps:$4 sm:$0xff]  }
 0x190   : > { %3813 = vmatprep.mubr.bf16.mxu0 %v6035_v55  ;;  %3362 = vmatpush1.bf16.msra.mxu1 %v6068_v56  ;;  %v6154_v55 = vld [vmem:[%s6752_s12 + $0x80] ss:$44 sps:$4 sm:$0xff]   ;;  %v6155_v56 = vld [vmem:[%s6752_s12 + $0xc4] ss:$44 sps:$4 sm:$0xff]  }
 0x191   : > { %3363 = vmatprep.subr.bf16.mxu1 %v6082_v57  ;;  %v6157_v57 = vld [vmem:[%s6752_s12 + $0xc0] ss:$44 sps:$4 sm:$0xff]  }
 0x194   : > { %3364 = vmatpush1.bf16.msra.mxu1 %v6080_v58  ;;  %v6158_v58 = vld [vmem:[%s6752_s12 + $0xd8] ss:$44 sps:$4 sm:$0xff]  }
 0x195   : > { %3365 = vmatprep.subr.bf16.mxu1 %v6091_v59  ;;  %v6159_v59 = vld [vmem:[%s6752_s12 + $0x11c] ss:$44 sps:$4 sm:$0xff]  }
 0x196   : > { %3235 = vmatmul.mubr.bf16.gmra.mrb[20].mxu1 %v6037_v60  ;;  %v6161_v60 = vld [vmem:[%s6752_s12 + $0x118] ss:$44 sps:$4 sm:$0xff]  }
 0x197   : > { %3814 = vmatmul.mubr.bf16.gmra.mrb[20].mxu0 %v6041_v61  ;;  %3244 = vmatprep.mubr.bf16.mxu1 %v6042_v62  ;;  %v6162_v61 = vld [vmem:[%s6752_s12 + $0x130] ss:$44 sps:$4 sm:$0xff]   ;;  %v6163_v62 = vld [vmem:[%s6752_s12 + $0x174] ss:$44 sps:$4 sm:$0xff]  }
 0x198   : > { %3823 = vmatprep.mubr.bf16.mxu0 %v6044_v63  ;;  %3366 = vmatpush1.bf16.msra.mxu1 %v6089_v0  ;;  %v6165_v63 = vld [vmem:[%s6752_s12 + $0x170] ss:$44 sps:$4 sm:$0xff]   ;;  %v6166_v0 = vld [vmem:[%s6752_s12 + $0x188] ss:$44 sps:$4 sm:$0xff]  }
 0x199   : > { %3367 = vmatprep.subr.bf16.mxu1 %v6103_v1  ;;  %v6167_v1 = vld [vmem:[%s6752_s12 + $0x1cc] ss:$44 sps:$4 sm:$0xff]  }
 0x19c   : > { %3368 = vmatpush1.bf16.msra.mxu1 %v6101_v2  ;;  %v6169_v2 = vld [vmem:[%s6752_s12 + $0x1c8] ss:$44 sps:$4 sm:$0xff]  }
 0x19d   : > { %3369 = vmatprep.subr.bf16.mxu1 %v6112_v3  ;;  %v6170_v3 = vld [vmem:[%s6752_s12 + $0x1e0] ss:$44 sps:$4 sm:$0xff]  }
 0x19e   : > { %3245 = vmatmul.mubr.bf16.gmra.mrb[24].mxu1 %v6046_v4  ;;  %v6171_v4 = vld [vmem:[%s6752_s12 + $0x224] ss:$44 sps:$4 sm:$0xff]  }
 0x19f   : > { %3824 = vmatmul.mubr.bf16.gmra.mrb[24].mxu0 %v6050_v5  ;;  %3254 = vmatprep.mubr.bf16.mxu1 %v6054_v6  ;;  %v6173_v5 = vld [vmem:[%s6752_s12 + $0x220] ss:$44 sps:$4 sm:$0xff]   ;;  %v6174_v6 = vld [vmem:[%s6752_s12 + $0x238] ss:$44 sps:$4 sm:$0xff]  }
 0x1a0   : > { %3833 = vmatprep.mubr.bf16.mxu0 %v6056_v7  ;;  %3370 = vmatpush1.bf16.msra.mxu1 %v6110_v8  ;;  %v6175_v7 = vld [vmem:[%s6752_s12 + $0x27c] ss:$44 sps:$4 sm:$0xff]   ;;  %v6177_v8 = vld [vmem:[%s6752_s12 + $0x278] ss:$44 sps:$4 sm:$0xff]  }
 0x1a1   : > { %3371 = vmatprep.subr.bf16.mxu1 %v6124_v9  ;;  %v6178_v9 = vld [vmem:[%s6752_s12 + $0x290] ss:$44 sps:$4 sm:$0xff]  }
 0x1a4   : > { %3372 = vmatpush1.bf16.msra.mxu1 %v6122_v10  ;;  %v6179_v10 = vld [vmem:[%s6752_s12 + $0x2d4] ss:$44 sps:$4 sm:$0xff]  }
 0x1a5   : > { %3373 = vmatprep.subr.bf16.mxu1 %v6133_v11  ;;  %v6181_v11 = vld [vmem:[%s6752_s12 + $0x2d0] ss:$44 sps:$4 sm:$0xff]  }
 0x1a6   : > { %3255 = vmatmul.mubr.bf16.gmra.mrb[28].mxu1 %v6058_v12  ;;  %v6182_v12 = vld [vmem:[%s6752_s12 + $0x2e8] ss:$44 sps:$4 sm:$0xff]  }
 0x1a7   : > { %3834 = vmatmul.mubr.bf16.gmra.mrb[28].mxu0 %v6062_v13  ;;  %3264 = vmatprep.mubr.bf16.mxu1 %v6063_v14  ;;  %v6183_v13 = vld [vmem:[%s6752_s12 + $0x32c] ss:$44 sps:$4 sm:$0xff]   ;;  %v6185_v14 = vld [vmem:[%s6752_s12 + $0x328] ss:$44 sps:$4 sm:$0xff]  }
 0x1a8   : > { %3843 = vmatprep.mubr.bf16.mxu0 %v6065_v15  ;;  %3374 = vmatpush1.bf16.msra.mxu1 %v6131_v16  ;;  %v6186_v15 = vld [vmem:[%s6752_s12 + $0x340] ss:$44 sps:$4 sm:$0xff]   ;;  %v6187_v16 = vld [vmem:[%s6752_s12 + $0x384] ss:$44 sps:$4 sm:$0xff]  }
 0x1a9   : > { %3375 = vmatprep.subr.bf16.mxu1 %v6145_v17  ;;  %v6189_v17 = vld [vmem:[%s6752_s12 + $0x380] ss:$44 sps:$4 sm:$0xff]  }
 0x1ac   : > { %3376 = vmatpush1.bf16.msra.mxu1 %v6143_v18  ;;  %v6190_v18 = vld [vmem:[%s6752_s12 + $0x398] ss:$44 sps:$4 sm:$0xff]  }
 0x1ae   : > { %3265 = vmatmul.mubr.bf16.gmra.mrb[32].mxu1 %v6067_v19  ;;  %v6191_v19 = vld [vmem:[%s6752_s12 + $0x3dc] ss:$44 sps:$4 sm:$0xff]  }
 0x1af   : > { %3844 = vmatmul.mubr.bf16.gmra.mrb[32].mxu0 %v6071_v20  ;;  %3274 = vmatprep.mubr.bf16.mxu1 %v6075_v21  ;;  %v6193_v20 = vld [vmem:[%s6752_s12 + $0x3d8] ss:$44 sps:$4 sm:$0xff]   ;;  %v6194_v21 = vld [vmem:[%s6752_s12 + $0x3f0] ss:$44 sps:$4 sm:$0xff]  }
 0x1b0   : > { %3853 = vmatprep.mubr.bf16.mxu0 %v6077_v22  ;;  %v6195_v22 = vld [vmem:[%s6752_s12 + $0x434] ss:$44 sps:$4 sm:$0xff]  }
 0x1b6   : > { %3275 = vmatmul.mubr.bf16.gmra.mrb[36].mxu1 %v6079_v23  ;;  %v6197_v23 = vld [vmem:[%s6752_s12 + $0x430] ss:$44 sps:$4 sm:$0xff]  }
 0x1b7   : > { %3854 = vmatmul.mubr.bf16.gmra.mrb[36].mxu0 %v6083_v24  ;;  %3284 = vmatprep.mubr.bf16.mxu1 %v6084_v25  ;;  %v6198_v24 = vld [vmem:[%s6752_s12 + $0x448] ss:$44 sps:$4 sm:$0xff]   ;;  %v6199_v25 = vld [vmem:[%s6752_s12 + $0x48c] ss:$44 sps:$4 sm:$0xff]  }
 0x1b8   : > { %3863 = vmatprep.mubr.bf16.mxu0 %v6086_v26  ;;  %v6201_v26 = vld [vmem:[%s6752_s12 + $0x488] ss:$44 sps:$4 sm:$0xff]  }
 0x1be   : > { %3285 = vmatmul.mubr.bf16.gmra.mrb[40].mxu1 %v6088_v27  ;;  %v6202_v27 = vld [vmem:[%s6752_s12 + $0x4a0] ss:$44 sps:$4 sm:$0xff]  }
 0x1bf   : > { %3864 = vmatmul.mubr.bf16.gmra.mrb[40].mxu0 %v6092_v28  ;;  %3294 = vmatprep.mubr.bf16.mxu1 %v6096_v29  ;;  %v6203_v28 = vld [vmem:[%s6752_s12 + $0x4e4] ss:$44 sps:$4 sm:$0xff]   ;;  %v6205_v29 = vld [vmem:[%s6752_s12 + $0x4e0] ss:$44 sps:$4 sm:$0xff]  }
 0x1c0   : > { %3873 = vmatprep.mubr.bf16.mxu0 %v6098_v30  ;;  %v6206_v30 = vld [vmem:[%s6752_s12 + $0x4f8] ss:$44 sps:$4 sm:$0xff]  }
 0x1c6   : > { %3295 = vmatmul.mubr.bf16.gmra.mrb[44].mxu1 %v6100_v31  ;;  %v6207_v31 = vld [vmem:[%s6752_s12 + $0x53c] ss:$44 sps:$4 sm:$0xff]  }
 0x1c7   : > { %3874 = vmatmul.mubr.bf16.gmra.mrb[44].mxu0 %v6104_v32  ;;  %3304 = vmatprep.mubr.bf16.mxu1 %v6105_v33  ;;  %v6209_v32 = vld [vmem:[%s6752_s12 + $0x538] ss:$44 sps:$4 sm:$0xff]   ;;  %v6210_v33 = vld [vmem:[%s6752_s12 + $0x550] ss:$44 sps:$4 sm:$0xff]  }
 0x1c8   : > { %3883 = vmatprep.mubr.bf16.mxu0 %v6107_v34 }
 0x1ce   : > { %3305 = vmatmul.mubr.bf16.gmra.mrb[48].mxu1 %v6109_v35  ;;  %v751_v35 = vld [vmem:[#allocation2] sm:$0xff] }
 0x1cf   : > { %3884 = vmatmul.mubr.bf16.gmra.mrb[48].mxu0 %v6113_v36  ;;  %3314 = vmatprep.mubr.bf16.mxu1 %v6117_v37 }
 0x1d0   : > { %3893 = vmatprep.mubr.bf16.mxu0 %v6119_v38 }
 0x1d6   : > { %3315 = vmatmul.mubr.bf16.gmra.mrb[52].mxu1 %v6121_v39  ;;  %v752_v39 = vld [vmem:[#allocation2 + $0x8] sm:$0xff] }
 0x1d7   : > { %3894 = vmatmul.mubr.bf16.gmra.mrb[52].mxu0 %v6125_v40  ;;  %3324 = vmatprep.mubr.bf16.mxu1 %v6126_v41 }
 0x1d8   : > { %3903 = vmatprep.mubr.bf16.mxu0 %v6128_v42 }
 0x1de   : > { %3325 = vmatmul.mubr.bf16.gmra.mrb[56].mxu1 %v6130_v43  ;;  %v753_v43 = vld [vmem:[#allocation2 + $0x10] sm:$0xff] }
 0x1df   : > { %3904 = vmatmul.mubr.bf16.gmra.mrb[56].mxu0 %v6134_v44  ;;  %3334 = vmatprep.mubr.bf16.mxu1 %v6138_v45 }
 0x1e0   : > { %3913 = vmatprep.mubr.bf16.mxu0 %v6140_v46 }
 0x1e6   : > { %3335 = vmatmul.mubr.bf16.gmra.mrb[60].mxu1 %v6142_v47 }
 0x1e7   : > { %3914 = vmatmul.mubr.bf16.gmra.mrb[60].mxu0 %v6146_v48  ;;  %3377 = vmatprep.mubr.bf16.mxu1 %v6149_v49  ;;  %v754_v48 = vld [vmem:[#allocation2 + $0x18] sm:$0xff] }
 0x1e8   : > { %3956 = vmatprep.mubr.bf16.mxu0 %v6268_v50 }
 0x1ee   : > { %3378 = vmatmul.mubr.bf16.vlgmr.msra.gmra.mrb[0].mxu1 %v6147_v51 }
 0x1ef   : > { %3957 = vmatmul.mubr.bf16.vlgmr.msra.gmra.mrb[0].mxu0 %v6150_v52  ;;  %3387 = vmatprep.mubr.bf16.mxu1 %v6151_v53 }
 0x1f0   : > { %3966 = vmatprep.mubr.bf16.mxu0 %v6268_v50 }
 0x1f6   : > { %3388 = vmatmul.mubr.bf16.gmra.mrb[4].mxu1 %v6153_v54 }
 0x1f7   : > { %3967 = vmatmul.mubr.bf16.gmra.mrb[4].mxu0 %v6154_v55  ;;  %3397 = vmatprep.mubr.bf16.mxu1 %v6155_v56  ;;  %v755_v55 = vld [vmem:[#allocation2 + $0x20] sm:$0xff] }
 0x1f8   : > { %3976 = vmatprep.mubr.bf16.mxu0 %v6268_v50 }
 0x1fe   : > { %3398 = vmatmul.mubr.bf16.gmra.mrb[8].mxu1 %v6157_v57 }
 0x1ff   : > { %3977 = vmatmul.mubr.bf16.gmra.mrb[8].mxu0 %v6158_v58  ;;  %3407 = vmatprep.mubr.bf16.mxu1 %v6159_v59  ;;  %v756_v59 = vld [vmem:[#allocation2 + $0x28] sm:$0xff] }
 0x200   : > { %3986 = vmatprep.mubr.bf16.mxu0 %v6268_v50 }
 0x206   : > { %3408 = vmatmul.mubr.bf16.gmra.mrb[12].mxu1 %v6161_v60 }
 0x207   : > { %3987 = vmatmul.mubr.bf16.gmra.mrb[12].mxu0 %v6162_v61  ;;  %3417 = vmatprep.mubr.bf16.mxu1 %v6163_v62 }
 0x208   : > { %3996 = vmatprep.mubr.bf16.mxu0 %v6268_v50 }
 0x20e   : > { %3418 = vmatmul.mubr.bf16.gmra.mrb[16].mxu1 %v6165_v63  ;;  %v757_v63 = vld [vmem:[#allocation2 + $0x30] sm:$0xff] }
 0x20f   : > { %3997 = vmatmul.mubr.bf16.gmra.mrb[16].mxu0 %v6166_v0  ;;  %3427 = vmatprep.mubr.bf16.mxu1 %v6167_v1 }
 0x210   : > { %4006 = vmatprep.mubr.bf16.mxu0 %v6268_v50 }
 0x216   : > { %3428 = vmatmul.mubr.bf16.gmra.mrb[20].mxu1 %v6169_v2 }
 0x217   : > { %4007 = vmatmul.mubr.bf16.gmra.mrb[20].mxu0 %v6170_v3  ;;  %3437 = vmatprep.mubr.bf16.mxu1 %v6171_v4  ;;  %v758_v4 = vld [vmem:[#allocation2 + $0x38] sm:$0xff] }
 0x218   : > { %4016 = vmatprep.mubr.bf16.mxu0 %v6268_v50 }
 0x21e   : > { %3438 = vmatmul.mubr.bf16.gmra.mrb[24].mxu1 %v6173_v5 }
 0x21f   : > { %4017 = vmatmul.mubr.bf16.gmra.mrb[24].mxu0 %v6174_v6  ;;  %3447 = vmatprep.mubr.bf16.mxu1 %v6175_v7 }
 0x220   : > { %4026 = vmatprep.mubr.bf16.mxu0 %v6268_v50 }
 0x226   : > { %3448 = vmatmul.mubr.bf16.gmra.mrb[28].mxu1 %v6177_v8 }
 0x227   : > { %4027 = vmatmul.mubr.bf16.gmra.mrb[28].mxu0 %v6178_v9  ;;  %3457 = vmatprep.mubr.bf16.mxu1 %v6179_v10 }
 0x228   : > { %4036 = vmatprep.mubr.bf16.mxu0 %v6268_v50 }
 0x22e   : > { %3458 = vmatmul.mubr.bf16.gmra.mrb[32].mxu1 %v6181_v11  ;;  %v759_v11 = vld [vmem:[#allocation2 + $0x40] sm:$0xff] }
 0x22f   : > { %4037 = vmatmul.mubr.bf16.gmra.mrb[32].mxu0 %v6182_v12  ;;  %3467 = vmatprep.mubr.bf16.mxu1 %v6183_v13 }
 0x230   : > { %4046 = vmatprep.mubr.bf16.mxu0 %v6268_v50 }
 0x236   : > { %3468 = vmatmul.mubr.bf16.gmra.mrb[36].mxu1 %v6185_v14 }
 0x237   : > { %4047 = vmatmul.mubr.bf16.gmra.mrb[36].mxu0 %v6186_v15  ;;  %3477 = vmatprep.mubr.bf16.mxu1 %v6187_v16  ;;  %v760_v15 = vld [vmem:[#allocation2 + $0x48] sm:$0xff] }
 0x238   : > { %4056 = vmatprep.mubr.bf16.mxu0 %v6268_v50 }
 0x23e   : > { %3478 = vmatmul.mubr.bf16.gmra.mrb[40].mxu1 %v6189_v17 }
 0x23f   : > { %4057 = vmatmul.mubr.bf16.gmra.mrb[40].mxu0 %v6190_v18  ;;  %3487 = vmatprep.mubr.bf16.mxu1 %v6191_v19  ;;  %v761_v19 = vld [vmem:[#allocation2 + $0x50] sm:$0xff] }
 0x240   : > { %4066 = vmatprep.mubr.bf16.mxu0 %v6268_v50 }
 0x246   : > { %3488 = vmatmul.mubr.bf16.gmra.mrb[44].mxu1 %v6193_v20 }
 0x247   : > { %4067 = vmatmul.mubr.bf16.gmra.mrb[44].mxu0 %v6194_v21  ;;  %3497 = vmatprep.mubr.bf16.mxu1 %v6195_v22 }
 0x248   : > { %4076 = vmatprep.mubr.bf16.mxu0 %v6268_v50 }
 0x24e   : > { %3498 = vmatmul.mubr.bf16.gmra.mrb[48].mxu1 %v6197_v23 }
 0x24f   : > { %4077 = vmatmul.mubr.bf16.gmra.mrb[48].mxu0 %v6198_v24  ;;  %3507 = vmatprep.mubr.bf16.mxu1 %v6199_v25  ;;  %v762_v24 = vld [vmem:[#allocation2 + $0x58] sm:$0xff] }
 0x250   : > { %4086 = vmatprep.mubr.bf16.mxu0 %v6268_v50 }
 0x256   : > { %3508 = vmatmul.mubr.bf16.gmra.mrb[52].mxu1 %v6201_v26 }
 0x257   : > { %4087 = vmatmul.mubr.bf16.gmra.mrb[52].mxu0 %v6202_v27  ;;  %3517 = vmatprep.mubr.bf16.mxu1 %v6203_v28 }
 0x258   : > { %4096 = vmatprep.mubr.bf16.mxu0 %v6268_v50 }
 0x25e   : > { %3518 = vmatmul.mubr.bf16.gmra.mrb[56].mxu1 %v6205_v29 }
 0x25f   : > { %4097 = vmatmul.mubr.bf16.gmra.mrb[56].mxu0 %v6206_v30  ;;  %3527 = vmatprep.mubr.bf16.mxu1 %v6207_v31  ;;  %v763_v31 = vld [vmem:[#allocation2 + $0x60] sm:$0xff] }
 0x260   : > { %4106 = vmatprep.mubr.bf16.mxu0 %v6268_v50 }
 0x266   : > { %3528 = vmatmul.mubr.bf16.gmra.mrb[60].mxu1 %v6209_v32 }
 0x267   : > { %4107 = vmatmul.mubr.bf16.gmra.mrb[60].mxu0 %v6210_v33 }
 0x2c1   : > { %v3379_v34 = vpop.f32.mrb[0].mxu1 }
 0x2c2   : > { %v3958_v36 = vpop.f32.mrb[0].mxu0  ;;  %v3381_v38 = vpop.f32.mrb[1].mxu1 }
 0x2c3   : > { %v5310_v37 = vadd.f32 %v3958_v36, %v3379_v34  ;;  %v3960_v40 = vpop.f32.mrb[1].mxu0  ;;  %v3383_v42 = vpop.f32.mrb[2].mxu1 }
 0x2c4   : > { %v5311_v41 = vadd.f32 %v3960_v40, %v3381_v38  ;;  %v3962_v44 = vpop.f32.mrb[2].mxu0  ;;  %v3385_v47 = vpop.f32.mrb[3].mxu1 }
 0x2c5   : > { %v4117_v45 = vadd.f32 %v5310_v37, %v751_v35  ;;  %v5312_v46 = vadd.f32 %v3962_v44, %v3383_v42  ;;  %v3964_v49 = vpop.f32.mrb[3].mxu0  ;;  %v764_v35 = vld [vmem:[#allocation2 + $0x68] sm:$0xff]  ;;  %v766_v44 = vld [vmem:[#allocation2 + $0x78] sm:$0xff] }
 0x2c6   : > { %v4118_v50 = vadd.f32 %v5311_v41, %v752_v39  ;;  %v5313_v51 = vadd.f32 %v3964_v49, %v3385_v47  ;;  %v765_v39 = vld [vmem:[#allocation2 + $0x70] sm:$0xff] }
 0x2c7   : > { %4181 = vst [vmem:[#allocation2] sm:$0xff] %v4117_v45  ;;  %v4119_v52 = vadd.f32 %v5312_v46, %v753_v43 }
 0x2c8   : > { %4182 = vst [vmem:[#allocation2 + $0x8] sm:$0xff] %v4118_v50  ;;  %v4120_v53 = vadd.f32 %v5313_v51, %v754_v48  ;;  %v767_v51 = vld [vmem:[#allocation2 + $0x80] sm:$0xff] }
 0x2c9   : > { %4183 = vst [vmem:[#allocation2 + $0x10] sm:$0xff] %v4119_v52  ;;  %v3389_v54 = vpop.f32.mrb[4].mxu1 }
 0x2ca   : > { %4184 = vst [vmem:[#allocation2 + $0x18] sm:$0xff] %v4120_v53  ;;  %v3968_v56 = vpop.f32.mrb[4].mxu0  ;;  %v3391_v58 = vpop.f32.mrb[5].mxu1 }
 0x2cb   : > { %v5314_v57 = vadd.f32 %v3968_v56, %v3389_v54  ;;  %v3970_v60 = vpop.f32.mrb[5].mxu0  ;;  %v3393_v62 = vpop.f32.mrb[6].mxu1 }
 0x2cc   : > { %v5315_v61 = vadd.f32 %v3970_v60, %v3391_v58  ;;  %v3972_v0 = vpop.f32.mrb[6].mxu0  ;;  %v3395_v3 = vpop.f32.mrb[7].mxu1 }
 0x2cd   : > { %v4121_v1 = vadd.f32 %v5314_v57, %v755_v55  ;;  %v5316_v2 = vadd.f32 %v3972_v0, %v3393_v62  ;;  %v3974_v5 = vpop.f32.mrb[7].mxu0  ;;  %v768_v55 = vld [vmem:[#allocation2 + $0x88] sm:$0xff]  ;;  %v770_v0 = vld [vmem:[#allocation2 + $0x98] sm:$0xff] }
 0x2ce   : > { %v4122_v6 = vadd.f32 %v5315_v61, %v756_v59  ;;  %v5317_v7 = vadd.f32 %v3974_v5, %v3395_v3  ;;  %v769_v59 = vld [vmem:[#allocation2 + $0x90] sm:$0xff] }
 0x2cf   : > { %4185 = vst [vmem:[#allocation2 + $0x20] sm:$0xff] %v4121_v1  ;;  %v4123_v8 = vadd.f32 %v5316_v2, %v757_v63 }
 0x2d0   : > { %4186 = vst [vmem:[#allocation2 + $0x28] sm:$0xff] %v4122_v6  ;;  %v4124_v9 = vadd.f32 %v5317_v7, %v758_v4  ;;  %v771_v7 = vld [vmem:[#allocation2 + $0xa0] sm:$0xff] }
 0x2d1   : > { %4187 = vst [vmem:[#allocation2 + $0x30] sm:$0xff] %v4123_v8  ;;  %v3399_v10 = vpop.f32.mrb[8].mxu1 }
 0x2d2   : > { %4188 = vst [vmem:[#allocation2 + $0x38] sm:$0xff] %v4124_v9  ;;  %v3978_v12 = vpop.f32.mrb[8].mxu0  ;;  %v3401_v14 = vpop.f32.mrb[9].mxu1 }
 0x2d3   : > { %v5318_v13 = vadd.f32 %v3978_v12, %v3399_v10  ;;  %v3980_v16 = vpop.f32.mrb[9].mxu0  ;;  %v3403_v18 = vpop.f32.mrb[10].mxu1 }
 0x2d4   : > { %v5319_v17 = vadd.f32 %v3980_v16, %v3401_v14  ;;  %v3982_v20 = vpop.f32.mrb[10].mxu0  ;;  %v3405_v23 = vpop.f32.mrb[11].mxu1 }
 0x2d5   : > { %v4125_v21 = vadd.f32 %v5318_v13, %v759_v11  ;;  %v5320_v22 = vadd.f32 %v3982_v20, %v3403_v18  ;;  %v3984_v25 = vpop.f32.mrb[11].mxu0  ;;  %v772_v11 = vld [vmem:[#allocation2 + $0xa8] sm:$0xff]  ;;  %v774_v20 = vld [vmem:[#allocation2 + $0xb8] sm:$0xff] }
 0x2d6   : > { %v4126_v26 = vadd.f32 %v5319_v17, %v760_v15  ;;  %v5321_v27 = vadd.f32 %v3984_v25, %v3405_v23  ;;  %v773_v15 = vld [vmem:[#allocation2 + $0xb0] sm:$0xff] }
 0x2d7   : > { %4189 = vst [vmem:[#allocation2 + $0x40] sm:$0xff] %v4125_v21  ;;  %v4127_v28 = vadd.f32 %v5320_v22, %v761_v19 }
 0x2d8   : > { %4190 = vst [vmem:[#allocation2 + $0x48] sm:$0xff] %v4126_v26  ;;  %v4128_v29 = vadd.f32 %v5321_v27, %v762_v24  ;;  %v775_v27 = vld [vmem:[#allocation2 + $0xc0] sm:$0xff] }
 0x2d9   : > { %4191 = vst [vmem:[#allocation2 + $0x50] sm:$0xff] %v4127_v28  ;;  %v3409_v30 = vpop.f32.mrb[12].mxu1 }
 0x2da   : > { %4192 = vst [vmem:[#allocation2 + $0x58] sm:$0xff] %v4128_v29  ;;  %v3988_v32 = vpop.f32.mrb[12].mxu0  ;;  %v3411_v34 = vpop.f32.mrb[13].mxu1 }
 0x2db   : > { %v5322_v33 = vadd.f32 %v3988_v32, %v3409_v30  ;;  %v3990_v36 = vpop.f32.mrb[13].mxu0  ;;  %v3413_v38 = vpop.f32.mrb[14].mxu1 }
 0x2dc   : > { %v5323_v37 = vadd.f32 %v3990_v36, %v3411_v34  ;;  %v3992_v40 = vpop.f32.mrb[14].mxu0  ;;  %v3415_v43 = vpop.f32.mrb[15].mxu1 }
 0x2dd   : > { %v4129_v41 = vadd.f32 %v5322_v33, %v763_v31  ;;  %v5324_v42 = vadd.f32 %v3992_v40, %v3413_v38  ;;  %v3994_v45 = vpop.f32.mrb[15].mxu0  ;;  %v776_v31 = vld [vmem:[#allocation2 + $0xc8] sm:$0xff]  ;;  %v778_v40 = vld [vmem:[#allocation2 + $0xd8] sm:$0xff] }
 0x2de   : > { %v4130_v46 = vadd.f32 %v5323_v37, %v764_v35  ;;  %v5325_v47 = vadd.f32 %v3994_v45, %v3415_v43  ;;  %v777_v35 = vld [vmem:[#allocation2 + $0xd0] sm:$0xff] }
 0x2df   : > { %4193 = vst [vmem:[#allocation2 + $0x60] sm:$0xff] %v4129_v41  ;;  %v4131_v48 = vadd.f32 %v5324_v42, %v765_v39 }
 0x2e0   : > { %4194 = vst [vmem:[#allocation2 + $0x68] sm:$0xff] %v4130_v46  ;;  %v4132_v49 = vadd.f32 %v5325_v47, %v766_v44  ;;  %v779_v47 = vld [vmem:[#allocation2 + $0xe0] sm:$0xff] }
 0x2e1   : > { %4195 = vst [vmem:[#allocation2 + $0x70] sm:$0xff] %v4131_v48  ;;  %v3419_v50 = vpop.f32.mrb[16].mxu1 }
 0x2e2   : > { %4196 = vst [vmem:[#allocation2 + $0x78] sm:$0xff] %v4132_v49  ;;  %v3998_v52 = vpop.f32.mrb[16].mxu0  ;;  %v3421_v54 = vpop.f32.mrb[17].mxu1 }
 0x2e3   : > { %v5326_v53 = vadd.f32 %v3998_v52, %v3419_v50  ;;  %v4000_v56 = vpop.f32.mrb[17].mxu0  ;;  %v3423_v58 = vpop.f32.mrb[18].mxu1 }
 0x2e4   : > { %v5327_v57 = vadd.f32 %v4000_v56, %v3421_v54  ;;  %v4002_v60 = vpop.f32.mrb[18].mxu0  ;;  %v3425_v63 = vpop.f32.mrb[19].mxu1 }
 0x2e5   : > { %v4133_v61 = vadd.f32 %v5326_v53, %v767_v51  ;;  %v5328_v62 = vadd.f32 %v4002_v60, %v3423_v58  ;;  %v4004_v1 = vpop.f32.mrb[19].mxu0  ;;  %v780_v51 = vld [vmem:[#allocation2 + $0xe8] sm:$0xff]  ;;  %v782_v60 = vld [vmem:[#allocation2 + $0xf8] sm:$0xff] }
 0x2e6   : > { %v4134_v2 = vadd.f32 %v5327_v57, %v768_v55  ;;  %v5329_v3 = vadd.f32 %v4004_v1, %v3425_v63  ;;  %v781_v55 = vld [vmem:[#allocation2 + $0xf0] sm:$0xff] }
 0x2e7   : > { %4197 = vst [vmem:[#allocation2 + $0x80] sm:$0xff] %v4133_v61  ;;  %v4135_v4 = vadd.f32 %v5328_v62, %v769_v59 }
 0x2e8   : > { %4198 = vst [vmem:[#allocation2 + $0x88] sm:$0xff] %v4134_v2  ;;  %v4136_v5 = vadd.f32 %v5329_v3, %v770_v0  ;;  %v783_v3 = vld [vmem:[#allocation2 + $0x100] sm:$0xff] }
 0x2e9   : > { %4199 = vst [vmem:[#allocation2 + $0x90] sm:$0xff] %v4135_v4  ;;  %v3429_v6 = vpop.f32.mrb[20].mxu1 }
 0x2ea   : > { %4200 = vst [vmem:[#allocation2 + $0x98] sm:$0xff] %v4136_v5  ;;  %v4008_v8 = vpop.f32.mrb[20].mxu0  ;;  %v3431_v10 = vpop.f32.mrb[21].mxu1 }
 0x2eb   : > { %v5330_v9 = vadd.f32 %v4008_v8, %v3429_v6  ;;  %v4010_v12 = vpop.f32.mrb[21].mxu0  ;;  %v3433_v14 = vpop.f32.mrb[22].mxu1 }
 0x2ec   : > { %v5331_v13 = vadd.f32 %v4010_v12, %v3431_v10  ;;  %v4012_v16 = vpop.f32.mrb[22].mxu0  ;;  %v3435_v19 = vpop.f32.mrb[23].mxu1 }
 0x2ed   : > { %v4137_v17 = vadd.f32 %v5330_v9, %v771_v7  ;;  %v5332_v18 = vadd.f32 %v4012_v16, %v3433_v14  ;;  %v4014_v21 = vpop.f32.mrb[23].mxu0  ;;  %v784_v7 = vld [vmem:[#allocation2 + $0x108] sm:$0xff]  ;;  %v786_v16 = vld [vmem:[#allocation2 + $0x118] sm:$0xff] }
 0x2ee   : > { %v4138_v22 = vadd.f32 %v5331_v13, %v772_v11  ;;  %v5333_v23 = vadd.f32 %v4014_v21, %v3435_v19  ;;  %v785_v11 = vld [vmem:[#allocation2 + $0x110] sm:$0xff] }
 0x2ef   : > { %4201 = vst [vmem:[#allocation2 + $0xa0] sm:$0xff] %v4137_v17  ;;  %v4139_v24 = vadd.f32 %v5332_v18, %v773_v15 }
 0x2f0   : > { %4202 = vst [vmem:[#allocation2 + $0xa8] sm:$0xff] %v4138_v22  ;;  %v4140_v25 = vadd.f32 %v5333_v23, %v774_v20  ;;  %v787_v23 = vld [vmem:[#allocation2 + $0x120] sm:$0xff] }
 0x2f1   : > { %4203 = vst [vmem:[#allocation2 + $0xb0] sm:$0xff] %v4139_v24  ;;  %v3439_v26 = vpop.f32.mrb[24].mxu1 }
 0x2f2   : > { %4204 = vst [vmem:[#allocation2 + $0xb8] sm:$0xff] %v4140_v25  ;;  %v4018_v28 = vpop.f32.mrb[24].mxu0  ;;  %v3441_v30 = vpop.f32.mrb[25].mxu1 }
 0x2f3   : > { %v5334_v29 = vadd.f32 %v4018_v28, %v3439_v26  ;;  %v4020_v32 = vpop.f32.mrb[25].mxu0  ;;  %v3443_v34 = vpop.f32.mrb[26].mxu1 }
 0x2f4   : > { %v5335_v33 = vadd.f32 %v4020_v32, %v3441_v30  ;;  %v4022_v36 = vpop.f32.mrb[26].mxu0  ;;  %v3445_v39 = vpop.f32.mrb[27].mxu1 }
 0x2f5   : > { %v4141_v37 = vadd.f32 %v5334_v29, %v775_v27  ;;  %v5336_v38 = vadd.f32 %v4022_v36, %v3443_v34  ;;  %v4024_v41 = vpop.f32.mrb[27].mxu0  ;;  %v788_v27 = vld [vmem:[#allocation2 + $0x128] sm:$0xff]  ;;  %v790_v36 = vld [vmem:[#allocation2 + $0x138] sm:$0xff] }
 0x2f6   : > { %v4142_v42 = vadd.f32 %v5335_v33, %v776_v31  ;;  %v5337_v43 = vadd.f32 %v4024_v41, %v3445_v39  ;;  %v789_v31 = vld [vmem:[#allocation2 + $0x130] sm:$0xff] }
 0x2f7   : > { %4205 = vst [vmem:[#allocation2 + $0xc0] sm:$0xff] %v4141_v37  ;;  %v4143_v44 = vadd.f32 %v5336_v38, %v777_v35 }
 0x2f8   : > { %4206 = vst [vmem:[#allocation2 + $0xc8] sm:$0xff] %v4142_v42  ;;  %v4144_v45 = vadd.f32 %v5337_v43, %v778_v40  ;;  %v791_v43 = vld [vmem:[#allocation2 + $0x140] sm:$0xff] }
 0x2f9   : > { %4207 = vst [vmem:[#allocation2 + $0xd0] sm:$0xff] %v4143_v44  ;;  %v3449_v46 = vpop.f32.mrb[28].mxu1 }
 0x2fa   : > { %4208 = vst [vmem:[#allocation2 + $0xd8] sm:$0xff] %v4144_v45  ;;  %v4028_v48 = vpop.f32.mrb[28].mxu0  ;;  %v3451_v50 = vpop.f32.mrb[29].mxu1 }
 0x2fb   : > { %v5338_v49 = vadd.f32 %v4028_v48, %v3449_v46  ;;  %v4030_v52 = vpop.f32.mrb[29].mxu0  ;;  %v3453_v54 = vpop.f32.mrb[30].mxu1 }
 0x2fc   : > { %v5339_v53 = vadd.f32 %v4030_v52, %v3451_v50  ;;  %v4032_v56 = vpop.f32.mrb[30].mxu0  ;;  %v3455_v59 = vpop.f32.mrb[31].mxu1 }
 0x2fd   : > { %v4145_v57 = vadd.f32 %v5338_v49, %v779_v47  ;;  %v5340_v58 = vadd.f32 %v4032_v56, %v3453_v54  ;;  %v4034_v61 = vpop.f32.mrb[31].mxu0  ;;  %v792_v47 = vld [vmem:[#allocation2 + $0x148] sm:$0xff]  ;;  %v794_v56 = vld [vmem:[#allocation2 + $0x158] sm:$0xff] }
 0x2fe   : > { %v4146_v62 = vadd.f32 %v5339_v53, %v780_v51  ;;  %v5341_v63 = vadd.f32 %v4034_v61, %v3455_v59  ;;  %v793_v51 = vld [vmem:[#allocation2 + $0x150] sm:$0xff] }
 0x2ff   : > { %4209 = vst [vmem:[#allocation2 + $0xe0] sm:$0xff] %v4145_v57  ;;  %v4147_v0 = vadd.f32 %v5340_v58, %v781_v55 }
 0x300   : > { %4210 = vst [vmem:[#allocation2 + $0xe8] sm:$0xff] %v4146_v62  ;;  %v4148_v1 = vadd.f32 %v5341_v63, %v782_v60  ;;  %v795_v63 = vld [vmem:[#allocation2 + $0x160] sm:$0xff] }
 0x301   : > { %4211 = vst [vmem:[#allocation2 + $0xf0] sm:$0xff] %v4147_v0  ;;  %v3459_v2 = vpop.f32.mrb[32].mxu1 }
 0x302   : > { %4212 = vst [vmem:[#allocation2 + $0xf8] sm:$0xff] %v4148_v1  ;;  %v4038_v4 = vpop.f32.mrb[32].mxu0  ;;  %v3461_v6 = vpop.f32.mrb[33].mxu1 }
 0x303   : > { %v5342_v5 = vadd.f32 %v4038_v4, %v3459_v2  ;;  %v4040_v8 = vpop.f32.mrb[33].mxu0  ;;  %v3463_v10 = vpop.f32.mrb[34].mxu1 }
 0x304   : > { %v5343_v9 = vadd.f32 %v4040_v8, %v3461_v6  ;;  %v4042_v12 = vpop.f32.mrb[34].mxu0  ;;  %v3465_v15 = vpop.f32.mrb[35].mxu1 }
 0x305   : > { %v4149_v13 = vadd.f32 %v5342_v5, %v783_v3  ;;  %v5344_v14 = vadd.f32 %v4042_v12, %v3463_v10  ;;  %v4044_v17 = vpop.f32.mrb[35].mxu0  ;;  %v796_v3 = vld [vmem:[#allocation2 + $0x168] sm:$0xff]  ;;  %v798_v12 = vld [vmem:[#allocation2 + $0x178] sm:$0xff] }
 0x306   : > { %v4150_v18 = vadd.f32 %v5343_v9, %v784_v7  ;;  %v5345_v19 = vadd.f32 %v4044_v17, %v3465_v15  ;;  %v797_v7 = vld [vmem:[#allocation2 + $0x170] sm:$0xff] }
 0x307   : > { %4213 = vst [vmem:[#allocation2 + $0x100] sm:$0xff] %v4149_v13  ;;  %v4151_v20 = vadd.f32 %v5344_v14, %v785_v11 }
 0x308   : > { %4214 = vst [vmem:[#allocation2 + $0x108] sm:$0xff] %v4150_v18  ;;  %v4152_v21 = vadd.f32 %v5345_v19, %v786_v16  ;;  %v799_v19 = vld [vmem:[#allocation2 + $0x180] sm:$0xff] }
 0x309   : > { %4215 = vst [vmem:[#allocation2 + $0x110] sm:$0xff] %v4151_v20  ;;  %v3469_v22 = vpop.f32.mrb[36].mxu1 }
 0x30a   : > { %4216 = vst [vmem:[#allocation2 + $0x118] sm:$0xff] %v4152_v21  ;;  %v4048_v24 = vpop.f32.mrb[36].mxu0  ;;  %v3471_v26 = vpop.f32.mrb[37].mxu1 }
 0x30b   : > { %v5346_v25 = vadd.f32 %v4048_v24, %v3469_v22  ;;  %v4050_v28 = vpop.f32.mrb[37].mxu0  ;;  %v3473_v30 = vpop.f32.mrb[38].mxu1 }
 0x30c   : > { %v5347_v29 = vadd.f32 %v4050_v28, %v3471_v26  ;;  %v4052_v32 = vpop.f32.mrb[38].mxu0  ;;  %v3475_v35 = vpop.f32.mrb[39].mxu1 }
 0x30d   : > { %v4153_v33 = vadd.f32 %v5346_v25, %v787_v23  ;;  %v5348_v34 = vadd.f32 %v4052_v32, %v3473_v30  ;;  %v4054_v37 = vpop.f32.mrb[39].mxu0  ;;  %v800_v23 = vld [vmem:[#allocation2 + $0x188] sm:$0xff]  ;;  %v802_v32 = vld [vmem:[#allocation2 + $0x198] sm:$0xff] }
 0x30e   : > { %v4154_v38 = vadd.f32 %v5347_v29, %v788_v27  ;;  %v5349_v39 = vadd.f32 %v4054_v37, %v3475_v35  ;;  %v801_v27 = vld [vmem:[#allocation2 + $0x190] sm:$0xff] }
 0x30f   : > { %4217 = vst [vmem:[#allocation2 + $0x120] sm:$0xff] %v4153_v33  ;;  %v4155_v40 = vadd.f32 %v5348_v34, %v789_v31 }
 0x310   : > { %4218 = vst [vmem:[#allocation2 + $0x128] sm:$0xff] %v4154_v38  ;;  %v4156_v41 = vadd.f32 %v5349_v39, %v790_v36  ;;  %v803_v39 = vld [vmem:[#allocation2 + $0x1a0] sm:$0xff] }
 0x311   : > { %4219 = vst [vmem:[#allocation2 + $0x130] sm:$0xff] %v4155_v40  ;;  %v3479_v42 = vpop.f32.mrb[40].mxu1 }
 0x312   : > { %4220 = vst [vmem:[#allocation2 + $0x138] sm:$0xff] %v4156_v41  ;;  %v4058_v44 = vpop.f32.mrb[40].mxu0  ;;  %v3481_v46 = vpop.f32.mrb[41].mxu1 }
 0x313   : > { %v5350_v45 = vadd.f32 %v4058_v44, %v3479_v42  ;;  %v4060_v48 = vpop.f32.mrb[41].mxu0  ;;  %v3483_v50 = vpop.f32.mrb[42].mxu1 }
 0x314   : > { %v5351_v49 = vadd.f32 %v4060_v48, %v3481_v46  ;;  %v4062_v52 = vpop.f32.mrb[42].mxu0  ;;  %v3485_v55 = vpop.f32.mrb[43].mxu1 }
 0x315   : > { %v4157_v53 = vadd.f32 %v5350_v45, %v791_v43  ;;  %v5352_v54 = vadd.f32 %v4062_v52, %v3483_v50  ;;  %v4064_v57 = vpop.f32.mrb[43].mxu0  ;;  %v804_v43 = vld [vmem:[#allocation2 + $0x1a8] sm:$0xff]  ;;  %v806_v52 = vld [vmem:[#allocation2 + $0x1b8] sm:$0xff] }
 0x316   : > { %v4158_v58 = vadd.f32 %v5351_v49, %v792_v47  ;;  %v5353_v59 = vadd.f32 %v4064_v57, %v3485_v55  ;;  %v805_v47 = vld [vmem:[#allocation2 + $0x1b0] sm:$0xff] }
 0x317   : > { %4221 = vst [vmem:[#allocation2 + $0x140] sm:$0xff] %v4157_v53  ;;  %v4159_v60 = vadd.f32 %v5352_v54, %v793_v51 }
 0x318   : > { %4222 = vst [vmem:[#allocation2 + $0x148] sm:$0xff] %v4158_v58  ;;  %v4160_v61 = vadd.f32 %v5353_v59, %v794_v56  ;;  %v807_v59 = vld [vmem:[#allocation2 + $0x1c0] sm:$0xff] }
 0x319   : > { %4223 = vst [vmem:[#allocation2 + $0x150] sm:$0xff] %v4159_v60  ;;  %v3489_v62 = vpop.f32.mrb[44].mxu1 }
 0x31a   : > { %4224 = vst [vmem:[#allocation2 + $0x158] sm:$0xff] %v4160_v61  ;;  %v4068_v0 = vpop.f32.mrb[44].mxu0  ;;  %v3491_v2 = vpop.f32.mrb[45].mxu1 }
 0x31b   : > { %v5354_v1 = vadd.f32 %v4068_v0, %v3489_v62  ;;  %v4070_v4 = vpop.f32.mrb[45].mxu0  ;;  %v3493_v6 = vpop.f32.mrb[46].mxu1 }
 0x31c   : > { %v5355_v5 = vadd.f32 %v4070_v4, %v3491_v2  ;;  %v4072_v8 = vpop.f32.mrb[46].mxu0  ;;  %v3495_v11 = vpop.f32.mrb[47].mxu1 }
 0x31d   : > { %v4161_v9 = vadd.f32 %v5354_v1, %v795_v63  ;;  %v5356_v10 = vadd.f32 %v4072_v8, %v3493_v6  ;;  %v4074_v13 = vpop.f32.mrb[47].mxu0  ;;  %v808_v63 = vld [vmem:[#allocation2 + $0x1c8] sm:$0xff]  ;;  %v810_v8 = vld [vmem:[#allocation2 + $0x1d8] sm:$0xff] }
 0x31e   : > { %v4162_v14 = vadd.f32 %v5355_v5, %v796_v3  ;;  %v5357_v15 = vadd.f32 %v4074_v13, %v3495_v11  ;;  %v809_v3 = vld [vmem:[#allocation2 + $0x1d0] sm:$0xff] }
 0x31f   : > { %4225 = vst [vmem:[#allocation2 + $0x160] sm:$0xff] %v4161_v9  ;;  %v4163_v16 = vadd.f32 %v5356_v10, %v797_v7 }
 0x320   : > { %4226 = vst [vmem:[#allocation2 + $0x168] sm:$0xff] %v4162_v14  ;;  %v4164_v17 = vadd.f32 %v5357_v15, %v798_v12  ;;  %v811_v15 = vld [vmem:[#allocation2 + $0x1e0] sm:$0xff] }
 0x321   : > { %4227 = vst [vmem:[#allocation2 + $0x170] sm:$0xff] %v4163_v16  ;;  %v3499_v18 = vpop.f32.mrb[48].mxu1 }
 0x322   : > { %4228 = vst [vmem:[#allocation2 + $0x178] sm:$0xff] %v4164_v17  ;;  %v4078_v20 = vpop.f32.mrb[48].mxu0  ;;  %v3501_v22 = vpop.f32.mrb[49].mxu1 }
 0x323   : > { %v5358_v21 = vadd.f32 %v4078_v20, %v3499_v18  ;;  %v4080_v24 = vpop.f32.mrb[49].mxu0  ;;  %v3503_v26 = vpop.f32.mrb[50].mxu1 }
 0x324   : > { %v5359_v25 = vadd.f32 %v4080_v24, %v3501_v22  ;;  %v4082_v28 = vpop.f32.mrb[50].mxu0  ;;  %v3505_v31 = vpop.f32.mrb[51].mxu1 }
 0x325   : > { %v4165_v29 = vadd.f32 %v5358_v21, %v799_v19  ;;  %v5360_v30 = vadd.f32 %v4082_v28, %v3503_v26  ;;  %v4084_v33 = vpop.f32.mrb[51].mxu0  ;;  %v812_v19 = vld [vmem:[#allocation2 + $0x1e8] sm:$0xff]  ;;  %v814_v28 = vld [vmem:[#allocation2 + $0x1f8] sm:$0xff] }
 0x326   : > { %v4166_v34 = vadd.f32 %v5359_v25, %v800_v23  ;;  %v5361_v35 = vadd.f32 %v4084_v33, %v3505_v31  ;;  %v813_v23 = vld [vmem:[#allocation2 + $0x1f0] sm:$0xff] }
 0x327   : > { %4229 = vst [vmem:[#allocation2 + $0x180] sm:$0xff] %v4165_v29  ;;  %v4167_v36 = vadd.f32 %v5360_v30, %v801_v27 }
 0x328   : > { %4230 = vst [vmem:[#allocation2 + $0x188] sm:$0xff] %v4166_v34  ;;  %v4168_v37 = vadd.f32 %v5361_v35, %v802_v32  ;;  %v4315_v34 = vlaneseq (!%p5241_p13) }
 0x329   : > { %4231 = vst [vmem:[#allocation2 + $0x190] sm:$0xff] %v4167_v36  ;;  %v3509_v38 = vpop.f32.mrb[52].mxu1  ;;  %v4313_v36 = vld [vmem:[%s7314_s2] sm:$0x3] (!%p5241_p13) }
 0x32a   : > { %4232 = vst [vmem:[#allocation2 + $0x198] sm:$0xff] %v4168_v37  ;;  %v4088_v40 = vpop.f32.mrb[52].mxu0  ;;  %v3511_v42 = vpop.f32.mrb[53].mxu1  ;;  %v4316_v35 = vshrl.u32 (!%p5241_p13), %v4315_v34, 7  ;;  %v4249_v37 = vld [vmem:[#allocation2] sm:$0xff] (!%p5241_p13)  ;;  %v4270_v34 = vld [vmem:[#allocation2 + $0xa8] sm:$0xff] (!%p5241_p13) }
 0x32b   : > { %v5362_v41 = vadd.f32 %v4088_v40, %v3509_v38  ;;  %v4090_v44 = vpop.f32.mrb[53].mxu0  ;;  %v3513_v46 = vpop.f32.mrb[54].mxu1  ;;  %v4250_v38 = vld [vmem:[#allocation2 + $0x8] sm:$0xff] (!%p5241_p13) }
 0x32c   : > { %v5363_v45 = vadd.f32 %v4090_v44, %v3511_v42  ;;  %v4092_v48 = vpop.f32.mrb[54].mxu0  ;;  %v3515_v51 = vpop.f32.mrb[55].mxu1  ;;  %v4321_v40 = vsub.s32 (!%p5241_p13), 1, %v4316_v35  ;;  %v4252_v42 = vld [vmem:[#allocation2 + $0x18] sm:$0xff] (!%p5241_p13) }
 0x32d   : > { %v4169_v49 = vadd.f32 %v5362_v41, %v803_v39  ;;  %v5364_v50 = vadd.f32 %v4092_v48, %v3513_v46  ;;  %v4094_v53 = vpop.f32.mrb[55].mxu0  ;;  %v4317_v39 = vsub.s32 (!%p5241_p13), 0, %v4316_v35  ;;  %v4251_v41 = vld [vmem:[#allocation2 + $0x10] sm:$0xff] (!%p5241_p13)  ;;  %v4254_v46 = vld [vmem:[#allocation2 + $0x28] sm:$0xff] (!%p5241_p13)  ;;  %v4256_v48 = vld [vmem:[#allocation2 + $0x38] sm:$0xff] (!%p5241_p13) }
 0x32e   : > { %v4170_v54 = vadd.f32 %v5363_v45, %v804_v43  ;;  %v5365_v55 = vadd.f32 %v4094_v53, %v3515_v51  ;;  %v4253_v43 = vld [vmem:[#allocation2 + $0x20] sm:$0xff] (!%p5241_p13)  ;;  %v7193_v45 = vrot.slane (!%p5241_p13), %v4313_v36, %v4321_v40  ;;  %v4272_v40 = vld [vmem:[#allocation2 + $0xb8] sm:$0xff] (!%p5241_p13) }
 0x32f   : > { %4233 = vst [vmem:[#allocation2 + $0x1a0] sm:$0xff] %v4169_v49  ;;  %v4171_v56 = vadd.f32 %v5364_v50, %v805_v47  ;;  %v7191_v44 = vrot.slane (!%p5241_p13), %v4313_v36, %v4317_v39  ;;  %v4255_v47 = vld [vmem:[#allocation2 + $0x30] sm:$0xff] (!%p5241_p13) }
 0x330   : > { %4234 = vst [vmem:[#allocation2 + $0x1a8] sm:$0xff] %v4170_v54  ;;  %v4172_v57 = vadd.f32 %v5365_v55, %v806_v52  ;;  %v4326_v50 = vadd.f32 (!%p5241_p13), %v7193_v45, %v4250_v38  ;;  %v4328_v52 = vadd.f32 (!%p5241_p13), %v7193_v45, %v4252_v42  ;;  %v4330_v54 = vadd.f32 (!%p5241_p13), %v7193_v45, %v4254_v46  ;;  %v4271_v39 = vld [vmem:[#allocation2 + $0xb0] sm:$0xff] (!%p5241_p13) }
 0x331   : > { %4235 = vst [vmem:[#allocation2 + $0x1b0] sm:$0xff] %v4171_v56  ;;  %v3519_v58 = vpop.f32.mrb[56].mxu1  ;;  %v4325_v49 = vadd.f32 (!%p5241_p13), %v7191_v44, %v4249_v37  ;;  %v4327_v51 = vadd.f32 (!%p5241_p13), %v7191_v44, %v4251_v41  ;;  %v4329_v53 = vadd.f32 (!%p5241_p13), %v7191_v44, %v4253_v43  ;;  %v4331_v55 = vadd.f32 (!%p5241_p13), %v7191_v44, %v4255_v47  ;;  %v4273_v47 = vld [vmem:[#allocation2 + $0xc0] sm:$0xff] (!%p5241_p13) }
 0x332   : > { %4236 = vst [vmem:[#allocation2 + $0x1b8] sm:$0xff] %v4172_v57  ;;  %v4098_v60 = vpop.f32.mrb[56].mxu0  ;;  %v3521_v62 = vpop.f32.mrb[57].mxu1  ;;  %v4332_v56 = vadd.f32 (!%p5241_p13), %v7193_v45, %v4256_v48  ;;  %v4257_v57 = vld [vmem:[#allocation2 + $0x40] sm:$0xff] (!%p5241_p13) }
 0x333   : > { %v5366_v61 = vadd.f32 %v4098_v60, %v3519_v58  ;;  %v4100_v0 = vpop.f32.mrb[57].mxu0  ;;  %v3523_v2 = vpop.f32.mrb[58].mxu1  ;;  %v4258_v58 = vld [vmem:[#allocation2 + $0x48] sm:$0xff] (!%p5241_p13)  ;;  %v4390_v60 = vmax.f32 (!%p5241_p13), %v4326_v50, 0.0 }
 0x334   : > { %v5367_v1 = vadd.f32 %v4100_v0, %v3521_v62  ;;  %v4102_v4 = vpop.f32.mrb[58].mxu0  ;;  %v3525_v7 = vpop.f32.mrb[59].mxu1  ;;  %v4392_v62 = vmax.f32 (!%p5241_p13), %v4328_v52, 0.0  ;;  %v4260_v0 = vld [vmem:[#allocation2 + $0x58] sm:$0xff] (!%p5241_p13)  ;;  %v4274_v52 = vld [vmem:[#allocation2 + $0xc8] sm:$0xff] (!%p5241_p13) }
 0x335   : > { %v4173_v5 = vadd.f32 %v5366_v61, %v807_v59  ;;  %v5368_v6 = vadd.f32 %v4102_v4, %v3523_v2  ;;  %v4104_v9 = vpop.f32.mrb[59].mxu0  ;;  %v4389_v59 = vmax.f32 (!%p5241_p13), %v4325_v49, 0.0  ;;  %v4391_v61 = vmax.f32 (!%p5241_p13), %v4327_v51, 0.0 }
 0x336   : > { %v4174_v10 = vadd.f32 %v5367_v1, %v808_v63  ;;  %v5369_v11 = vadd.f32 %v4104_v9, %v3525_v7  ;;  %v4259_v63 = vld [vmem:[#allocation2 + $0x50] sm:$0xff] (!%p5241_p13)  ;;  %v4393_v1 = vmax.f32 (!%p5241_p13), %v4329_v53, 0.0  ;;  %v4394_v2 = vmax.f32 (!%p5241_p13), %v4330_v54, 0.0 }
 0x337   : > { %4237 = vst [vmem:[#allocation2 + $0x1c0] sm:$0xff] %v4173_v5  ;;  %v4175_v12 = vadd.f32 %v5368_v6, %v809_v3  ;;  %v4395_v3 = vmax.f32 (!%p5241_p13), %v4331_v55, 0.0  ;;  %v4396_v4 = vmax.f32 (!%p5241_p13), %v4332_v56, 0.0  ;;  %v4261_v5 = vld [vmem:[#allocation2 + $0x60] sm:$0xff] (!%p5241_p13)  ;;  %v4262_v6 = vld [vmem:[#allocation2 + $0x68] sm:$0xff] (!%p5241_p13)  ;;  %v5278_v7 = vpack.c.bf16 (!%p5241_p13), %v4390_v60, %v4389_v59 }
 0x338   : > { %4238 = vst [vmem:[#allocation2 + $0x1c8] sm:$0xff] %v4174_v10  ;;  %v4176_v13 = vadd.f32 %v5369_v11, %v810_v8  ;;  %v5279_v8 = vpack.c.bf16 (!%p5241_p13), %v4392_v62, %v4391_v61  ;;  %v4333_v9 = vadd.f32 (!%p5241_p13), %v7191_v44, %v4257_v57  ;;  %v4334_v10 = vadd.f32 (!%p5241_p13), %v7193_v45, %v4258_v58  ;;  %v4263_v11 = vld [vmem:[#allocation2 + $0x70] sm:$0xff] (!%p5241_p13)  ;;  %v4276_v58 = vld [vmem:[#allocation2 + $0xd8] sm:$0xff] (!%p5241_p13) }
 0x339   : > { %4239 = vst [vmem:[#allocation2 + $0x1d0] sm:$0xff] %v4175_v12  ;;  %v3529_v14 = vpop.f32.mrb[60].mxu1  ;;  %v4264_v12 = vld [vmem:[#allocation2 + $0x78] sm:$0xff] (!%p5241_p13)  ;;  %4645 = vst [vmem:[%s6750_s30] sm:$0xff] (!%p5241_p13), %v5278_v7  ;;  %v4346_v51 = vadd.f32 (!%p5241_p13), %v7193_v45, %v4270_v34  ;;  %v4347_v55 = vadd.f32 (!%p5241_p13), %v7191_v44, %v4271_v39  ;;  %v4348_v56 = vadd.f32 (!%p5241_p13), %v7193_v45, %v4272_v40  ;;  %v4275_v57 = vld [vmem:[#allocation2 + $0xd0] sm:$0xff] (!%p5241_p13) }
 0x33a   : > { %4240 = vst [vmem:[#allocation2 + $0x1d8] sm:$0xff] %v4176_v13  ;;  %v4108_v16 = vpop.f32.mrb[60].mxu0  ;;  %v3531_v18 = vpop.f32.mrb[61].mxu1  ;;  %v5280_v13 = vpack.c.bf16 (!%p5241_p13), %v4394_v2, %v4393_v1  ;;  %4646 = vst [vmem:[%s6750_s30 + $0x8] sm:$0xff] (!%p5241_p13), %v5279_v8  ;;  %v4349_v62 = vadd.f32 (!%p5241_p13), %v7191_v44, %v4273_v47  ;;  %v4288_v34 = vld [vmem:[#allocation2 + $0x138] sm:$0xff] (!%p5241_p13)  ;;  %v4289_v39 = vld [vmem:[#allocation2 + $0x140] sm:$0xff] (!%p5241_p13) }
 0x33b   : > { %v5370_v17 = vadd.f32 %v4108_v16, %v3529_v14  ;;  %v4110_v20 = vpop.f32.mrb[61].mxu0  ;;  %v3533_v22 = vpop.f32.mrb[62].mxu1  ;;  %v5281_v14 = vpack.c.bf16 (!%p5241_p13), %v4396_v4, %v4395_v3  ;;  %v4336_v16 = vadd.f32 (!%p5241_p13), %v7193_v45, %v4260_v0  ;;  %v4410_v61 = vmax.f32 (!%p5241_p13), %v4346_v51, 0.0  ;;  %v4278_v0 = vld [vmem:[#allocation2 + $0xe8] sm:$0xff] (!%p5241_p13)  ;;  %v4291_v51 = vld [vmem:[#allocation2 + $0x150] sm:$0xff] (!%p5241_p13) }
 0x33c   : > { %v5371_v21 = vadd.f32 %v4110_v20, %v3531_v18  ;;  %v4112_v24 = vpop.f32.mrb[62].mxu0  ;;  %v3535_v27 = vpop.f32.mrb[63].mxu1  ;;  %4248 = sbr.rel (%p5241_p13) target bundleno = 867 (0x363), region = 66  ;;  %v4397_v18 = vmax.f32 (!%p5241_p13), %v4333_v9, 0.0  ;;  %v4337_v20 = vadd.f32 (!%p5241_p13), %v7191_v44, %v4261_v5  ;;  %4647 = vst [vmem:[%s6750_s30 + $0x10] sm:$0xff] (!%p5241_p13), %v5280_v13  ;;  %v4411_v2 = vmax.f32 (!%p5241_p13), %v4347_v55, 0.0 }
 0x33d   : > { %v4177_v25 = vadd.f32 %v5370_v17, %v811_v15  ;;  %v5372_v26 = vadd.f32 %v4112_v24, %v3533_v22  ;;  %v4114_v29 = vpop.f32.mrb[63].mxu0  ;;  %v4335_v15 = vadd.f32 (!%p5241_p13), %v7191_v44, %v4259_v63  ;;  %v4265_v17 = vld [vmem:[#allocation2 + $0x80] sm:$0xff] (!%p5241_p13)  ;;  %v4266_v22 = vld [vmem:[#allocation2 + $0x88] sm:$0xff] (!%p5241_p13)  ;;  %4648 = vst [vmem:[%s6750_s30 + $0x18] sm:$0xff] (!%p5241_p13), %v5281_v14  ;;  %v4400_v24 = vmax.f32 (!%p5241_p13), %v4336_v16, 0.0  ;;  %v4279_v5 = vld [vmem:[#allocation2 + $0xf0] sm:$0xff] (!%p5241_p13) }
 0x33e   : > { %v4178_v30 = vadd.f32 %v5371_v21, %v812_v19  ;;  %v5373_v31 = vadd.f32 %v4114_v29, %v3535_v27  ;;  %v4398_v19 = vmax.f32 (!%p5241_p13), %v4334_v10, 0.0  ;;  %v4338_v21 = vadd.f32 (!%p5241_p13), %v7193_v45, %v4262_v6  ;;  %v4267_v27 = vld [vmem:[#allocation2 + $0x90] sm:$0xff] (!%p5241_p13)  ;;  %v4277_v63 = vld [vmem:[#allocation2 + $0xe0] sm:$0xff] (!%p5241_p13)  ;;  %v4280_v6 = vld [vmem:[#allocation2 + $0xf8] sm:$0xff] (!%p5241_p13) }
 0x33f   : > { %4241 = vst [vmem:[#allocation2 + $0x1e0] sm:$0xff] %v4177_v25  ;;  %v4179_v32 = vadd.f32 %v5372_v26, %v813_v23  ;;  %v4399_v23 = vmax.f32 (!%p5241_p13), %v4335_v15, 0.0  ;;  %v4339_v25 = vadd.f32 (!%p5241_p13), %v7191_v44, %v4263_v11  ;;  %v4340_v26 = vadd.f32 (!%p5241_p13), %v7193_v45, %v4264_v12  ;;  %v4281_v11 = vld [vmem:[#allocation2 + $0x100] sm:$0xff] (!%p5241_p13)  ;;  %v4282_v16 = vld [vmem:[#allocation2 + $0x108] sm:$0xff] (!%p5241_p13) }
 0x340   : > { %4242 = vst [vmem:[#allocation2 + $0x1e8] sm:$0xff] %v4178_v30  ;;  %v4180_v33 = vadd.f32 %v5373_v31, %v814_v28  ;;  %v4268_v28 = vld [vmem:[#allocation2 + $0x98] sm:$0xff] (!%p5241_p13)  ;;  %v5282_v29 = vpack.c.bf16 (!%p5241_p13), %v4398_v19, %v4397_v18  ;;  %v4401_v30 = vmax.f32 (!%p5241_p13), %v4337_v20, 0.0  ;;  %v4402_v31 = vmax.f32 (!%p5241_p13), %v4338_v21, 0.0  ;;  %v4283_v21 = vld [vmem:[#allocation2 + $0x110] sm:$0xff] (!%p5241_p13) }
 0x341   : > { %4243 = vst [vmem:[#allocation2 + $0x1f0] sm:$0xff] %v4179_v32  ;;  %v4341_v32 = vadd.f32 (!%p5241_p13), %v7191_v44, %v4265_v17  ;;  %v5283_v35 = vpack.c.bf16 (!%p5241_p13), %v4400_v24, %v4399_v23  ;;  %v4403_v36 = vmax.f32 (!%p5241_p13), %v4339_v25, 0.0  ;;  %v4404_v37 = vmax.f32 (!%p5241_p13), %v4340_v26, 0.0 }
 0x342   : > { %4244 = vst [vmem:[#allocation2 + $0x1f8] sm:$0xff] %v4180_v33  ;;  %v4269_v33 = vld [vmem:[#allocation2 + $0xa0] sm:$0xff] (!%p5241_p13)  ;;  %v4342_v38 = vadd.f32 (!%p5241_p13), %v7193_v45, %v4266_v22  ;;  %4649 = vst [vmem:[%s6750_s30 + $0x20] sm:$0xff] (!%p5241_p13), %v5282_v29  ;;  %v5284_v41 = vpack.c.bf16 (!%p5241_p13), %v4402_v31, %v4401_v30  ;;  %v4343_v43 = vadd.f32 (!%p5241_p13), %v7191_v44, %v4267_v27  ;;  %v4412_v3 = vmax.f32 (!%p5241_p13), %v4348_v56, 0.0  ;;  %v4284_v22 = vld [vmem:[#allocation2 + $0x118] sm:$0xff] (!%p5241_p13) }
 0x343   : > { %v4405_v42 = vmax.f32 %v4341_v32, 0.0  ;;  %v4344_v46 = vadd.f32 %v7193_v45, %v4268_v28  ;;  %4650 = vst [vmem:[%s6750_s30 + $0x28] sm:$0xff] %v5283_v35  ;;  %v5285_v48 = vpack.c.bf16 %v4404_v37, %v4403_v36  ;;  %v4345_v50 = vadd.f32 %v7191_v44, %v4269_v33  ;;  %v4285_v27 = vld [vmem:[#allocation2 + $0x120] sm:$0xff]  ;;  %v4286_v28 = vld [vmem:[#allocation2 + $0x128] sm:$0xff]  ;;  %v4287_v33 = vld [vmem:[#allocation2 + $0x130] sm:$0xff] }
 0x344   : > { %v4406_v49 = vmax.f32 %v4342_v38, 0.0  ;;  %4651 = vst [vmem:[%s6750_s30 + $0x30] sm:$0xff] %v5284_v41  ;;  %v4407_v53 = vmax.f32 %v4343_v43, 0.0  ;;  %v4350_v4 = vadd.f32 %v7193_v45, %v4274_v52  ;;  %v4413_v8 = vmax.f32 %v4349_v62, 0.0  ;;  %v4292_v52 = vld [vmem:[#allocation2 + $0x158] sm:$0xff] }
 0x345   : > { %v4408_v54 = vmax.f32 %v4344_v46, 0.0  ;;  %4652 = vst [vmem:[%s6750_s30 + $0x38] sm:$0xff] %v5285_v48  ;;  %v4409_v60 = vmax.f32 %v4345_v50, 0.0  ;;  %v4351_v9 = vadd.f32 %v7191_v44, %v4275_v57  ;;  %v4352_v10 = vadd.f32 %v7193_v45, %v4276_v58  ;;  %v4290_v46 = vld [vmem:[#allocation2 + $0x148] sm:$0xff]  ;;  %v4293_v57 = vld [vmem:[#allocation2 + $0x160] sm:$0xff] }
 0x346   : > { %v5286_v59 = vpack.c.bf16 %v4406_v49, %v4405_v42  ;;  %v5289_v12 = vpack.c.bf16 %v4412_v3, %v4411_v2  ;;  %v4414_v13 = vmax.f32 %v4350_v4, 0.0  ;;  %v4353_v14 = vadd.f32 %v7191_v44, %v4277_v63  ;;  %v4294_v58 = vld [vmem:[#allocation2 + $0x168] sm:$0xff]  ;;  %v4295_v63 = vld [vmem:[#allocation2 + $0x170] sm:$0xff] }
 0x347   : > { %v5287_v1 = vpack.c.bf16 %v4408_v54, %v4407_v53  ;;  %v5288_v7 = vpack.c.bf16 %v4410_v61, %v4409_v60  ;;  %v4354_v15 = vadd.f32 %v7193_v45, %v4278_v0  ;;  %v4415_v17 = vmax.f32 %v4351_v9, 0.0  ;;  %v4296_v0 = vld [vmem:[#allocation2 + $0x178] sm:$0xff] }
 0x348   : > { %4653 = vst [vmem:[%s6750_s30 + $0x40] sm:$0xff] %v5286_v59  ;;  %v4416_v18 = vmax.f32 %v4352_v10, 0.0  ;;  %v4355_v19 = vadd.f32 %v7191_v44, %v4279_v5  ;;  %v4356_v20 = vadd.f32 %v7193_v45, %v4280_v6  ;;  %4656 = vst [vmem:[%s6750_s30 + $0x58] sm:$0xff] %v5289_v12  ;;  %v5290_v23 = vpack.c.bf16 %v4414_v13, %v4413_v8  ;;  %v4297_v5 = vld [vmem:[#allocation2 + $0x180] sm:$0xff]  ;;  %v4298_v10 = vld [vmem:[#allocation2 + $0x188] sm:$0xff] }
 0x349   : > { %4654 = vst [vmem:[%s6750_s30 + $0x48] sm:$0xff] %v5287_v1  ;;  %4655 = vst [vmem:[%s6750_s30 + $0x50] sm:$0xff] %v5288_v7  ;;  %v4417_v24 = vmax.f32 %v4353_v14, 0.0  ;;  %v4418_v25 = vmax.f32 %v4354_v15, 0.0  ;;  %v4357_v26 = vadd.f32 %v7191_v44, %v4281_v11  ;;  %v4358_v32 = vadd.f32 %v7193_v45, %v4282_v16  ;;  %v4299_v15 = vld [vmem:[#allocation2 + $0x190] sm:$0xff]  ;;  %v4300_v16 = vld [vmem:[#allocation2 + $0x198] sm:$0xff] }
 0x34a   : > { %v5291_v29 = vpack.c.bf16 %v4416_v18, %v4415_v17  ;;  %v4419_v30 = vmax.f32 %v4355_v19, 0.0  ;;  %v4420_v31 = vmax.f32 %v4356_v20, 0.0  ;;  %4657 = vst [vmem:[%s6750_s30 + $0x60] sm:$0xff] %v5290_v23  ;;  %v4359_v37 = vadd.f32 %v7191_v44, %v4283_v21  ;;  %v4301_v21 = vld [vmem:[#allocation2 + $0x1a0] sm:$0xff] }
 0x34b   : > { %v5292_v35 = vpack.c.bf16 %v4418_v25, %v4417_v24  ;;  %v4421_v36 = vmax.f32 %v4357_v26, 0.0  ;;  %v4360_v38 = vadd.f32 %v7193_v45, %v4284_v22  ;;  %v4422_v41 = vmax.f32 %v4358_v32, 0.0  ;;  %v4302_v22 = vld [vmem:[#allocation2 + $0x1a8] sm:$0xff] }
 0x34c   : > { %4658 = vst [vmem:[%s6750_s30 + $0x68] sm:$0xff] %v5291_v29  ;;  %v5293_v40 = vpack.c.bf16 %v4420_v31, %v4419_v30  ;;  %v4361_v42 = vadd.f32 %v7191_v44, %v4285_v27  ;;  %v4362_v43 = vadd.f32 %v7193_v45, %v4286_v28  ;;  %v4423_v47 = vmax.f32 %v4359_v37, 0.0  ;;  %v4303_v27 = vld [vmem:[#allocation2 + $0x1b0] sm:$0xff]  ;;  %v4304_v28 = vld [vmem:[#allocation2 + $0x1b8] sm:$0xff] }
 0x34d   : > { %4659 = vst [vmem:[%s6750_s30 + $0x70] sm:$0xff] %v5292_v35  ;;  %v4424_v48 = vmax.f32 %v4360_v38, 0.0  ;;  %v4363_v49 = vadd.f32 %v7191_v44, %v4287_v33  ;;  %v4364_v50 = vadd.f32 %v7193_v45, %v4288_v34  ;;  %v5294_v53 = vpack.c.bf16 %v4422_v41, %v4421_v36  ;;  %v4305_v33 = vld [vmem:[#allocation2 + $0x1c0] sm:$0xff]  ;;  %v4306_v38 = vld [vmem:[#allocation2 + $0x1c8] sm:$0xff] }
 0x34e   : > { %4660 = vst [vmem:[%s6750_s30 + $0x78] sm:$0xff] %v5293_v40  ;;  %v4425_v54 = vmax.f32 %v4361_v42, 0.0  ;;  %v4426_v55 = vmax.f32 %v4362_v43, 0.0  ;;  %v4365_v56 = vadd.f32 %v7191_v44, %v4289_v39  ;;  %v4366_v62 = vadd.f32 %v7193_v45, %v4290_v46  ;;  %v4307_v43 = vld [vmem:[#allocation2 + $0x1d0] sm:$0xff]  ;;  %v4308_v46 = vld [vmem:[#allocation2 + $0x1d8] sm:$0xff] }
 0x34f   : > { %v5295_v59 = vpack.c.bf16 %v4424_v48, %v4423_v47  ;;  %v4427_v60 = vmax.f32 %v4363_v49, 0.0  ;;  %v4428_v61 = vmax.f32 %v4364_v50, 0.0  ;;  %4661 = vst [vmem:[%s6750_s30 + $0x80] sm:$0xff] %v5294_v53  ;;  %v4367_v3 = vadd.f32 %v7191_v44, %v4291_v51  ;;  %v4309_v51 = vld [vmem:[#allocation2 + $0x1e0] sm:$0xff] }
 0x350   : > { %v5296_v1 = vpack.c.bf16 %v4426_v55, %v4425_v54  ;;  %v4429_v2 = vmax.f32 %v4365_v56, 0.0  ;;  %v4368_v4 = vadd.f32 %v7193_v45, %v4292_v52  ;;  %v4430_v7 = vmax.f32 %v4366_v62, 0.0  ;;  %v4310_v52 = vld [vmem:[#allocation2 + $0x1e8] sm:$0xff] }
 0x351   : > { %4662 = vst [vmem:[%s6750_s30 + $0x88] sm:$0xff] %v5295_v59  ;;  %v5297_v6 = vpack.c.bf16 %v4428_v61, %v4427_v60  ;;  %v4369_v8 = vadd.f32 %v7191_v44, %v4293_v57  ;;  %v4370_v9 = vadd.f32 %v7193_v45, %v4294_v58  ;;  %v4431_v11 = vmax.f32 %v4367_v3, 0.0  ;;  %v4311_v57 = vld [vmem:[#allocation2 + $0x1f0] sm:$0xff]  ;;  %v4312_v58 = vld [vmem:[#allocation2 + $0x1f8] sm:$0xff] }
 0x352   : > { %4663 = vst [vmem:[%s6750_s30 + $0x90] sm:$0xff] %v5296_v1  ;;  %v4432_v12 = vmax.f32 %v4368_v4, 0.0  ;;  %v4371_v13 = vadd.f32 %v7191_v44, %v4295_v63  ;;  %v4372_v14 = vadd.f32 %v7193_v45, %v4296_v0  ;;  %v5298_v17 = vpack.c.bf16 %v4430_v7, %v4429_v2 }
 0x353   : > { %4664 = vst [vmem:[%s6750_s30 + $0x98] sm:$0xff] %v5297_v6  ;;  %v4433_v18 = vmax.f32 %v4369_v8, 0.0  ;;  %v4434_v19 = vmax.f32 %v4370_v9, 0.0  ;;  %v4373_v20 = vadd.f32 %v7191_v44, %v4297_v5  ;;  %v4374_v26 = vadd.f32 %v7193_v45, %v4298_v10 }
 0x354   : > { %v5299_v23 = vpack.c.bf16 %v4432_v12, %v4431_v11  ;;  %v4435_v24 = vmax.f32 %v4371_v13, 0.0  ;;  %v4436_v25 = vmax.f32 %v4372_v14, 0.0  ;;  %4665 = vst [vmem:[%s6750_s30 + $0xa0] sm:$0xff] %v5298_v17  ;;  %v4375_v31 = vadd.f32 %v7191_v44, %v4299_v15 }
 0x355   : > { %v5300_v29 = vpack.c.bf16 %v4434_v19, %v4433_v18  ;;  %v4437_v30 = vmax.f32 %v4373_v20, 0.0  ;;  %v4376_v32 = vadd.f32 %v7193_v45, %v4300_v16  ;;  %v4438_v35 = vmax.f32 %v4374_v26, 0.0 }
 0x356   : > { %4666 = vst [vmem:[%s6750_s30 + $0xa8] sm:$0xff] %v5299_v23  ;;  %v5301_v34 = vpack.c.bf16 %v4436_v25, %v4435_v24  ;;  %v4377_v36 = vadd.f32 %v7191_v44, %v4301_v21  ;;  %v4378_v37 = vadd.f32 %v7193_v45, %v4302_v22  ;;  %v4439_v39 = vmax.f32 %v4375_v31, 0.0 }
 0x357   : > { %4667 = vst [vmem:[%s6750_s30 + $0xb0] sm:$0xff] %v5300_v29  ;;  %v4440_v40 = vmax.f32 %v4376_v32, 0.0  ;;  %v4379_v41 = vadd.f32 %v7191_v44, %v4303_v27  ;;  %v4380_v42 = vadd.f32 %v7193_v45, %v4304_v28  ;;  %v5302_v47 = vpack.c.bf16 %v4438_v35, %v4437_v30 }
 0x358   : > { %4668 = vst [vmem:[%s6750_s30 + $0xb8] sm:$0xff] %v5301_v34  ;;  %v4441_v48 = vmax.f32 %v4377_v36, 0.0  ;;  %v4442_v49 = vmax.f32 %v4378_v37, 0.0  ;;  %v4381_v50 = vadd.f32 %v7191_v44, %v4305_v33  ;;  %v4382_v56 = vadd.f32 %v7193_v45, %v4306_v38 }
 0x359   : > { %v5303_v53 = vpack.c.bf16 %v4440_v40, %v4439_v39  ;;  %v4443_v54 = vmax.f32 %v4379_v41, 0.0  ;;  %v4444_v55 = vmax.f32 %v4380_v42, 0.0  ;;  %4669 = vst [vmem:[%s6750_s30 + $0xc0] sm:$0xff] %v5302_v47  ;;  %v4383_v61 = vadd.f32 %v7191_v44, %v4307_v43 }
 0x35a   : > { %v5304_v59 = vpack.c.bf16 %v4442_v49, %v4441_v48  ;;  %v4445_v60 = vmax.f32 %v4381_v50, 0.0  ;;  %v4384_v62 = vadd.f32 %v7193_v45, %v4308_v46  ;;  %v4446_v0 = vmax.f32 %v4382_v56, 0.0 }
 0x35b   : > { %4670 = vst [vmem:[%s6750_s30 + $0xc8] sm:$0xff] %v5303_v53  ;;  %v5305_v63 = vpack.c.bf16 %v4444_v55, %v4443_v54  ;;  %v4385_v1 = vadd.f32 %v7191_v44, %v4309_v51  ;;  %v4386_v2 = vadd.f32 %v7193_v45, %v4310_v52  ;;  %v4447_v3 = vmax.f32 %v4383_v61, 0.0 }
 0x35c   : > { %4671 = vst [vmem:[%s6750_s30 + $0xd0] sm:$0xff] %v5304_v59  ;;  %v4448_v4 = vmax.f32 %v4384_v62, 0.0  ;;  %v4387_v5 = vadd.f32 %v7191_v44, %v4311_v57  ;;  %v4388_v6 = vadd.f32 %v7193_v45, %v4312_v58  ;;  %v5306_v7 = vpack.c.bf16 %v4446_v0, %v4445_v60 }
 0x35d   : > { %4672 = vst [vmem:[%s6750_s30 + $0xd8] sm:$0xff] %v5305_v63  ;;  %v4449_v8 = vmax.f32 %v4385_v1, 0.0  ;;  %v4450_v9 = vmax.f32 %v4386_v2, 0.0 }
 0x35e   : > { %v5307_v10 = vpack.c.bf16 %v4448_v4, %v4447_v3  ;;  %v4451_v11 = vmax.f32 %v4387_v5, 0.0  ;;  %v4452_v12 = vmax.f32 %v4388_v6, 0.0  ;;  %4673 = vst [vmem:[%s6750_s30 + $0xe0] sm:$0xff] %v5306_v7 }
 0x35f   : > { %v5308_v13 = vpack.c.bf16 %v4450_v9, %v4449_v8 }
 0x360   : > { %4674 = vst [vmem:[%s6750_s30 + $0xe8] sm:$0xff] %v5307_v10  ;;  %v5309_v14 = vpack.c.bf16 %v4452_v12, %v4451_v11 }
 0x361   : > { %4675 = vst [vmem:[%s6750_s30 + $0xf0] sm:$0xff] %v5308_v13 }
 0x362   : > { %4676 = vst [vmem:[%s6750_s30 + $0xf8] sm:$0xff] %v5309_v14 }
 0x363 PF: > { %s13_s18 = sadd.s32 1, %s6265_s18   ;;  %s7316_s12 = smov %s6245_s13 }
 0x364   : > { %p10_p0 = scmp.ge.s32.totalorder %s13_s18, 6   ;;  %s7317_s13 = smov %s6340_s25 }
 0x365   : > { %s7318_s14 = smov %s6257_s16  ;;  %s7319_s15 = smov %s6261_s17 }
 0x366   : > { %s7320_s16 = smov %s7323_s19  ;;  %s7321_s17 = smov %s7327_s20 }
 0x367   :  { %12 = sbr.rel (!%p10_p0) target bundleno = 4 (0x4), region = 113 }

// kernel: deeplab_forward.7
= control target key start
LH: loop header
LB: loop body
LE: loop exit
PB: predicated region body
PF: predicated region fallthrough
CT: control target
= control target key end

     0   :  { %s8096_s15 = smov 0   ;;  %s9618_s0 = inlined_call_operand.vmem [shape: bf16[512,2304], index: 0, kind: input, shape index: {}]   ;;  %s9619_s1 = inlined_call_operand.vmem [shape: bf16[2304,256], index: 1, kind: input, shape index: {}]   ;;  %s9620_s2 = inlined_call_operand.vmem [shape: f32[1,256], index: 2, kind: input, shape index: {}]   ;;  %s9621_s3 = inlined_call_operand.vmem [shape: bf16[256,128], index: 3, kind: input, shape index: {}]   ;;  %s9622_s4 = inlined_call_operand.vmem [shape: f32[512,128], index: 4, kind: output, shape index: {}]  }
   0x1 LB: > { %s5883_s16 = sadd.s32 4294967295, %s8069_s15   ;;  %p5887_p0 = scmp.ge.s32.totalorder %s8069_s15, 1  ;;  %s8069_s15 = sphi %s8096_s15, %s14_s15  }
   0x2   : > { %p164_p1 = scmp.lt.s32.totalorder %s8069_s15, 3 }
   0x4   : > { %p165_p2 = pnand %p5887_p0, %p164_p1 }
   0x6   : > { %168 = sbr.rel (%p165_p2) target bundleno = 1151 (0x47f), region = 36 }
   0xd   : > { %v7183_v0 = vld [vmem:[%s9619_s1 + $0x4] ss:$8 sps:$4 sm:$0xff]   ;;  %v7187_v2 = vld [vmem:[%s9619_s1] ss:$8 sps:$4 sm:$0xff]   ;;  %v7189_v4 = vld [vmem:[%s9619_s1 + $0x14] ss:$8 sps:$4 sm:$0xff]  }
   0xe   : > { %v7185_v1 = vld [vmem:[%s9619_s1 + $0x404] ss:$8 sps:$4 sm:$0xff]   ;;  %3673 = vmatprep.subr.bf16.mxu1 %v7183_v0  ;;  %v7188_v3 = vld [vmem:[%s9619_s1 + $0x400] ss:$8 sps:$4 sm:$0xff]   ;;  %v7191_v5 = vld [vmem:[%s9619_s1 + $0x414] ss:$8 sps:$4 sm:$0xff]  }
   0xf   : > { %4445 = vmatprep.subr.bf16.mxu0 %v7185_v1  ;;  %3674 = vmatpush1.bf16.msra.mxu1 %v7187_v2  ;;  %v7193_v6 = vld [vmem:[%s9619_s1 + $0x10] ss:$8 sps:$4 sm:$0xff]   ;;  %v7195_v8 = vld [vmem:[%s9619_s1 + $0x24] ss:$8 sps:$4 sm:$0xff]   ;;  %v7199_v10 = vld [vmem:[%s9619_s1 + $0x20] ss:$8 sps:$4 sm:$0xff]  }
  0x10   : > { %4446 = vmatpush1.bf16.msra.mxu0 %v7188_v3  ;;  %3675 = vmatprep.subr.bf16.mxu1 %v7189_v4  ;;  %v7194_v7 = vld [vmem:[%s9619_s1 + $0x410] ss:$8 sps:$4 sm:$0xff]   ;;  %v7197_v9 = vld [vmem:[%s9619_s1 + $0x424] ss:$8 sps:$4 sm:$0xff]   ;;  %v7200_v11 = vld [vmem:[%s9619_s1 + $0x420] ss:$8 sps:$4 sm:$0xff]  }
  0x11   : > { %4447 = vmatprep.subr.bf16.mxu0 %v7191_v5  ;;  %v7201_v12 = vld [vmem:[%s9619_s1 + $0x34] ss:$8 sps:$4 sm:$0xff]   ;;  %v7205_v14 = vld [vmem:[%s9619_s1 + $0x30] ss:$8 sps:$4 sm:$0xff]   ;;  %v7207_v16 = vld [vmem:[%s9619_s1 + $0x44] ss:$8 sps:$4 sm:$0xff]  }
  0x12   : > { %v7203_v13 = vld [vmem:[%s9619_s1 + $0x434] ss:$8 sps:$4 sm:$0xff]   ;;  %v7206_v15 = vld [vmem:[%s9619_s1 + $0x430] ss:$8 sps:$4 sm:$0xff]   ;;  %v7209_v17 = vld [vmem:[%s9619_s1 + $0x444] ss:$8 sps:$4 sm:$0xff]  }
  0x13   : > { %3676 = vmatpush1.bf16.msra.mxu1 %v7193_v6  ;;  %v7211_v18 = vld [vmem:[%s9619_s1 + $0x40] ss:$8 sps:$4 sm:$0xff]   ;;  %v7213_v20 = vld [vmem:[%s9619_s1 + $0x54] ss:$8 sps:$4 sm:$0xff]   ;;  %v7217_v22 = vld [vmem:[%s9619_s1 + $0x50] ss:$8 sps:$4 sm:$0xff]  }
  0x14   : > { %4448 = vmatpush1.bf16.msra.mxu0 %v7194_v7  ;;  %3677 = vmatprep.subr.bf16.mxu1 %v7195_v8  ;;  %v7212_v19 = vld [vmem:[%s9619_s1 + $0x440] ss:$8 sps:$4 sm:$0xff]   ;;  %v7215_v21 = vld [vmem:[%s9619_s1 + $0x454] ss:$8 sps:$4 sm:$0xff]   ;;  %v7218_v23 = vld [vmem:[%s9619_s1 + $0x450] ss:$8 sps:$4 sm:$0xff]  }
  0x15   : > { %4449 = vmatprep.subr.bf16.mxu0 %v7197_v9  ;;  %v7219_v24 = vld [vmem:[%s9619_s1 + $0x64] ss:$8 sps:$4 sm:$0xff]   ;;  %v7223_v26 = vld [vmem:[%s9619_s1 + $0x60] ss:$8 sps:$4 sm:$0xff]   ;;  %v7225_v28 = vld [vmem:[%s9619_s1 + $0x74] ss:$8 sps:$4 sm:$0xff]  }
  0x16   : > { %v7221_v25 = vld [vmem:[%s9619_s1 + $0x464] ss:$8 sps:$4 sm:$0xff]   ;;  %v7224_v27 = vld [vmem:[%s9619_s1 + $0x460] ss:$8 sps:$4 sm:$0xff]   ;;  %v7227_v29 = vld [vmem:[%s9619_s1 + $0x474] ss:$8 sps:$4 sm:$0xff]  }
  0x17   : > { %3678 = vmatpush1.bf16.msra.mxu1 %v7199_v10  ;;  %s5888_s29 = sshll.u32 %s5883_s16, 5  ;;  %v7229_v30 = vld [vmem:[%s9619_s1 + $0x70] ss:$8 sps:$4 sm:$0xff]   ;;  %v7231_v32 = vld [vmem:[%s9619_s1 + $0x84] ss:$8 sps:$4 sm:$0xff]  }
  0x18   : > { %4450 = vmatpush1.bf16.msra.mxu0 %v7200_v11  ;;  %3679 = vmatprep.subr.bf16.mxu1 %v7201_v12  ;;  %v7230_v31 = vld [vmem:[%s9619_s1 + $0x470] ss:$8 sps:$4 sm:$0xff]   ;;  %p192_p3 = scmp.lt.s32.totalorder %s5888_s29, 63  ;;  %v7233_v33 = vld [vmem:[%s9619_s1 + $0x484] ss:$8 sps:$4 sm:$0xff]  }
  0x19   : > { %4451 = vmatprep.subr.bf16.mxu0 %v7203_v13  ;;  %v7235_v34 = vld [vmem:[%s9619_s1 + $0x80] ss:$8 sps:$4 sm:$0xff]   ;;  %v7237_v36 = vld [vmem:[%s9619_s1 + $0x94] ss:$8 sps:$4 sm:$0xff]   ;;  %v7241_v38 = vld [vmem:[%s9619_s1 + $0x90] ss:$8 sps:$4 sm:$0xff]  }
  0x1a   : > { %v7236_v35 = vld [vmem:[%s9619_s1 + $0x480] ss:$8 sps:$4 sm:$0xff]   ;;  %s9660_s29 = smov (!%p192_p3, %s5888_s29), 63  ;;  %v7239_v37 = vld [vmem:[%s9619_s1 + $0x494] ss:$8 sps:$4 sm:$0xff]  }
  0x1b   : > { %3680 = vmatpush1.bf16.msra.mxu1 %v7205_v14  ;;  %v7242_v39 = vld [vmem:[%s9619_s1 + $0x490] ss:$8 sps:$4 sm:$0xff]   ;;  %v7243_v40 = vld [vmem:[%s9619_s1 + $0xa4] ss:$8 sps:$4 sm:$0xff]   ;;  %s7174_s27 = smul.u32 72, %s9660_s29  ;;  %s5891_s28 = sshll.u32 %s9660_s29, 3 }
  0x1c   : > { %4452 = vmatpush1.bf16.msra.mxu0 %v7206_v15  ;;  %3681 = vmatprep.subr.bf16.mxu1 %v7207_v16  ;;  %v7245_v41 = vld [vmem:[%s9619_s1 + $0x4a4] ss:$8 sps:$4 sm:$0xff]   ;;  %v7247_v42 = vld [vmem:[%s9619_s1 + $0xa0] ss:$8 sps:$4 sm:$0xff]   ;;  %v7249_v44 = vld [vmem:[%s9619_s1 + $0xb4] ss:$8 sps:$4 sm:$0xff]   ;;  %s9581_s6 = scalar_lea.vmem %s9622_s4, %s5891_s28 }
  0x1d   : > { %4453 = vmatprep.subr.bf16.mxu0 %v7209_v17  ;;  %v7248_v43 = vld [vmem:[%s9619_s1 + $0x4a0] ss:$8 sps:$4 sm:$0xff]   ;;  %s8247_s12 = scalar_lea.vmem %s9618_s0, %s7174_s27  ;;  %v7251_v45 = vld [vmem:[%s9619_s1 + $0x4b4] ss:$8 sps:$4 sm:$0xff]   ;;  %v7253_v46 = vld [vmem:[%s9619_s1 + $0xb0] ss:$8 sps:$4 sm:$0xff]  }
  0x1e   : > { %v7254_v47 = vld [vmem:[%s9619_s1 + $0x4b0] ss:$8 sps:$4 sm:$0xff]   ;;  %v7255_v48 = vld [vmem:[%s9619_s1 + $0xc4] ss:$8 sps:$4 sm:$0xff]   ;;  %v7259_v52 = vld [vmem:[%s9619_s1 + $0xc0] ss:$8 sps:$4 sm:$0xff]  }
  0x1f   : > { %3682 = vmatpush1.bf16.msra.mxu1 %v7211_v18  ;;  %v7281_v49 = vld [vmem:[%s8247_s12 + $0x4] ss:$72 sps:$4 sm:$0xff]   ;;  %v7260_v53 = vld [vmem:[%s9619_s1 + $0x4c0] ss:$8 sps:$4 sm:$0xff]   ;;  %v7261_v54 = vld [vmem:[%s9619_s1 + $0xd4] ss:$8 sps:$4 sm:$0xff]  }
  0x20   : > { %4454 = vmatpush1.bf16.msra.mxu0 %v7212_v19  ;;  %3683 = vmatprep.subr.bf16.mxu1 %v7213_v20  ;;  %v7257_v50 = vld [vmem:[%s9619_s1 + $0x4c4] ss:$8 sps:$4 sm:$0xff]   ;;  %v7263_v55 = vld [vmem:[%s9619_s1 + $0x4d4] ss:$8 sps:$4 sm:$0xff]   ;;  %v7265_v56 = vld [vmem:[%s9619_s1 + $0xd0] ss:$8 sps:$4 sm:$0xff]  }
  0x21   : > { %4455 = vmatprep.subr.bf16.mxu0 %v7215_v21  ;;  %v7284_v51 = vld [vmem:[%s8247_s12 + $0x24] ss:$72 sps:$4 sm:$0xff]   ;;  %3705 = vmatprep.mubr.bf16.mxu1 %v7281_v49  ;;  %v7266_v57 = vld [vmem:[%s9619_s1 + $0x4d0] ss:$8 sps:$4 sm:$0xff]   ;;  %v7271_v60 = vld [vmem:[%s9619_s1 + $0xe0] ss:$8 sps:$4 sm:$0xff]  }
  0x22   : > { %4477 = vmatprep.mubr.bf16.mxu0 %v7284_v51  ;;  %v7267_v58 = vld [vmem:[%s9619_s1 + $0xe4] ss:$8 sps:$4 sm:$0xff]   ;;  %v7272_v61 = vld [vmem:[%s9619_s1 + $0x4e0] ss:$8 sps:$4 sm:$0xff]   ;;  %v7273_v62 = vld [vmem:[%s9619_s1 + $0xf4] ss:$8 sps:$4 sm:$0xff]  }
  0x23   : > { %3684 = vmatpush1.bf16.msra.mxu1 %v7217_v22  ;;  %v7269_v59 = vld [vmem:[%s9619_s1 + $0x4e4] ss:$8 sps:$4 sm:$0xff]   ;;  %v7275_v63 = vld [vmem:[%s9619_s1 + $0x4f4] ss:$8 sps:$4 sm:$0xff]   ;;  %v7277_v0 = vld [vmem:[%s9619_s1 + $0xf0] ss:$8 sps:$4 sm:$0xff]  }
  0x24   : > { %4456 = vmatpush1.bf16.msra.mxu0 %v7218_v23  ;;  %3685 = vmatprep.subr.bf16.mxu1 %v7219_v24  ;;  %v7278_v1 = vld [vmem:[%s9619_s1 + $0x4f0] ss:$8 sps:$4 sm:$0xff]   ;;  %v7287_v2 = vld [vmem:[%s9619_s1 + $0x504] ss:$8 sps:$4 sm:$0xff]   ;;  %v7279_v3 = vld [vmem:[%s8247_s12] ss:$72 sps:$4 sm:$0xff]  }
  0x25   : > { %4457 = vmatprep.subr.bf16.mxu0 %v7221_v25  ;;  %v7282_v4 = vld [vmem:[%s8247_s12 + $0x20] ss:$72 sps:$4 sm:$0xff]   ;;  %v7288_v6 = vld [vmem:[%s8247_s12 + $0x94] ss:$72 sps:$4 sm:$0xff]   ;;  %v7294_v9 = vld [vmem:[%s9619_s1 + $0x510] ss:$8 sps:$4 sm:$0xff]  }
  0x26   : > { %v7285_v5 = vld [vmem:[%s9619_s1 + $0x500] ss:$8 sps:$4 sm:$0xff]   ;;  %v7290_v7 = vld [vmem:[%s8247_s12 + $0xb4] ss:$72 sps:$4 sm:$0xff]   ;;  %v7305_v10 = vld [vmem:[%s9619_s1 + $0x524] ss:$8 sps:$4 sm:$0xff]  }
  0x27   : > { %3686 = vmatpush1.bf16.msra.mxu1 %v7223_v26  ;;  %v7296_v8 = vld [vmem:[%s9619_s1 + $0x514] ss:$8 sps:$4 sm:$0xff]   ;;  %v7292_v11 = vld [vmem:[%s8247_s12 + $0x90] ss:$72 sps:$4 sm:$0xff]   ;;  %v7297_v13 = vld [vmem:[%s8247_s12 + $0x124] ss:$72 sps:$4 sm:$0xff]  }
  0x28   : > { %4458 = vmatpush1.bf16.msra.mxu0 %v7224_v27  ;;  %3687 = vmatprep.subr.bf16.mxu1 %v7225_v28  ;;  %v7293_v12 = vld [vmem:[%s8247_s12 + $0xb0] ss:$72 sps:$4 sm:$0xff]   ;;  %v7299_v14 = vld [vmem:[%s8247_s12 + $0x144] ss:$72 sps:$4 sm:$0xff]   ;;  %v7303_v15 = vld [vmem:[%s9619_s1 + $0x520] ss:$8 sps:$4 sm:$0xff]  }
  0x29   : > { %4459 = vmatprep.subr.bf16.mxu0 %v7227_v29  ;;  %v7314_v16 = vld [vmem:[%s9619_s1 + $0x534] ss:$8 sps:$4 sm:$0xff]   ;;  %v7312_v17 = vld [vmem:[%s9619_s1 + $0x530] ss:$8 sps:$4 sm:$0xff]   ;;  %v7301_v18 = vld [vmem:[%s8247_s12 + $0x120] ss:$72 sps:$4 sm:$0xff]  }
  0x2a   : > { %v7302_v19 = vld [vmem:[%s8247_s12 + $0x140] ss:$72 sps:$4 sm:$0xff]   ;;  %v7306_v21 = vld [vmem:[%s8247_s12 + $0x1b4] ss:$72 sps:$4 sm:$0xff]   ;;  %v7323_v22 = vld [vmem:[%s9619_s1 + $0x544] ss:$8 sps:$4 sm:$0xff]  }
  0x2b   : > { %3688 = vmatpush1.bf16.msra.mxu1 %v7229_v30  ;;  %v7356_v20 = vld [vmem:[%s9619_s1 + $0x100] ss:$8 sps:$4 sm:$0xff]   ;;  %v7358_v23 = vld [vmem:[%s9619_s1 + $0x104] ss:$8 sps:$4 sm:$0xff]   ;;  %v7308_v24 = vld [vmem:[%s8247_s12 + $0x1d4] ss:$72 sps:$4 sm:$0xff]  }
  0x2c   : > { %4460 = vmatpush1.bf16.msra.mxu0 %v7230_v31  ;;  %3689 = vmatprep.subr.bf16.mxu1 %v7231_v32  ;;  %v7321_v25 = vld [vmem:[%s9619_s1 + $0x540] ss:$8 sps:$4 sm:$0xff]   ;;  %v7332_v26 = vld [vmem:[%s9619_s1 + $0x554] ss:$8 sps:$4 sm:$0xff]   ;;  %v7363_v28 = vld [vmem:[%s9619_s1 + $0x110] ss:$8 sps:$4 sm:$0xff]  }
  0x2d   : > { %4461 = vmatprep.subr.bf16.mxu0 %v7233_v33  ;;  %v7365_v27 = vld [vmem:[%s9619_s1 + $0x114] ss:$8 sps:$4 sm:$0xff]   ;;  %v7373_v29 = vld [vmem:[%s9619_s1 + $0x124] ss:$8 sps:$4 sm:$0xff]   ;;  %v7310_v30 = vld [vmem:[%s8247_s12 + $0x1b0] ss:$72 sps:$4 sm:$0xff]  }
  0x2e   : > { %v7311_v31 = vld [vmem:[%s8247_s12 + $0x1d0] ss:$72 sps:$4 sm:$0xff]   ;;  %v7315_v33 = vld [vmem:[%s8247_s12 + $0x244] ss:$72 sps:$4 sm:$0xff]   ;;  %v7360_v49 = vld [vmem:[%s9619_s1 + $0x580] ss:$8 sps:$4 sm:$0xff]  }
  0x2f   : > { %3690 = vmatpush1.bf16.msra.mxu1 %v7235_v34  ;;  %v7330_v32 = vld [vmem:[%s9619_s1 + $0x550] ss:$8 sps:$4 sm:$0xff]   ;;  %v7341_v34 = vld [vmem:[%s9619_s1 + $0x564] ss:$8 sps:$4 sm:$0xff]   ;;  %v7377_v51 = vld [vmem:[%s9619_s1 + $0x594] ss:$8 sps:$4 sm:$0xff]  }
  0x30   : > { %4462 = vmatpush1.bf16.msra.mxu0 %v7236_v35  ;;  %3691 = vmatprep.subr.bf16.mxu1 %v7237_v36  ;;  %v7371_v35 = vld [vmem:[%s9619_s1 + $0x120] ss:$8 sps:$4 sm:$0xff]   ;;  %v7317_v36 = vld [vmem:[%s8247_s12 + $0x264] ss:$72 sps:$4 sm:$0xff]  }
  0x31   : > { %4463 = vmatprep.subr.bf16.mxu0 %v7239_v37  ;;  %v7339_v37 = vld [vmem:[%s9619_s1 + $0x560] ss:$8 sps:$4 sm:$0xff]  }
  0x33   : > { %3692 = vmatpush1.bf16.msra.mxu1 %v7241_v38  ;;  %v7350_v38 = vld [vmem:[%s9619_s1 + $0x574] ss:$8 sps:$4 sm:$0xff]  }
  0x34   : > { %4464 = vmatpush1.bf16.msra.mxu0 %v7242_v39  ;;  %3693 = vmatprep.subr.bf16.mxu1 %v7243_v40  ;;  %v7380_v39 = vld [vmem:[%s9619_s1 + $0x134] ss:$8 sps:$4 sm:$0xff]   ;;  %v7378_v40 = vld [vmem:[%s9619_s1 + $0x130] ss:$8 sps:$4 sm:$0xff]  }
  0x35   : > { %4465 = vmatprep.subr.bf16.mxu0 %v7245_v41  ;;  %v7388_v41 = vld [vmem:[%s9619_s1 + $0x144] ss:$8 sps:$4 sm:$0xff]  }
  0x37   : > { %3694 = vmatpush1.bf16.msra.mxu1 %v7247_v42  ;;  %v7319_v42 = vld [vmem:[%s8247_s12 + $0x240] ss:$72 sps:$4 sm:$0xff]  }
  0x38   : > { %4466 = vmatpush1.bf16.msra.mxu0 %v7248_v43  ;;  %3695 = vmatprep.subr.bf16.mxu1 %v7249_v44  ;;  %v7320_v43 = vld [vmem:[%s8247_s12 + $0x260] ss:$72 sps:$4 sm:$0xff]   ;;  %v7348_v44 = vld [vmem:[%s9619_s1 + $0x570] ss:$8 sps:$4 sm:$0xff]  }
  0x39   : > { %4467 = vmatprep.subr.bf16.mxu0 %v7251_v45  ;;  %v7362_v45 = vld [vmem:[%s9619_s1 + $0x584] ss:$8 sps:$4 sm:$0xff]  }
  0x3b   : > { %3696 = vmatpush1.bf16.msra.mxu1 %v7253_v46  ;;  %v7386_v46 = vld [vmem:[%s9619_s1 + $0x140] ss:$8 sps:$4 sm:$0xff]  }
  0x3c   : > { %4468 = vmatpush1.bf16.msra.mxu0 %v7254_v47  ;;  %3697 = vmatprep.subr.bf16.mxu1 %v7255_v48  ;;  %v7324_v47 = vld [vmem:[%s8247_s12 + $0x2d4] ss:$72 sps:$4 sm:$0xff]  }
  0x3d   : > { %4469 = vmatprep.subr.bf16.mxu0 %v7257_v50  ;;  %v7326_v48 = vld [vmem:[%s8247_s12 + $0x2f4] ss:$72 sps:$4 sm:$0xff]  }
  0x3e   : > { %v7395_v50 = vld [vmem:[%s9619_s1 + $0x154] ss:$8 sps:$4 sm:$0xff]  }
  0x3f   : > { %3698 = vmatpush1.bf16.msra.mxu1 %v7259_v52  ;;  %v7393_v52 = vld [vmem:[%s9619_s1 + $0x150] ss:$8 sps:$4 sm:$0xff]  }
  0x40   : > { %4470 = vmatpush1.bf16.msra.mxu0 %v7260_v53  ;;  %3699 = vmatprep.subr.bf16.mxu1 %v7261_v54  ;;  %v7403_v53 = vld [vmem:[%s9619_s1 + $0x164] ss:$8 sps:$4 sm:$0xff]   ;;  %v7375_v54 = vld [vmem:[%s9619_s1 + $0x590] ss:$8 sps:$4 sm:$0xff]  }
  0x41   : > { %4471 = vmatprep.subr.bf16.mxu0 %v7263_v55  ;;  %v7328_v55 = vld [vmem:[%s8247_s12 + $0x2d0] ss:$72 sps:$4 sm:$0xff]  }
  0x43   : > { %3700 = vmatpush1.bf16.msra.mxu1 %v7265_v56  ;;  %v7392_v56 = vld [vmem:[%s9619_s1 + $0x5a4] ss:$8 sps:$4 sm:$0xff]  }
  0x44   : > { %4472 = vmatpush1.bf16.msra.mxu0 %v7266_v57  ;;  %3701 = vmatprep.subr.bf16.mxu1 %v7267_v58  ;;  %v7401_v57 = vld [vmem:[%s9619_s1 + $0x160] ss:$8 sps:$4 sm:$0xff]   ;;  %v7329_v58 = vld [vmem:[%s8247_s12 + $0x2f0] ss:$72 sps:$4 sm:$0xff]  }
  0x45   : > { %4473 = vmatprep.subr.bf16.mxu0 %v7269_v59  ;;  %v7333_v59 = vld [vmem:[%s8247_s12 + $0x364] ss:$72 sps:$4 sm:$0xff]  }
  0x47   : > { %3702 = vmatpush1.bf16.msra.mxu1 %v7271_v60  ;;  %v7335_v60 = vld [vmem:[%s8247_s12 + $0x384] ss:$72 sps:$4 sm:$0xff]  }
  0x48   : > { %4474 = vmatpush1.bf16.msra.mxu0 %v7272_v61  ;;  %3703 = vmatprep.subr.bf16.mxu1 %v7273_v62  ;;  %v7390_v61 = vld [vmem:[%s9619_s1 + $0x5a0] ss:$8 sps:$4 sm:$0xff]   ;;  %v7410_v62 = vld [vmem:[%s9619_s1 + $0x174] ss:$8 sps:$4 sm:$0xff]  }
  0x49   : > { %4475 = vmatprep.subr.bf16.mxu0 %v7275_v63  ;;  %v7407_v63 = vld [vmem:[%s9619_s1 + $0x5b4] ss:$8 sps:$4 sm:$0xff]  }
  0x4b   : > { %3704 = vmatpush1.bf16.msra.mxu1 %v7277_v0  ;;  %v7408_v0 = vld [vmem:[%s9619_s1 + $0x170] ss:$8 sps:$4 sm:$0xff]  }
  0x4c   : > { %4476 = vmatpush1.bf16.msra.mxu0 %v7278_v1  ;;  %3866 = vmatprep.subr.bf16.mxu1 %v7358_v23  ;;  %v7418_v1 = vld [vmem:[%s9619_s1 + $0x184] ss:$8 sps:$4 sm:$0xff]   ;;  %v7438_v23 = vld [vmem:[%s9619_s1 + $0x1b0] ss:$8 sps:$4 sm:$0xff]  }
  0x4d   : > { %4638 = vmatprep.subr.bf16.mxu0 %v7287_v2  ;;  %v7405_v2 = vld [vmem:[%s9619_s1 + $0x5b0] ss:$8 sps:$4 sm:$0xff]  }
  0x4e   : > { %3706 = vmatmul.mubr.bf16.vlgmr.msra.gmra.mrb[0].mxu1 %v7279_v3  ;;  %v7337_v3 = vld [vmem:[%s8247_s12 + $0x360] ss:$72 sps:$4 sm:$0xff]  }
  0x4f   : > { %4478 = vmatmul.mubr.bf16.vlgmr.msra.gmra.mrb[0].mxu0 %v7282_v4  ;;  %3715 = vmatprep.mubr.bf16.mxu1 %v7288_v6  ;;  %v7416_v4 = vld [vmem:[%s9619_s1 + $0x180] ss:$8 sps:$4 sm:$0xff]  }
  0x50   : > { %4639 = vmatpush1.bf16.msra.mxu0 %v7285_v5  ;;  %4487 = vmatprep.mubr.bf16.mxu0 %v7290_v7  ;;  %v7422_v5 = vld [vmem:[%s9619_s1 + $0x5c4] ss:$8 sps:$4 sm:$0xff]   ;;  %v7338_v6 = vld [vmem:[%s8247_s12 + $0x380] ss:$72 sps:$4 sm:$0xff]   ;;  %v7342_v7 = vld [vmem:[%s8247_s12 + $0x3f4] ss:$72 sps:$4 sm:$0xff]  }
  0x51   : > { %4640 = vmatprep.subr.bf16.mxu0 %v7296_v8  ;;  %3867 = vmatpush1.bf16.msra.mxu1 %v7356_v20  ;;  %v7344_v8 = vld [vmem:[%s8247_s12 + $0x414] ss:$72 sps:$4 sm:$0xff]   ;;  %v7452_v20 = vld [vmem:[%s9619_s1 + $0x5e4] ss:$8 sps:$4 sm:$0xff]  }
  0x52   : > { %3868 = vmatprep.subr.bf16.mxu1 %v7365_v27  ;;  %v7465_v27 = vld [vmem:[%s9619_s1 + $0x5f0] ss:$8 sps:$4 sm:$0xff]  }
  0x54   : > { %4641 = vmatpush1.bf16.msra.mxu0 %v7294_v9  ;;  %v7420_v9 = vld [vmem:[%s9619_s1 + $0x5c0] ss:$8 sps:$4 sm:$0xff]  }
  0x55   : > { %4642 = vmatprep.subr.bf16.mxu0 %v7305_v10  ;;  %3869 = vmatpush1.bf16.msra.mxu1 %v7363_v28  ;;  %v7425_v10 = vld [vmem:[%s9619_s1 + $0x194] ss:$8 sps:$4 sm:$0xff]  }
  0x56   : > { %3716 = vmatmul.mubr.bf16.gmra.mrb[4].mxu1 %v7292_v11  ;;  %3870 = vmatprep.subr.bf16.mxu1 %v7373_v29  ;;  %v7423_v11 = vld [vmem:[%s9619_s1 + $0x190] ss:$8 sps:$4 sm:$0xff]   ;;  %v7467_v28 = vld [vmem:[%s9619_s1 + $0x5f4] ss:$8 sps:$4 sm:$0xff]   ;;  %v7359_v29 = vld [vmem:[%s8247_s12 + $0x4a0] ss:$72 sps:$4 sm:$0xff]  }
  0x57   : > { %4488 = vmatmul.mubr.bf16.gmra.mrb[4].mxu0 %v7293_v12  ;;  %3725 = vmatprep.mubr.bf16.mxu1 %v7297_v13  ;;  %v7437_v12 = vld [vmem:[%s9619_s1 + $0x5d4] ss:$8 sps:$4 sm:$0xff]   ;;  %v7433_v13 = vld [vmem:[%s9619_s1 + $0x1a4] ss:$8 sps:$4 sm:$0xff]  }
  0x58   : > { %4497 = vmatprep.mubr.bf16.mxu0 %v7299_v14  ;;  %4643 = vmatpush1.bf16.msra.mxu0 %v7303_v15  ;;  %v7346_v14 = vld [vmem:[%s8247_s12 + $0x3f0] ss:$72 sps:$4 sm:$0xff]  }
  0x59   : > { %4644 = vmatprep.subr.bf16.mxu0 %v7314_v16  ;;  %3871 = vmatpush1.bf16.msra.mxu1 %v7371_v35  ;;  %v7347_v15 = vld [vmem:[%s8247_s12 + $0x410] ss:$72 sps:$4 sm:$0xff]   ;;  %v7479_v35 = vld [vmem:[%s9619_s1 + $0x604] ss:$8 sps:$4 sm:$0xff]  }
  0x5a   : > { %3872 = vmatprep.subr.bf16.mxu1 %v7380_v39  ;;  %v7435_v16 = vld [vmem:[%s9619_s1 + $0x5d0] ss:$8 sps:$4 sm:$0xff]   ;;  %v7381_v39 = vld [vmem:[%s8247_s12 + $0x5a4] ss:$72 sps:$4 sm:$0xff]  }
  0x5c   : > { %4645 = vmatpush1.bf16.msra.mxu0 %v7312_v17  ;;  %v7351_v17 = vld [vmem:[%s8247_s12 + $0x484] ss:$72 sps:$4 sm:$0xff]  }
  0x5d   : > { %4646 = vmatprep.subr.bf16.mxu0 %v7323_v22  ;;  %3873 = vmatpush1.bf16.msra.mxu1 %v7378_v40  ;;  %v7450_v22 = vld [vmem:[%s9619_s1 + $0x5e0] ss:$8 sps:$4 sm:$0xff]   ;;  %v7383_v40 = vld [vmem:[%s8247_s12 + $0x5c4] ss:$72 sps:$4 sm:$0xff]  }
  0x5e   : > { %3726 = vmatmul.mubr.bf16.gmra.mrb[8].mxu1 %v7301_v18  ;;  %3874 = vmatprep.subr.bf16.mxu1 %v7388_v41  ;;  %v7431_v18 = vld [vmem:[%s9619_s1 + $0x1a0] ss:$8 sps:$4 sm:$0xff]   ;;  %v7470_v41 = vld [vmem:[%s9619_s1 + $0x1f4] ss:$8 sps:$4 sm:$0xff]  }
  0x5f   : > { %4498 = vmatmul.mubr.bf16.gmra.mrb[8].mxu0 %v7302_v19  ;;  %3735 = vmatprep.mubr.bf16.mxu1 %v7306_v21  ;;  %v7353_v19 = vld [vmem:[%s8247_s12 + $0x4a4] ss:$72 sps:$4 sm:$0xff]   ;;  %v7440_v21 = vld [vmem:[%s9619_s1 + $0x1b4] ss:$8 sps:$4 sm:$0xff]  }
  0x60   : > { %4507 = vmatprep.mubr.bf16.mxu0 %v7308_v24  ;;  %4647 = vmatpush1.bf16.msra.mxu0 %v7321_v25  ;;  %v7448_v24 = vld [vmem:[%s9619_s1 + $0x1c4] ss:$8 sps:$4 sm:$0xff]   ;;  %v7355_v25 = vld [vmem:[%s8247_s12 + $0x480] ss:$72 sps:$4 sm:$0xff]  }
  0x61   : > { %4648 = vmatprep.subr.bf16.mxu0 %v7332_v26  ;;  %3875 = vmatpush1.bf16.msra.mxu1 %v7386_v46  ;;  %v7446_v26 = vld [vmem:[%s9619_s1 + $0x1c0] ss:$8 sps:$4 sm:$0xff]   ;;  %v7398_v46 = vld [vmem:[%s8247_s12 + $0x654] ss:$72 sps:$4 sm:$0xff]  }
  0x62   : > { %3876 = vmatprep.subr.bf16.mxu1 %v7395_v50  ;;  %v7413_v50 = vld [vmem:[%s8247_s12 + $0x6e4] ss:$72 sps:$4 sm:$0xff]  }
  0x64   : > { %4649 = vmatpush1.bf16.msra.mxu0 %v7330_v32  ;;  %v7455_v32 = vld [vmem:[%s9619_s1 + $0x1d4] ss:$8 sps:$4 sm:$0xff]  }
  0x65   : > { %4650 = vmatprep.subr.bf16.mxu0 %v7341_v34  ;;  %3877 = vmatpush1.bf16.msra.mxu1 %v7393_v52  ;;  %v7463_v34 = vld [vmem:[%s9619_s1 + $0x1e4] ss:$8 sps:$4 sm:$0xff]   ;;  %v7419_v52 = vld [vmem:[%s8247_s12 + $0x6e0] ss:$72 sps:$4 sm:$0xff]  }
  0x66   : > { %3736 = vmatmul.mubr.bf16.gmra.mrb[12].mxu1 %v7310_v30  ;;  %3878 = vmatprep.subr.bf16.mxu1 %v7403_v53  ;;  %v7366_v30 = vld [vmem:[%s8247_s12 + $0x514] ss:$72 sps:$4 sm:$0xff]  }
  0x67   : > { %4508 = vmatmul.mubr.bf16.gmra.mrb[12].mxu0 %v7311_v31  ;;  %3745 = vmatprep.mubr.bf16.mxu1 %v7315_v33  ;;  %v7368_v31 = vld [vmem:[%s8247_s12 + $0x534] ss:$72 sps:$4 sm:$0xff]   ;;  %v7453_v33 = vld [vmem:[%s9619_s1 + $0x1d0] ss:$8 sps:$4 sm:$0xff]  }
  0x68   : > { %4517 = vmatprep.mubr.bf16.mxu0 %v7317_v36  ;;  %4651 = vmatpush1.bf16.msra.mxu0 %v7339_v37  ;;  %v7370_v36 = vld [vmem:[%s8247_s12 + $0x510] ss:$72 sps:$4 sm:$0xff]   ;;  %v7461_v37 = vld [vmem:[%s9619_s1 + $0x1e0] ss:$8 sps:$4 sm:$0xff]   ;;  %v7426_v53 = vld [vmem:[%s8247_s12 + $0x754] ss:$72 sps:$4 sm:$0xff]  }
  0x69   : > { %4652 = vmatprep.subr.bf16.mxu0 %v7350_v38  ;;  %3879 = vmatpush1.bf16.msra.mxu1 %v7401_v57  ;;  %v7374_v38 = vld [vmem:[%s8247_s12 + $0x530] ss:$72 sps:$4 sm:$0xff]  }
  0x6a   : > { %3880 = vmatprep.subr.bf16.mxu1 %v7410_v62  ;;  %v7434_v57 = vld [vmem:[%s8247_s12 + $0x770] ss:$72 sps:$4 sm:$0xff]   ;;  %v7456_v62 = vld [vmem:[%s8247_s12 + $0x874] ss:$72 sps:$4 sm:$0xff]  }
  0x6c   : > { %4653 = vmatpush1.bf16.msra.mxu0 %v7348_v44  ;;  %v7389_v44 = vld [vmem:[%s8247_s12 + $0x5c0] ss:$72 sps:$4 sm:$0xff]  }
  0x6d   : > { %4654 = vmatprep.subr.bf16.mxu0 %v7362_v45  ;;  %3881 = vmatpush1.bf16.msra.mxu1 %v7408_v0  ;;  %v7396_v45 = vld [vmem:[%s8247_s12 + $0x634] ss:$72 sps:$4 sm:$0xff]   ;;  %v7460_v0 = vld [vmem:[%s8247_s12 + $0x870] ss:$72 sps:$4 sm:$0xff]  }
  0x6e   : > { %3746 = vmatmul.mubr.bf16.gmra.mrb[16].mxu1 %v7319_v42  ;;  %3882 = vmatprep.subr.bf16.mxu1 %v7418_v1  ;;  %v7468_v42 = vld [vmem:[%s9619_s1 + $0x1f0] ss:$8 sps:$4 sm:$0xff]  }
  0x6f   : > { %4518 = vmatmul.mubr.bf16.gmra.mrb[16].mxu0 %v7320_v43  ;;  %3755 = vmatprep.mubr.bf16.mxu1 %v7324_v47  ;;  %v7385_v43 = vld [vmem:[%s8247_s12 + $0x5a0] ss:$72 sps:$4 sm:$0xff]   ;;  %v7400_v47 = vld [vmem:[%s8247_s12 + $0x630] ss:$72 sps:$4 sm:$0xff]  }
  0x70   : > { %4527 = vmatprep.mubr.bf16.mxu0 %v7326_v48  ;;  %4655 = vmatpush1.bf16.msra.mxu0 %v7360_v49  ;;  %v7404_v48 = vld [vmem:[%s8247_s12 + $0x650] ss:$72 sps:$4 sm:$0xff]   ;;  %v7411_v49 = vld [vmem:[%s8247_s12 + $0x6c4] ss:$72 sps:$4 sm:$0xff]  }
  0x71   : > { %4656 = vmatprep.subr.bf16.mxu0 %v7377_v51  ;;  %3883 = vmatpush1.bf16.msra.mxu1 %v7416_v4  ;;  %v7415_v51 = vld [vmem:[%s8247_s12 + $0x6c0] ss:$72 sps:$4 sm:$0xff]   ;;  %v7464_v1 = vld [vmem:[%s8247_s12 + $0x890] ss:$72 sps:$4 sm:$0xff]  }
  0x72   : > { %3884 = vmatprep.subr.bf16.mxu1 %v7425_v10  ;;  %v7471_v4 = vld [vmem:[%s8247_s12 + $0x8] ss:$72 sps:$4 sm:$0xff]  }
  0x73   : > { %v7548_v10 = vld [vmem:[%s9619_s1 + $0x200] ss:$8 sps:$4 sm:$0xff]  }
  0x74   : > { %4657 = vmatpush1.bf16.msra.mxu0 %v7375_v54  ;;  %v7428_v54 = vld [vmem:[%s8247_s12 + $0x774] ss:$72 sps:$4 sm:$0xff]  }
  0x75   : > { %4658 = vmatprep.subr.bf16.mxu0 %v7392_v56  ;;  %3885 = vmatpush1.bf16.msra.mxu1 %v7423_v11  ;;  %v7430_v56 = vld [vmem:[%s8247_s12 + $0x750] ss:$72 sps:$4 sm:$0xff]   ;;  %v7557_v11 = vld [vmem:[%s9619_s1 + $0x214] ss:$8 sps:$4 sm:$0xff]  }
  0x76   : > { %3756 = vmatmul.mubr.bf16.gmra.mrb[20].mxu1 %v7328_v55  ;;  %3886 = vmatprep.subr.bf16.mxu1 %v7433_v13  ;;  %v7550_v55 = vld [vmem:[%s9619_s1 + $0x204] ss:$8 sps:$4 sm:$0xff]   ;;  %v7484_v13 = vld [vmem:[%s8247_s12 + $0x98] ss:$72 sps:$4 sm:$0xff]  }
  0x77   : > { %4528 = vmatmul.mubr.bf16.gmra.mrb[20].mxu0 %v7329_v58  ;;  %3765 = vmatprep.mubr.bf16.mxu1 %v7333_v59  ;;  %v7441_v58 = vld [vmem:[%s8247_s12 + $0x7e4] ss:$72 sps:$4 sm:$0xff]  }
  0x78   : > { %4537 = vmatprep.mubr.bf16.mxu0 %v7335_v60  ;;  %4659 = vmatpush1.bf16.msra.mxu0 %v7390_v61  ;;  %v7443_v59 = vld [vmem:[%s8247_s12 + $0x804] ss:$72 sps:$4 sm:$0xff]   ;;  %v7445_v60 = vld [vmem:[%s8247_s12 + $0x7e0] ss:$72 sps:$4 sm:$0xff]  }
  0x79   : > { %4660 = vmatprep.subr.bf16.mxu0 %v7407_v63  ;;  %3887 = vmatpush1.bf16.msra.mxu1 %v7431_v18  ;;  %v7449_v61 = vld [vmem:[%s8247_s12 + $0x800] ss:$72 sps:$4 sm:$0xff]   ;;  %v7458_v63 = vld [vmem:[%s8247_s12 + $0x894] ss:$72 sps:$4 sm:$0xff]  }
  0x7a   : > { %3888 = vmatprep.subr.bf16.mxu1 %v7440_v21  ;;  %v7491_v18 = vld [vmem:[%s8247_s12 + $0x14c] ss:$72 sps:$4 sm:$0xff]  }
  0x7b   : > { %v7565_v21 = vld [vmem:[%s9619_s1 + $0x224] ss:$8 sps:$4 sm:$0xff]  }
  0x7c   : > { %4661 = vmatpush1.bf16.msra.mxu0 %v7405_v2  ;;  %v7473_v2 = vld [vmem:[%s8247_s12 + $0xc] ss:$72 sps:$4 sm:$0xff]  }
  0x7d   : > { %4662 = vmatprep.subr.bf16.mxu0 %v7422_v5  ;;  %3889 = vmatpush1.bf16.msra.mxu1 %v7438_v23  ;;  %v7474_v5 = vld [vmem:[%s8247_s12 + $0x28] ss:$72 sps:$4 sm:$0xff]   ;;  %v7572_v23 = vld [vmem:[%s9619_s1 + $0x234] ss:$8 sps:$4 sm:$0xff]  }
  0x7e   : > { %3766 = vmatmul.mubr.bf16.gmra.mrb[24].mxu1 %v7337_v3  ;;  %3890 = vmatprep.subr.bf16.mxu1 %v7448_v24  ;;  %v7476_v3 = vld [vmem:[%s8247_s12 + $0x2c] ss:$72 sps:$4 sm:$0xff]   ;;  %v7493_v24 = vld [vmem:[%s8247_s12 + $0x128] ss:$72 sps:$4 sm:$0xff]  }
  0x7f   : > { %4538 = vmatmul.mubr.bf16.gmra.mrb[24].mxu0 %v7338_v6  ;;  %3775 = vmatprep.mubr.bf16.mxu1 %v7342_v7  ;;  %v7477_v6 = vld [vmem:[%s9619_s1 + $0x600] ss:$8 sps:$4 sm:$0xff]   ;;  %v7480_v7 = vld [vmem:[%s8247_s12 + $0x9c] ss:$72 sps:$4 sm:$0xff]  }
  0x80   : > { %4547 = vmatprep.mubr.bf16.mxu0 %v7344_v8  ;;  %4663 = vmatpush1.bf16.msra.mxu0 %v7420_v9  ;;  %v7482_v8 = vld [vmem:[%s8247_s12 + $0xbc] ss:$72 sps:$4 sm:$0xff]  }
  0x81   : > { %4664 = vmatprep.subr.bf16.mxu0 %v7437_v12  ;;  %3891 = vmatpush1.bf16.msra.mxu1 %v7446_v26  ;;  %v7488_v9 = vld [vmem:[%s9619_s1 + $0x614] ss:$8 sps:$4 sm:$0xff]   ;;  %v7486_v12 = vld [vmem:[%s9619_s1 + $0x610] ss:$8 sps:$4 sm:$0xff]  }
  0x82   : > { %3892 = vmatprep.subr.bf16.mxu1 %v7455_v32  ;;  %v7504_v26 = vld [vmem:[%s9619_s1 + $0x630] ss:$8 sps:$4 sm:$0xff]   ;;  %v7580_v32 = vld [vmem:[%s9619_s1 + $0x244] ss:$8 sps:$4 sm:$0xff]  }
  0x84   : > { %4665 = vmatpush1.bf16.msra.mxu0 %v7435_v16  ;;  %v7489_v16 = vld [vmem:[%s8247_s12 + $0x12c] ss:$72 sps:$4 sm:$0xff]  }
  0x85   : > { %4666 = vmatprep.subr.bf16.mxu0 %v7452_v20  ;;  %3893 = vmatpush1.bf16.msra.mxu1 %v7453_v33  ;;  %v7506_v20 = vld [vmem:[%s9619_s1 + $0x634] ss:$8 sps:$4 sm:$0xff]  }
  0x86   : > { %3776 = vmatmul.mubr.bf16.gmra.mrb[28].mxu1 %v7346_v14  ;;  %3894 = vmatprep.subr.bf16.mxu1 %v7463_v34  ;;  %v7485_v14 = vld [vmem:[%s8247_s12 + $0xb8] ss:$72 sps:$4 sm:$0xff]   ;;  %v7524_v33 = vld [vmem:[%s9619_s1 + $0x654] ss:$8 sps:$4 sm:$0xff]  }
  0x87   : > { %4548 = vmatmul.mubr.bf16.gmra.mrb[28].mxu0 %v7347_v15  ;;  %3785 = vmatprep.mubr.bf16.mxu1 %v7351_v17  ;;  %v7497_v15 = vld [vmem:[%s9619_s1 + $0x624] ss:$8 sps:$4 sm:$0xff]   ;;  %v7555_v17 = vld [vmem:[%s9619_s1 + $0x210] ss:$8 sps:$4 sm:$0xff]   ;;  %v7578_v34 = vld [vmem:[%s9619_s1 + $0x240] ss:$8 sps:$4 sm:$0xff]  }
  0x88   : > { %4557 = vmatprep.mubr.bf16.mxu0 %v7353_v19  ;;  %4667 = vmatpush1.bf16.msra.mxu0 %v7450_v22  ;;  %v7495_v19 = vld [vmem:[%s9619_s1 + $0x620] ss:$8 sps:$4 sm:$0xff]  }
  0x89   : > { %4668 = vmatprep.subr.bf16.mxu0 %v7467_v28  ;;  %3895 = vmatpush1.bf16.msra.mxu1 %v7461_v37  ;;  %v7563_v22 = vld [vmem:[%s9619_s1 + $0x220] ss:$8 sps:$4 sm:$0xff]   ;;  %v7570_v28 = vld [vmem:[%s9619_s1 + $0x230] ss:$8 sps:$4 sm:$0xff]  }
  0x8a   : > { %3896 = vmatprep.subr.bf16.mxu1 %v7470_v41  ;;  %v7503_v37 = vld [vmem:[%s8247_s12 + $0x1d8] ss:$72 sps:$4 sm:$0xff]  }
  0x8b   : > { %v7585_v41 = vld [vmem:[%s9619_s1 + $0x250] ss:$8 sps:$4 sm:$0xff]  }
  0x8c   : > { %4669 = vmatpush1.bf16.msra.mxu0 %v7465_v27  ;;  %v7515_v27 = vld [vmem:[%s9619_s1 + $0x644] ss:$8 sps:$4 sm:$0xff]  }
  0x8d   : > { %4831 = vmatprep.subr.bf16.mxu0 %v7479_v35  ;;  %3897 = vmatpush1.bf16.msra.mxu1 %v7468_v42  ;;  %v7587_v35 = vld [vmem:[%s9619_s1 + $0x254] ss:$8 sps:$4 sm:$0xff]  }
  0x8e   : > { %3786 = vmatmul.mubr.bf16.gmra.mrb[32].mxu1 %v7355_v25  ;;  %4059 = vmatprep.subr.bf16.mxu1 %v7550_v55  ;;  %v7494_v25 = vld [vmem:[%s8247_s12 + $0x148] ss:$72 sps:$4 sm:$0xff]   ;;  %v7509_v42 = vld [vmem:[%s8247_s12 + $0x26c] ss:$72 sps:$4 sm:$0xff]  }
  0x8f   : > { %4558 = vmatmul.mubr.bf16.gmra.mrb[32].mxu0 %v7359_v29  ;;  %3795 = vmatprep.mubr.bf16.mxu1 %v7366_v30  ;;  %v7498_v29 = vld [vmem:[%s8247_s12 + $0x1bc] ss:$72 sps:$4 sm:$0xff]   ;;  %v7552_v55 = vld [vmem:[%s9619_s1 + $0x680] ss:$8 sps:$4 sm:$0xff]  }
  0x90   : > { %4567 = vmatprep.mubr.bf16.mxu0 %v7368_v31  ;;  %v7500_v30 = vld [vmem:[%s8247_s12 + $0x1dc] ss:$72 sps:$4 sm:$0xff]   ;;  %v7513_v31 = vld [vmem:[%s9619_s1 + $0x640] ss:$8 sps:$4 sm:$0xff]  }
  0x96   : > { %3796 = vmatmul.mubr.bf16.gmra.mrb[36].mxu1 %v7370_v36  ;;  %v7502_v36 = vld [vmem:[%s8247_s12 + $0x1b8] ss:$72 sps:$4 sm:$0xff]  }
  0x97   : > { %4568 = vmatmul.mubr.bf16.gmra.mrb[36].mxu0 %v7374_v38  ;;  %3805 = vmatprep.mubr.bf16.mxu1 %v7381_v39  ;;  %v7522_v38 = vld [vmem:[%s9619_s1 + $0x650] ss:$8 sps:$4 sm:$0xff]   ;;  %v7507_v39 = vld [vmem:[%s8247_s12 + $0x24c] ss:$72 sps:$4 sm:$0xff]  }
  0x98   : > { %4577 = vmatprep.mubr.bf16.mxu0 %v7383_v40  ;;  %v7533_v40 = vld [vmem:[%s9619_s1 + $0x664] ss:$8 sps:$4 sm:$0xff]  }
  0x9e   : > { %3806 = vmatmul.mubr.bf16.gmra.mrb[40].mxu1 %v7385_v43  ;;  %v7531_v43 = vld [vmem:[%s9619_s1 + $0x660] ss:$8 sps:$4 sm:$0xff]  }
  0x9f   : > { %4578 = vmatmul.mubr.bf16.gmra.mrb[40].mxu0 %v7389_v44  ;;  %3815 = vmatprep.mubr.bf16.mxu1 %v7396_v45  ;;  %v7542_v44 = vld [vmem:[%s9619_s1 + $0x674] ss:$8 sps:$4 sm:$0xff]   ;;  %v7595_v45 = vld [vmem:[%s9619_s1 + $0x264] ss:$8 sps:$4 sm:$0xff]  }
  0xa0   : > { %4587 = vmatprep.mubr.bf16.mxu0 %v7398_v46  ;;  %v7593_v46 = vld [vmem:[%s9619_s1 + $0x260] ss:$8 sps:$4 sm:$0xff]  }
  0xa6   : > { %3816 = vmatmul.mubr.bf16.gmra.mrb[44].mxu1 %v7400_v47  ;;  %v7602_v47 = vld [vmem:[%s9619_s1 + $0x274] ss:$8 sps:$4 sm:$0xff]  }
  0xa7   : > { %4588 = vmatmul.mubr.bf16.gmra.mrb[44].mxu0 %v7404_v48  ;;  %3825 = vmatprep.mubr.bf16.mxu1 %v7411_v49  ;;  %v7540_v48 = vld [vmem:[%s9619_s1 + $0x670] ss:$8 sps:$4 sm:$0xff]  }
  0xa8   : > { %4597 = vmatprep.mubr.bf16.mxu0 %v7413_v50  ;;  %v7511_v49 = vld [vmem:[%s8247_s12 + $0x248] ss:$72 sps:$4 sm:$0xff]  }
  0xa9   : > { %v7512_v50 = vld [vmem:[%s8247_s12 + $0x268] ss:$72 sps:$4 sm:$0xff]  }
  0xae   : > { %3826 = vmatmul.mubr.bf16.gmra.mrb[48].mxu1 %v7415_v51  ;;  %v7554_v51 = vld [vmem:[%s9619_s1 + $0x684] ss:$8 sps:$4 sm:$0xff]  }
  0xaf   : > { %4598 = vmatmul.mubr.bf16.gmra.mrb[48].mxu0 %v7419_v52  ;;  %3835 = vmatprep.mubr.bf16.mxu1 %v7426_v53  ;;  %v7600_v52 = vld [vmem:[%s9619_s1 + $0x270] ss:$8 sps:$4 sm:$0xff]   ;;  %v7516_v53 = vld [vmem:[%s8247_s12 + $0x2dc] ss:$72 sps:$4 sm:$0xff]  }
  0xb0   : > { %4607 = vmatprep.mubr.bf16.mxu0 %v7428_v54  ;;  %v7518_v54 = vld [vmem:[%s8247_s12 + $0x2fc] ss:$72 sps:$4 sm:$0xff]  }
  0xb6   : > { %3836 = vmatmul.mubr.bf16.gmra.mrb[52].mxu1 %v7430_v56  ;;  %v7569_v56 = vld [vmem:[%s9619_s1 + $0x694] ss:$8 sps:$4 sm:$0xff]  }
  0xb7   : > { %4608 = vmatmul.mubr.bf16.gmra.mrb[52].mxu0 %v7434_v57  ;;  %3845 = vmatprep.mubr.bf16.mxu1 %v7441_v58  ;;  %v7610_v57 = vld [vmem:[%s9619_s1 + $0x284] ss:$8 sps:$4 sm:$0xff]   ;;  %v7608_v58 = vld [vmem:[%s9619_s1 + $0x280] ss:$8 sps:$4 sm:$0xff]  }
  0xb8   : > { %4617 = vmatprep.mubr.bf16.mxu0 %v7443_v59  ;;  %v7617_v59 = vld [vmem:[%s9619_s1 + $0x294] ss:$8 sps:$4 sm:$0xff]  }
  0xbe   : > { %3846 = vmatmul.mubr.bf16.gmra.mrb[56].mxu1 %v7445_v60  ;;  %v7567_v60 = vld [vmem:[%s9619_s1 + $0x690] ss:$8 sps:$4 sm:$0xff]  }
  0xbf   : > { %4618 = vmatmul.mubr.bf16.gmra.mrb[56].mxu0 %v7449_v61  ;;  %3855 = vmatprep.mubr.bf16.mxu1 %v7456_v62  ;;  %v7520_v61 = vld [vmem:[%s8247_s12 + $0x2d8] ss:$72 sps:$4 sm:$0xff]  }
  0xc0   : > { %4627 = vmatprep.mubr.bf16.mxu0 %v7458_v63  ;;  %v7521_v62 = vld [vmem:[%s8247_s12 + $0x2f8] ss:$72 sps:$4 sm:$0xff]   ;;  %v7584_v63 = vld [vmem:[%s9619_s1 + $0x6a4] ss:$8 sps:$4 sm:$0xff]  }
  0xc6   : > { %3856 = vmatmul.mubr.bf16.gmra.mrb[60].mxu1 %v7460_v0  ;;  %v7615_v0 = vld [vmem:[%s9619_s1 + $0x290] ss:$8 sps:$4 sm:$0xff]  }
  0xc7   : > { %4628 = vmatmul.mubr.bf16.gmra.mrb[60].mxu0 %v7464_v1  ;;  %3898 = vmatprep.mubr.bf16.mxu1 %v7473_v2  ;;  %v7525_v1 = vld [vmem:[%s8247_s12 + $0x36c] ss:$72 sps:$4 sm:$0xff]  }
  0xc8   : > { %4670 = vmatprep.mubr.bf16.mxu0 %v7476_v3  ;;  %v7527_v2 = vld [vmem:[%s8247_s12 + $0x38c] ss:$72 sps:$4 sm:$0xff]   ;;  %v7582_v3 = vld [vmem:[%s9619_s1 + $0x6a0] ss:$8 sps:$4 sm:$0xff]  }
  0xce   : > { %3899 = vmatmul.mubr.bf16.vlgmr.msra.gmra.mrb[0].mxu1 %v7471_v4  ;;  %v7599_v4 = vld [vmem:[%s9619_s1 + $0x6b4] ss:$8 sps:$4 sm:$0xff]  }
  0xcf   : > { %4671 = vmatmul.mubr.bf16.vlgmr.msra.gmra.mrb[0].mxu0 %v7474_v5  ;;  %3908 = vmatprep.mubr.bf16.mxu1 %v7480_v7  ;;  %v7625_v5 = vld [vmem:[%s9619_s1 + $0x2a4] ss:$8 sps:$4 sm:$0xff]   ;;  %v7632_v7 = vld [vmem:[%s9619_s1 + $0x2b4] ss:$8 sps:$4 sm:$0xff]  }
  0xd0   : > { %4832 = vmatpush1.bf16.msra.mxu0 %v7477_v6  ;;  %4680 = vmatprep.mubr.bf16.mxu0 %v7482_v8  ;;  %v7623_v6 = vld [vmem:[%s9619_s1 + $0x2a0] ss:$8 sps:$4 sm:$0xff]   ;;  %v7597_v8 = vld [vmem:[%s9619_s1 + $0x6b0] ss:$8 sps:$4 sm:$0xff]  }
  0xd1   : > { %4833 = vmatprep.subr.bf16.mxu0 %v7488_v9  ;;  %4060 = vmatpush1.bf16.msra.mxu1 %v7548_v10  ;;  %v7529_v9 = vld [vmem:[%s8247_s12 + $0x368] ss:$72 sps:$4 sm:$0xff]  }
  0xd2   : > { %4061 = vmatprep.subr.bf16.mxu1 %v7557_v11  ;;  %v7530_v10 = vld [vmem:[%s8247_s12 + $0x388] ss:$72 sps:$4 sm:$0xff]   ;;  %v7614_v11 = vld [vmem:[%s9619_s1 + $0x6c4] ss:$8 sps:$4 sm:$0xff]  }
  0xd4   : > { %4834 = vmatpush1.bf16.msra.mxu0 %v7486_v12  ;;  %v7534_v12 = vld [vmem:[%s8247_s12 + $0x3fc] ss:$72 sps:$4 sm:$0xff]  }
  0xd5   : > { %4835 = vmatprep.subr.bf16.mxu0 %v7497_v15  ;;  %4062 = vmatpush1.bf16.msra.mxu1 %v7555_v17  ;;  %v7612_v15 = vld [vmem:[%s9619_s1 + $0x6c0] ss:$8 sps:$4 sm:$0xff]  }
  0xd6   : > { %3909 = vmatmul.mubr.bf16.gmra.mrb[4].mxu1 %v7484_v13  ;;  %4063 = vmatprep.subr.bf16.mxu1 %v7565_v21  ;;  %v7630_v13 = vld [vmem:[%s9619_s1 + $0x2b0] ss:$8 sps:$4 sm:$0xff]   ;;  %v7638_v17 = vld [vmem:[%s9619_s1 + $0x2c0] ss:$8 sps:$4 sm:$0xff]   ;;  %v7644_v21 = vld [vmem:[%s9619_s1 + $0x6e4] ss:$8 sps:$4 sm:$0xff]  }
  0xd7   : > { %4681 = vmatmul.mubr.bf16.gmra.mrb[4].mxu0 %v7485_v14  ;;  %3918 = vmatprep.mubr.bf16.mxu1 %v7489_v16  ;;  %v7536_v14 = vld [vmem:[%s8247_s12 + $0x41c] ss:$72 sps:$4 sm:$0xff]  }
  0xd8   : > { %4690 = vmatprep.mubr.bf16.mxu0 %v7491_v18  ;;  %4836 = vmatpush1.bf16.msra.mxu0 %v7495_v19  ;;  %v7629_v16 = vld [vmem:[%s9619_s1 + $0x6d4] ss:$8 sps:$4 sm:$0xff]   ;;  %v7640_v18 = vld [vmem:[%s9619_s1 + $0x2c4] ss:$8 sps:$4 sm:$0xff]   ;;  %v7627_v19 = vld [vmem:[%s9619_s1 + $0x6d0] ss:$8 sps:$4 sm:$0xff]  }
  0xd9   : > { %4837 = vmatprep.subr.bf16.mxu0 %v7506_v20  ;;  %4064 = vmatpush1.bf16.msra.mxu1 %v7563_v22  ;;  %v7647_v20 = vld [vmem:[%s9619_s1 + $0x2d4] ss:$8 sps:$4 sm:$0xff]   ;;  %v7645_v22 = vld [vmem:[%s9619_s1 + $0x2d0] ss:$8 sps:$4 sm:$0xff]  }
  0xda   : > { %4065 = vmatprep.subr.bf16.mxu1 %v7572_v23  ;;  %v7538_v23 = vld [vmem:[%s8247_s12 + $0x3f8] ss:$72 sps:$4 sm:$0xff]  }
  0xdc   : > { %4838 = vmatpush1.bf16.msra.mxu0 %v7504_v26  ;;  %v7545_v26 = vld [vmem:[%s8247_s12 + $0x4ac] ss:$72 sps:$4 sm:$0xff]  }
  0xdd   : > { %4839 = vmatprep.subr.bf16.mxu0 %v7515_v27  ;;  %4066 = vmatpush1.bf16.msra.mxu1 %v7570_v28  ;;  %v7642_v27 = vld [vmem:[%s9619_s1 + $0x6e0] ss:$8 sps:$4 sm:$0xff]   ;;  %v7655_v28 = vld [vmem:[%s9619_s1 + $0x2e4] ss:$8 sps:$4 sm:$0xff]  }
  0xde   : > { %3919 = vmatmul.mubr.bf16.gmra.mrb[8].mxu1 %v7493_v24  ;;  %4067 = vmatprep.subr.bf16.mxu1 %v7580_v32  ;;  %v7539_v24 = vld [vmem:[%s8247_s12 + $0x418] ss:$72 sps:$4 sm:$0xff]   ;;  %v7662_v32 = vld [vmem:[%s9619_s1 + $0x2f4] ss:$8 sps:$4 sm:$0xff]  }
  0xdf   : > { %4691 = vmatmul.mubr.bf16.gmra.mrb[8].mxu0 %v7494_v25  ;;  %3928 = vmatprep.mubr.bf16.mxu1 %v7498_v29  ;;  %v7543_v25 = vld [vmem:[%s8247_s12 + $0x48c] ss:$72 sps:$4 sm:$0xff]   ;;  %v7653_v29 = vld [vmem:[%s9619_s1 + $0x2e0] ss:$8 sps:$4 sm:$0xff]  }
  0xe0   : > { %4700 = vmatprep.mubr.bf16.mxu0 %v7500_v30  ;;  %4840 = vmatpush1.bf16.msra.mxu0 %v7513_v31  ;;  %v7659_v30 = vld [vmem:[%s9619_s1 + $0x6f4] ss:$8 sps:$4 sm:$0xff]   ;;  %v7657_v31 = vld [vmem:[%s9619_s1 + $0x6f0] ss:$8 sps:$4 sm:$0xff]  }
  0xe1   : > { %4841 = vmatprep.subr.bf16.mxu0 %v7524_v33  ;;  %4068 = vmatpush1.bf16.msra.mxu1 %v7578_v34  ;;  %v7660_v33 = vld [vmem:[%s9619_s1 + $0x2f0] ss:$8 sps:$4 sm:$0xff]   ;;  %v7671_v34 = vld [vmem:[%s9619_s1 + $0x704] ss:$8 sps:$4 sm:$0xff]  }
  0xe2   : > { %4069 = vmatprep.subr.bf16.mxu1 %v7587_v35  ;;  %v7547_v35 = vld [vmem:[%s8247_s12 + $0x488] ss:$72 sps:$4 sm:$0xff]  }
  0xe4   : > { %4842 = vmatpush1.bf16.msra.mxu0 %v7522_v38  ;;  %v7560_v38 = vld [vmem:[%s8247_s12 + $0x53c] ss:$72 sps:$4 sm:$0xff]  }
  0xe5   : > { %4843 = vmatprep.subr.bf16.mxu0 %v7533_v40  ;;  %4070 = vmatpush1.bf16.msra.mxu1 %v7585_v41  ;;  %v7562_v40 = vld [vmem:[%s8247_s12 + $0x518] ss:$72 sps:$4 sm:$0xff]  }
  0xe6   : > { %3929 = vmatmul.mubr.bf16.gmra.mrb[12].mxu1 %v7502_v36  ;;  %4071 = vmatprep.subr.bf16.mxu1 %v7595_v45  ;;  %v7551_v36 = vld [vmem:[%s8247_s12 + $0x4a8] ss:$72 sps:$4 sm:$0xff]   ;;  %v7566_v41 = vld [vmem:[%s8247_s12 + $0x538] ss:$72 sps:$4 sm:$0xff]  }
  0xe7   : > { %4701 = vmatmul.mubr.bf16.gmra.mrb[12].mxu0 %v7503_v37  ;;  %3938 = vmatprep.mubr.bf16.mxu1 %v7507_v39  ;;  %v7558_v37 = vld [vmem:[%s8247_s12 + $0x51c] ss:$72 sps:$4 sm:$0xff]   ;;  %v7581_v45 = vld [vmem:[%s8247_s12 + $0x5c8] ss:$72 sps:$4 sm:$0xff]  }
  0xe8   : > { %4710 = vmatprep.mubr.bf16.mxu0 %v7509_v42  ;;  %4844 = vmatpush1.bf16.msra.mxu0 %v7531_v43  ;;  %v7742_v39 = vld [vmem:[%s9619_s1 + $0x304] ss:$8 sps:$4 sm:$0xff]  }
  0xe9   : > { %4845 = vmatprep.subr.bf16.mxu0 %v7542_v44  ;;  %4072 = vmatpush1.bf16.msra.mxu1 %v7593_v46  ;;  %v7573_v42 = vld [vmem:[%s8247_s12 + $0x5ac] ss:$72 sps:$4 sm:$0xff]   ;;  %v7577_v44 = vld [vmem:[%s8247_s12 + $0x5a8] ss:$72 sps:$4 sm:$0xff]   ;;  %v7588_v46 = vld [vmem:[%s8247_s12 + $0x63c] ss:$72 sps:$4 sm:$0xff]  }
  0xea   : > { %4073 = vmatprep.subr.bf16.mxu1 %v7602_v47  ;;  %v7575_v43 = vld [vmem:[%s8247_s12 + $0x5cc] ss:$72 sps:$4 sm:$0xff]   ;;  %v7590_v47 = vld [vmem:[%s8247_s12 + $0x65c] ss:$72 sps:$4 sm:$0xff]  }
  0xec   : > { %4846 = vmatpush1.bf16.msra.mxu0 %v7540_v48  ;;  %v7592_v48 = vld [vmem:[%s8247_s12 + $0x638] ss:$72 sps:$4 sm:$0xff]  }
  0xed   : > { %4847 = vmatprep.subr.bf16.mxu0 %v7554_v51  ;;  %4074 = vmatpush1.bf16.msra.mxu1 %v7600_v52  ;;  %v7605_v51 = vld [vmem:[%s8247_s12 + $0x6ec] ss:$72 sps:$4 sm:$0xff]   ;;  %v7607_v52 = vld [vmem:[%s8247_s12 + $0x6c8] ss:$72 sps:$4 sm:$0xff]  }
  0xee   : > { %3939 = vmatmul.mubr.bf16.gmra.mrb[16].mxu1 %v7511_v49  ;;  %4075 = vmatprep.subr.bf16.mxu1 %v7610_v57  ;;  %v7596_v49 = vld [vmem:[%s8247_s12 + $0x658] ss:$72 sps:$4 sm:$0xff]  }
  0xef   : > { %4711 = vmatmul.mubr.bf16.gmra.mrb[16].mxu0 %v7512_v50  ;;  %3948 = vmatprep.mubr.bf16.mxu1 %v7516_v53  ;;  %v7603_v50 = vld [vmem:[%s8247_s12 + $0x6cc] ss:$72 sps:$4 sm:$0xff]   ;;  %v7611_v53 = vld [vmem:[%s8247_s12 + $0x6e8] ss:$72 sps:$4 sm:$0xff]   ;;  %v7626_v57 = vld [vmem:[%s8247_s12 + $0x778] ss:$72 sps:$4 sm:$0xff]  }
  0xf0   : > { %4720 = vmatprep.mubr.bf16.mxu0 %v7518_v54  ;;  %4848 = vmatpush1.bf16.msra.mxu0 %v7552_v55  ;;  %v7618_v54 = vld [vmem:[%s8247_s12 + $0x75c] ss:$72 sps:$4 sm:$0xff]  }
  0xf1   : > { %4849 = vmatprep.subr.bf16.mxu0 %v7569_v56  ;;  %4076 = vmatpush1.bf16.msra.mxu1 %v7608_v58  ;;  %v7620_v55 = vld [vmem:[%s8247_s12 + $0x77c] ss:$72 sps:$4 sm:$0xff]   ;;  %v7622_v56 = vld [vmem:[%s8247_s12 + $0x758] ss:$72 sps:$4 sm:$0xff]   ;;  %v7633_v58 = vld [vmem:[%s8247_s12 + $0x7ec] ss:$72 sps:$4 sm:$0xff]  }
  0xf2   : > { %4077 = vmatprep.subr.bf16.mxu1 %v7617_v59  ;;  %v7635_v59 = vld [vmem:[%s8247_s12 + $0x80c] ss:$72 sps:$4 sm:$0xff]  }
  0xf4   : > { %4850 = vmatpush1.bf16.msra.mxu0 %v7567_v60  ;;  %v7637_v60 = vld [vmem:[%s8247_s12 + $0x7e8] ss:$72 sps:$4 sm:$0xff]  }
  0xf5   : > { %4851 = vmatprep.subr.bf16.mxu0 %v7584_v63  ;;  %4078 = vmatpush1.bf16.msra.mxu1 %v7615_v0  ;;  %v7650_v63 = vld [vmem:[%s8247_s12 + $0x89c] ss:$72 sps:$4 sm:$0xff]   ;;  %v7652_v0 = vld [vmem:[%s8247_s12 + $0x878] ss:$72 sps:$4 sm:$0xff]  }
  0xf6   : > { %3949 = vmatmul.mubr.bf16.gmra.mrb[20].mxu1 %v7520_v61  ;;  %4079 = vmatprep.subr.bf16.mxu1 %v7625_v5  ;;  %v7641_v61 = vld [vmem:[%s8247_s12 + $0x808] ss:$72 sps:$4 sm:$0xff]  }
  0xf7   : > { %4721 = vmatmul.mubr.bf16.gmra.mrb[20].mxu0 %v7521_v62  ;;  %3958 = vmatprep.mubr.bf16.mxu1 %v7525_v1  ;;  %v7648_v62 = vld [vmem:[%s8247_s12 + $0x87c] ss:$72 sps:$4 sm:$0xff]   ;;  %v7656_v1 = vld [vmem:[%s8247_s12 + $0x898] ss:$72 sps:$4 sm:$0xff]  }
  0xf8   : > { %4730 = vmatprep.mubr.bf16.mxu0 %v7527_v2  ;;  %4852 = vmatpush1.bf16.msra.mxu0 %v7582_v3  ;;  %v7665_v2 = vld [vmem:[%s8247_s12 + $0x14] ss:$72 sps:$4 sm:$0xff]   ;;  %v7666_v5 = vld [vmem:[%s8247_s12 + $0x30] ss:$72 sps:$4 sm:$0xff]  }
  0xf9   : > { %4853 = vmatprep.subr.bf16.mxu0 %v7599_v4  ;;  %4080 = vmatpush1.bf16.msra.mxu1 %v7623_v6  ;;  %v7668_v3 = vld [vmem:[%s8247_s12 + $0x34] ss:$72 sps:$4 sm:$0xff]   ;;  %v7663_v4 = vld [vmem:[%s8247_s12 + $0x10] ss:$72 sps:$4 sm:$0xff]   ;;  %v7669_v6 = vld [vmem:[%s9619_s1 + $0x700] ss:$8 sps:$4 sm:$0xff]  }
  0xfa   : > { %4081 = vmatprep.subr.bf16.mxu1 %v7632_v7  ;;  %v7672_v7 = vld [vmem:[%s8247_s12 + $0xa4] ss:$72 sps:$4 sm:$0xff]  }
  0xfc   : > { %4854 = vmatpush1.bf16.msra.mxu0 %v7597_v8  ;;  %v7674_v8 = vld [vmem:[%s8247_s12 + $0xc4] ss:$72 sps:$4 sm:$0xff]  }
  0xfd   : > { %4855 = vmatprep.subr.bf16.mxu0 %v7614_v11  ;;  %4082 = vmatpush1.bf16.msra.mxu1 %v7630_v13  ;;  %v7749_v11 = vld [vmem:[%s9619_s1 + $0x314] ss:$8 sps:$4 sm:$0xff]   ;;  %v7689_v13 = vld [vmem:[%s9619_s1 + $0x724] ss:$8 sps:$4 sm:$0xff]  }
  0xfe   : > { %3959 = vmatmul.mubr.bf16.gmra.mrb[24].mxu1 %v7529_v9  ;;  %4083 = vmatprep.subr.bf16.mxu1 %v7640_v18  ;;  %v7680_v9 = vld [vmem:[%s9619_s1 + $0x714] ss:$8 sps:$4 sm:$0xff]  }
  0xff   : > { %4731 = vmatmul.mubr.bf16.gmra.mrb[24].mxu0 %v7530_v10  ;;  %3968 = vmatprep.mubr.bf16.mxu1 %v7534_v12  ;;  %v7740_v10 = vld [vmem:[%s9619_s1 + $0x300] ss:$8 sps:$4 sm:$0xff]   ;;  %v7678_v12 = vld [vmem:[%s9619_s1 + $0x710] ss:$8 sps:$4 sm:$0xff]   ;;  %v7683_v18 = vld [vmem:[%s8247_s12 + $0x154] ss:$72 sps:$4 sm:$0xff]  }
 0x100   : > { %4740 = vmatprep.mubr.bf16.mxu0 %v7536_v14  ;;  %4856 = vmatpush1.bf16.msra.mxu0 %v7612_v15  ;;  %v7676_v14 = vld [vmem:[%s8247_s12 + $0xa0] ss:$72 sps:$4 sm:$0xff]  }
 0x101   : > { %4857 = vmatprep.subr.bf16.mxu0 %v7629_v16  ;;  %4084 = vmatpush1.bf16.msra.mxu1 %v7638_v17  ;;  %v7677_v15 = vld [vmem:[%s8247_s12 + $0xc0] ss:$72 sps:$4 sm:$0xff]   ;;  %v7747_v16 = vld [vmem:[%s9619_s1 + $0x310] ss:$8 sps:$4 sm:$0xff]   ;;  %v7681_v17 = vld [vmem:[%s8247_s12 + $0x134] ss:$72 sps:$4 sm:$0xff]  }
 0x102   : > { %4085 = vmatprep.subr.bf16.mxu1 %v7647_v20  ;;  %v7757_v20 = vld [vmem:[%s9619_s1 + $0x324] ss:$8 sps:$4 sm:$0xff]  }
 0x104   : > { %4858 = vmatpush1.bf16.msra.mxu0 %v7627_v19  ;;  %v7687_v19 = vld [vmem:[%s9619_s1 + $0x720] ss:$8 sps:$4 sm:$0xff]  }
 0x105   : > { %4859 = vmatprep.subr.bf16.mxu0 %v7644_v21  ;;  %4086 = vmatpush1.bf16.msra.mxu1 %v7645_v22  ;;  %v7698_v21 = vld [vmem:[%s9619_s1 + $0x734] ss:$8 sps:$4 sm:$0xff]   ;;  %v7755_v22 = vld [vmem:[%s9619_s1 + $0x320] ss:$8 sps:$4 sm:$0xff]  }
 0x106   : > { %3969 = vmatmul.mubr.bf16.gmra.mrb[28].mxu1 %v7538_v23  ;;  %4087 = vmatprep.subr.bf16.mxu1 %v7655_v28  ;;  %v7696_v23 = vld [vmem:[%s9619_s1 + $0x730] ss:$8 sps:$4 sm:$0xff]  }
 0x107   : > { %4741 = vmatmul.mubr.bf16.gmra.mrb[28].mxu0 %v7539_v24  ;;  %3978 = vmatprep.mubr.bf16.mxu1 %v7543_v25  ;;  %v7764_v24 = vld [vmem:[%s9619_s1 + $0x334] ss:$8 sps:$4 sm:$0xff]   ;;  %v7707_v25 = vld [vmem:[%s9619_s1 + $0x744] ss:$8 sps:$4 sm:$0xff]   ;;  %v7686_v28 = vld [vmem:[%s8247_s12 + $0x150] ss:$72 sps:$4 sm:$0xff]  }
 0x108   : > { %4750 = vmatprep.mubr.bf16.mxu0 %v7545_v26  ;;  %4860 = vmatpush1.bf16.msra.mxu0 %v7642_v27  ;;  %v7762_v26 = vld [vmem:[%s9619_s1 + $0x330] ss:$8 sps:$4 sm:$0xff]  }
 0x109   : > { %4861 = vmatprep.subr.bf16.mxu0 %v7659_v30  ;;  %4088 = vmatpush1.bf16.msra.mxu1 %v7653_v29  ;;  %v7685_v27 = vld [vmem:[%s8247_s12 + $0x130] ss:$72 sps:$4 sm:$0xff]   ;;  %v7690_v29 = vld [vmem:[%s8247_s12 + $0x1c4] ss:$72 sps:$4 sm:$0xff]  }
 0x10a   : > { %4089 = vmatprep.subr.bf16.mxu1 %v7662_v32  ;;  %v7692_v30 = vld [vmem:[%s8247_s12 + $0x1e4] ss:$72 sps:$4 sm:$0xff]  }
 0x10b   : > { %v7772_v32 = vld [vmem:[%s9619_s1 + $0x344] ss:$8 sps:$4 sm:$0xff]  }
 0x10c   : > { %4862 = vmatpush1.bf16.msra.mxu0 %v7657_v31  ;;  %v7705_v31 = vld [vmem:[%s9619_s1 + $0x740] ss:$8 sps:$4 sm:$0xff]  }
 0x10d   : > { %4090 = vmatpush1.bf16.msra.mxu1 %v7660_v33  ;;  %5024 = vmatprep.subr.bf16.mxu0 %v7671_v34  ;;  %v7716_v33 = vld [vmem:[%s9619_s1 + $0x754] ss:$8 sps:$4 sm:$0xff]   ;;  %v7770_v34 = vld [vmem:[%s9619_s1 + $0x340] ss:$8 sps:$4 sm:$0xff]  }
 0x10e   : > { %3979 = vmatmul.mubr.bf16.gmra.mrb[32].mxu1 %v7547_v35  ;;  %4252 = vmatprep.subr.bf16.mxu1 %v7742_v39  ;;  %v7714_v35 = vld [vmem:[%s9619_s1 + $0x750] ss:$8 sps:$4 sm:$0xff]   ;;  %v7694_v39 = vld [vmem:[%s8247_s12 + $0x1c0] ss:$72 sps:$4 sm:$0xff]  }
 0x10f   : > { %4751 = vmatmul.mubr.bf16.gmra.mrb[32].mxu0 %v7551_v36  ;;  %3988 = vmatprep.mubr.bf16.mxu1 %v7558_v37  ;;  %v7779_v36 = vld [vmem:[%s9619_s1 + $0x354] ss:$8 sps:$4 sm:$0xff]   ;;  %v7725_v37 = vld [vmem:[%s9619_s1 + $0x764] ss:$8 sps:$4 sm:$0xff]  }
 0x110   : > { %4760 = vmatprep.mubr.bf16.mxu0 %v7560_v38  ;;  %v7777_v38 = vld [vmem:[%s9619_s1 + $0x350] ss:$8 sps:$4 sm:$0xff]  }
 0x116   : > { %3989 = vmatmul.mubr.bf16.gmra.mrb[36].mxu1 %v7562_v40  ;;  %v7695_v40 = vld [vmem:[%s8247_s12 + $0x1e0] ss:$72 sps:$4 sm:$0xff]  }
 0x117   : > { %4761 = vmatmul.mubr.bf16.gmra.mrb[36].mxu0 %v7566_v41  ;;  %3998 = vmatprep.mubr.bf16.mxu1 %v7573_v42  ;;  %v7699_v41 = vld [vmem:[%s8247_s12 + $0x254] ss:$72 sps:$4 sm:$0xff]  }
 0x118   : > { %4770 = vmatprep.mubr.bf16.mxu0 %v7575_v43  ;;  %v7701_v42 = vld [vmem:[%s8247_s12 + $0x274] ss:$72 sps:$4 sm:$0xff]   ;;  %v7723_v43 = vld [vmem:[%s9619_s1 + $0x760] ss:$8 sps:$4 sm:$0xff]  }
 0x11e   : > { %3999 = vmatmul.mubr.bf16.gmra.mrb[40].mxu1 %v7577_v44  ;;  %v7787_v44 = vld [vmem:[%s9619_s1 + $0x364] ss:$8 sps:$4 sm:$0xff]  }
 0x11f   : > { %4771 = vmatmul.mubr.bf16.gmra.mrb[40].mxu0 %v7581_v45  ;;  %4008 = vmatprep.mubr.bf16.mxu1 %v7588_v46  ;;  %v7734_v45 = vld [vmem:[%s9619_s1 + $0x774] ss:$8 sps:$4 sm:$0xff]   ;;  %v7785_v46 = vld [vmem:[%s9619_s1 + $0x360] ss:$8 sps:$4 sm:$0xff]  }
 0x120   : > { %4780 = vmatprep.mubr.bf16.mxu0 %v7590_v47  ;;  %v7732_v47 = vld [vmem:[%s9619_s1 + $0x770] ss:$8 sps:$4 sm:$0xff]  }
 0x126   : > { %4009 = vmatmul.mubr.bf16.gmra.mrb[44].mxu1 %v7592_v48  ;;  %v7794_v48 = vld [vmem:[%s9619_s1 + $0x374] ss:$8 sps:$4 sm:$0xff]  }
 0x127   : > { %4781 = vmatmul.mubr.bf16.gmra.mrb[44].mxu0 %v7596_v49  ;;  %4018 = vmatprep.mubr.bf16.mxu1 %v7603_v50  ;;  %v7746_v49 = vld [vmem:[%s9619_s1 + $0x784] ss:$8 sps:$4 sm:$0xff]   ;;  %v7792_v50 = vld [vmem:[%s9619_s1 + $0x370] ss:$8 sps:$4 sm:$0xff]  }
 0x128   : > { %4790 = vmatprep.mubr.bf16.mxu0 %v7605_v51  ;;  %v7703_v51 = vld [vmem:[%s8247_s12 + $0x250] ss:$72 sps:$4 sm:$0xff]  }
 0x12e   : > { %4019 = vmatmul.mubr.bf16.gmra.mrb[48].mxu1 %v7607_v52  ;;  %v7704_v52 = vld [vmem:[%s8247_s12 + $0x270] ss:$72 sps:$4 sm:$0xff]  }
 0x12f   : > { %4791 = vmatmul.mubr.bf16.gmra.mrb[48].mxu0 %v7611_v53  ;;  %4028 = vmatprep.mubr.bf16.mxu1 %v7618_v54  ;;  %v7708_v53 = vld [vmem:[%s8247_s12 + $0x2e4] ss:$72 sps:$4 sm:$0xff]  }
 0x130   : > { %4800 = vmatprep.mubr.bf16.mxu0 %v7620_v55  ;;  %v7710_v54 = vld [vmem:[%s8247_s12 + $0x304] ss:$72 sps:$4 sm:$0xff]   ;;  %v7744_v55 = vld [vmem:[%s9619_s1 + $0x780] ss:$8 sps:$4 sm:$0xff]  }
 0x136   : > { %4029 = vmatmul.mubr.bf16.gmra.mrb[52].mxu1 %v7622_v56  ;;  %v7802_v56 = vld [vmem:[%s9619_s1 + $0x384] ss:$8 sps:$4 sm:$0xff]  }
 0x137   : > { %4801 = vmatmul.mubr.bf16.gmra.mrb[52].mxu0 %v7626_v57  ;;  %4038 = vmatprep.mubr.bf16.mxu1 %v7633_v58  ;;  %v7761_v57 = vld [vmem:[%s9619_s1 + $0x794] ss:$8 sps:$4 sm:$0xff]   ;;  %v7800_v58 = vld [vmem:[%s9619_s1 + $0x380] ss:$8 sps:$4 sm:$0xff]  }
 0x138   : > { %4810 = vmatprep.mubr.bf16.mxu0 %v7635_v59  ;;  %v7759_v59 = vld [vmem:[%s9619_s1 + $0x790] ss:$8 sps:$4 sm:$0xff]  }
 0x13e   : > { %4039 = vmatmul.mubr.bf16.gmra.mrb[56].mxu1 %v7637_v60  ;;  %v7809_v60 = vld [vmem:[%s9619_s1 + $0x394] ss:$8 sps:$4 sm:$0xff]  }
 0x13f   : > { %4811 = vmatmul.mubr.bf16.gmra.mrb[56].mxu0 %v7641_v61  ;;  %4048 = vmatprep.mubr.bf16.mxu1 %v7648_v62  ;;  %v7776_v61 = vld [vmem:[%s9619_s1 + $0x7a4] ss:$8 sps:$4 sm:$0xff]   ;;  %v7807_v62 = vld [vmem:[%s9619_s1 + $0x390] ss:$8 sps:$4 sm:$0xff]  }
 0x140   : > { %4820 = vmatprep.mubr.bf16.mxu0 %v7650_v63  ;;  %v7712_v63 = vld [vmem:[%s8247_s12 + $0x2e0] ss:$72 sps:$4 sm:$0xff]  }
 0x146   : > { %4049 = vmatmul.mubr.bf16.gmra.mrb[60].mxu1 %v7652_v0  ;;  %v7713_v0 = vld [vmem:[%s8247_s12 + $0x300] ss:$72 sps:$4 sm:$0xff]  }
 0x147   : > { %4821 = vmatmul.mubr.bf16.gmra.mrb[60].mxu0 %v7656_v1  ;;  %4091 = vmatprep.mubr.bf16.mxu1 %v7665_v2  ;;  %v7717_v1 = vld [vmem:[%s8247_s12 + $0x374] ss:$72 sps:$4 sm:$0xff]  }
 0x148   : > { %4863 = vmatprep.mubr.bf16.mxu0 %v7668_v3  ;;  %v7719_v2 = vld [vmem:[%s8247_s12 + $0x394] ss:$72 sps:$4 sm:$0xff]   ;;  %v7774_v3 = vld [vmem:[%s9619_s1 + $0x7a0] ss:$8 sps:$4 sm:$0xff]  }
 0x14e   : > { %4092 = vmatmul.mubr.bf16.vlgmr.msra.gmra.mrb[0].mxu1 %v7663_v4  ;;  %v7817_v4 = vld [vmem:[%s9619_s1 + $0x3a4] ss:$8 sps:$4 sm:$0xff]  }
 0x14f   : > { %4864 = vmatmul.mubr.bf16.vlgmr.msra.gmra.mrb[0].mxu0 %v7666_v5  ;;  %4101 = vmatprep.mubr.bf16.mxu1 %v7672_v7  ;;  %v7791_v5 = vld [vmem:[%s9619_s1 + $0x7b4] ss:$8 sps:$4 sm:$0xff]  }
 0x150   : > { %5025 = vmatpush1.bf16.msra.mxu0 %v7669_v6  ;;  %4873 = vmatprep.mubr.bf16.mxu0 %v7674_v8  ;;  %v7815_v6 = vld [vmem:[%s9619_s1 + $0x3a0] ss:$8 sps:$4 sm:$0xff]   ;;  %v7824_v7 = vld [vmem:[%s9619_s1 + $0x3b4] ss:$8 sps:$4 sm:$0xff]   ;;  %v7789_v8 = vld [vmem:[%s9619_s1 + $0x7b0] ss:$8 sps:$4 sm:$0xff]  }
 0x151   : > { %5026 = vmatprep.subr.bf16.mxu0 %v7680_v9  ;;  %4253 = vmatpush1.bf16.msra.mxu1 %v7740_v10  ;;  %v7806_v9 = vld [vmem:[%s9619_s1 + $0x7c4] ss:$8 sps:$4 sm:$0xff]   ;;  %v7822_v10 = vld [vmem:[%s9619_s1 + $0x3b0] ss:$8 sps:$4 sm:$0xff]  }
 0x152   : > { %4254 = vmatprep.subr.bf16.mxu1 %v7749_v11  ;;  %v7721_v11 = vld [vmem:[%s8247_s12 + $0x370] ss:$72 sps:$4 sm:$0xff]  }
 0x154   : > { %5027 = vmatpush1.bf16.msra.mxu0 %v7678_v12  ;;  %v7722_v12 = vld [vmem:[%s8247_s12 + $0x390] ss:$72 sps:$4 sm:$0xff]  }
 0x155   : > { %5028 = vmatprep.subr.bf16.mxu0 %v7689_v13  ;;  %4255 = vmatpush1.bf16.msra.mxu1 %v7747_v16  ;;  %v7726_v13 = vld [vmem:[%s8247_s12 + $0x404] ss:$72 sps:$4 sm:$0xff]  }
 0x156   : > { %4102 = vmatmul.mubr.bf16.gmra.mrb[4].mxu1 %v7676_v14  ;;  %4256 = vmatprep.subr.bf16.mxu1 %v7757_v20  ;;  %v7728_v14 = vld [vmem:[%s8247_s12 + $0x424] ss:$72 sps:$4 sm:$0xff]   ;;  %v7819_v20 = vld [vmem:[%s9619_s1 + $0x7d0] ss:$8 sps:$4 sm:$0xff]  }
 0x157   : > { %4874 = vmatmul.mubr.bf16.gmra.mrb[4].mxu0 %v7677_v15  ;;  %4111 = vmatprep.mubr.bf16.mxu1 %v7681_v17  ;;  %v7804_v15 = vld [vmem:[%s9619_s1 + $0x7c0] ss:$8 sps:$4 sm:$0xff]   ;;  %v7832_v16 = vld [vmem:[%s9619_s1 + $0x3c4] ss:$8 sps:$4 sm:$0xff]   ;;  %v7821_v17 = vld [vmem:[%s9619_s1 + $0x7d4] ss:$8 sps:$4 sm:$0xff]  }
 0x158   : > { %4883 = vmatprep.mubr.bf16.mxu0 %v7683_v18  ;;  %5029 = vmatpush1.bf16.msra.mxu0 %v7687_v19  ;;  %v7830_v18 = vld [vmem:[%s9619_s1 + $0x3c0] ss:$8 sps:$4 sm:$0xff]   ;;  %v7839_v19 = vld [vmem:[%s9619_s1 + $0x3d4] ss:$8 sps:$4 sm:$0xff]  }
 0x159   : > { %5030 = vmatprep.subr.bf16.mxu0 %v7698_v21  ;;  %4257 = vmatpush1.bf16.msra.mxu1 %v7755_v22  ;;  %v7836_v21 = vld [vmem:[%s9619_s1 + $0x7e4] ss:$8 sps:$4 sm:$0xff]   ;;  %v7837_v22 = vld [vmem:[%s9619_s1 + $0x3d0] ss:$8 sps:$4 sm:$0xff]  }
 0x15a   : > { %4258 = vmatprep.subr.bf16.mxu1 %v7764_v24  ;;  %v7731_v24 = vld [vmem:[%s8247_s12 + $0x420] ss:$72 sps:$4 sm:$0xff]  }
 0x15c   : > { %5031 = vmatpush1.bf16.msra.mxu0 %v7696_v23  ;;  %v7730_v23 = vld [vmem:[%s8247_s12 + $0x400] ss:$72 sps:$4 sm:$0xff]  }
 0x15d   : > { %5032 = vmatprep.subr.bf16.mxu0 %v7707_v25  ;;  %4259 = vmatpush1.bf16.msra.mxu1 %v7762_v26  ;;  %v7735_v25 = vld [vmem:[%s8247_s12 + $0x494] ss:$72 sps:$4 sm:$0xff]  }
 0x15e   : > { %4112 = vmatmul.mubr.bf16.gmra.mrb[8].mxu1 %v7685_v27  ;;  %4260 = vmatprep.subr.bf16.mxu1 %v7772_v32  ;;  %v7737_v26 = vld [vmem:[%s8247_s12 + $0x4b4] ss:$72 sps:$4 sm:$0xff]   ;;  %v7834_v27 = vld [vmem:[%s9619_s1 + $0x7e0] ss:$8 sps:$4 sm:$0xff]   ;;  %v7849_v32 = vld [vmem:[%s9619_s1 + $0x7f0] ss:$8 sps:$4 sm:$0xff]  }
 0x15f   : > { %4884 = vmatmul.mubr.bf16.gmra.mrb[8].mxu0 %v7686_v28  ;;  %4121 = vmatprep.mubr.bf16.mxu1 %v7690_v29  ;;  %v7847_v28 = vld [vmem:[%s9619_s1 + $0x3e4] ss:$8 sps:$4 sm:$0xff]   ;;  %v7845_v29 = vld [vmem:[%s9619_s1 + $0x3e0] ss:$8 sps:$4 sm:$0xff]  }
 0x160   : > { %4893 = vmatprep.mubr.bf16.mxu0 %v7692_v30  ;;  %5033 = vmatpush1.bf16.msra.mxu0 %v7705_v31  ;;  %v7851_v30 = vld [vmem:[%s9619_s1 + $0x7f4] ss:$8 sps:$4 sm:$0xff]  }
 0x161   : > { %5034 = vmatprep.subr.bf16.mxu0 %v7716_v33  ;;  %4261 = vmatpush1.bf16.msra.mxu1 %v7770_v34  ;;  %v7854_v31 = vld [vmem:[%s9619_s1 + $0x3f4] ss:$8 sps:$4 sm:$0xff]   ;;  %v7852_v33 = vld [vmem:[%s9619_s1 + $0x3f0] ss:$8 sps:$4 sm:$0xff]   ;;  %v7863_v34 = vld [vmem:[%s9619_s1 + $0x804] ss:$8 sps:$4 sm:$0xff]  }
 0x162   : > { %4262 = vmatprep.subr.bf16.mxu1 %v7779_v36  ;;  %v7743_v36 = vld [vmem:[%s8247_s12 + $0x4b0] ss:$72 sps:$4 sm:$0xff]  }
 0x164   : > { %5035 = vmatpush1.bf16.msra.mxu0 %v7714_v35  ;;  %v7739_v35 = vld [vmem:[%s8247_s12 + $0x490] ss:$72 sps:$4 sm:$0xff]  }
 0x165   : > { %5036 = vmatprep.subr.bf16.mxu0 %v7725_v37  ;;  %4263 = vmatpush1.bf16.msra.mxu1 %v7777_v38  ;;  %v7750_v37 = vld [vmem:[%s8247_s12 + $0x524] ss:$72 sps:$4 sm:$0xff]  }
 0x166   : > { %4122 = vmatmul.mubr.bf16.gmra.mrb[12].mxu1 %v7694_v39  ;;  %4264 = vmatprep.subr.bf16.mxu1 %v7787_v44  ;;  %v7752_v38 = vld [vmem:[%s8247_s12 + $0x544] ss:$72 sps:$4 sm:$0xff]   ;;  %v7754_v39 = vld [vmem:[%s8247_s12 + $0x520] ss:$72 sps:$4 sm:$0xff]   ;;  %v7773_v44 = vld [vmem:[%s8247_s12 + $0x5d0] ss:$72 sps:$4 sm:$0xff]  }
 0x167   : > { %4894 = vmatmul.mubr.bf16.gmra.mrb[12].mxu0 %v7695_v40  ;;  %4131 = vmatprep.mubr.bf16.mxu1 %v7699_v41  ;;  %v7758_v40 = vld [vmem:[%s8247_s12 + $0x540] ss:$72 sps:$4 sm:$0xff]   ;;  %v7765_v41 = vld [vmem:[%s8247_s12 + $0x5b4] ss:$72 sps:$4 sm:$0xff]  }
 0x168   : > { %4903 = vmatprep.mubr.bf16.mxu0 %v7701_v42  ;;  %5037 = vmatpush1.bf16.msra.mxu0 %v7723_v43  ;;  %v7767_v42 = vld [vmem:[%s8247_s12 + $0x5d4] ss:$72 sps:$4 sm:$0xff]   ;;  %v7769_v43 = vld [vmem:[%s8247_s12 + $0x5b0] ss:$72 sps:$4 sm:$0xff]  }
 0x169   : > { %5038 = vmatprep.subr.bf16.mxu0 %v7734_v45  ;;  %4265 = vmatpush1.bf16.msra.mxu1 %v7785_v46  ;;  %v7780_v45 = vld [vmem:[%s8247_s12 + $0x644] ss:$72 sps:$4 sm:$0xff]  }
 0x16a   : > { %4266 = vmatprep.subr.bf16.mxu1 %v7794_v48  ;;  %v7782_v46 = vld [vmem:[%s8247_s12 + $0x664] ss:$72 sps:$4 sm:$0xff]   ;;  %v7788_v48 = vld [vmem:[%s8247_s12 + $0x660] ss:$72 sps:$4 sm:$0xff]  }
 0x16c   : > { %5039 = vmatpush1.bf16.msra.mxu0 %v7732_v47  ;;  %v7784_v47 = vld [vmem:[%s8247_s12 + $0x640] ss:$72 sps:$4 sm:$0xff]  }
 0x16d   : > { %5040 = vmatprep.subr.bf16.mxu0 %v7746_v49  ;;  %4267 = vmatpush1.bf16.msra.mxu1 %v7792_v50  ;;  %v7795_v49 = vld [vmem:[%s8247_s12 + $0x6d4] ss:$72 sps:$4 sm:$0xff]  }
 0x16e   : > { %4132 = vmatmul.mubr.bf16.gmra.mrb[16].mxu1 %v7703_v51  ;;  %4268 = vmatprep.subr.bf16.mxu1 %v7802_v56  ;;  %v7797_v50 = vld [vmem:[%s8247_s12 + $0x6f4] ss:$72 sps:$4 sm:$0xff]   ;;  %v7799_v51 = vld [vmem:[%s8247_s12 + $0x6d0] ss:$72 sps:$4 sm:$0xff]   ;;  %v7818_v56 = vld [vmem:[%s8247_s12 + $0x780] ss:$72 sps:$4 sm:$0xff]  }
 0x16f   : > { %4904 = vmatmul.mubr.bf16.gmra.mrb[16].mxu0 %v7704_v52  ;;  %4141 = vmatprep.mubr.bf16.mxu1 %v7708_v53  ;;  %v7803_v52 = vld [vmem:[%s8247_s12 + $0x6f0] ss:$72 sps:$4 sm:$0xff]   ;;  %v7810_v53 = vld [vmem:[%s8247_s12 + $0x764] ss:$72 sps:$4 sm:$0xff]  }
 0x170   : > { %4913 = vmatprep.mubr.bf16.mxu0 %v7710_v54  ;;  %5041 = vmatpush1.bf16.msra.mxu0 %v7744_v55  ;;  %v7812_v54 = vld [vmem:[%s8247_s12 + $0x784] ss:$72 sps:$4 sm:$0xff]   ;;  %v7814_v55 = vld [vmem:[%s8247_s12 + $0x760] ss:$72 sps:$4 sm:$0xff]  }
 0x171   : > { %5042 = vmatprep.subr.bf16.mxu0 %v7761_v57  ;;  %4269 = vmatpush1.bf16.msra.mxu1 %v7800_v58  ;;  %v7825_v57 = vld [vmem:[%s8247_s12 + $0x7f4] ss:$72 sps:$4 sm:$0xff]  }
 0x172   : > { %4270 = vmatprep.subr.bf16.mxu1 %v7809_v60  ;;  %v7827_v58 = vld [vmem:[%s8247_s12 + $0x814] ss:$72 sps:$4 sm:$0xff]   ;;  %v7833_v60 = vld [vmem:[%s8247_s12 + $0x810] ss:$72 sps:$4 sm:$0xff]  }
 0x174   : > { %5043 = vmatpush1.bf16.msra.mxu0 %v7759_v59  ;;  %v7829_v59 = vld [vmem:[%s8247_s12 + $0x7f0] ss:$72 sps:$4 sm:$0xff]  }
 0x175   : > { %5044 = vmatprep.subr.bf16.mxu0 %v7776_v61  ;;  %4271 = vmatpush1.bf16.msra.mxu1 %v7807_v62  ;;  %v7840_v61 = vld [vmem:[%s8247_s12 + $0x884] ss:$72 sps:$4 sm:$0xff]  }
 0x176   : > { %4142 = vmatmul.mubr.bf16.gmra.mrb[20].mxu1 %v7712_v63  ;;  %4272 = vmatprep.subr.bf16.mxu1 %v7817_v4  ;;  %v7842_v62 = vld [vmem:[%s8247_s12 + $0x8a4] ss:$72 sps:$4 sm:$0xff]   ;;  %v7844_v63 = vld [vmem:[%s8247_s12 + $0x880] ss:$72 sps:$4 sm:$0xff]  }
 0x177   : > { %4914 = vmatmul.mubr.bf16.gmra.mrb[20].mxu0 %v7713_v0  ;;  %4151 = vmatprep.mubr.bf16.mxu1 %v7717_v1  ;;  %v7848_v0 = vld [vmem:[%s8247_s12 + $0x8a0] ss:$72 sps:$4 sm:$0xff]   ;;  %v7857_v1 = vld [vmem:[%s8247_s12 + $0x1c] ss:$72 sps:$4 sm:$0xff]  }
 0x178   : > { %4923 = vmatprep.mubr.bf16.mxu0 %v7719_v2  ;;  %5045 = vmatpush1.bf16.msra.mxu0 %v7774_v3  ;;  %v7860_v2 = vld [vmem:[%s8247_s12 + $0x3c] ss:$72 sps:$4 sm:$0xff]   ;;  %v7855_v3 = vld [vmem:[%s8247_s12 + $0x18] ss:$72 sps:$4 sm:$0xff]  }
 0x179   : > { %5046 = vmatprep.subr.bf16.mxu0 %v7791_v5  ;;  %4273 = vmatpush1.bf16.msra.mxu1 %v7815_v6  ;;  %v7858_v4 = vld [vmem:[%s8247_s12 + $0x38] ss:$72 sps:$4 sm:$0xff]   ;;  %v7864_v6 = vld [vmem:[%s8247_s12 + $0xac] ss:$72 sps:$4 sm:$0xff]  }
 0x17a   : > { %4274 = vmatprep.subr.bf16.mxu1 %v7824_v7  ;;  %v7861_v5 = vld [vmem:[%s9619_s1 + $0x800] ss:$8 sps:$4 sm:$0xff]   ;;  %v7866_v7 = vld [vmem:[%s8247_s12 + $0xcc] ss:$72 sps:$4 sm:$0xff]  }
 0x17c   : > { %5047 = vmatpush1.bf16.msra.mxu0 %v7789_v8  ;;  %v7872_v8 = vld [vmem:[%s9619_s1 + $0x814] ss:$8 sps:$4 sm:$0xff]  }
 0x17d   : > { %5048 = vmatprep.subr.bf16.mxu0 %v7806_v9  ;;  %4275 = vmatpush1.bf16.msra.mxu1 %v7822_v10  ;;  %v7870_v9 = vld [vmem:[%s9619_s1 + $0x810] ss:$8 sps:$4 sm:$0xff]   ;;  %v7881_v10 = vld [vmem:[%s9619_s1 + $0x824] ss:$8 sps:$4 sm:$0xff]  }
 0x17e   : > { %4152 = vmatmul.mubr.bf16.gmra.mrb[24].mxu1 %v7721_v11  ;;  %4276 = vmatprep.subr.bf16.mxu1 %v7832_v16  ;;  %v7868_v11 = vld [vmem:[%s8247_s12 + $0xa8] ss:$72 sps:$4 sm:$0xff]   ;;  %v7890_v16 = vld [vmem:[%s9619_s1 + $0x834] ss:$8 sps:$4 sm:$0xff]  }
 0x17f   : > { %4924 = vmatmul.mubr.bf16.gmra.mrb[24].mxu0 %v7722_v12  ;;  %4161 = vmatprep.mubr.bf16.mxu1 %v7726_v13  ;;  %v7869_v12 = vld [vmem:[%s8247_s12 + $0xc8] ss:$72 sps:$4 sm:$0xff]   ;;  %v7873_v13 = vld [vmem:[%s8247_s12 + $0x13c] ss:$72 sps:$4 sm:$0xff]  }
 0x180   : > { %4933 = vmatprep.mubr.bf16.mxu0 %v7728_v14  ;;  %5049 = vmatpush1.bf16.msra.mxu0 %v7804_v15  ;;  %v7875_v14 = vld [vmem:[%s8247_s12 + $0x15c] ss:$72 sps:$4 sm:$0xff]   ;;  %v7879_v15 = vld [vmem:[%s9619_s1 + $0x820] ss:$8 sps:$4 sm:$0xff]  }
 0x181   : > { %5050 = vmatprep.subr.bf16.mxu0 %v7821_v17  ;;  %4277 = vmatpush1.bf16.msra.mxu1 %v7830_v18  ;;  %v7888_v17 = vld [vmem:[%s9619_s1 + $0x830] ss:$8 sps:$4 sm:$0xff]   ;;  %v7899_v18 = vld [vmem:[%s9619_s1 + $0x844] ss:$8 sps:$4 sm:$0xff]  }
 0x182   : > { %4278 = vmatprep.subr.bf16.mxu1 %v7839_v19  ;;  %v7877_v19 = vld [vmem:[%s8247_s12 + $0x138] ss:$72 sps:$4 sm:$0xff]  }
 0x184   : > { %5051 = vmatpush1.bf16.msra.mxu0 %v7819_v20  ;;  %v7878_v20 = vld [vmem:[%s8247_s12 + $0x158] ss:$72 sps:$4 sm:$0xff]  }
 0x185   : > { %5052 = vmatprep.subr.bf16.mxu0 %v7836_v21  ;;  %4279 = vmatpush1.bf16.msra.mxu1 %v7837_v22  ;;  %v7882_v21 = vld [vmem:[%s8247_s12 + $0x1cc] ss:$72 sps:$4 sm:$0xff]  }
 0x186   : > { %4162 = vmatmul.mubr.bf16.gmra.mrb[28].mxu1 %v7730_v23  ;;  %4280 = vmatprep.subr.bf16.mxu1 %v7847_v28  ;;  %v7884_v22 = vld [vmem:[%s8247_s12 + $0x1ec] ss:$72 sps:$4 sm:$0xff]   ;;  %v7897_v23 = vld [vmem:[%s9619_s1 + $0x840] ss:$8 sps:$4 sm:$0xff]  }
 0x187   : > { %4934 = vmatmul.mubr.bf16.gmra.mrb[28].mxu0 %v7731_v24  ;;  %4171 = vmatprep.mubr.bf16.mxu1 %v7735_v25  ;;  %v7908_v24 = vld [vmem:[%s9619_s1 + $0x854] ss:$8 sps:$4 sm:$0xff]   ;;  %v7906_v25 = vld [vmem:[%s9619_s1 + $0x850] ss:$8 sps:$4 sm:$0xff]  }
 0x188   : > { %4943 = vmatprep.mubr.bf16.mxu0 %v7737_v26  ;;  %5053 = vmatpush1.bf16.msra.mxu0 %v7834_v27  ;;  %v7917_v26 = vld [vmem:[%s9619_s1 + $0x864] ss:$8 sps:$4 sm:$0xff]   ;;  %v7886_v27 = vld [vmem:[%s8247_s12 + $0x1c8] ss:$72 sps:$4 sm:$0xff]  }
 0x189   : > { %5054 = vmatprep.subr.bf16.mxu0 %v7851_v30  ;;  %4281 = vmatpush1.bf16.msra.mxu1 %v7845_v29  ;;  %v7887_v28 = vld [vmem:[%s8247_s12 + $0x1e8] ss:$72 sps:$4 sm:$0xff]   ;;  %v7891_v29 = vld [vmem:[%s8247_s12 + $0x25c] ss:$72 sps:$4 sm:$0xff]  }
 0x18a   : > { %4282 = vmatprep.subr.bf16.mxu1 %v7854_v31  ;;  %v7893_v30 = vld [vmem:[%s8247_s12 + $0x27c] ss:$72 sps:$4 sm:$0xff]   ;;  %v7915_v31 = vld [vmem:[%s9619_s1 + $0x860] ss:$8 sps:$4 sm:$0xff]  }
 0x18c   : > { %5055 = vmatpush1.bf16.msra.mxu0 %v7849_v32  ;;  %v7926_v32 = vld [vmem:[%s9619_s1 + $0x874] ss:$8 sps:$4 sm:$0xff]  }
 0x18d   : > { %4283 = vmatpush1.bf16.msra.mxu1 %v7852_v33  ;;  %5217 = vmatprep.subr.bf16.mxu0 %v7863_v34  ;;  %v7924_v33 = vld [vmem:[%s9619_s1 + $0x870] ss:$8 sps:$4 sm:$0xff]   ;;  %v7935_v34 = vld [vmem:[%s9619_s1 + $0x884] ss:$8 sps:$4 sm:$0xff]  }
 0x18e   : > { %4172 = vmatmul.mubr.bf16.gmra.mrb[32].mxu1 %v7739_v35  ;;  %v7895_v35 = vld [vmem:[%s8247_s12 + $0x258] ss:$72 sps:$4 sm:$0xff]  }
 0x18f   : > { %4944 = vmatmul.mubr.bf16.gmra.mrb[32].mxu0 %v7743_v36  ;;  %4181 = vmatprep.mubr.bf16.mxu1 %v7750_v37  ;;  %v7896_v36 = vld [vmem:[%s8247_s12 + $0x278] ss:$72 sps:$4 sm:$0xff]   ;;  %v7900_v37 = vld [vmem:[%s8247_s12 + $0x2ec] ss:$72 sps:$4 sm:$0xff]  }
 0x190   : > { %4953 = vmatprep.mubr.bf16.mxu0 %v7752_v38  ;;  %v7902_v38 = vld [vmem:[%s8247_s12 + $0x30c] ss:$72 sps:$4 sm:$0xff]  }
 0x196   : > { %4182 = vmatmul.mubr.bf16.gmra.mrb[36].mxu1 %v7754_v39  ;;  %v7933_v39 = vld [vmem:[%s9619_s1 + $0x880] ss:$8 sps:$4 sm:$0xff]  }
 0x197   : > { %4954 = vmatmul.mubr.bf16.gmra.mrb[36].mxu0 %v7758_v40  ;;  %4191 = vmatprep.mubr.bf16.mxu1 %v7765_v41  ;;  %v7944_v40 = vld [vmem:[%s9619_s1 + $0x894] ss:$8 sps:$4 sm:$0xff]   ;;  %v7942_v41 = vld [vmem:[%s9619_s1 + $0x890] ss:$8 sps:$4 sm:$0xff]  }
 0x198   : > { %4963 = vmatprep.mubr.bf16.mxu0 %v7767_v42  ;;  %v7953_v42 = vld [vmem:[%s9619_s1 + $0x8a4] ss:$8 sps:$4 sm:$0xff]  }
 0x19e   : > { %4192 = vmatmul.mubr.bf16.gmra.mrb[40].mxu1 %v7769_v43  ;;  %v7904_v43 = vld [vmem:[%s8247_s12 + $0x2e8] ss:$72 sps:$4 sm:$0xff]  }
 0x19f   : > { %4964 = vmatmul.mubr.bf16.gmra.mrb[40].mxu0 %v7773_v44  ;;  %4201 = vmatprep.mubr.bf16.mxu1 %v7780_v45  ;;  %v7905_v44 = vld [vmem:[%s8247_s12 + $0x308] ss:$72 sps:$4 sm:$0xff]   ;;  %v7909_v45 = vld [vmem:[%s8247_s12 + $0x37c] ss:$72 sps:$4 sm:$0xff]  }
 0x1a0   : > { %4973 = vmatprep.mubr.bf16.mxu0 %v7782_v46  ;;  %v7911_v46 = vld [vmem:[%s8247_s12 + $0x39c] ss:$72 sps:$4 sm:$0xff]  }
 0x1a6   : > { %4202 = vmatmul.mubr.bf16.gmra.mrb[44].mxu1 %v7784_v47  ;;  %v7951_v47 = vld [vmem:[%s9619_s1 + $0x8a0] ss:$8 sps:$4 sm:$0xff]  }
 0x1a7   : > { %4974 = vmatmul.mubr.bf16.gmra.mrb[44].mxu0 %v7788_v48  ;;  %4211 = vmatprep.mubr.bf16.mxu1 %v7795_v49  ;;  %v7962_v48 = vld [vmem:[%s9619_s1 + $0x8b4] ss:$8 sps:$4 sm:$0xff]   ;;  %v7960_v49 = vld [vmem:[%s9619_s1 + $0x8b0] ss:$8 sps:$4 sm:$0xff]  }
 0x1a8   : > { %4983 = vmatprep.mubr.bf16.mxu0 %v7797_v50  ;;  %v7971_v50 = vld [vmem:[%s9619_s1 + $0x8c4] ss:$8 sps:$4 sm:$0xff]  }
 0x1ae   : > { %4212 = vmatmul.mubr.bf16.gmra.mrb[48].mxu1 %v7799_v51  ;;  %v7913_v51 = vld [vmem:[%s8247_s12 + $0x378] ss:$72 sps:$4 sm:$0xff]  }
 0x1af   : > { %4984 = vmatmul.mubr.bf16.gmra.mrb[48].mxu0 %v7803_v52  ;;  %4221 = vmatprep.mubr.bf16.mxu1 %v7810_v53  ;;  %v7914_v52 = vld [vmem:[%s8247_s12 + $0x398] ss:$72 sps:$4 sm:$0xff]   ;;  %v7918_v53 = vld [vmem:[%s8247_s12 + $0x40c] ss:$72 sps:$4 sm:$0xff]  }
 0x1b0   : > { %4993 = vmatprep.mubr.bf16.mxu0 %v7812_v54  ;;  %v7920_v54 = vld [vmem:[%s8247_s12 + $0x42c] ss:$72 sps:$4 sm:$0xff]  }
 0x1b6   : > { %4222 = vmatmul.mubr.bf16.gmra.mrb[52].mxu1 %v7814_v55  ;;  %v7969_v55 = vld [vmem:[%s9619_s1 + $0x8c0] ss:$8 sps:$4 sm:$0xff]  }
 0x1b7   : > { %4994 = vmatmul.mubr.bf16.gmra.mrb[52].mxu0 %v7818_v56  ;;  %4231 = vmatprep.mubr.bf16.mxu1 %v7825_v57  ;;  %v7980_v56 = vld [vmem:[%s9619_s1 + $0x8d4] ss:$8 sps:$4 sm:$0xff]   ;;  %v7978_v57 = vld [vmem:[%s9619_s1 + $0x8d0] ss:$8 sps:$4 sm:$0xff]  }
 0x1b8   : > { %5003 = vmatprep.mubr.bf16.mxu0 %v7827_v58  ;;  %v7989_v58 = vld [vmem:[%s9619_s1 + $0x8e4] ss:$8 sps:$4 sm:$0xff]  }
 0x1be   : > { %4232 = vmatmul.mubr.bf16.gmra.mrb[56].mxu1 %v7829_v59  ;;  %v7922_v59 = vld [vmem:[%s8247_s12 + $0x408] ss:$72 sps:$4 sm:$0xff]  }
 0x1bf   : > { %5004 = vmatmul.mubr.bf16.gmra.mrb[56].mxu0 %v7833_v60  ;;  %4241 = vmatprep.mubr.bf16.mxu1 %v7840_v61  ;;  %v7923_v60 = vld [vmem:[%s8247_s12 + $0x428] ss:$72 sps:$4 sm:$0xff]   ;;  %v7927_v61 = vld [vmem:[%s8247_s12 + $0x49c] ss:$72 sps:$4 sm:$0xff]  }
 0x1c0   : > { %5013 = vmatprep.mubr.bf16.mxu0 %v7842_v62  ;;  %v7929_v62 = vld [vmem:[%s8247_s12 + $0x4bc] ss:$72 sps:$4 sm:$0xff]  }
 0x1c6   : > { %4242 = vmatmul.mubr.bf16.gmra.mrb[60].mxu1 %v7844_v63  ;;  %v7987_v63 = vld [vmem:[%s9619_s1 + $0x8e0] ss:$8 sps:$4 sm:$0xff]  }
 0x1c7   : > { %5014 = vmatmul.mubr.bf16.gmra.mrb[60].mxu0 %v7848_v0  ;;  %4284 = vmatprep.mubr.bf16.mxu1 %v7857_v1  ;;  %v7998_v0 = vld [vmem:[%s9619_s1 + $0x8f4] ss:$8 sps:$4 sm:$0xff]   ;;  %v7996_v1 = vld [vmem:[%s9619_s1 + $0x8f0] ss:$8 sps:$4 sm:$0xff]  }
 0x1c8   : > { %5056 = vmatprep.mubr.bf16.mxu0 %v7860_v2  ;;  %v7931_v2 = vld [vmem:[%s8247_s12 + $0x498] ss:$72 sps:$4 sm:$0xff]  }
 0x1ce   : > { %4285 = vmatmul.mubr.bf16.vlgmr.msra.gmra.mrb[0].mxu1 %v7855_v3  ;;  %v7932_v3 = vld [vmem:[%s8247_s12 + $0x4b8] ss:$72 sps:$4 sm:$0xff]  }
 0x1cf   : > { %5057 = vmatmul.mubr.bf16.vlgmr.msra.gmra.mrb[0].mxu0 %v7858_v4  ;;  %4294 = vmatprep.mubr.bf16.mxu1 %v7864_v6  ;;  %v7936_v4 = vld [vmem:[%s8247_s12 + $0x52c] ss:$72 sps:$4 sm:$0xff]   ;;  %v7940_v6 = vld [vmem:[%s8247_s12 + $0x528] ss:$72 sps:$4 sm:$0xff]  }
 0x1d0   : > { %5218 = vmatpush1.bf16.msra.mxu0 %v7861_v5  ;;  %5066 = vmatprep.mubr.bf16.mxu0 %v7866_v7  ;;  %v7938_v5 = vld [vmem:[%s8247_s12 + $0x54c] ss:$72 sps:$4 sm:$0xff]   ;;  %v7941_v7 = vld [vmem:[%s8247_s12 + $0x548] ss:$72 sps:$4 sm:$0xff]  }
 0x1d1   : > { %5219 = vmatprep.subr.bf16.mxu0 %v7872_v8  ;;  %v7945_v8 = vld [vmem:[%s8247_s12 + $0x5bc] ss:$72 sps:$4 sm:$0xff]  }
 0x1d4   : > { %5220 = vmatpush1.bf16.msra.mxu0 %v7870_v9  ;;  %v7947_v9 = vld [vmem:[%s8247_s12 + $0x5dc] ss:$72 sps:$4 sm:$0xff]  }
 0x1d5   : > { %5221 = vmatprep.subr.bf16.mxu0 %v7881_v10  ;;  %v7949_v10 = vld [vmem:[%s8247_s12 + $0x5b8] ss:$72 sps:$4 sm:$0xff]  }
 0x1d6   : > { %4295 = vmatmul.mubr.bf16.gmra.mrb[4].mxu1 %v7868_v11  ;;  %v7950_v11 = vld [vmem:[%s8247_s12 + $0x5d8] ss:$72 sps:$4 sm:$0xff]  }
 0x1d7   : > { %5067 = vmatmul.mubr.bf16.gmra.mrb[4].mxu0 %v7869_v12  ;;  %4304 = vmatprep.mubr.bf16.mxu1 %v7873_v13  ;;  %v7954_v12 = vld [vmem:[%s8247_s12 + $0x64c] ss:$72 sps:$4 sm:$0xff]  }
 0x1d8   : > { %5076 = vmatprep.mubr.bf16.mxu0 %v7875_v14  ;;  %5222 = vmatpush1.bf16.msra.mxu0 %v7879_v15  ;;  %v7956_v13 = vld [vmem:[%s8247_s12 + $0x66c] ss:$72 sps:$4 sm:$0xff]   ;;  %v7958_v14 = vld [vmem:[%s8247_s12 + $0x648] ss:$72 sps:$4 sm:$0xff]  }
 0x1d9   : > { %5223 = vmatprep.subr.bf16.mxu0 %v7890_v16  ;;  %v7959_v15 = vld [vmem:[%s8247_s12 + $0x668] ss:$72 sps:$4 sm:$0xff]   ;;  %v7963_v16 = vld [vmem:[%s8247_s12 + $0x6dc] ss:$72 sps:$4 sm:$0xff]  }
 0x1dc   : > { %5224 = vmatpush1.bf16.msra.mxu0 %v7888_v17  ;;  %v7965_v17 = vld [vmem:[%s8247_s12 + $0x6fc] ss:$72 sps:$4 sm:$0xff]  }
 0x1dd   : > { %5225 = vmatprep.subr.bf16.mxu0 %v7899_v18  ;;  %v7967_v18 = vld [vmem:[%s8247_s12 + $0x6d8] ss:$72 sps:$4 sm:$0xff]  }
 0x1de   : > { %4305 = vmatmul.mubr.bf16.gmra.mrb[8].mxu1 %v7877_v19  ;;  %v7968_v19 = vld [vmem:[%s8247_s12 + $0x6f8] ss:$72 sps:$4 sm:$0xff]  }
 0x1df   : > { %5077 = vmatmul.mubr.bf16.gmra.mrb[8].mxu0 %v7878_v20  ;;  %4314 = vmatprep.mubr.bf16.mxu1 %v7882_v21  ;;  %v7972_v20 = vld [vmem:[%s8247_s12 + $0x76c] ss:$72 sps:$4 sm:$0xff]  }
 0x1e0   : > { %5086 = vmatprep.mubr.bf16.mxu0 %v7884_v22  ;;  %5226 = vmatpush1.bf16.msra.mxu0 %v7897_v23  ;;  %v7974_v21 = vld [vmem:[%s8247_s12 + $0x78c] ss:$72 sps:$4 sm:$0xff]   ;;  %v8035_v22 = vld [vmem:[%s9621_s3 + $0x40] sm:$0xff]  }
 0x1e1   : > { %5227 = vmatprep.subr.bf16.mxu0 %v7908_v24  ;;  %v8038_v23 = vld [vmem:[%s9621_s3] sm:$0xff]   ;;  %6486 = vmatprep.subr.bf16.mxu1 %v8035_v22  ;;  %v7976_v24 = vld [vmem:[%s8247_s12 + $0x768] ss:$72 sps:$4 sm:$0xff]  }
 0x1e2   : > { %6487 = vmatpush3.bf16.msra.mxu1 %v8038_v23  ;;  %v8044_v23 = vld [vmem:[%s8247_s12 + $0x824] ss:$72 sps:$4 sm:$0xff]  }
 0x1e4   : > { %5228 = vmatpush1.bf16.msra.mxu0 %v7906_v25  ;;  %v7977_v25 = vld [vmem:[%s8247_s12 + $0x788] ss:$72 sps:$4 sm:$0xff]  }
 0x1e5   : > { %5229 = vmatprep.subr.bf16.mxu0 %v7917_v26  ;;  %v7981_v26 = vld [vmem:[%s8247_s12 + $0x7fc] ss:$72 sps:$4 sm:$0xff]  }
 0x1e6   : > { %4315 = vmatmul.mubr.bf16.gmra.mrb[12].mxu1 %v7886_v27  ;;  %v7983_v27 = vld [vmem:[%s8247_s12 + $0x81c] ss:$72 sps:$4 sm:$0xff]  }
 0x1e7   : > { %5087 = vmatmul.mubr.bf16.gmra.mrb[12].mxu0 %v7887_v28  ;;  %4324 = vmatprep.mubr.bf16.mxu1 %v7891_v29  ;;  %v7985_v28 = vld [vmem:[%s8247_s12 + $0x7f8] ss:$72 sps:$4 sm:$0xff]  }
 0x1e8   : > { %5096 = vmatprep.mubr.bf16.mxu0 %v7893_v30  ;;  %5230 = vmatpush1.bf16.msra.mxu0 %v7915_v31  ;;  %v7986_v29 = vld [vmem:[%s8247_s12 + $0x818] ss:$72 sps:$4 sm:$0xff]   ;;  %v7990_v30 = vld [vmem:[%s8247_s12 + $0x88c] ss:$72 sps:$4 sm:$0xff]  }
 0x1e9   : > { %5231 = vmatprep.subr.bf16.mxu0 %v7926_v32  ;;  %v7992_v31 = vld [vmem:[%s8247_s12 + $0x8ac] ss:$72 sps:$4 sm:$0xff]  }
 0x1ea   : > { %v8043_v32 = vld [vmem:[%s9621_s3 + $0x48] sm:$0xff]  }
 0x1eb   : > { %6488 = vmatprep.subr.bf16.mxu1 %v8043_v32 }
 0x1ec   : > { %5232 = vmatpush1.bf16.msra.mxu0 %v7924_v33  ;;  %v8046_v33 = vld [vmem:[%s9621_s3 + $0x8] sm:$0xff]  }
 0x1ed   : > { %5233 = vmatprep.subr.bf16.mxu0 %v7935_v34  ;;  %6489 = vmatpush3.bf16.msra.mxu1 %v8046_v33  ;;  %v7994_v34 = vld [vmem:[%s8247_s12 + $0x888] ss:$72 sps:$4 sm:$0xff]  }
 0x1ee   : > { %4325 = vmatmul.mubr.bf16.gmra.mrb[16].mxu1 %v7895_v35  ;;  %v7995_v35 = vld [vmem:[%s8247_s12 + $0x8a8] ss:$72 sps:$4 sm:$0xff]  }
 0x1ef   : > { %5097 = vmatmul.mubr.bf16.gmra.mrb[16].mxu0 %v7896_v36  ;;  %4334 = vmatprep.mubr.bf16.mxu1 %v7900_v37  ;;  %v8001_v36 = vld [vmem:[%s8247_s12 + $0x44] ss:$72 sps:$4 sm:$0xff]   ;;  %v7999_v37 = vld [vmem:[%s8247_s12 + $0x40] ss:$72 sps:$4 sm:$0xff]   ;;  %v8050_v33 = vld [vmem:[%s8247_s12 + $0x8b0] ss:$72 sps:$4 sm:$0xff]  }
 0x1f0   : > { %5106 = vmatprep.mubr.bf16.mxu0 %v7902_v38  ;;  %5234 = vmatpush1.bf16.msra.mxu0 %v7933_v39  ;;  %v8002_v38 = vld [vmem:[%s8247_s12 + $0xd4] ss:$72 sps:$4 sm:$0xff]  }
 0x1f1   : > { %5235 = vmatprep.subr.bf16.mxu0 %v7944_v40  ;;  %v8051_v39 = vld [vmem:[%s9621_s3 + $0x50] sm:$0xff]  }
 0x1f2   : > { %v8052_v40 = vld [vmem:[%s9621_s3 + $0x10] sm:$0xff]   ;;  %6490 = vmatprep.subr.bf16.mxu1 %v8051_v39 }
 0x1f3   : > { %6491 = vmatpush3.bf16.msra.mxu1 %v8052_v40 }
 0x1f4   : > { %5236 = vmatpush1.bf16.msra.mxu0 %v7942_v41  ;;  %v8004_v41 = vld [vmem:[%s8247_s12 + $0xd0] ss:$72 sps:$4 sm:$0xff]  }
 0x1f5   : > { %5237 = vmatprep.subr.bf16.mxu0 %v7953_v42  ;;  %v8005_v42 = vld [vmem:[%s8247_s12 + $0x164] ss:$72 sps:$4 sm:$0xff]  }
 0x1f6   : > { %4335 = vmatmul.mubr.bf16.gmra.mrb[20].mxu1 %v7904_v43  ;;  %v8007_v43 = vld [vmem:[%s8247_s12 + $0x160] ss:$72 sps:$4 sm:$0xff]  }
 0x1f7   : > { %5107 = vmatmul.mubr.bf16.gmra.mrb[20].mxu0 %v7905_v44  ;;  %4344 = vmatprep.mubr.bf16.mxu1 %v7909_v45  ;;  %v8008_v44 = vld [vmem:[%s8247_s12 + $0x1f4] ss:$72 sps:$4 sm:$0xff]  }
 0x1f8   : > { %5116 = vmatprep.mubr.bf16.mxu0 %v7911_v46  ;;  %5238 = vmatpush1.bf16.msra.mxu0 %v7951_v47  ;;  %v8053_v45 = vld [vmem:[%s9621_s3 + $0x58] sm:$0xff]  }
 0x1f9   : > { %5239 = vmatprep.subr.bf16.mxu0 %v7962_v48  ;;  %v8054_v46 = vld [vmem:[%s9621_s3 + $0x18] sm:$0xff]   ;;  %6492 = vmatprep.subr.bf16.mxu1 %v8053_v45  ;;  %v8011_v48 = vld [vmem:[%s8247_s12 + $0x284] ss:$72 sps:$4 sm:$0xff]  }
 0x1fa   : > { %6493 = vmatpush3.bf16.msra.mxu1 %v8054_v46  ;;  %v8010_v47 = vld [vmem:[%s8247_s12 + $0x1f0] ss:$72 sps:$4 sm:$0xff]  }
 0x1fc   : > { %5240 = vmatpush1.bf16.msra.mxu0 %v7960_v49  ;;  %v8013_v49 = vld [vmem:[%s8247_s12 + $0x280] ss:$72 sps:$4 sm:$0xff]  }
 0x1fd   : > { %5241 = vmatprep.subr.bf16.mxu0 %v7971_v50  ;;  %v8014_v50 = vld [vmem:[%s8247_s12 + $0x314] ss:$72 sps:$4 sm:$0xff]  }
 0x1fe   : > { %4345 = vmatmul.mubr.bf16.gmra.mrb[24].mxu1 %v7913_v51  ;;  %v8055_v51 = vld [vmem:[%s9621_s3 + $0x60] sm:$0xff]  }
 0x1ff   : > { %5117 = vmatmul.mubr.bf16.gmra.mrb[24].mxu0 %v7914_v52  ;;  %4354 = vmatprep.mubr.bf16.mxu1 %v7918_v53  ;;  %v8056_v52 = vld [vmem:[%s9621_s3 + $0x20] sm:$0xff]   ;;  %v8016_v53 = vld [vmem:[%s8247_s12 + $0x310] ss:$72 sps:$4 sm:$0xff]  }
 0x200   : > { %5126 = vmatprep.mubr.bf16.mxu0 %v7920_v54  ;;  %5242 = vmatpush1.bf16.msra.mxu0 %v7969_v55  ;;  %v8017_v54 = vld [vmem:[%s8247_s12 + $0x3a4] ss:$72 sps:$4 sm:$0xff]   ;;  %v8019_v55 = vld [vmem:[%s8247_s12 + $0x3a0] ss:$72 sps:$4 sm:$0xff]  }
 0x201   : > { %5243 = vmatprep.subr.bf16.mxu0 %v7980_v56  ;;  %6494 = vmatprep.subr.bf16.mxu1 %v8055_v51  ;;  %v8020_v56 = vld [vmem:[%s8247_s12 + $0x434] ss:$72 sps:$4 sm:$0xff]  }
 0x202   : > { %6495 = vmatpush3.bf16.msra.mxu1 %v8056_v52 }
 0x204   : > { %5244 = vmatpush1.bf16.msra.mxu0 %v7978_v57  ;;  %v8057_v57 = vld [vmem:[%s9621_s3 + $0x68] sm:$0xff]  }
 0x205   : > { %5245 = vmatprep.subr.bf16.mxu0 %v7989_v58  ;;  %v8058_v58 = vld [vmem:[%s9621_s3 + $0x28] sm:$0xff]   ;;  %6496 = vmatprep.subr.bf16.mxu1 %v8057_v57 }
 0x206   : > { %4355 = vmatmul.mubr.bf16.gmra.mrb[28].mxu1 %v7922_v59  ;;  %v8022_v59 = vld [vmem:[%s8247_s12 + $0x430] ss:$72 sps:$4 sm:$0xff]  }
 0x207   : > { %5127 = vmatmul.mubr.bf16.gmra.mrb[28].mxu0 %v7923_v60  ;;  %4364 = vmatprep.mubr.bf16.mxu1 %v7927_v61  ;;  %v8023_v60 = vld [vmem:[%s8247_s12 + $0x4c4] ss:$72 sps:$4 sm:$0xff]   ;;  %v8025_v61 = vld [vmem:[%s8247_s12 + $0x4c0] ss:$72 sps:$4 sm:$0xff]  }
 0x208   : > { %5136 = vmatprep.mubr.bf16.mxu0 %v7929_v62  ;;  %5246 = vmatpush1.bf16.msra.mxu0 %v7987_v63  ;;  %v8026_v62 = vld [vmem:[%s8247_s12 + $0x554] ss:$72 sps:$4 sm:$0xff]  }
 0x209   : > { %5247 = vmatprep.subr.bf16.mxu0 %v7998_v0  ;;  %6497 = vmatpush3.bf16.msra.mxu1 %v8058_v58  ;;  %v8059_v63 = vld [vmem:[%s9621_s3 + $0x70] sm:$0xff]  }
 0x20a   : > { %v8060_v0 = vld [vmem:[%s9621_s3 + $0x30] sm:$0xff]   ;;  %6498 = vmatprep.subr.bf16.mxu1 %v8059_v63 }
 0x20c   : > { %5248 = vmatpush1.bf16.msra.mxu0 %v7996_v1  ;;  %v8028_v1 = vld [vmem:[%s8247_s12 + $0x550] ss:$72 sps:$4 sm:$0xff]  }
 0x20d   : > { %6499 = vmatpush3.bf16.msra.mxu1 %v8060_v0 }
 0x20e   : > { %4365 = vmatmul.mubr.bf16.gmra.mrb[32].mxu1 %v7931_v2  ;;  %v8029_v2 = vld [vmem:[%s8247_s12 + $0x5e4] ss:$72 sps:$4 sm:$0xff]  }
 0x20f   : > { %5137 = vmatmul.mubr.bf16.gmra.mrb[32].mxu0 %v7932_v3  ;;  %4374 = vmatprep.mubr.bf16.mxu1 %v7936_v4  ;;  %v8031_v3 = vld [vmem:[%s8247_s12 + $0x5e0] ss:$72 sps:$4 sm:$0xff]   ;;  %v8032_v4 = vld [vmem:[%s8247_s12 + $0x674] ss:$72 sps:$4 sm:$0xff]  }
 0x210   : > { %5146 = vmatprep.mubr.bf16.mxu0 %v7938_v5  ;;  %v8061_v5 = vld [vmem:[%s9621_s3 + $0x78] sm:$0xff]  }
 0x211   : > { %6500 = vmatprep.subr.bf16.mxu1 %v8061_v5 }
 0x216   : > { %4375 = vmatmul.mubr.bf16.gmra.mrb[36].mxu1 %v7940_v6  ;;  %v8062_v6 = vld [vmem:[%s9621_s3 + $0x38] sm:$0xff]  }
 0x217   : > { %5147 = vmatmul.mubr.bf16.gmra.mrb[36].mxu0 %v7941_v7  ;;  %4384 = vmatprep.mubr.bf16.mxu1 %v7945_v8 }
 0x218   : > { %5156 = vmatprep.mubr.bf16.mxu0 %v7947_v9  ;;  %6501 = vmatpush3.bf16.msra.mxu1 %v8062_v6  ;;  %v8034_v9 = vld [vmem:[%s8247_s12 + $0x670] ss:$72 sps:$4 sm:$0xff]  }
 0x21e   : > { %4385 = vmatmul.mubr.bf16.gmra.mrb[40].mxu1 %v7949_v10 }
 0x21f   : > { %5157 = vmatmul.mubr.bf16.gmra.mrb[40].mxu0 %v7950_v11  ;;  %4394 = vmatprep.mubr.bf16.mxu1 %v7954_v12  ;;  %v8036_v11 = vld [vmem:[%s8247_s12 + $0x704] ss:$72 sps:$4 sm:$0xff]  }
 0x220   : > { %5166 = vmatprep.mubr.bf16.mxu0 %v7956_v13 }
 0x226   : > { %4395 = vmatmul.mubr.bf16.gmra.mrb[44].mxu1 %v7958_v14 }
 0x227   : > { %5167 = vmatmul.mubr.bf16.gmra.mrb[44].mxu0 %v7959_v15  ;;  %4404 = vmatprep.mubr.bf16.mxu1 %v7963_v16  ;;  %v8039_v15 = vld [vmem:[%s8247_s12 + $0x700] ss:$72 sps:$4 sm:$0xff]  }
 0x228   : > { %5176 = vmatprep.mubr.bf16.mxu0 %v7965_v17  ;;  %v8040_v17 = vld [vmem:[%s8247_s12 + $0x794] ss:$72 sps:$4 sm:$0xff]  }
 0x22e   : > { %4405 = vmatmul.mubr.bf16.gmra.mrb[48].mxu1 %v7967_v18 }
 0x22f   : > { %5177 = vmatmul.mubr.bf16.gmra.mrb[48].mxu0 %v7968_v19  ;;  %4414 = vmatprep.mubr.bf16.mxu1 %v7972_v20 }
 0x230   : > { %5186 = vmatprep.mubr.bf16.mxu0 %v7974_v21  ;;  %v8042_v21 = vld [vmem:[%s8247_s12 + $0x790] ss:$72 sps:$4 sm:$0xff]  }
 0x236   : > { %4415 = vmatmul.mubr.bf16.gmra.mrb[52].mxu1 %v7976_v24 }
 0x237   : > { %5187 = vmatmul.mubr.bf16.gmra.mrb[52].mxu0 %v7977_v25  ;;  %4424 = vmatprep.mubr.bf16.mxu1 %v7981_v26 }
 0x238   : > { %5196 = vmatprep.mubr.bf16.mxu0 %v7983_v27  ;;  %v8047_v27 = vld [vmem:[%s8247_s12 + $0x820] ss:$72 sps:$4 sm:$0xff]  }
 0x23e   : > { %4425 = vmatmul.mubr.bf16.gmra.mrb[56].mxu1 %v7985_v28 }
 0x23f   : > { %5197 = vmatmul.mubr.bf16.gmra.mrb[56].mxu0 %v7986_v29  ;;  %4434 = vmatprep.mubr.bf16.mxu1 %v7990_v30  ;;  %v8048_v29 = vld [vmem:[%s8247_s12 + $0x8b4] ss:$72 sps:$4 sm:$0xff]  }
 0x240   : > { %5206 = vmatprep.mubr.bf16.mxu0 %v7992_v31 }
 0x246   : > { %4435 = vmatmul.mubr.bf16.gmra.mrb[60].mxu1 %v7994_v34 }
 0x247   : > { %5207 = vmatmul.mubr.bf16.gmra.mrb[60].mxu0 %v7995_v35 }
 0x248   : > { %5249 = vmatprep.mubr.bf16.mxu0 %v8001_v36 }
 0x24f   : > { %5250 = vmatmul.mubr.bf16.vlgmr.msra.gmra.mrb[0].mxu0 %v7999_v37 }
 0x250   : > { %5259 = vmatprep.mubr.bf16.mxu0 %v8002_v38 }
 0x257   : > { %5260 = vmatmul.mubr.bf16.gmra.mrb[4].mxu0 %v8004_v41 }
 0x258   : > { %5269 = vmatprep.mubr.bf16.mxu0 %v8005_v42 }
 0x25f   : > { %5270 = vmatmul.mubr.bf16.gmra.mrb[8].mxu0 %v8007_v43 }
 0x260   : > { %5279 = vmatprep.mubr.bf16.mxu0 %v8008_v44 }
 0x267   : > { %5280 = vmatmul.mubr.bf16.gmra.mrb[12].mxu0 %v8010_v47 }
 0x268   : > { %5289 = vmatprep.mubr.bf16.mxu0 %v8011_v48 }
 0x26f   : > { %5290 = vmatmul.mubr.bf16.gmra.mrb[16].mxu0 %v8013_v49 }
 0x270   : > { %5299 = vmatprep.mubr.bf16.mxu0 %v8014_v50 }
 0x277   : > { %5300 = vmatmul.mubr.bf16.gmra.mrb[20].mxu0 %v8016_v53 }
 0x278   : > { %5309 = vmatprep.mubr.bf16.mxu0 %v8017_v54 }
 0x27f   : > { %5310 = vmatmul.mubr.bf16.gmra.mrb[24].mxu0 %v8019_v55 }
 0x280   : > { %5319 = vmatprep.mubr.bf16.mxu0 %v8020_v56 }
 0x287   : > { %5320 = vmatmul.mubr.bf16.gmra.mrb[28].mxu0 %v8022_v59 }
 0x288   : > { %5329 = vmatprep.mubr.bf16.mxu0 %v8023_v60 }
 0x28f   : > { %5330 = vmatmul.mubr.bf16.gmra.mrb[32].mxu0 %v8025_v61 }
 0x290   : > { %5339 = vmatprep.mubr.bf16.mxu0 %v8026_v62 }
 0x297   : > { %5340 = vmatmul.mubr.bf16.gmra.mrb[36].mxu0 %v8028_v1 }
 0x298   : > { %5349 = vmatprep.mubr.bf16.mxu0 %v8029_v2 }
 0x29f   : > { %5350 = vmatmul.mubr.bf16.gmra.mrb[40].mxu0 %v8031_v3 }
 0x2a0   : > { %5359 = vmatprep.mubr.bf16.mxu0 %v8032_v4 }
 0x2a1   : > { %v9305_v7 = vpop.f32.mrb[0].mxu1 }
 0x2a2   : > { %v9307_v8 = vpop.f32.mrb[1].mxu1 }
 0x2a3   : > { %v9310_v10 = vpop.f32.mrb[2].mxu1 }
 0x2a4   : > { %v9313_v12 = vpop.f32.mrb[3].mxu1 }
 0x2a7   : > { %5360 = vmatmul.mubr.bf16.gmra.mrb[44].mxu0 %v8034_v9 }
 0x2a8   : > { %5369 = vmatprep.mubr.bf16.mxu0 %v8036_v11  ;;  %v783_v11 = vlaneseq }
 0x2a9   : > { %v9315_v13 = vpop.f32.mrb[4].mxu1 }
 0x2aa   : > { %v9317_v14 = vpop.f32.mrb[5].mxu1 }
 0x2ab   : > { %v9320_v16 = vpop.f32.mrb[6].mxu1 }
 0x2ac   : > { %v9323_v18 = vpop.f32.mrb[7].mxu1 }
 0x2af   : > { %5370 = vmatmul.mubr.bf16.gmra.mrb[48].mxu0 %v8039_v15 }
 0x2b0   : > { %5379 = vmatprep.mubr.bf16.mxu0 %v8040_v17 }
 0x2b1   : > { %v9325_v19 = vpop.f32.mrb[8].mxu1 }
 0x2b2   : > { %v9327_v20 = vpop.f32.mrb[9].mxu1 }
 0x2b3   : > { %v9330_v22 = vpop.f32.mrb[10].mxu1 }
 0x2b4   : > { %v9333_v24 = vpop.f32.mrb[11].mxu1 }
 0x2b7   : > { %5380 = vmatmul.mubr.bf16.gmra.mrb[52].mxu0 %v8042_v21 }
 0x2b8   : > { %5389 = vmatprep.mubr.bf16.mxu0 %v8044_v23  ;;  %v784_v23 = vshrl.u32 %v783_v11, 7 }
 0x2b9   : > { %v9335_v25 = vpop.f32.mrb[12].mxu1 }
 0x2ba   : > { %v9337_v26 = vpop.f32.mrb[13].mxu1 }
 0x2bb   : > { %v9340_v28 = vpop.f32.mrb[14].mxu1 }
 0x2bc   : > { %v9343_v30 = vpop.f32.mrb[15].mxu1 }
 0x2bf   : > { %5390 = vmatmul.mubr.bf16.gmra.mrb[56].mxu0 %v8047_v27 }
 0x2c0   : > { %5399 = vmatprep.mubr.bf16.mxu0 %v8048_v29  ;;  %v785_v29 = vsub.s32 0, %v784_v23 }
 0x2c1   : > { %v9345_v31 = vpop.f32.mrb[16].mxu1 }
 0x2c2   : > { %v9347_v32 = vpop.f32.mrb[17].mxu1 }
 0x2c3   : > { %v9350_v34 = vpop.f32.mrb[18].mxu1 }
 0x2c4   : > { %v9352_v35 = vpop.f32.mrb[19].mxu1 }
 0x2c7   : > { %5400 = vmatmul.mubr.bf16.gmra.mrb[60].mxu0 %v8050_v33  ;;  %v781_v33 = vld [vmem:[%s9620_s2] sm:$0x3] }
 0x2c9   : > { %v9354_v36 = vpop.f32.mrb[20].mxu1 }
 0x2ca   : > { %v9356_v37 = vpop.f32.mrb[21].mxu1 }
 0x2cb   : > { %v9358_v38 = vpop.f32.mrb[22].mxu1 }
 0x2cc   : > { %v9360_v39 = vpop.f32.mrb[23].mxu1 }
 0x2d1   : > { %v9362_v40 = vpop.f32.mrb[24].mxu1 }
 0x2d2   : > { %v9364_v41 = vpop.f32.mrb[25].mxu1 }
 0x2d3   : > { %v9366_v42 = vpop.f32.mrb[26].mxu1 }
 0x2d4   : > { %v9368_v43 = vpop.f32.mrb[27].mxu1 }
 0x2d9   : > { %v9370_v44 = vpop.f32.mrb[28].mxu1 }
 0x2da   : > { %v9372_v45 = vpop.f32.mrb[29].mxu1 }
 0x2db   : > { %v9374_v46 = vpop.f32.mrb[30].mxu1 }
 0x2dc   : > { %v9376_v47 = vpop.f32.mrb[31].mxu1 }
 0x2e1   : > { %v9378_v48 = vpop.f32.mrb[32].mxu1 }
 0x2e2   : > { %v9380_v49 = vpop.f32.mrb[33].mxu1 }
 0x2e3   : > { %v9382_v50 = vpop.f32.mrb[34].mxu1 }
 0x2e4   : > { %v9384_v51 = vpop.f32.mrb[35].mxu1 }
 0x2e9   : > { %v9386_v52 = vpop.f32.mrb[36].mxu1 }
 0x2ea   : > { %v9388_v53 = vpop.f32.mrb[37].mxu1 }
 0x2eb   : > { %v9390_v54 = vpop.f32.mrb[38].mxu1 }
 0x2ec   : > { %v9392_v55 = vpop.f32.mrb[39].mxu1 }
 0x2f1   : > { %v9394_v56 = vpop.f32.mrb[40].mxu1 }
 0x2f2   : > { %v9396_v57 = vpop.f32.mrb[41].mxu1 }
 0x2f3   : > { %v9398_v58 = vpop.f32.mrb[42].mxu1 }
 0x2f4   : > { %v9400_v59 = vpop.f32.mrb[43].mxu1 }
 0x2f9   : > { %v9402_v60 = vpop.f32.mrb[44].mxu1 }
 0x2fa   : > { %v9404_v61 = vpop.f32.mrb[45].mxu1 }
 0x2fb   : > { %v9406_v62 = vpop.f32.mrb[46].mxu1 }
 0x2fc   : > { %9623 = vst [vmem:[#allocation2_spill] sm:$0xff] %v9406_v62  ;;  %v9408_v63 = vpop.f32.mrb[47].mxu1 }
 0x2fd   : > { %9624 = vst [vmem:[#allocation3_spill] sm:$0xff] %v9408_v63 }
 0x301   : > { %v9410_v0 = vpop.f32.mrb[48].mxu1 }
 0x302   : > { %9625 = vst [vmem:[#allocation4_spill] sm:$0xff] %v9410_v0  ;;  %v9412_v1 = vpop.f32.mrb[49].mxu1 }
 0x303   : > { %9626 = vst [vmem:[#allocation5_spill] sm:$0xff] %v9412_v1  ;;  %v9414_v2 = vpop.f32.mrb[50].mxu1 }
 0x304   : > { %9627 = vst [vmem:[#allocation6_spill] sm:$0xff] %v9414_v2  ;;  %v9416_v3 = vpop.f32.mrb[51].mxu1 }
 0x305   : > { %9628 = vst [vmem:[#allocation7_spill] sm:$0xff] %v9416_v3 }
 0x309   : > { %v9418_v4 = vpop.f32.mrb[52].mxu1 }
 0x30a   : > { %9629 = vst [vmem:[#allocation8_spill] sm:$0xff] %v9418_v4  ;;  %v9420_v5 = vpop.f32.mrb[53].mxu1 }
 0x30b   : > { %9630 = vst [vmem:[#allocation9_spill] sm:$0xff] %v9420_v5  ;;  %v9422_v6 = vpop.f32.mrb[54].mxu1  ;;  %v789_v5 = vsub.s32 1, %v784_v23 }
 0x30c   : > { %9631 = vst [vmem:[#allocation10_spill] sm:$0xff] %v9422_v6  ;;  %v9424_v9 = vpop.f32.mrb[55].mxu1 }
 0x30d   : > { %9632 = vst [vmem:[#allocation11_spill] sm:$0xff] %v9424_v9 }
 0x311   : > { %v9426_v15 = vpop.f32.mrb[56].mxu1 }
 0x312   : > { %9633 = vst [vmem:[#allocation12_spill] sm:$0xff] %v9426_v15  ;;  %v9428_v17 = vpop.f32.mrb[57].mxu1  ;;  %v9443_v15 = vrot.slane %v781_v33, %v785_v29 }
 0x313   : > { %9634 = vst [vmem:[#allocation13_spill] sm:$0xff] %v9428_v17  ;;  %v9430_v21 = vpop.f32.mrb[58].mxu1 }
 0x314   : > { %9635 = vst [vmem:[#allocation14_spill] sm:$0xff] %v9430_v21  ;;  %v9432_v27 = vpop.f32.mrb[59].mxu1  ;;  %v9447_v21 = vrot.slane %v781_v33, %v789_v5  ;;  %v6598_v11 = vadd.f32 %v9305_v7, %v9443_v15  ;;  %v6602_v23 = vadd.f32 %v9310_v10, %v9443_v15 }
 0x315   : > { %9636 = vst [vmem:[#allocation15_spill] sm:$0xff] %v9432_v27 }
 0x316   : > { %v6600_v27 = vadd.f32 %v9307_v8, %v9447_v21  ;;  %v6604_v29 = vadd.f32 %v9313_v12, %v9447_v21  ;;  %v6606_v8 = vadd.f32 %v9315_v13, %v9443_v15  ;;  %v6608_v10 = vadd.f32 %v9317_v14, %v9447_v21 }
 0x317   : > { %v6610_v12 = vadd.f32 %v9320_v16, %v9443_v15 }
 0x319   : > { %v9437_v4 = vpop.f32.mrb[60].mxu1 }
 0x31a   : > { %9637 = vst [vmem:[#allocation16_spill] sm:$0xff] %v9437_v4  ;;  %v9439_v6 = vpop.f32.mrb[61].mxu1 }
 0x31b   : > { %9638 = vst [vmem:[#allocation17_spill] sm:$0xff] %v9439_v6  ;;  %v9441_v9 = vpop.f32.mrb[62].mxu1 }
 0x31c   : > { %9639 = vst [vmem:[#allocation18_spill] sm:$0xff] %v9441_v9  ;;  %v9445_v17 = vpop.f32.mrb[63].mxu1 }
 0x31d   : > { %9640 = vst [vmem:[#allocation19_spill] sm:$0xff] %v9445_v17 }
 0x322   : > { %v5251_v3 = vpop.f32.mrb[0].mxu0 }
 0x323   : > { %v6599_v4 = vadd.f32 %v6598_v11, %v5251_v3  ;;  %v5253_v6 = vpop.f32.mrb[1].mxu0 }
 0x324   : > { %v6601_v9 = vadd.f32 %v6600_v27, %v5253_v6  ;;  %v5255_v2 = vpop.f32.mrb[2].mxu0 }
 0x325   : > { %v6603_v17 = vadd.f32 %v6602_v23, %v5255_v2  ;;  %v5257_v5 = vpop.f32.mrb[3].mxu0  ;;  %v5410_v1 = vmax.f32 %v6599_v4, 0.0  ;;  %v6612_v4 = vadd.f32 %v9323_v18, %v9447_v21 }
 0x326   : > { %v6605_v33 = vadd.f32 %v6604_v29, %v5257_v5  ;;  %v5411_v7 = vmax.f32 %v6601_v9, 0.0  ;;  %v6614_v29 = vadd.f32 %v9325_v19, %v9443_v15  ;;  %v6616_v5 = vadd.f32 %v9327_v20, %v9447_v21 }
 0x327   : > { %v5412_v0 = vmax.f32 %v6603_v17, 0.0 }
 0x328   : > { %v5413_v63 = vmax.f32 %v6605_v33, 0.0 }
 0x329   : > { %v5474_v62 = vpack.c.bf16 %v5412_v0, %v5410_v1 }
 0x32a   : > { %v5475_v3 = vpack.c.bf16 %v5413_v63, %v5411_v7  ;;  %v5261_v11 = vpop.f32.mrb[4].mxu0  ;;  %v6618_v7 = vadd.f32 %v9330_v22, %v9443_v15 }
 0x32b   : > { %v6607_v6 = vadd.f32 %v6606_v8, %v5261_v11  ;;  %v5263_v2 = vpop.f32.mrb[5].mxu0 }
 0x32c   : > { %v6609_v17 = vadd.f32 %v6608_v10, %v5263_v2  ;;  %v5265_v9 = vpop.f32.mrb[6].mxu0  ;;  %5666 = vmatprep.mubr.bf16.mxu1 %v5475_v3 }
 0x32d   : > { %v6611_v27 = vadd.f32 %v6610_v12, %v5265_v9  ;;  %v5267_v23 = vpop.f32.mrb[7].mxu0  ;;  %5667 = vmatmul.mubr.bf16.vlgmr.msra.gmra.mrb[64].mxu1 %v5474_v62  ;;  %v5414_v0 = vmax.f32 %v6607_v6, 0.0  ;;  %v6620_v62 = vadd.f32 %v9333_v24, %v9447_v21  ;;  %v6622_v9 = vadd.f32 %v9335_v25, %v9443_v15 }
 0x32e   : > { %v6613_v13 = vadd.f32 %v6612_v4, %v5267_v23  ;;  %v5415_v14 = vmax.f32 %v6609_v17, 0.0 }
 0x32f   : > { %v5416_v1 = vmax.f32 %v6611_v27, 0.0  ;;  %v6624_v27 = vadd.f32 %v9337_v26, %v9447_v21 }
 0x330   : > { %v5417_v63 = vmax.f32 %v6613_v13, 0.0  ;;  %v6626_v13 = vadd.f32 %v9340_v28, %v9443_v15 }
 0x331   : > { %v5476_v16 = vpack.c.bf16 %v5416_v1, %v5414_v0 }
 0x332   : > { %v5477_v33 = vpack.c.bf16 %v5417_v63, %v5415_v14  ;;  %v5271_v18 = vpop.f32.mrb[8].mxu0  ;;  %v6628_v14 = vadd.f32 %v9343_v30, %v9447_v21 }
 0x333   : > { %v6615_v8 = vadd.f32 %v6614_v29, %v5271_v18  ;;  %v5273_v10 = vpop.f32.mrb[9].mxu0 }
 0x334   : > { %v6617_v3 = vadd.f32 %v6616_v5, %v5273_v10  ;;  %v5275_v11 = vpop.f32.mrb[10].mxu0  ;;  %5674 = vmatprep.mubr.bf16.mxu1 %v5477_v33  ;;  %v6632_v10 = vadd.f32 %v9347_v32, %v9447_v21 }
 0x335   : > { %v6619_v12 = vadd.f32 %v6618_v7, %v5275_v11  ;;  %v5277_v6 = vpop.f32.mrb[11].mxu0  ;;  %5675 = vmatmul.mubr.bf16.gmra.mrb[68].mxu1 %v5476_v16  ;;  %v5418_v2 = vmax.f32 %v6615_v8, 0.0  ;;  %v6630_v8 = vadd.f32 %v9345_v31, %v9443_v15 }
 0x336   : > { %v6621_v19 = vadd.f32 %v6620_v62, %v5277_v6  ;;  %v5419_v20 = vmax.f32 %v6617_v3, 0.0  ;;  %v6634_v3 = vadd.f32 %v9350_v34, %v9443_v15  ;;  %v6636_v6 = vadd.f32 %v9352_v35, %v9447_v21 }
 0x337   : > { %v5420_v4 = vmax.f32 %v6619_v12, 0.0 }
 0x338   : > { %v5421_v17 = vmax.f32 %v6621_v19, 0.0 }
 0x339   : > { %v5478_v22 = vpack.c.bf16 %v5420_v4, %v5418_v2 }
 0x33a   : > { %v5479_v23 = vpack.c.bf16 %v5421_v17, %v5419_v20  ;;  %v5281_v24 = vpop.f32.mrb[12].mxu0 }
 0x33b   : > { %v6623_v0 = vadd.f32 %v6622_v9, %v5281_v24  ;;  %v5283_v1 = vpop.f32.mrb[13].mxu0 }
 0x33c   : > { %v6625_v63 = vadd.f32 %v6624_v27, %v5283_v1  ;;  %v5285_v29 = vpop.f32.mrb[14].mxu0  ;;  %5682 = vmatprep.mubr.bf16.mxu1 %v5479_v23  ;;  %v6638_v27 = vadd.f32 %v9354_v36, %v9443_v15  ;;  %v6640_v23 = vadd.f32 %v9356_v37, %v9447_v21 }
 0x33d   : > { %v6627_v16 = vadd.f32 %v6626_v13, %v5285_v29  ;;  %v5287_v5 = vpop.f32.mrb[15].mxu0  ;;  %5683 = vmatmul.mubr.bf16.gmra.mrb[72].mxu1 %v5478_v22  ;;  %v5422_v33 = vmax.f32 %v6623_v0, 0.0  ;;  %v6642_v13 = vadd.f32 %v9358_v38, %v9443_v15 }
 0x33e   : > { %v6629_v25 = vadd.f32 %v6628_v14, %v5287_v5  ;;  %v5423_v26 = vmax.f32 %v6625_v63, 0.0  ;;  %v6644_v14 = vadd.f32 %v9360_v39, %v9447_v21 }
 0x33f   : > { %v5424_v18 = vmax.f32 %v6627_v16, 0.0 }
 0x340   : > { %v5425_v7 = vmax.f32 %v6629_v25, 0.0 }
 0x341   : > { %v5480_v28 = vpack.c.bf16 %v5424_v18, %v5422_v33 }
 0x342   : > { %v5481_v62 = vpack.c.bf16 %v5425_v7, %v5423_v26  ;;  %v5291_v30 = vpop.f32.mrb[16].mxu0  ;;  %v6646_v26 = vadd.f32 %v9362_v40, %v9443_v15  ;;  %v6648_v7 = vadd.f32 %v9364_v41, %v9447_v21 }
 0x343   : > { %v6631_v11 = vadd.f32 %v6630_v8, %v5291_v30  ;;  %v5293_v12 = vpop.f32.mrb[17].mxu0  ;;  %v6652_v30 = vadd.f32 %v9368_v43, %v9447_v21 }
 0x344   : > { %v6633_v19 = vadd.f32 %v6632_v10, %v5293_v12  ;;  %v5295_v2 = vpop.f32.mrb[18].mxu0  ;;  %5690 = vmatprep.mubr.bf16.mxu1 %v5481_v62 }
 0x345   : > { %v6635_v4 = vadd.f32 %v6634_v3, %v5295_v2  ;;  %v5297_v20 = vpop.f32.mrb[19].mxu0  ;;  %5691 = vmatmul.mubr.bf16.gmra.mrb[76].mxu1 %v5480_v28  ;;  %v5426_v17 = vmax.f32 %v6631_v11, 0.0  ;;  %v6650_v28 = vadd.f32 %v9366_v42, %v9443_v15 }
 0x346   : > { %v6637_v31 = vadd.f32 %v6636_v6, %v5297_v20  ;;  %v5427_v32 = vmax.f32 %v6633_v19, 0.0  ;;  %v6654_v20 = vadd.f32 %v9370_v44, %v9443_v15 }
 0x347   : > { %v5428_v9 = vmax.f32 %v6635_v4, 0.0 }
 0x348   : > { %v5429_v22 = vmax.f32 %v6637_v31, 0.0  ;;  %v6656_v31 = vadd.f32 %v9372_v45, %v9447_v21 }
 0x349   : > { %v5482_v34 = vpack.c.bf16 %v5428_v9, %v5426_v17  ;;  %v6658_v9 = vadd.f32 %v9374_v46, %v9443_v15 }
 0x34a   : > { %v5483_v24 = vpack.c.bf16 %v5429_v22, %v5427_v32  ;;  %v5301_v35 = vpop.f32.mrb[20].mxu0 }
 0x34b   : > { %v6639_v0 = vadd.f32 %v6638_v27, %v5301_v35  ;;  %v5303_v1 = vpop.f32.mrb[21].mxu0  ;;  %v6660_v27 = vadd.f32 %v9376_v47, %v9447_v21 }
 0x34c   : > { %v6641_v63 = vadd.f32 %v6640_v23, %v5303_v1  ;;  %v5305_v29 = vpop.f32.mrb[22].mxu0  ;;  %5698 = vmatprep.mubr.bf16.mxu1 %v5483_v24 }
 0x34d   : > { %v6643_v16 = vadd.f32 %v6642_v13, %v5305_v29  ;;  %v5307_v5 = vpop.f32.mrb[23].mxu0  ;;  %5699 = vmatmul.mubr.bf16.gmra.mrb[80].mxu1 %v5482_v34  ;;  %v5430_v25 = vmax.f32 %v6639_v0, 0.0 }
 0x34e   : > { %v6645_v36 = vadd.f32 %v6644_v14, %v5307_v5  ;;  %v5431_v37 = vmax.f32 %v6641_v63, 0.0  ;;  %v6662_v14 = vadd.f32 %v9378_v48, %v9443_v15  ;;  %v6664_v63 = vadd.f32 %v9380_v49, %v9447_v21 }
 0x34f   : > { %v5432_v33 = vmax.f32 %v6643_v16, 0.0  ;;  %v6666_v16 = vadd.f32 %v9382_v50, %v9443_v15 }
 0x350   : > { %v5433_v18 = vmax.f32 %v6645_v36, 0.0 }
 0x351   : > { %v5484_v38 = vpack.c.bf16 %v5432_v33, %v5430_v25  ;;  %v6668_v25 = vadd.f32 %v9384_v51, %v9447_v21 }
 0x352   : > { %v5485_v8 = vpack.c.bf16 %v5433_v18, %v5431_v37  ;;  %v5311_v39 = vpop.f32.mrb[24].mxu0 }
 0x353   : > { %v6647_v10 = vadd.f32 %v6646_v26, %v5311_v39  ;;  %v5313_v62 = vpop.f32.mrb[25].mxu0  ;;  %v6670_v39 = vadd.f32 %v9386_v52, %v9443_v15 }
 0x354   : > { %v6649_v3 = vadd.f32 %v6648_v7, %v5313_v62  ;;  %v5315_v11 = vpop.f32.mrb[26].mxu0  ;;  %5706 = vmatprep.mubr.bf16.mxu1 %v5485_v8  ;;  %v6674_v62 = vadd.f32 %v9390_v54, %v9443_v15 }
 0x355   : > { %v6651_v12 = vadd.f32 %v6650_v28, %v5315_v11  ;;  %v5317_v6 = vpop.f32.mrb[27].mxu0  ;;  %5707 = vmatmul.mubr.bf16.gmra.mrb[84].mxu1 %v5484_v38  ;;  %v5434_v19 = vmax.f32 %v6647_v10, 0.0  ;;  %v6672_v28 = vadd.f32 %v9388_v53, %v9447_v21  ;;  %v6676_v11 = vadd.f32 %v9392_v55, %v9447_v21 }
 0x356   : > { %v6653_v40 = vadd.f32 %v6652_v30, %v5317_v6  ;;  %v5435_v41 = vmax.f32 %v6649_v3, 0.0 }
 0x357   : > { %v5436_v2 = vmax.f32 %v6651_v12, 0.0 }
 0x358   : > { %v5437_v4 = vmax.f32 %v6653_v40, 0.0 }
 0x359   : > { %v5486_v42 = vpack.c.bf16 %v5436_v2, %v5434_v19 }
 0x35a   : > { %v5487_v17 = vpack.c.bf16 %v5437_v4, %v5435_v41  ;;  %v5321_v43 = vpop.f32.mrb[28].mxu0 }
 0x35b   : > { %v6655_v32 = vadd.f32 %v6654_v20, %v5321_v43  ;;  %v5323_v22 = vpop.f32.mrb[29].mxu0  ;;  %v6678_v20 = vadd.f32 %v9394_v56, %v9443_v15 }
 0x35c   : > { %v6657_v34 = vadd.f32 %v6656_v31, %v5323_v22  ;;  %v5325_v23 = vpop.f32.mrb[30].mxu0  ;;  %5714 = vmatprep.mubr.bf16.mxu1 %v5487_v17  ;;  %v6682_v17 = vadd.f32 %v9398_v58, %v9443_v15 }
 0x35d   : > { %v6659_v24 = vadd.f32 %v6658_v9, %v5325_v23  ;;  %v5327_v35 = vpop.f32.mrb[31].mxu0  ;;  %5715 = vmatmul.mubr.bf16.gmra.mrb[88].mxu1 %v5486_v42  ;;  %v5438_v13 = vmax.f32 %v6655_v32, 0.0  ;;  %v6680_v42 = vadd.f32 %v9396_v57, %v9447_v21  ;;  %v6684_v32 = vadd.f32 %v9400_v59, %v9447_v21 }
 0x35e   : > { %v6661_v44 = vadd.f32 %v6660_v27, %v5327_v35  ;;  %v5439_v45 = vmax.f32 %v6657_v34, 0.0 }
 0x35f   : > { %v5440_v0 = vmax.f32 %v6659_v24, 0.0 }
 0x360   : > { %v5441_v1 = vmax.f32 %v6661_v44, 0.0 }
 0x361   : > { %v5488_v46 = vpack.c.bf16 %v5440_v0, %v5438_v13  ;;  %v6686_v13 = vadd.f32 %v9402_v60, %v9443_v15  ;;  %v6688_v0 = vadd.f32 %v9404_v61, %v9447_v21 }
 0x362   : > { %v5489_v29 = vpack.c.bf16 %v5441_v1, %v5439_v45  ;;  %v5331_v47 = vpop.f32.mrb[32].mxu0  ;;  %v9641_v1 = vld [vmem:[#allocation2_spill] sm:$0xff] }
 0x363   : > { %v6663_v5 = vadd.f32 %v6662_v14, %v5331_v47  ;;  %v5333_v36 = vpop.f32.mrb[33].mxu0  ;;  %v6690_v14 = vadd.f32 %v9641_v1, %v9443_v15  ;;  %v9652_v1 = vld [vmem:[#allocation13_spill] sm:$0xff] }
 0x364   : > { %v6665_v33 = vadd.f32 %v6664_v63, %v5333_v36  ;;  %v5335_v37 = vpop.f32.mrb[34].mxu0  ;;  %5722 = vmatprep.mubr.bf16.mxu1 %v5489_v29  ;;  %v9642_v29 = vld [vmem:[#allocation3_spill] sm:$0xff] }
 0x365   : > { %v6667_v18 = vadd.f32 %v6666_v16, %v5335_v37  ;;  %v5337_v26 = vpop.f32.mrb[35].mxu0  ;;  %5723 = vmatmul.mubr.bf16.gmra.mrb[92].mxu1 %v5488_v46  ;;  %v5442_v38 = vmax.f32 %v6663_v5, 0.0  ;;  %v6692_v47 = vadd.f32 %v9642_v29, %v9447_v21  ;;  %v9653_v29 = vld [vmem:[#allocation14_spill] sm:$0xff] }
 0x366   : > { %v6669_v48 = vadd.f32 %v6668_v25, %v5337_v26  ;;  %v5443_v49 = vmax.f32 %v6665_v33, 0.0  ;;  %v9643_v26 = vld [vmem:[#allocation4_spill] sm:$0xff] }
 0x367   : > { %v5444_v7 = vmax.f32 %v6667_v18, 0.0 }
 0x368   : > { %v5445_v8 = vmax.f32 %v6669_v48, 0.0  ;;  %v6694_v48 = vadd.f32 %v9643_v26, %v9443_v15 }
 0x369   : > { %v5490_v50 = vpack.c.bf16 %v5444_v7, %v5442_v38  ;;  %v9644_v7 = vld [vmem:[#allocation5_spill] sm:$0xff] }
 0x36a   : > { %v5491_v10 = vpack.c.bf16 %v5445_v8, %v5443_v49  ;;  %v5341_v51 = vpop.f32.mrb[36].mxu0  ;;  %v6696_v49 = vadd.f32 %v9644_v7, %v9447_v21 }
 0x36b   : > { %v6671_v30 = vadd.f32 %v6670_v39, %v5341_v51  ;;  %v5343_v3 = vpop.f32.mrb[37].mxu0 }
 0x36c   : > { %v6673_v12 = vadd.f32 %v6672_v28, %v5343_v3  ;;  %v5345_v6 = vpop.f32.mrb[38].mxu0  ;;  %5730 = vmatprep.mubr.bf16.mxu1 %v5491_v10 }
 0x36d   : > { %v6675_v40 = vadd.f32 %v6674_v62, %v5345_v6  ;;  %v5347_v19 = vpop.f32.mrb[39].mxu0  ;;  %5731 = vmatmul.mubr.bf16.gmra.mrb[96].mxu1 %v5490_v50  ;;  %v5446_v2 = vmax.f32 %v6671_v30, 0.0  ;;  %v9645_v50 = vld [vmem:[#allocation6_spill] sm:$0xff]  ;;  %v9646_v62 = vld [vmem:[#allocation7_spill] sm:$0xff] }
 0x36e   : > { %v6677_v52 = vadd.f32 %v6676_v11, %v5347_v19  ;;  %v5447_v53 = vmax.f32 %v6673_v12, 0.0  ;;  %v6698_v28 = vadd.f32 %v9645_v50, %v9443_v15  ;;  %v6700_v30 = vadd.f32 %v9646_v62, %v9447_v21  ;;  %v9656_v50 = vld [vmem:[#allocation17_spill] sm:$0xff]  ;;  %v9657_v62 = vld [vmem:[#allocation18_spill] sm:$0xff] }
 0x36f   : > { %v5448_v41 = vmax.f32 %v6675_v40, 0.0 }
 0x370   : > { %v5449_v4 = vmax.f32 %v6677_v52, 0.0 }
 0x371   : > { %v5492_v54 = vpack.c.bf16 %v5448_v41, %v5446_v2 }
 0x372   : > { %v5493_v31 = vpack.c.bf16 %v5449_v4, %v5447_v53  ;;  %v5351_v55 = vpop.f32.mrb[40].mxu0  ;;  %v9647_v53 = vld [vmem:[#allocation8_spill] sm:$0xff] }
 0x373   : > { %v6679_v43 = vadd.f32 %v6678_v20, %v5351_v55  ;;  %v5353_v9 = vpop.f32.mrb[41].mxu0  ;;  %v6702_v4 = vadd.f32 %v9647_v53, %v9443_v15 }
 0x374   : > { %v6681_v22 = vadd.f32 %v6680_v42, %v5353_v9  ;;  %v5355_v27 = vpop.f32.mrb[42].mxu0  ;;  %5738 = vmatprep.mubr.bf16.mxu1 %v5493_v31 }
 0x375   : > { %v6683_v34 = vadd.f32 %v6682_v17, %v5355_v27  ;;  %v5357_v23 = vpop.f32.mrb[43].mxu0  ;;  %5739 = vmatmul.mubr.bf16.gmra.mrb[100].mxu1 %v5492_v54  ;;  %v5450_v24 = vmax.f32 %v6679_v43, 0.0  ;;  %v9648_v54 = vld [vmem:[#allocation9_spill] sm:$0xff]  ;;  %v9649_v17 = vld [vmem:[#allocation10_spill] sm:$0xff] }
 0x376   : > { %v6685_v56 = vadd.f32 %v6684_v32, %v5357_v23  ;;  %v5451_v57 = vmax.f32 %v6681_v22, 0.0  ;;  %v6704_v42 = vadd.f32 %v9648_v54, %v9447_v21  ;;  %v6706_v43 = vadd.f32 %v9649_v17, %v9443_v15  ;;  %v9650_v22 = vld [vmem:[#allocation11_spill] sm:$0xff] }
 0x377   : > { %v5452_v35 = vmax.f32 %v6683_v34, 0.0  ;;  %v6708_v27 = vadd.f32 %v9650_v22, %v9447_v21 }
 0x378   : > { %v5453_v44 = vmax.f32 %v6685_v56, 0.0 }
 0x379   : > { %v5494_v58 = vpack.c.bf16 %v5452_v35, %v5450_v24 }
 0x37a   : > { %v5495_v45 = vpack.c.bf16 %v5453_v44, %v5451_v57  ;;  %v5361_v59 = vpop.f32.mrb[44].mxu0 }
 0x37b   : > { %v6687_v46 = vadd.f32 %v6686_v13, %v5361_v59  ;;  %v5363_v63 = vpop.f32.mrb[45].mxu0 }
 0x37c   : > { %v6689_v16 = vadd.f32 %v6688_v0, %v5363_v63  ;;  %v5365_v5 = vpop.f32.mrb[46].mxu0  ;;  %5746 = vmatprep.mubr.bf16.mxu1 %v5495_v45  ;;  %v9651_v0 = vld [vmem:[#allocation12_spill] sm:$0xff] }
 0x37d   : > { %v6691_v36 = vadd.f32 %v6690_v14, %v5365_v5  ;;  %v5367_v25 = vpop.f32.mrb[47].mxu0  ;;  %5747 = vmatmul.mubr.bf16.gmra.mrb[104].mxu1 %v5494_v58  ;;  %v5454_v33 = vmax.f32 %v6687_v46, 0.0  ;;  %v6710_v45 = vadd.f32 %v9651_v0, %v9443_v15  ;;  %v6712_v14 = vadd.f32 %v9652_v1, %v9447_v21 }
 0x37e   : > { %v6693_v60 = vadd.f32 %v6692_v47, %v5367_v25  ;;  %v5455_v61 = vmax.f32 %v6689_v16, 0.0  ;;  %v6714_v47 = vadd.f32 %v9653_v29, %v9443_v15 }
 0x37f   : > { %v5456_v37 = vmax.f32 %v6691_v36, 0.0  ;;  %v9654_v36 = vld [vmem:[#allocation15_spill] sm:$0xff] }
 0x380   : > { %v5457_v18 = vmax.f32 %v6693_v60, 0.0  ;;  %v6716_v25 = vadd.f32 %v9654_v36, %v9447_v21 }
 0x381   : > { %v5496_v38 = vpack.c.bf16 %v5456_v37, %v5454_v33 }
 0x382   : > { %v5497_v8 = vpack.c.bf16 %v5457_v18, %v5455_v61  ;;  %v5371_v39 = vpop.f32.mrb[48].mxu0 }
 0x383   : > { %v6695_v10 = vadd.f32 %v6694_v48, %v5371_v39  ;;  %v5373_v51 = vpop.f32.mrb[49].mxu0 }
 0x384   : > { %v6697_v3 = vadd.f32 %v6696_v49, %v5373_v51  ;;  %v5375_v11 = vpop.f32.mrb[50].mxu0  ;;  %5754 = vmatprep.mubr.bf16.mxu1 %v5497_v8  ;;  %v9655_v49 = vld [vmem:[#allocation16_spill] sm:$0xff] }
 0x385   : > { %v6699_v12 = vadd.f32 %v6698_v28, %v5375_v11  ;;  %v5377_v6 = vpop.f32.mrb[51].mxu0  ;;  %5755 = vmatmul.mubr.bf16.gmra.mrb[108].mxu1 %v5496_v38  ;;  %v5458_v19 = vmax.f32 %v6695_v10, 0.0  ;;  %v6718_v8 = vadd.f32 %v9655_v49, %v9443_v15  ;;  %v6720_v28 = vadd.f32 %v9656_v50, %v9447_v21 }
 0x386   : > { %v6701_v40 = vadd.f32 %v6700_v30, %v5377_v6  ;;  %v5459_v2 = vmax.f32 %v6697_v3, 0.0  ;;  %v6722_v30 = vadd.f32 %v9657_v62, %v9443_v15 }
 0x387   : > { %v5460_v52 = vmax.f32 %v6699_v12, 0.0  ;;  %v9658_v12 = vld [vmem:[#allocation19_spill] sm:$0xff] }
 0x388   : > { %v5461_v41 = vmax.f32 %v6701_v40, 0.0  ;;  %v6724_v6 = vadd.f32 %v9658_v12, %v9447_v21 }
 0x389   : > { %v5498_v20 = vpack.c.bf16 %v5460_v52, %v5458_v19 }
 0x38a   : > { %v5499_v31 = vpack.c.bf16 %v5461_v41, %v5459_v2  ;;  %v5381_v55 = vpop.f32.mrb[52].mxu0 }
 0x38b   : > { %v6703_v9 = vadd.f32 %v6702_v4, %v5381_v55  ;;  %v5383_v32 = vpop.f32.mrb[53].mxu0 }
 0x38c   : > { %v6705_v34 = vadd.f32 %v6704_v42, %v5383_v32  ;;  %v5385_v23 = vpop.f32.mrb[54].mxu0  ;;  %5762 = vmatprep.mubr.bf16.mxu1 %v5499_v31 }
 0x38d   : > { %v6707_v56 = vadd.f32 %v6706_v43, %v5385_v23  ;;  %v5387_v24 = vpop.f32.mrb[55].mxu0  ;;  %5763 = vmatmul.mubr.bf16.gmra.mrb[112].mxu1 %v5498_v20  ;;  %v5462_v57 = vmax.f32 %v6703_v9, 0.0 }
 0x38e   : > { %v6709_v35 = vadd.f32 %v6708_v27, %v5387_v24  ;;  %v5463_v13 = vmax.f32 %v6705_v34, 0.0 }
 0x38f   : > { %v5464_v44 = vmax.f32 %v6707_v56, 0.0 }
 0x390   : > { %v5465_v58 = vmax.f32 %v6709_v35, 0.0 }
 0x391   : > { %v5500_v59 = vpack.c.bf16 %v5464_v44, %v5462_v57 }
 0x392   : > { %v5501_v46 = vpack.c.bf16 %v5465_v58, %v5463_v13  ;;  %v5391_v63 = vpop.f32.mrb[56].mxu0 }
 0x393   : > { %v6711_v16 = vadd.f32 %v6710_v45, %v5391_v63  ;;  %v5393_v5 = vpop.f32.mrb[57].mxu0 }
 0x394   : > { %v6713_v60 = vadd.f32 %v6712_v14, %v5393_v5  ;;  %v5395_v33 = vpop.f32.mrb[58].mxu0  ;;  %5770 = vmatprep.mubr.bf16.mxu1 %v5501_v46 }
 0x395   : > { %v6715_v37 = vadd.f32 %v6714_v47, %v5395_v33  ;;  %v5397_v61 = vpop.f32.mrb[59].mxu0  ;;  %5771 = vmatmul.mubr.bf16.gmra.mrb[116].mxu1 %v5500_v59  ;;  %v5466_v26 = vmax.f32 %v6711_v16, 0.0 }
 0x396   : > { %v6717_v18 = vadd.f32 %v6716_v25, %v5397_v61  ;;  %v5467_v38 = vmax.f32 %v6713_v60, 0.0 }
 0x397   : > { %v5468_v48 = vmax.f32 %v6715_v37, 0.0 }
 0x398   : > { %v5469_v7 = vmax.f32 %v6717_v18, 0.0 }
 0x399   : > { %v5502_v39 = vpack.c.bf16 %v5468_v48, %v5466_v26 }
 0x39a   : > { %v5503_v10 = vpack.c.bf16 %v5469_v7, %v5467_v38  ;;  %v5401_v51 = vpop.f32.mrb[60].mxu0 }
 0x39b   : > { %v6719_v3 = vadd.f32 %v6718_v8, %v5401_v51  ;;  %v5403_v11 = vpop.f32.mrb[61].mxu0 }
 0x39c   : > { %v6721_v40 = vadd.f32 %v6720_v28, %v5403_v11  ;;  %v5405_v19 = vpop.f32.mrb[62].mxu0  ;;  %5778 = vmatprep.mubr.bf16.mxu1 %v5503_v10 }
 0x39d   : > { %v6723_v52 = vadd.f32 %v6722_v30, %v5405_v19  ;;  %v5407_v2 = vpop.f32.mrb[63].mxu0  ;;  %5779 = vmatmul.mubr.bf16.gmra.mrb[120].mxu1 %v5502_v39  ;;  %v5470_v53 = vmax.f32 %v6719_v3, 0.0 }
 0x39e   : > { %v6725_v41 = vadd.f32 %v6724_v6, %v5407_v2  ;;  %v5471_v20 = vmax.f32 %v6721_v40, 0.0 }
 0x39f   : > { %v5472_v4 = vmax.f32 %v6723_v52, 0.0 }
 0x3a0   : > { %v5473_v54 = vmax.f32 %v6725_v41, 0.0 }
 0x3a1   : > { %v5504_v42 = vpack.c.bf16 %v5472_v4, %v5470_v53 }
 0x3a2   : > { %v5505_v31 = vpack.c.bf16 %v5473_v54, %v5471_v20 }
 0x3a4   : > { %5786 = vmatprep.mubr.bf16.mxu1 %v5505_v31 }
 0x3a5   : > { %5787 = vmatmul.mubr.bf16.gmra.mrb[124].mxu1 %v5504_v42 }
 0x400   : > { %v6502_v15 = vpop.f32.mrb[64].mxu1 }
 0x401   : > { %v6503_v21 = vpop.f32.mrb[65].mxu1 }
 0x402   : > { %v6504_v55 = vadd.f32 %v6503_v21, %v6502_v15  ;;  %v6505_v17 = vpop.f32.mrb[66].mxu1 }
 0x403   : > { %v6506_v43 = vpop.f32.mrb[67].mxu1 }
 0x404   : > { %5795 = vst [vmem:[%s9581_s6] sm:$0xff] %v6504_v55  ;;  %v6507_v9 = vadd.f32 %v6506_v43, %v6505_v17 }
 0x406   : > { %5796 = vst [vmem:[%s9581_s6 + $0x8] sm:$0xff] %v6507_v9 }
 0x408   : > { %v6508_v32 = vpop.f32.mrb[68].mxu1 }
 0x409   : > { %v6509_v22 = vpop.f32.mrb[69].mxu1 }
 0x40a   : > { %v6510_v27 = vadd.f32 %v6509_v22, %v6508_v32  ;;  %v6511_v34 = vpop.f32.mrb[70].mxu1 }
 0x40b   : > { %v6512_v23 = vpop.f32.mrb[71].mxu1 }
 0x40c   : > { %5797 = vst [vmem:[%s9581_s6 + $0x10] sm:$0xff] %v6510_v27  ;;  %v6513_v56 = vadd.f32 %v6512_v23, %v6511_v34 }
 0x40e   : > { %5798 = vst [vmem:[%s9581_s6 + $0x18] sm:$0xff] %v6513_v56 }
 0x410   : > { %v6514_v24 = vpop.f32.mrb[72].mxu1 }
 0x411   : > { %v6515_v35 = vpop.f32.mrb[73].mxu1 }
 0x412   : > { %v6516_v57 = vadd.f32 %v6515_v35, %v6514_v24  ;;  %v6517_v44 = vpop.f32.mrb[74].mxu1 }
 0x413   : > { %v6518_v13 = vpop.f32.mrb[75].mxu1 }
 0x414   : > { %5799 = vst [vmem:[%s9581_s6 + $0x20] sm:$0xff] %v6516_v57  ;;  %v6519_v58 = vadd.f32 %v6518_v13, %v6517_v44 }
 0x416   : > { %5800 = vst [vmem:[%s9581_s6 + $0x28] sm:$0xff] %v6519_v58 }
 0x418   : > { %v6520_v0 = vpop.f32.mrb[76].mxu1 }
 0x419   : > { %v6521_v45 = vpop.f32.mrb[77].mxu1 }
 0x41a   : > { %v6522_v59 = vadd.f32 %v6521_v45, %v6520_v0  ;;  %v6523_v1 = vpop.f32.mrb[78].mxu1 }
 0x41b   : > { %v6524_v14 = vpop.f32.mrb[79].mxu1 }
 0x41c   : > { %5801 = vst [vmem:[%s9581_s6 + $0x30] sm:$0xff] %v6522_v59  ;;  %v6525_v46 = vadd.f32 %v6524_v14, %v6523_v1 }
 0x41e   : > { %5802 = vst [vmem:[%s9581_s6 + $0x38] sm:$0xff] %v6525_v46 }
 0x420   : > { %v6526_v63 = vpop.f32.mrb[80].mxu1 }
 0x421   : > { %v6527_v29 = vpop.f32.mrb[81].mxu1 }
 0x422   : > { %v6528_v47 = vadd.f32 %v6527_v29, %v6526_v63  ;;  %v6529_v16 = vpop.f32.mrb[82].mxu1 }
 0x423   : > { %v6530_v5 = vpop.f32.mrb[83].mxu1 }
 0x424   : > { %5803 = vst [vmem:[%s9581_s6 + $0x40] sm:$0xff] %v6528_v47  ;;  %v6531_v36 = vadd.f32 %v6530_v5, %v6529_v16 }
 0x426   : > { %5804 = vst [vmem:[%s9581_s6 + $0x48] sm:$0xff] %v6531_v36 }
 0x428   : > { %v6532_v25 = vpop.f32.mrb[84].mxu1 }
 0x429   : > { %v6533_v60 = vpop.f32.mrb[85].mxu1 }
 0x42a   : > { %v6534_v33 = vadd.f32 %v6533_v60, %v6532_v25  ;;  %v6535_v37 = vpop.f32.mrb[86].mxu1 }
 0x42b   : > { %v6536_v61 = vpop.f32.mrb[87].mxu1 }
 0x42c   : > { %5805 = vst [vmem:[%s9581_s6 + $0x50] sm:$0xff] %v6534_v33  ;;  %v6537_v18 = vadd.f32 %v6536_v61, %v6535_v37 }
 0x42e   : > { %5806 = vst [vmem:[%s9581_s6 + $0x58] sm:$0xff] %v6537_v18 }
 0x430   : > { %v6538_v26 = vpop.f32.mrb[88].mxu1 }
 0x431   : > { %v6539_v48 = vpop.f32.mrb[89].mxu1 }
 0x432   : > { %v6540_v38 = vadd.f32 %v6539_v48, %v6538_v26  ;;  %v6541_v7 = vpop.f32.mrb[90].mxu1 }
 0x433   : > { %v6542_v49 = vpop.f32.mrb[91].mxu1 }
 0x434   : > { %5807 = vst [vmem:[%s9581_s6 + $0x60] sm:$0xff] %v6540_v38  ;;  %v6543_v8 = vadd.f32 %v6542_v49, %v6541_v7 }
 0x436   : > { %5808 = vst [vmem:[%s9581_s6 + $0x68] sm:$0xff] %v6543_v8 }
 0x438   : > { %v6544_v39 = vpop.f32.mrb[92].mxu1 }
 0x439   : > { %v6545_v50 = vpop.f32.mrb[93].mxu1 }
 0x43a   : > { %v6546_v28 = vadd.f32 %v6545_v50, %v6544_v39  ;;  %v6547_v10 = vpop.f32.mrb[94].mxu1 }
 0x43b   : > { %v6548_v51 = vpop.f32.mrb[95].mxu1 }
 0x43c   : > { %5809 = vst [vmem:[%s9581_s6 + $0x70] sm:$0xff] %v6546_v28  ;;  %v6549_v62 = vadd.f32 %v6548_v51, %v6547_v10 }
 0x43e   : > { %5810 = vst [vmem:[%s9581_s6 + $0x78] sm:$0xff] %v6549_v62 }
 0x440   : > { %v6550_v30 = vpop.f32.mrb[96].mxu1 }
 0x441   : > { %v6551_v3 = vpop.f32.mrb[97].mxu1 }
 0x442   : > { %v6552_v11 = vadd.f32 %v6551_v3, %v6550_v30  ;;  %v6553_v12 = vpop.f32.mrb[98].mxu1 }
 0x443   : > { %v6554_v6 = vpop.f32.mrb[99].mxu1 }
 0x444   : > { %5811 = vst [vmem:[%s9581_s6 + $0x80] sm:$0xff] %v6552_v11  ;;  %v6555_v40 = vadd.f32 %v6554_v6, %v6553_v12 }
 0x446   : > { %5812 = vst [vmem:[%s9581_s6 + $0x88] sm:$0xff] %v6555_v40 }
 0x448   : > { %v6556_v19 = vpop.f32.mrb[100].mxu1 }
 0x449   : > { %v6557_v52 = vpop.f32.mrb[101].mxu1 }
 0x44a   : > { %v6558_v2 = vadd.f32 %v6557_v52, %v6556_v19  ;;  %v6559_v41 = vpop.f32.mrb[102].mxu1 }
 0x44b   : > { %v6560_v53 = vpop.f32.mrb[103].mxu1 }
 0x44c   : > { %5813 = vst [vmem:[%s9581_s6 + $0x90] sm:$0xff] %v6558_v2  ;;  %v6561_v4 = vadd.f32 %v6560_v53, %v6559_v41 }
 0x44e   : > { %5814 = vst [vmem:[%s9581_s6 + $0x98] sm:$0xff] %v6561_v4 }
 0x450   : > { %v6562_v20 = vpop.f32.mrb[104].mxu1 }
 0x451   : > { %v6563_v54 = vpop.f32.mrb[105].mxu1 }
 0x452   : > { %v6564_v42 = vadd.f32 %v6563_v54, %v6562_v20  ;;  %v6565_v31 = vpop.f32.mrb[106].mxu1 }
 0x453   : > { %v6566_v15 = vpop.f32.mrb[107].mxu1 }
 0x454   : > { %5815 = vst [vmem:[%s9581_s6 + $0xa0] sm:$0xff] %v6564_v42  ;;  %v6567_v21 = vadd.f32 %v6566_v15, %v6565_v31 }
 0x456   : > { %5816 = vst [vmem:[%s9581_s6 + $0xa8] sm:$0xff] %v6567_v21 }
 0x458   : > { %v6568_v55 = vpop.f32.mrb[108].mxu1 }
 0x459   : > { %v6569_v17 = vpop.f32.mrb[109].mxu1 }
 0x45a   : > { %v6570_v43 = vadd.f32 %v6569_v17, %v6568_v55  ;;  %v6571_v9 = vpop.f32.mrb[110].mxu1 }
 0x45b   : > { %v6572_v32 = vpop.f32.mrb[111].mxu1 }
 0x45c   : > { %5817 = vst [vmem:[%s9581_s6 + $0xb0] sm:$0xff] %v6570_v43  ;;  %v6573_v22 = vadd.f32 %v6572_v32, %v6571_v9 }
 0x45e   : > { %5818 = vst [vmem:[%s9581_s6 + $0xb8] sm:$0xff] %v6573_v22 }
 0x460   : > { %v6574_v27 = vpop.f32.mrb[112].mxu1 }
 0x461   : > { %v6575_v34 = vpop.f32.mrb[113].mxu1 }
 0x462   : > { %v6576_v23 = vadd.f32 %v6575_v34, %v6574_v27  ;;  %v6577_v56 = vpop.f32.mrb[114].mxu1 }
 0x463   : > { %v6578_v24 = vpop.f32.mrb[115].mxu1 }
 0x464   : > { %5819 = vst [vmem:[%s9581_s6 + $0xc0] sm:$0xff] %v6576_v23  ;;  %v6579_v35 = vadd.f32 %v6578_v24, %v6577_v56 }
 0x466   : > { %5820 = vst [vmem:[%s9581_s6 + $0xc8] sm:$0xff] %v6579_v35 }
 0x468   : > { %v6580_v57 = vpop.f32.mrb[116].mxu1 }
 0x469   : > { %v6581_v44 = vpop.f32.mrb[117].mxu1 }
 0x46a   : > { %v6582_v13 = vadd.f32 %v6581_v44, %v6580_v57  ;;  %v6583_v58 = vpop.f32.mrb[118].mxu1 }
 0x46b   : > { %v6584_v0 = vpop.f32.mrb[119].mxu1 }
 0x46c   : > { %5821 = vst [vmem:[%s9581_s6 + $0xd0] sm:$0xff] %v6582_v13  ;;  %v6585_v45 = vadd.f32 %v6584_v0, %v6583_v58 }
 0x46e   : > { %5822 = vst [vmem:[%s9581_s6 + $0xd8] sm:$0xff] %v6585_v45 }
 0x470   : > { %v6586_v59 = vpop.f32.mrb[120].mxu1 }
 0x471   : > { %v6587_v1 = vpop.f32.mrb[121].mxu1 }
 0x472   : > { %v6588_v14 = vadd.f32 %v6587_v1, %v6586_v59  ;;  %v6589_v46 = vpop.f32.mrb[122].mxu1 }
 0x473   : > { %v6590_v63 = vpop.f32.mrb[123].mxu1 }
 0x474   : > { %5823 = vst [vmem:[%s9581_s6 + $0xe0] sm:$0xff] %v6588_v14  ;;  %v6591_v29 = vadd.f32 %v6590_v63, %v6589_v46 }
 0x476   : > { %5824 = vst [vmem:[%s9581_s6 + $0xe8] sm:$0xff] %v6591_v29 }
 0x478   : > { %v6592_v47 = vpop.f32.mrb[124].mxu1 }
 0x479   : > { %v6593_v16 = vpop.f32.mrb[125].mxu1 }
 0x47a   : > { %v6594_v5 = vadd.f32 %v6593_v16, %v6592_v47  ;;  %v6595_v36 = vpop.f32.mrb[126].mxu1 }
 0x47b   : > { %v6596_v25 = vpop.f32.mrb[127].mxu1 }
 0x47c   : > { %5825 = vst [vmem:[%s9581_s6 + $0xf0] sm:$0xff] %v6594_v5  ;;  %v6597_v60 = vadd.f32 %v6596_v25, %v6595_v36 }
 0x47e   : > { %5826 = vst [vmem:[%s9581_s6 + $0xf8] sm:$0xff] %v6597_v60 }
 0x47f PF: > { %s14_s15 = sadd.s32 1, %s8069_s15  }
 0x480   : > { %p11_p4 = scmp.ge.s32.totalorder %s14_s15, 4  }
 0x482   :  { %13 = sbr.rel (!%p11_p4) target bundleno = 1 (0x1), region = 66 }

</bundles_post_ra>
